<compile_context>
chip_gen: v7x
topology: tpu7x:2x2x1
jax: 0.10.0
libtpu: 0.0.40
codegen_flags: <defaults>
</compile_context>

<pallas_src>
import functools
import math

import jax
import jax.numpy as jnp
from jax import lax
from jax.experimental import pallas as pl
from jax.experimental.pallas import tpu as pltpu

VMEM = pltpu.MemorySpace.VMEM


def _full_spec():
    # Whole-array block resident in VMEM (all operands here are small).
    return pl.BlockSpec(memory_space=VMEM)


# ----------------------------------------------------------------------------
# In-kernel helpers (traced inside the fused kernels)
# ----------------------------------------------------------------------------
def _layernorm(y, g, b, eps=1e-5):
    """PyTorch LayerNorm semantics: biased variance, eps=1e-5."""
    mu = jnp.mean(y, axis=-1, keepdims=True)
    d = y - mu
    var = jnp.mean(d * d, axis=-1, keepdims=True)
    return d * lax.rsqrt(var + eps) * g + b


def _mha_rows(q, k, v, wo, bo, *, B, S_q, S_kv, nhead, dh):
    """Multi-head attention + output projection on flattened (B*S, D) slabs.

    Heads are handled with a small static (B x nhead) unrolled loop inside one
    kernel invocation; the output projection is folded per head
    ( concat_h(o_h) @ Wo == sum_h o_h @ Wo[h*dh:(h+1)*dh, :] ), so no head
    transpose/concat is ever materialized and D=128 stays the lane axis.
    """
    scale = 1.0 / math.sqrt(dh)
    out_rows = []
    for b in range(B):
        qb = q[b * S_q:(b + 1) * S_q, :]
        kb = k[b * S_kv:(b + 1) * S_kv, :]
        vb = v[b * S_kv:(b + 1) * S_kv, :]
        acc = None
        for h in range(nhead):
            sl = slice(h * dh, (h + 1) * dh)
            qh, kh, vh = qb[:, sl], kb[:, sl], vb[:, sl]
            s = lax.dot_general(qh, kh, (((1,), (1,)), ((), ())),
                                preferred_element_type=jnp.float32) * scale
            m = jnp.max(s, axis=-1, keepdims=True)
            p = jnp.exp(s - m)
            p = p * pl.reciprocal(jnp.sum(p, axis=-1, keepdims=True), approx=False)
            oh = jnp.dot(p, vh, preferred_element_type=jnp.float32)          # (S_q, dh)
            contrib = jnp.dot(oh, wo[sl, :], preferred_element_type=jnp.float32)
            acc = contrib if acc is None else acc + contrib
        out_rows.append(acc)
    return jnp.concatenate(out_rows, axis=0) + bo


# ----------------------------------------------------------------------------
# Kernels
# ----------------------------------------------------------------------------
def _embed_pe_kernel(x_ref, w_ref, b_ref, pe_ref, o_ref, *, scale):
    """(x @ W + b) * sqrt(d_model) + pe  (PosEnc fused into the linear epilogue)."""
    y = jnp.dot(x_ref[...], w_ref[...], preferred_element_type=jnp.float32) + b_ref[...]
    o_ref[...] = y * scale + pe_ref[...]


def _encoder_layer_kernel(x_ref, wqkv_ref, bqkv_ref, wo_ref, bo_ref,
                          ln1g_ref, ln1b_ref, w1_ref, b1_ref, w2_ref, b2_ref,
                          ln2g_ref, ln2b_ref, o_ref, *, B, S, nhead):
    D = x_ref.shape[-1]
    dh = D // nhead
    x = x_ref[...]

    # Fused QKV projection: one (D, 3D) matmul, lane-dense 3D=384 output.
    qkv = jnp.dot(x, wqkv_ref[...], preferred_element_type=jnp.float32) + bqkv_ref[...]
    sa = _mha_rows(qkv[:, 0:D], qkv[:, D:2 * D], qkv[:, 2 * D:3 * D],
                   wo_ref[...], bo_ref[...],
                   B=B, S_q=S, S_kv=S, nhead=nhead, dh=dh)
    x1 = _layernorm(x + sa, ln1g_ref[...], ln1b_ref[...])

    # FFN (Linear -> ReLU -> Linear) + residual LayerNorm, still in-VMEM.
    h = jnp.maximum(
        jnp.dot(x1, w1_ref[...], preferred_element_type=jnp.float32) + b1_ref[...], 0.0)
    ff = jnp.dot(h, w2_ref[...], preferred_element_type=jnp.float32) + b2_ref[...]
    o_ref[...] = _layernorm(x1 + ff, ln2g_ref[...], ln2b_ref[...])


def _decoder_layer_kernel(x_ref, mem_ref,
                          sa_wqkv, sa_bqkv, sa_wo, sa_bo, ln1g, ln1b,
                          ca_wq, ca_bq, ca_wkv, ca_bkv, ca_wo, ca_bo, ln2g, ln2b,
                          w1_ref, b1_ref, w2_ref, b2_ref, ln3g, ln3b,
                          o_ref, *, B, St, Sa, nhead):
    D = x_ref.shape[-1]
    dh = D // nhead
    x = x_ref[...]
    mem = mem_ref[...]

    # --- self attention + LN1 ---
    qkv = jnp.dot(x, sa_wqkv[...], preferred_element_type=jnp.float32) + sa_bqkv[...]
    sa = _mha_rows(qkv[:, 0:D], qkv[:, D:2 * D], qkv[:, 2 * D:3 * D],
                   sa_wo[...], sa_bo[...],
                   B=B, S_q=St, S_kv=St, nhead=nhead, dh=dh)
    x1 = _layernorm(x + sa, ln1g[...], ln1b[...])

    # --- cross attention (fused (D, 2D) KV projection from memory) + LN2 ---
    q = jnp.dot(x1, ca_wq[...], preferred_element_type=jnp.float32) + ca_bq[...]
    kv = jnp.dot(mem, ca_wkv[...], preferred_element_type=jnp.float32) + ca_bkv[...]
    ca = _mha_rows(q, kv[:, 0:D], kv[:, D:2 * D], ca_wo[...], ca_bo[...],
                   B=B, S_q=St, S_kv=Sa, nhead=nhead, dh=dh)
    x2 = _layernorm(x1 + ca, ln2g[...], ln2b[...])

    # --- FFN + LN3 ---
    h = jnp.maximum(
        jnp.dot(x2, w1_ref[...], preferred_element_type=jnp.float32) + b1_ref[...], 0.0)
    ff = jnp.dot(h, w2_ref[...], preferred_element_type=jnp.float32) + b2_ref[...]
    o_ref[...] = _layernorm(x2 + ff, ln3g[...], ln3b[...])


def _out_linear_kernel(x_ref, w_ref, b_ref, o_ref):
    o_ref[...] = (jnp.dot(x_ref[...], w_ref[...], preferred_element_type=jnp.float32)
                  + b_ref[...])


# ----------------------------------------------------------------------------
# Wrappers around pallas_call
# ----------------------------------------------------------------------------
def embed_posenc(x2d, w, b, pe_flat, d_model):
    M = x2d.shape[0]
    return pl.pallas_call(
        functools.partial(_embed_pe_kernel, scale=math.sqrt(d_model)),
        out_shape=jax.ShapeDtypeStruct((M, d_model), jnp.float32),
        in_specs=[_full_spec()] * 4,
        out_specs=_full_spec(),
    )(x2d, w, b, pe_flat)


def encoder_layer(x2d, p, *, B, S, nhead):
    M, D = x2d.shape
    return pl.pallas_call(
        functools.partial(_encoder_layer_kernel, B=B, S=S, nhead=nhead),
        out_shape=jax.ShapeDtypeStruct((M, D), jnp.float32),
        in_specs=[_full_spec()] * 13,
        out_specs=_full_spec(),
    )(x2d,
      p["sa_wqkv"], p["sa_bqkv"], p["sa_wo"], p["sa_bo"],
      p["ln1_g"], p["ln1_b"],
      p["w1"], p["b1"], p["w2"], p["b2"],
      p["ln2_g"], p["ln2_b"])


def decoder_layer(x2d, mem2d, p, *, B, St, Sa, nhead):
    M, D = x2d.shape
    return pl.pallas_call(
        functools.partial(_decoder_layer_kernel, B=B, St=St, Sa=Sa, nhead=nhead),
        out_shape=jax.ShapeDtypeStruct((M, D), jnp.float32),
        in_specs=[_full_spec()] * 22,
        out_specs=_full_spec(),
    )(x2d, mem2d,
      p["sa_wqkv"], p["sa_bqkv"], p["sa_wo"], p["sa_bo"], p["ln1_g"], p["ln1_b"],
      p["ca_wq"], p["ca_bq"], p["ca_wkv"], p["ca_bkv"], p["ca_wo"], p["ca_bo"],
      p["ln2_g"], p["ln2_b"],
      p["w1"], p["b1"], p["w2"], p["b2"], p["ln3_g"], p["ln3_b"])


def out_linear(x2d, w, b):
    M = x2d.shape[0]
    Dout = w.shape[1]
    return pl.pallas_call(
        _out_linear_kernel,
        out_shape=jax.ShapeDtypeStruct((M, Dout), jnp.float32),
        in_specs=[_full_spec()] * 3,
        out_specs=_full_spec(),
    )(x2d, w, b)


# ----------------------------------------------------------------------------
# Forward pass
# ----------------------------------------------------------------------------
def talking_head_forward(params, identity_image, audio_spectrogram, target_landmarks,
                         *, nhead, d_model):
    del identity_image  # output is independent of identity_image (see module-level note)
    B, Sa, _ = audio_spectrogram.shape
    St = target_landmarks.shape[1]

    # pe[:B] broadcast over the *sequence* axis (reference semantics), flattened
    # to (B*S, D) rows so the add fuses into the embedding kernel epilogue.
    pe_rows = params["pe"][:B, 0, :]                                     # (B, D)
    pe_a = jnp.broadcast_to(pe_rows[:, None, :], (B, Sa, d_model)).reshape(B * Sa, d_model)
    pe_t = jnp.broadcast_to(pe_rows[:, None, :], (B, St, d_model)).reshape(B * St, d_model)

    wa, ba = params["audio_emb"]
    mem = embed_posenc(audio_spectrogram.reshape(B * Sa, -1), wa, ba, pe_a, d_model)
    for lp in params["enc_layers"]:
        mem = encoder_layer(mem, lp, B=B, S=Sa, nhead=nhead)

    wl, bl = params["landmark_emb"]
    out = embed_posenc(target_landmarks.reshape(B * St, -1), wl, bl, pe_t, d_model)
    for lp in params["dec_layers"]:
        out = decoder_layer(out, mem, lp, B=B, St=St, Sa=Sa, nhead=nhead)

    wout, bout = params["out_layer"]
    pred = out_linear(out, wout, bout).reshape(B, St, 136)
    return pred


# ----------------------------------------------------------------------------
# Deterministic parameter initialization
# ----------------------------------------------------------------------------
def init_linear(key, din, dout):
    kw, kb = jax.random.split(key)
    w_t = jax.random.normal(kw, (din, dout), jnp.float32) / math.sqrt(din)
    b = jax.random.normal(kb, (1, dout), jnp.float32) * 0.01
    return w_t, b


def init_attn(key, d):
    ks = jax.random.split(key, 4)
    wq, bq = init_linear(ks[0], d, d)
    wk, bk = init_linear(ks[1], d, d)
    wv, bv = init_linear(ks[2], d, d)
    wo, bo = init_linear(ks[3], d, d)
    return dict(
        wqkv=jnp.concatenate([wq, wk, wv], axis=1),     # (d, 3d)
        bqkv=jnp.concatenate([bq, bk, bv], axis=1),     # (1, 3d)
        wq=wq, bq=bq,
        wkv=jnp.concatenate([wk, wv], axis=1),          # (d, 2d)
        bkv=jnp.concatenate([bk, bv], axis=1),          # (1, 2d)
        wo=wo, bo=bo)


def make_pe(max_len, d_model):
    position = jnp.arange(max_len, dtype=jnp.float32)[:, None]
    div_term = jnp.exp(jnp.arange(0, d_model, 2, dtype=jnp.float32)
                       * (-math.log(10000.0) / d_model))
    pe = jnp.zeros((max_len, 1, d_model), jnp.float32)
    pe = pe.at[:, 0, 0::2].set(jnp.sin(position * div_term))
    pe = pe.at[:, 0, 1::2].set(jnp.cos(position * div_term))
    return pe


def init_params(key, d_model, nhead, n_enc, n_dec, d_ff, max_len=5000):
    keys = jax.random.split(key, 3 + n_enc + n_dec)
    ones2 = jnp.ones((1, d_model), jnp.float32)
    zeros2 = jnp.zeros((1, d_model), jnp.float32)
    params = {
        "audio_emb": init_linear(keys[0], 80, d_model),
        "landmark_emb": init_linear(keys[1], 136, d_model),
        "out_layer": init_linear(keys[2], d_model, 136),
        "pe": make_pe(max_len, d_model),
    }
    enc_layers = []
    for i in range(n_enc):
        ks = jax.random.split(keys[3 + i], 3)
        sa = init_attn(ks[0], d_model)
        w1, b1 = init_linear(ks[1], d_model, d_ff)
        w2, b2 = init_linear(ks[2], d_ff, d_model)
        enc_layers.append(dict(
            sa_wqkv=sa["wqkv"], sa_bqkv=sa["bqkv"], sa_wo=sa["wo"], sa_bo=sa["bo"],
            w1=w1, b1=b1, w2=w2, b2=b2,
            ln1_g=ones2, ln1_b=zeros2, ln2_g=ones2, ln2_b=zeros2,
        ))
    params["enc_layers"] = enc_layers
    dec_layers = []
    for i in range(n_dec):
        ks = jax.random.split(keys[3 + n_enc + i], 4)
        sa = init_attn(ks[0], d_model)
        ca = init_attn(ks[1], d_model)
        w1, b1 = init_linear(ks[2], d_model, d_ff)
        w2, b2 = init_linear(ks[3], d_ff, d_model)
        dec_layers.append(dict(
            sa_wqkv=sa["wqkv"], sa_bqkv=sa["bqkv"], sa_wo=sa["wo"], sa_bo=sa["bo"],
            ca_wq=ca["wq"], ca_bq=ca["bq"], ca_wkv=ca["wkv"], ca_bkv=ca["bkv"],
            ca_wo=ca["wo"], ca_bo=ca["bo"],
            w1=w1, b1=b1, w2=w2, b2=b2,
            ln1_g=ones2, ln1_b=zeros2, ln2_g=ones2, ln2_b=zeros2,
            ln3_g=ones2, ln3_b=zeros2,
        ))
    params["dec_layers"] = dec_layers
    return params


# ----------------------------------------------------------------------------
if __name__ == "__main__":
    d_model, nhead, n_enc, n_dec, d_ff = 128, 4, 2, 2, 256
    B, Sa, St = 2, 8, 8

    key = jax.random.PRNGKey(0)
    k_param, k_img, k_aud, k_lmk = jax.random.split(key, 4)
    params = init_params(k_param, d_model, nhead, n_enc, n_dec, d_ff)

    identity_image = jax.random.normal(k_img, (B, 3, 16, 16), jnp.float32)     # NCHW (unused)
    audio_spectrogram = jax.random.normal(k_aud, (B, Sa, 80), jnp.float32)
    target_landmarks = jax.random.normal(k_lmk, (B, St, 136), jnp.float32)

    fwd = jax.jit(functools.partial(talking_head_forward, nhead=nhead, d_model=d_model))
    out = fwd(params, identity_image, audio_spectrogram, target_landmarks)
    jax.block_until_ready(out)
    assert out.shape == (B, St, 136) and out.dtype == jnp.float32
    assert bool(jnp.all(jnp.isfinite(out)))
    print("KERNEL_OK")
</pallas_src>

<mosaic_0001>
module attributes {stable_mosaic.version = 11 : i64} {
  func.func @_embed_pe_kernel(%arg0: memref<16x136xf32, #tpu.memory_space<vmem>>, %arg1: memref<136x128xf32, #tpu.memory_space<vmem>>, %arg2: memref<1x128xf32, #tpu.memory_space<vmem>>, %arg3: memref<16x128xf32, #tpu.memory_space<vmem>>, %arg4: memref<16x128xf32, #tpu.memory_space<vmem>>) attributes {dimension_semantics = [], scalar_prefetch = 0 : i64, scratch_operands = 0 : i64, tpu.core_type = #tpu.core_type<tc>} {
    %c0 = arith.constant 0 : index
    %c0_0 = arith.constant 0 : index
    %0 = vector.load %arg0[%c0, %c0_0] : memref<16x136xf32, #tpu.memory_space<vmem>>, vector<16x136xf32>
    %c0_1 = arith.constant 0 : index
    %c0_2 = arith.constant 0 : index
    %1 = vector.load %arg1[%c0_1, %c0_2] : memref<136x128xf32, #tpu.memory_space<vmem>>, vector<136x128xf32>
    %cst = arith.constant dense<0.000000e+00> : vector<16x128xf32>
    %2 = tpu.matmul %0, %1, %cst {dimension_numbers = #tpu.dot_dimension_numbers<[1], [0], [0], [1], [0, 0, 1, 1], [], []>} : vector<16x136xf32>, vector<136x128xf32>, vector<16x128xf32> -> vector<16x128xf32>
    %c0_3 = arith.constant 0 : index
    %c0_4 = arith.constant 0 : index
    %3 = vector.load %arg2[%c0_3, %c0_4] : memref<1x128xf32, #tpu.memory_space<vmem>>, vector<1x128xf32>
    %4 = vector.broadcast %3 : vector<1x128xf32> to vector<16x128xf32>
    %5 = arith.addf %2, %4 : vector<16x128xf32>
    %cst_5 = arith.constant 11.3137083 : f32
    %6 = vector.broadcast %cst_5 : f32 to vector<16x128xf32>
    %7 = arith.mulf %5, %6 : vector<16x128xf32>
    %c0_6 = arith.constant 0 : index
    %c0_7 = arith.constant 0 : index
    %8 = vector.load %arg3[%c0_6, %c0_7] : memref<16x128xf32, #tpu.memory_space<vmem>>, vector<16x128xf32>
    %9 = arith.addf %7, %8 : vector<16x128xf32>
    %c0_8 = arith.constant 0 : index
    %c0_9 = arith.constant 0 : index
    %10 = vector.load %arg4[%c0_8, %c0_9] : memref<16x128xf32, #tpu.memory_space<vmem>>, vector<16x128xf32>
    tpu.vector_store %arg4[%c0_8, %c0_9], %9 {strides = array<i32>} : memref<16x128xf32, #tpu.memory_space<vmem>>, vector<16x128xf32>,
    return
  }
}

module attributes {stable_mosaic.version = 11 : i64} {
  func.func @_embed_pe_kernel(%arg0: memref<16x80xf32, #tpu.memory_space<vmem>>, %arg1: memref<80x128xf32, #tpu.memory_space<vmem>>, %arg2: memref<1x128xf32, #tpu.memory_space<vmem>>, %arg3: memref<16x128xf32, #tpu.memory_space<vmem>>, %arg4: memref<16x128xf32, #tpu.memory_space<vmem>>) attributes {dimension_semantics = [], scalar_prefetch = 0 : i64, scratch_operands = 0 : i64, tpu.core_type = #tpu.core_type<tc>} {
    %c0 = arith.constant 0 : index
    %c0_0 = arith.constant 0 : index
    %0 = vector.load %arg0[%c0, %c0_0] : memref<16x80xf32, #tpu.memory_space<vmem>>, vector<16x80xf32>
    %c0_1 = arith.constant 0 : index
    %c0_2 = arith.constant 0 : index
    %1 = vector.load %arg1[%c0_1, %c0_2] : memref<80x128xf32, #tpu.memory_space<vmem>>, vector<80x128xf32>
    %cst = arith.constant dense<0.000000e+00> : vector<16x128xf32>
    %2 = tpu.matmul %0, %1, %cst {dimension_numbers = #tpu.dot_dimension_numbers<[1], [0], [0], [1], [0, 0, 1, 1], [], []>} : vector<16x80xf32>, vector<80x128xf32>, vector<16x128xf32> -> vector<16x128xf32>
    %c0_3 = arith.constant 0 : index
    %c0_4 = arith.constant 0 : index
    %3 = vector.load %arg2[%c0_3, %c0_4] : memref<1x128xf32, #tpu.memory_space<vmem>>, vector<1x128xf32>
    %4 = vector.broadcast %3 : vector<1x128xf32> to vector<16x128xf32>
    %5 = arith.addf %2, %4 : vector<16x128xf32>
    %cst_5 = arith.constant 11.3137083 : f32
    %6 = vector.broadcast %cst_5 : f32 to vector<16x128xf32>
    %7 = arith.mulf %5, %6 : vector<16x128xf32>
    %c0_6 = arith.constant 0 : index
    %c0_7 = arith.constant 0 : index
    %8 = vector.load %arg3[%c0_6, %c0_7] : memref<16x128xf32, #tpu.memory_space<vmem>>, vector<16x128xf32>
    %9 = arith.addf %7, %8 : vector<16x128xf32>
    %c0_8 = arith.constant 0 : index
    %c0_9 = arith.constant 0 : index
    %10 = vector.load %arg4[%c0_8, %c0_9] : memref<16x128xf32, #tpu.memory_space<vmem>>, vector<16x128xf32>
    tpu.vector_store %arg4[%c0_8, %c0_9], %9 {strides = array<i32>} : memref<16x128xf32, #tpu.memory_space<vmem>>, vector<16x128xf32>,
    return
  }
}

module attributes {stable_mosaic.version = 11 : i64} {
  func.func @_encoder_layer_kernel(%arg0: memref<16x128xf32, #tpu.memory_space<vmem>>, %arg1: memref<128x384xf32, #tpu.memory_space<vmem>>, %arg2: memref<1x384xf32, #tpu.memory_space<vmem>>, %arg3: memref<128x128xf32, #tpu.memory_space<vmem>>, %arg4: memref<1x128xf32, #tpu.memory_space<vmem>>, %arg5: memref<1x128xf32, #tpu.memory_space<vmem>>, %arg6: memref<1x128xf32, #tpu.memory_space<vmem>>, %arg7: memref<128x256xf32, #tpu.memory_space<vmem>>, %arg8: memref<1x256xf32, #tpu.memory_space<vmem>>, %arg9: memref<256x128xf32, #tpu.memory_space<vmem>>, %arg10: memref<1x128xf32, #tpu.memory_space<vmem>>, %arg11: memref<1x128xf32, #tpu.memory_space<vmem>>, %arg12: memref<1x128xf32, #tpu.memory_space<vmem>>, %arg13: memref<16x128xf32, #tpu.memory_space<vmem>>) attributes {dimension_semantics = [], scalar_prefetch = 0 : i64, scratch_operands = 0 : i64, tpu.core_type = #tpu.core_type<tc>} {
    %c0 = arith.constant 0 : index
    %c0_0 = arith.constant 0 : index
    %0 = vector.load %arg0[%c0, %c0_0] : memref<16x128xf32, #tpu.memory_space<vmem>>, vector<16x128xf32>
    %c0_1 = arith.constant 0 : index
    %c0_2 = arith.constant 0 : index
    %1 = vector.load %arg1[%c0_1, %c0_2] : memref<128x384xf32, #tpu.memory_space<vmem>>, vector<128x384xf32>
    %cst = arith.constant dense<0.000000e+00> : vector<16x384xf32>
    %2 = tpu.matmul %0, %1, %cst {dimension_numbers = #tpu.dot_dimension_numbers<[1], [0], [0], [1], [0, 0, 1, 1], [], []>} : vector<16x128xf32>, vector<128x384xf32>, vector<16x384xf32> -> vector<16x384xf32>
    %c0_3 = arith.constant 0 : index
    %c0_4 = arith.constant 0 : index
    %3 = vector.load %arg2[%c0_3, %c0_4] : memref<1x384xf32, #tpu.memory_space<vmem>>, vector<1x384xf32>
    %4 = vector.broadcast %3 : vector<1x384xf32> to vector<16x384xf32>
    %5 = arith.addf %2, %4 : vector<16x384xf32>
    %6 = vector.extract_strided_slice %5 {offsets = [0, 0], sizes = [16, 128], strides = [1, 1]} : vector<16x384xf32> to vector<16x128xf32>
    %7 = vector.extract_strided_slice %5 {offsets = [0, 128], sizes = [16, 128], strides = [1, 1]} : vector<16x384xf32> to vector<16x128xf32>
    %8 = vector.extract_strided_slice %5 {offsets = [0, 256], sizes = [16, 128], strides = [1, 1]} : vector<16x384xf32> to vector<16x128xf32>
    %c0_5 = arith.constant 0 : index
    %c0_6 = arith.constant 0 : index
    %9 = vector.load %arg3[%c0_5, %c0_6] : memref<128x128xf32, #tpu.memory_space<vmem>>, vector<128x128xf32>
    %c0_7 = arith.constant 0 : index
    %c0_8 = arith.constant 0 : index
    %10 = vector.load %arg4[%c0_7, %c0_8] : memref<1x128xf32, #tpu.memory_space<vmem>>, vector<1x128xf32>
    %11 = vector.extract_strided_slice %6 {offsets = [0, 0], sizes = [8, 128], strides = [1, 1]} : vector<16x128xf32> to vector<8x128xf32>
    %12 = vector.extract_strided_slice %7 {offsets = [0, 0], sizes = [8, 128], strides = [1, 1]} : vector<16x128xf32> to vector<8x128xf32>
    %13 = vector.extract_strided_slice %8 {offsets = [0, 0], sizes = [8, 128], strides = [1, 1]} : vector<16x128xf32> to vector<8x128xf32>
    %14 = vector.extract_strided_slice %11 {offsets = [0, 0], sizes = [8, 32], strides = [1, 1]} : vector<8x128xf32> to vector<8x32xf32>
    %15 = vector.extract_strided_slice %12 {offsets = [0, 0], sizes = [8, 32], strides = [1, 1]} : vector<8x128xf32> to vector<8x32xf32>
    %16 = vector.extract_strided_slice %13 {offsets = [0, 0], sizes = [8, 32], strides = [1, 1]} : vector<8x128xf32> to vector<8x32xf32>
    %cst_9 = arith.constant dense<0.000000e+00> : vector<8x8xf32>
    %17 = tpu.matmul %14, %15, %cst_9 {dimension_numbers = #tpu.dot_dimension_numbers<[1], [1], [0], [0], [0, 0, 1, 0], [], []>} : vector<8x32xf32>, vector<8x32xf32>, vector<8x8xf32> -> vector<8x8xf32>
    %cst_10 = arith.constant 0.176776692 : f32
    %18 = vector.broadcast %cst_10 : f32 to vector<8x8xf32>
    %19 = arith.mulf %17, %18 : vector<8x8xf32>
    %cst_11 = arith.constant dense<0xFF800000> : vector<8xf32>
    %20 = vector.multi_reduction <maximumf>, %19, %cst_11 [1] : vector<8x8xf32> to vector<8xf32>
    %21 = vector.shape_cast %20 : vector<8xf32> to vector<8x1xf32>
    %22 = vector.broadcast %21 : vector<8x1xf32> to vector<8x8xf32>
    %23 = arith.subf %19, %22 : vector<8x8xf32>
    %24 = math.exp %23 : vector<8x8xf32>
    %cst_12 = arith.constant dense<0.000000e+00> : vector<8xf32>
    %25 = vector.multi_reduction <add>, %24, %cst_12 [1] : vector<8x8xf32> to vector<8xf32>
    %26 = vector.shape_cast %25 : vector<8xf32> to vector<8x1xf32>
    %27 = tpu.reciprocal %26 : vector<8x1xf32> -> vector<8x1xf32>
    %28 = vector.broadcast %27 : vector<8x1xf32> to vector<8x8xf32>
    %29 = arith.mulf %24, %28 : vector<8x8xf32>
    %cst_13 = arith.constant dense<0.000000e+00> : vector<8x32xf32>
    %30 = tpu.matmul %29, %16, %cst_13 {dimension_numbers = #tpu.dot_dimension_numbers<[1], [0], [0], [1], [0, 0, 1, 1], [], []>} : vector<8x8xf32>, vector<8x32xf32>, vector<8x32xf32> -> vector<8x32xf32>
    %31 = vector.extract_strided_slice %9 {offsets = [0, 0], sizes = [32, 128], strides = [1, 1]} : vector<128x128xf32> to vector<32x128xf32>
    %cst_14 = arith.constant dense<0.000000e+00> : vector<8x128xf32>
    %32 = tpu.matmul %30, %31, %cst_14 {dimension_numbers = #tpu.dot_dimension_numbers<[1], [0], [0], [1], [0, 0, 1, 1], [], []>} : vector<8x32xf32>, vector<32x128xf32>, vector<8x128xf32> -> vector<8x128xf32>
    %33 = vector.extract_strided_slice %11 {offsets = [0, 32], sizes = [8, 32], strides = [1, 1]} : vector<8x128xf32> to vector<8x32xf32>
    %34 = vector.extract_strided_slice %12 {offsets = [0, 32], sizes = [8, 32], strides = [1, 1]} : vector<8x128xf32> to vector<8x32xf32>
    %35 = vector.extract_strided_slice %13 {offsets = [0, 32], sizes = [8, 32], strides = [1, 1]} : vector<8x128xf32> to vector<8x32xf32>
    %cst_15 = arith.constant dense<0.000000e+00> : vector<8x8xf32>
    %36 = tpu.matmul %33, %34, %cst_15 {dimension_numbers = #tpu.dot_dimension_numbers<[1], [1], [0], [0], [0, 0, 1, 0], [], []>} : vector<8x32xf32>, vector<8x32xf32>, vector<8x8xf32> -> vector<8x8xf32>
    %cst_16 = arith.constant 0.176776692 : f32
    %37 = vector.broadcast %cst_16 : f32 to vector<8x8xf32>
    %38 = arith.mulf %36, %37 : vector<8x8xf32>
    %cst_17 = arith.constant dense<0xFF800000> : vector<8xf32>
    %39 = vector.multi_reduction <maximumf>, %38, %cst_17 [1] : vector<8x8xf32> to vector<8xf32>
    %40 = vector.shape_cast %39 : vector<8xf32> to vector<8x1xf32>
    %41 = vector.broadcast %40 : vector<8x1xf32> to vector<8x8xf32>
    %42 = arith.subf %38, %41 : vector<8x8xf32>
    %43 = math.exp %42 : vector<8x8xf32>
    %cst_18 = arith.constant dense<0.000000e+00> : vector<8xf32>
    %44 = vector.multi_reduction <add>, %43, %cst_18 [1] : vector<8x8xf32> to vector<8xf32>
    %45 = vector.shape_cast %44 : vector<8xf32> to vector<8x1xf32>
    %46 = tpu.reciprocal %45 : vector<8x1xf32> -> vector<8x1xf32>
    %47 = vector.broadcast %46 : vector<8x1xf32> to vector<8x8xf32>
    %48 = arith.mulf %43, %47 : vector<8x8xf32>
    %cst_19 = arith.constant dense<0.000000e+00> : vector<8x32xf32>
    %49 = tpu.matmul %48, %35, %cst_19 {dimension_numbers = #tpu.dot_dimension_numbers<[1], [0], [0], [1], [0, 0, 1, 1], [], []>} : vector<8x8xf32>, vector<8x32xf32>, vector<8x32xf32> -> vector<8x32xf32>
    %50 = vector.extract_strided_slice %9 {offsets = [32, 0], sizes = [32, 128], strides = [1, 1]} : vector<128x128xf32> to vector<32x128xf32>
    %cst_20 = arith.constant dense<0.000000e+00> : vector<8x128xf32>
    %51 = tpu.matmul %49, %50, %cst_20 {dimension_numbers = #tpu.dot_dimension_numbers<[1], [0], [0], [1], [0, 0, 1, 1], [], []>} : vector<8x32xf32>, vector<32x128xf32>, vector<8x128xf32> -> vector<8x128xf32>
    %52 = arith.addf %32, %51 : vector<8x128xf32>
    %53 = vector.extract_strided_slice %11 {offsets = [0, 64], sizes = [8, 32], strides = [1, 1]} : vector<8x128xf32> to vector<8x32xf32>
    %54 = vector.extract_strided_slice %12 {offsets = [0, 64], sizes = [8, 32], strides = [1, 1]} : vector<8x128xf32> to vector<8x32xf32>
    %55 = vector.extract_strided_slice %13 {offsets = [0, 64], sizes = [8, 32], strides = [1, 1]} : vector<8x128xf32> to vector<8x32xf32>
    %cst_21 = arith.constant dense<0.000000e+00> : vector<8x8xf32>
    %56 = tpu.matmul %53, %54, %cst_21 {dimension_numbers = #tpu.dot_dimension_numbers<[1], [1], [0], [0], [0, 0, 1, 0], [], []>} : vector<8x32xf32>, vector<8x32xf32>, vector<8x8xf32> -> vector<8x8xf32>
    %cst_22 = arith.constant 0.176776692 : f32
    %57 = vector.broadcast %cst_22 : f32 to vector<8x8xf32>
    %58 = arith.mulf %56, %57 : vector<8x8xf32>
    %cst_23 = arith.constant dense<0xFF800000> : vector<8xf32>
    %59 = vector.multi_reduction <maximumf>, %58, %cst_23 [1] : vector<8x8xf32> to vector<8xf32>
    %60 = vector.shape_cast %59 : vector<8xf32> to vector<8x1xf32>
    %61 = vector.broadcast %60 : vector<8x1xf32> to vector<8x8xf32>
    %62 = arith.subf %58, %61 : vector<8x8xf32>
    %63 = math.exp %62 : vector<8x8xf32>
    %cst_24 = arith.constant dense<0.000000e+00> : vector<8xf32>
    %64 = vector.multi_reduction <add>, %63, %cst_24 [1] : vector<8x8xf32> to vector<8xf32>
    %65 = vector.shape_cast %64 : vector<8xf32> to vector<8x1xf32>
    %66 = tpu.reciprocal %65 : vector<8x1xf32> -> vector<8x1xf32>
    %67 = vector.broadcast %66 : vector<8x1xf32> to vector<8x8xf32>
    %68 = arith.mulf %63, %67 : vector<8x8xf32>
    %cst_25 = arith.constant dense<0.000000e+00> : vector<8x32xf32>
    %69 = tpu.matmul %68, %55, %cst_25 {dimension_numbers = #tpu.dot_dimension_numbers<[1], [0], [0], [1], [0, 0, 1, 1], [], []>} : vector<8x8xf32>, vector<8x32xf32>, vector<8x32xf32> -> vector<8x32xf32>
    %70 = vector.extract_strided_slice %9 {offsets = [64, 0], sizes = [32, 128], strides = [1, 1]} : vector<128x128xf32> to vector<32x128xf32>
    %cst_26 = arith.constant dense<0.000000e+00> : vector<8x128xf32>
    %71 = tpu.matmul %69, %70, %cst_26 {dimension_numbers = #tpu.dot_dimension_numbers<[1], [0], [0], [1], [0, 0, 1, 1], [], []>} : vector<8x32xf32>, vector<32x128xf32>, vector<8x128xf32> -> vector<8x128xf32>
    %72 = arith.addf %52, %71 : vector<8x128xf32>
    %73 = vector.extract_strided_slice %11 {offsets = [0, 96], sizes = [8, 32], strides = [1, 1]} : vector<8x128xf32> to vector<8x32xf32>
    %74 = vector.extract_strided_slice %12 {offsets = [0, 96], sizes = [8, 32], strides = [1, 1]} : vector<8x128xf32> to vector<8x32xf32>
    %75 = vector.extract_strided_slice %13 {offsets = [0, 96], sizes = [8, 32], strides = [1, 1]} : vector<8x128xf32> to vector<8x32xf32>
    %cst_27 = arith.constant dense<0.000000e+00> : vector<8x8xf32>
    %76 = tpu.matmul %73, %74, %cst_27 {dimension_numbers = #tpu.dot_dimension_numbers<[1], [1], [0], [0], [0, 0, 1, 0], [], []>} : vector<8x32xf32>, vector<8x32xf32>, vector<8x8xf32> -> vector<8x8xf32>
    %cst_28 = arith.constant 0.176776692 : f32
    %77 = vector.broadcast %cst_28 : f32 to vector<8x8xf32>
    %78 = arith.mulf %76, %77 : vector<8x8xf32>
    %cst_29 = arith.constant dense<0xFF800000> : vector<8xf32>
    %79 = vector.multi_reduction <maximumf>, %78, %cst_29 [1] : vector<8x8xf32> to vector<8xf32>
    %80 = vector.shape_cast %79 : vector<8xf32> to vector<8x1xf32>
    %81 = vector.broadcast %80 : vector<8x1xf32> to vector<8x8xf32>
    %82 = arith.subf %78, %81 : vector<8x8xf32>
    %83 = math.exp %82 : vector<8x8xf32>
    %cst_30 = arith.constant dense<0.000000e+00> : vector<8xf32>
    %84 = vector.multi_reduction <add>, %83, %cst_30 [1] : vector<8x8xf32> to vector<8xf32>
    %85 = vector.shape_cast %84 : vector<8xf32> to vector<8x1xf32>
    %86 = tpu.reciprocal %85 : vector<8x1xf32> -> vector<8x1xf32>
    %87 = vector.broadcast %86 : vector<8x1xf32> to vector<8x8xf32>
    %88 = arith.mulf %83, %87 : vector<8x8xf32>
    %cst_31 = arith.constant dense<0.000000e+00> : vector<8x32xf32>
    %89 = tpu.matmul %88, %75, %cst_31 {dimension_numbers = #tpu.dot_dimension_numbers<[1], [0], [0], [1], [0, 0, 1, 1], [], []>} : vector<8x8xf32>, vector<8x32xf32>, vector<8x32xf32> -> vector<8x32xf32>
    %90 = vector.extract_strided_slice %9 {offsets = [96, 0], sizes = [32, 128], strides = [1, 1]} : vector<128x128xf32> to vector<32x128xf32>
    %cst_32 = arith.constant dense<0.000000e+00> : vector<8x128xf32>
    %91 = tpu.matmul %89, %90, %cst_32 {dimension_numbers = #tpu.dot_dimension_numbers<[1], [0], [0], [1], [0, 0, 1, 1], [], []>} : vector<8x32xf32>, vector<32x128xf32>, vector<8x128xf32> -> vector<8x128xf32>
    %92 = arith.addf %72, %91 : vector<8x128xf32>
    %93 = vector.extract_strided_slice %6 {offsets = [8, 0], sizes = [8, 128], strides = [1, 1]} : vector<16x128xf32> to vector<8x128xf32>
    %94 = vector.extract_strided_slice %7 {offsets = [8, 0], sizes = [8, 128], strides = [1, 1]} : vector<16x128xf32> to vector<8x128xf32>
    %95 = vector.extract_strided_slice %8 {offsets = [8, 0], sizes = [8, 128], strides = [1, 1]} : vector<16x128xf32> to vector<8x128xf32>
    %96 = vector.extract_strided_slice %93 {offsets = [0, 0], sizes = [8, 32], strides = [1, 1]} : vector<8x128xf32> to vector<8x32xf32>
    %97 = vector.extract_strided_slice %94 {offsets = [0, 0], sizes = [8, 32], strides = [1, 1]} : vector<8x128xf32> to vector<8x32xf32>
    %98 = vector.extract_strided_slice %95 {offsets = [0, 0], sizes = [8, 32], strides = [1, 1]} : vector<8x128xf32> to vector<8x32xf32>
    %cst_33 = arith.constant dense<0.000000e+00> : vector<8x8xf32>
    %99 = tpu.matmul %96, %97, %cst_33 {dimension_numbers = #tpu.dot_dimension_numbers<[1], [1], [0], [0], [0, 0, 1, 0], [], []>} : vector<8x32xf32>, vector<8x32xf32>, vector<8x8xf32> -> vector<8x8xf32>
    %cst_34 = arith.constant 0.176776692 : f32
    %100 = vector.broadcast %cst_34 : f32 to vector<8x8xf32>
    %101 = arith.mulf %99, %100 : vector<8x8xf32>
    %cst_35 = arith.constant dense<0xFF800000> : vector<8xf32>
    %102 = vector.multi_reduction <maximumf>, %101, %cst_35 [1] : vector<8x8xf32> to vector<8xf32>
    %103 = vector.shape_cast %102 : vector<8xf32> to vector<8x1xf32>
    %104 = vector.broadcast %103 : vector<8x1xf32> to vector<8x8xf32>
    %105 = arith.subf %101, %104 : vector<8x8xf32>
    %106 = math.exp %105 : vector<8x8xf32>
    %cst_36 = arith.constant dense<0.000000e+00> : vector<8xf32>
    %107 = vector.multi_reduction <add>, %106, %cst_36 [1] : vector<8x8xf32> to vector<8xf32>
    %108 = vector.shape_cast %107 : vector<8xf32> to vector<8x1xf32>
    %109 = tpu.reciprocal %108 : vector<8x1xf32> -> vector<8x1xf32>
    %110 = vector.broadcast %109 : vector<8x1xf32> to vector<8x8xf32>
    %111 = arith.mulf %106, %110 : vector<8x8xf32>
    %cst_37 = arith.constant dense<0.000000e+00> : vector<8x32xf32>
    %112 = tpu.matmul %111, %98, %cst_37 {dimension_numbers = #tpu.dot_dimension_numbers<[1], [0], [0], [1], [0, 0, 1, 1], [], []>} : vector<8x8xf32>, vector<8x32xf32>, vector<8x32xf32> -> vector<8x32xf32>
    %113 = vector.extract_strided_slice %9 {offsets = [0, 0], sizes = [32, 128], strides = [1, 1]} : vector<128x128xf32> to vector<32x128xf32>
    %cst_38 = arith.constant dense<0.000000e+00> : vector<8x128xf32>
    %114 = tpu.matmul %112, %113, %cst_38 {dimension_numbers = #tpu.dot_dimension_numbers<[1], [0], [0], [1], [0, 0, 1, 1], [], []>} : vector<8x32xf32>, vector<32x128xf32>, vector<8x128xf32> -> vector<8x128xf32>
    %115 = vector.extract_strided_slice %93 {offsets = [0, 32], sizes = [8, 32], strides = [1, 1]} : vector<8x128xf32> to vector<8x32xf32>
    %116 = vector.extract_strided_slice %94 {offsets = [0, 32], sizes = [8, 32], strides = [1, 1]} : vector<8x128xf32> to vector<8x32xf32>
    %117 = vector.extract_strided_slice %95 {offsets = [0, 32], sizes = [8, 32], strides = [1, 1]} : vector<8x128xf32> to vector<8x32xf32>
    %cst_39 = arith.constant dense<0.000000e+00> : vector<8x8xf32>
    %118 = tpu.matmul %115, %116, %cst_39 {dimension_numbers = #tpu.dot_dimension_numbers<[1], [1], [0], [0], [0, 0, 1, 0], [], []>} : vector<8x32xf32>, vector<8x32xf32>, vector<8x8xf32> -> vector<8x8xf32>
    %cst_40 = arith.constant 0.176776692 : f32
    %119 = vector.broadcast %cst_40 : f32 to vector<8x8xf32>
    %120 = arith.mulf %118, %119 : vector<8x8xf32>
    %cst_41 = arith.constant dense<0xFF800000> : vector<8xf32>
    %121 = vector.multi_reduction <maximumf>, %120, %cst_41 [1] : vector<8x8xf32> to vector<8xf32>
    %122 = vector.shape_cast %121 : vector<8xf32> to vector<8x1xf32>
    %123 = vector.broadcast %122 : vector<8x1xf32> to vector<8x8xf32>
    %124 = arith.subf %120, %123 : vector<8x8xf32>
    %125 = math.exp %124 : vector<8x8xf32>
    %cst_42 = arith.constant dense<0.000000e+00> : vector<8xf32>
    %126 = vector.multi_reduction <add>, %125, %cst_42 [1] : vector<8x8xf32> to vector<8xf32>
    %127 = vector.shape_cast %126 : vector<8xf32> to vector<8x1xf32>
    %128 = tpu.reciprocal %127 : vector<8x1xf32> -> vector<8x1xf32>
    %129 = vector.broadcast %128 : vector<8x1xf32> to vector<8x8xf32>
    %130 = arith.mulf %125, %129 : vector<8x8xf32>
    %cst_43 = arith.constant dense<0.000000e+00> : vector<8x32xf32>
    %131 = tpu.matmul %130, %117, %cst_43 {dimension_numbers = #tpu.dot_dimension_numbers<[1], [0], [0], [1], [0, 0, 1, 1], [], []>} : vector<8x8xf32>, vector<8x32xf32>, vector<8x32xf32> -> vector<8x32xf32>
    %132 = vector.extract_strided_slice %9 {offsets = [32, 0], sizes = [32, 128], strides = [1, 1]} : vector<128x128xf32> to vector<32x128xf32>
    %cst_44 = arith.constant dense<0.000000e+00> : vector<8x128xf32>
    %133 = tpu.matmul %131, %132, %cst_44 {dimension_numbers = #tpu.dot_dimension_numbers<[1], [0], [0], [1], [0, 0, 1, 1], [], []>} : vector<8x32xf32>, vector<32x128xf32>, vector<8x128xf32> -> vector<8x128xf32>
    %134 = arith.addf %114, %133 : vector<8x128xf32>
    %135 = vector.extract_strided_slice %93 {offsets = [0, 64], sizes = [8, 32], strides = [1, 1]} : vector<8x128xf32> to vector<8x32xf32>
    %136 = vector.extract_strided_slice %94 {offsets = [0, 64], sizes = [8, 32], strides = [1, 1]} : vector<8x128xf32> to vector<8x32xf32>
    %137 = vector.extract_strided_slice %95 {offsets = [0, 64], sizes = [8, 32], strides = [1, 1]} : vector<8x128xf32> to vector<8x32xf32>
    %cst_45 = arith.constant dense<0.000000e+00> : vector<8x8xf32>
    %138 = tpu.matmul %135, %136, %cst_45 {dimension_numbers = #tpu.dot_dimension_numbers<[1], [1], [0], [0], [0, 0, 1, 0], [], []>} : vector<8x32xf32>, vector<8x32xf32>, vector<8x8xf32> -> vector<8x8xf32>
    %cst_46 = arith.constant 0.176776692 : f32
    %139 = vector.broadcast %cst_46 : f32 to vector<8x8xf32>
    %140 = arith.mulf %138, %139 : vector<8x8xf32>
    %cst_47 = arith.constant dense<0xFF800000> : vector<8xf32>
    %141 = vector.multi_reduction <maximumf>, %140, %cst_47 [1] : vector<8x8xf32> to vector<8xf32>
    %142 = vector.shape_cast %141 : vector<8xf32> to vector<8x1xf32>
    %143 = vector.broadcast %142 : vector<8x1xf32> to vector<8x8xf32>
    %144 = arith.subf %140, %143 : vector<8x8xf32>
    %145 = math.exp %144 : vector<8x8xf32>
    %cst_48 = arith.constant dense<0.000000e+00> : vector<8xf32>
    %146 = vector.multi_reduction <add>, %145, %cst_48 [1] : vector<8x8xf32> to vector<8xf32>
    %147 = vector.shape_cast %146 : vector<8xf32> to vector<8x1xf32>
    %148 = tpu.reciprocal %147 : vector<8x1xf32> -> vector<8x1xf32>
    %149 = vector.broadcast %148 : vector<8x1xf32> to vector<8x8xf32>
    %150 = arith.mulf %145, %149 : vector<8x8xf32>
    %cst_49 = arith.constant dense<0.000000e+00> : vector<8x32xf32>
    %151 = tpu.matmul %150, %137, %cst_49 {dimension_numbers = #tpu.dot_dimension_numbers<[1], [0], [0], [1], [0, 0, 1, 1], [], []>} : vector<8x8xf32>, vector<8x32xf32>, vector<8x32xf32> -> vector<8x32xf32>
    %152 = vector.extract_strided_slice %9 {offsets = [64, 0], sizes = [32, 128], strides = [1, 1]} : vector<128x128xf32> to vector<32x128xf32>
    %cst_50 = arith.constant dense<0.000000e+00> : vector<8x128xf32>
    %153 = tpu.matmul %151, %152, %cst_50 {dimension_numbers = #tpu.dot_dimension_numbers<[1], [0], [0], [1], [0, 0, 1, 1], [], []>} : vector<8x32xf32>, vector<32x128xf32>, vector<8x128xf32> -> vector<8x128xf32>
    %154 = arith.addf %134, %153 : vector<8x128xf32>
    %155 = vector.extract_strided_slice %93 {offsets = [0, 96], sizes = [8, 32], strides = [1, 1]} : vector<8x128xf32> to vector<8x32xf32>
    %156 = vector.extract_strided_slice %94 {offsets = [0, 96], sizes = [8, 32], strides = [1, 1]} : vector<8x128xf32> to vector<8x32xf32>
    %157 = vector.extract_strided_slice %95 {offsets = [0, 96], sizes = [8, 32], strides = [1, 1]} : vector<8x128xf32> to vector<8x32xf32>
    %cst_51 = arith.constant dense<0.000000e+00> : vector<8x8xf32>
    %158 = tpu.matmul %155, %156, %cst_51 {dimension_numbers = #tpu.dot_dimension_numbers<[1], [1], [0], [0], [0, 0, 1, 0], [], []>} : vector<8x32xf32>, vector<8x32xf32>, vector<8x8xf32> -> vector<8x8xf32>
    %cst_52 = arith.constant 0.176776692 : f32
    %159 = vector.broadcast %cst_52 : f32 to vector<8x8xf32>
    %160 = arith.mulf %158, %159 : vector<8x8xf32>
    %cst_53 = arith.constant dense<0xFF800000> : vector<8xf32>
    %161 = vector.multi_reduction <maximumf>, %160, %cst_53 [1] : vector<8x8xf32> to vector<8xf32>
    %162 = vector.shape_cast %161 : vector<8xf32> to vector<8x1xf32>
    %163 = vector.broadcast %162 : vector<8x1xf32> to vector<8x8xf32>
    %164 = arith.subf %160, %163 : vector<8x8xf32>
    %165 = math.exp %164 : vector<8x8xf32>
    %cst_54 = arith.constant dense<0.000000e+00> : vector<8xf32>
    %166 = vector.multi_reduction <add>, %165, %cst_54 [1] : vector<8x8xf32> to vector<8xf32>
    %167 = vector.shape_cast %166 : vector<8xf32> to vector<8x1xf32>
    %168 = tpu.reciprocal %167 : vector<8x1xf32> -> vector<8x1xf32>
    %169 = vector.broadcast %168 : vector<8x1xf32> to vector<8x8xf32>
    %170 = arith.mulf %165, %169 : vector<8x8xf32>
    %cst_55 = arith.constant dense<0.000000e+00> : vector<8x32xf32>
    %171 = tpu.matmul %170, %157, %cst_55 {dimension_numbers = #tpu.dot_dimension_numbers<[1], [0], [0], [1], [0, 0, 1, 1], [], []>} : vector<8x8xf32>, vector<8x32xf32>, vector<8x32xf32> -> vector<8x32xf32>
    %172 = vector.extract_strided_slice %9 {offsets = [96, 0], sizes = [32, 128], strides = [1, 1]} : vector<128x128xf32> to vector<32x128xf32>
    %cst_56 = arith.constant dense<0.000000e+00> : vector<8x128xf32>
    %173 = tpu.matmul %171, %172, %cst_56 {dimension_numbers = #tpu.dot_dimension_numbers<[1], [0], [0], [1], [0, 0, 1, 1], [], []>} : vector<8x32xf32>, vector<32x128xf32>, vector<8x128xf32> -> vector<8x128xf32>
    %174 = arith.addf %154, %173 : vector<8x128xf32>
    %175 = tpu.concatenate %92, %174 in 0 : vector<8x128xf32>, vector<8x128xf32> -> vector<16x128xf32>
    %176 = vector.broadcast %10 : vector<1x128xf32> to vector<16x128xf32>
    %177 = arith.addf %175, %176 : vector<16x128xf32>
    %178 = arith.addf %0, %177 : vector<16x128xf32>
    %c0_57 = arith.constant 0 : index
    %c0_58 = arith.constant 0 : index
    %179 = vector.load %arg5[%c0_57, %c0_58] : memref<1x128xf32, #tpu.memory_space<vmem>>, vector<1x128xf32>
    %c0_59 = arith.constant 0 : index
    %c0_60 = arith.constant 0 : index
    %180 = vector.load %arg6[%c0_59, %c0_60] : memref<1x128xf32, #tpu.memory_space<vmem>>, vector<1x128xf32>
    %cst_61 = arith.constant dense<0.000000e+00> : vector<16xf32>
    %181 = vector.multi_reduction <add>, %178, %cst_61 [1] : vector<16x128xf32> to vector<16xf32>
    %182 = vector.shape_cast %181 : vector<16xf32> to vector<16x1xf32>
    %cst_62 = arith.constant 1.280000e+02 : f32
    %183 = vector.broadcast %cst_62 : f32 to vector<16x1xf32>
    %184 = arith.divf %182, %183 : vector<16x1xf32>
    %185 = vector.broadcast %184 : vector<16x1xf32> to vector<16x128xf32>
    %186 = arith.subf %178, %185 : vector<16x128xf32>
    %187 = arith.mulf %186, %186 : vector<16x128xf32>
    %cst_63 = arith.constant dense<0.000000e+00> : vector<16xf32>
    %188 = vector.multi_reduction <add>, %187, %cst_63 [1] : vector<16x128xf32> to vector<16xf32>
    %189 = vector.shape_cast %188 : vector<16xf32> to vector<16x1xf32>
    %cst_64 = arith.constant 1.280000e+02 : f32
    %190 = vector.broadcast %cst_64 : f32 to vector<16x1xf32>
    %191 = arith.divf %189, %190 : vector<16x1xf32>
    %cst_65 = arith.constant 9.99999974E-6 : f32
    %192 = vector.broadcast %cst_65 : f32 to vector<16x1xf32>
    %193 = arith.addf %191, %192 : vector<16x1xf32>
    %194 = math.rsqrt %193 : vector<16x1xf32>
    %195 = vector.broadcast %194 : vector<16x1xf32> to vector<16x128xf32>
    %196 = arith.mulf %186, %195 : vector<16x128xf32>
    %197 = vector.broadcast %179 : vector<1x128xf32> to vector<16x128xf32>
    %198 = arith.mulf %196, %197 : vector<16x128xf32>
    %199 = vector.broadcast %180 : vector<1x128xf32> to vector<16x128xf32>
    %200 = arith.addf %198, %199 : vector<16x128xf32>
    %c0_66 = arith.constant 0 : index
    %c0_67 = arith.constant 0 : index
    %201 = vector.load %arg7[%c0_66, %c0_67] : memref<128x256xf32, #tpu.memory_space<vmem>>, vector<128x256xf32>
    %cst_68 = arith.constant dense<0.000000e+00> : vector<16x256xf32>
    %202 = tpu.matmul %200, %201, %cst_68 {dimension_numbers = #tpu.dot_dimension_numbers<[1], [0], [0], [1], [0, 0, 1, 1], [], []>} : vector<16x128xf32>, vector<128x256xf32>, vector<16x256xf32> -> vector<16x256xf32>
    %c0_69 = arith.constant 0 : index
    %c0_70 = arith.constant 0 : index
    %203 = vector.load %arg8[%c0_69, %c0_70] : memref<1x256xf32, #tpu.memory_space<vmem>>, vector<1x256xf32>
    %204 = vector.broadcast %203 : vector<1x256xf32> to vector<16x256xf32>
    %205 = arith.addf %202, %204 : vector<16x256xf32>
    %cst_71 = arith.constant 0.000000e+00 : f32
    %206 = vector.broadcast %cst_71 : f32 to vector<16x256xf32>
    %207 = arith.maximumf %205, %206 : vector<16x256xf32>
    %c0_72 = arith.constant 0 : index
    %c0_73 = arith.constant 0 : index
    %208 = vector.load %arg9[%c0_72, %c0_73] : memref<256x128xf32, #tpu.memory_space<vmem>>, vector<256x128xf32>
    %cst_74 = arith.constant dense<0.000000e+00> : vector<16x128xf32>
    %209 = tpu.matmul %207, %208, %cst_74 {dimension_numbers = #tpu.dot_dimension_numbers<[1], [0], [0], [1], [0, 0, 1, 1], [], []>} : vector<16x256xf32>, vector<256x128xf32>, vector<16x128xf32> -> vector<16x128xf32>
    %c0_75 = arith.constant 0 : index
    %c0_76 = arith.constant 0 : index
    %210 = vector.load %arg10[%c0_75, %c0_76] : memref<1x128xf32, #tpu.memory_space<vmem>>, vector<1x128xf32>
    %211 = vector.broadcast %210 : vector<1x128xf32> to vector<16x128xf32>
    %212 = arith.addf %209, %211 : vector<16x128xf32>
    %213 = arith.addf %200, %212 : vector<16x128xf32>
    %c0_77 = arith.constant 0 : index
    %c0_78 = arith.constant 0 : index
    %214 = vector.load %arg11[%c0_77, %c0_78] : memref<1x128xf32, #tpu.memory_space<vmem>>, vector<1x128xf32>
    %c0_79 = arith.constant 0 : index
    %c0_80 = arith.constant 0 : index
    %215 = vector.load %arg12[%c0_79, %c0_80] : memref<1x128xf32, #tpu.memory_space<vmem>>, vector<1x128xf32>
    %cst_81 = arith.constant dense<0.000000e+00> : vector<16xf32>
    %216 = vector.multi_reduction <add>, %213, %cst_81 [1] : vector<16x128xf32> to vector<16xf32>
    %217 = vector.shape_cast %216 : vector<16xf32> to vector<16x1xf32>
    %cst_82 = arith.constant 1.280000e+02 : f32
    %218 = vector.broadcast %cst_82 : f32 to vector<16x1xf32>
    %219 = arith.divf %217, %218 : vector<16x1xf32>
    %220 = vector.broadcast %219 : vector<16x1xf32> to vector<16x128xf32>
    %221 = arith.subf %213, %220 : vector<16x128xf32>
    %222 = arith.mulf %221, %221 : vector<16x128xf32>
    %cst_83 = arith.constant dense<0.000000e+00> : vector<16xf32>
    %223 = vector.multi_reduction <add>, %222, %cst_83 [1] : vector<16x128xf32> to vector<16xf32>
    %224 = vector.shape_cast %223 : vector<16xf32> to vector<16x1xf32>
    %cst_84 = arith.constant 1.280000e+02 : f32
    %225 = vector.broadcast %cst_84 : f32 to vector<16x1xf32>
    %226 = arith.divf %224, %225 : vector<16x1xf32>
    %cst_85 = arith.constant 9.99999974E-6 : f32
    %227 = vector.broadcast %cst_85 : f32 to vector<16x1xf32>
    %228 = arith.addf %226, %227 : vector<16x1xf32>
    %229 = math.rsqrt %228 : vector<16x1xf32>
    %230 = vector.broadcast %229 : vector<16x1xf32> to vector<16x128xf32>
    %231 = arith.mulf %221, %230 : vector<16x128xf32>
    %232 = vector.broadcast %214 : vector<1x128xf32> to vector<16x128xf32>
    %233 = arith.mulf %231, %232 : vector<16x128xf32>
    %234 = vector.broadcast %215 : vector<1x128xf32> to vector<16x128xf32>
    %235 = arith.addf %233, %234 : vector<16x128xf32>
    %c0_86 = arith.constant 0 : index
    %c0_87 = arith.constant 0 : index
    %236 = vector.load %arg13[%c0_86, %c0_87] : memref<16x128xf32, #tpu.memory_space<vmem>>, vector<16x128xf32>
    tpu.vector_store %arg13[%c0_86, %c0_87], %235 {strides = array<i32>} : memref<16x128xf32, #tpu.memory_space<vmem>>, vector<16x128xf32>,
    return
  }
}

module attributes {stable_mosaic.version = 11 : i64} {
  func.func @_decoder_layer_kernel(%arg0: memref<16x128xf32, #tpu.memory_space<vmem>>, %arg1: memref<16x128xf32, #tpu.memory_space<vmem>>, %arg2: memref<128x384xf32, #tpu.memory_space<vmem>>, %arg3: memref<1x384xf32, #tpu.memory_space<vmem>>, %arg4: memref<128x128xf32, #tpu.memory_space<vmem>>, %arg5: memref<1x128xf32, #tpu.memory_space<vmem>>, %arg6: memref<1x128xf32, #tpu.memory_space<vmem>>, %arg7: memref<1x128xf32, #tpu.memory_space<vmem>>, %arg8: memref<128x128xf32, #tpu.memory_space<vmem>>, %arg9: memref<1x128xf32, #tpu.memory_space<vmem>>, %arg10: memref<128x256xf32, #tpu.memory_space<vmem>>, %arg11: memref<1x256xf32, #tpu.memory_space<vmem>>, %arg12: memref<128x128xf32, #tpu.memory_space<vmem>>, %arg13: memref<1x128xf32, #tpu.memory_space<vmem>>, %arg14: memref<1x128xf32, #tpu.memory_space<vmem>>, %arg15: memref<1x128xf32, #tpu.memory_space<vmem>>, %arg16: memref<128x256xf32, #tpu.memory_space<vmem>>, %arg17: memref<1x256xf32, #tpu.memory_space<vmem>>, %arg18: memref<256x128xf32, #tpu.memory_space<vmem>>, %arg19: memref<1x128xf32, #tpu.memory_space<vmem>>, %arg20: memref<1x128xf32, #tpu.memory_space<vmem>>, %arg21: memref<1x128xf32, #tpu.memory_space<vmem>>, %arg22: memref<16x128xf32, #tpu.memory_space<vmem>>) attributes {dimension_semantics = [], scalar_prefetch = 0 : i64, scratch_operands = 0 : i64, tpu.core_type = #tpu.core_type<tc>} {
    %c0 = arith.constant 0 : index
    %c0_0 = arith.constant 0 : index
    %0 = vector.load %arg0[%c0, %c0_0] : memref<16x128xf32, #tpu.memory_space<vmem>>, vector<16x128xf32>
    %c0_1 = arith.constant 0 : index
    %c0_2 = arith.constant 0 : index
    %1 = vector.load %arg1[%c0_1, %c0_2] : memref<16x128xf32, #tpu.memory_space<vmem>>, vector<16x128xf32>
    %c0_3 = arith.constant 0 : index
    %c0_4 = arith.constant 0 : index
    %2 = vector.load %arg2[%c0_3, %c0_4] : memref<128x384xf32, #tpu.memory_space<vmem>>, vector<128x384xf32>
    %cst = arith.constant dense<0.000000e+00> : vector<16x384xf32>
    %3 = tpu.matmul %0, %2, %cst {dimension_numbers = #tpu.dot_dimension_numbers<[1], [0], [0], [1], [0, 0, 1, 1], [], []>} : vector<16x128xf32>, vector<128x384xf32>, vector<16x384xf32> -> vector<16x384xf32>
    %c0_5 = arith.constant 0 : index
    %c0_6 = arith.constant 0 : index
    %4 = vector.load %arg3[%c0_5, %c0_6] : memref<1x384xf32, #tpu.memory_space<vmem>>, vector<1x384xf32>
    %5 = vector.broadcast %4 : vector<1x384xf32> to vector<16x384xf32>
    %6 = arith.addf %3, %5 : vector<16x384xf32>
    %7 = vector.extract_strided_slice %6 {offsets = [0, 0], sizes = [16, 128], strides = [1, 1]} : vector<16x384xf32> to vector<16x128xf32>
    %8 = vector.extract_strided_slice %6 {offsets = [0, 128], sizes = [16, 128], strides = [1, 1]} : vector<16x384xf32> to vector<16x128xf32>
    %9 = vector.extract_strided_slice %6 {offsets = [0, 256], sizes = [16, 128], strides = [1, 1]} : vector<16x384xf32> to vector<16x128xf32>
    %c0_7 = arith.constant 0 : index
    %c0_8 = arith.constant 0 : index
    %10 = vector.load %arg4[%c0_7, %c0_8] : memref<128x128xf32, #tpu.memory_space<vmem>>, vector<128x128xf32>
    %c0_9 = arith.constant 0 : index
    %c0_10 = arith.constant 0 : index
    %11 = vector.load %arg5[%c0_9, %c0_10] : memref<1x128xf32, #tpu.memory_space<vmem>>, vector<1x128xf32>
    %12 = vector.extract_strided_slice %7 {offsets = [0, 0], sizes = [8, 128], strides = [1, 1]} : vector<16x128xf32> to vector<8x128xf32>
    %13 = vector.extract_strided_slice %8 {offsets = [0, 0], sizes = [8, 128], strides = [1, 1]} : vector<16x128xf32> to vector<8x128xf32>
    %14 = vector.extract_strided_slice %9 {offsets = [0, 0], sizes = [8, 128], strides = [1, 1]} : vector<16x128xf32> to vector<8x128xf32>
    %15 = vector.extract_strided_slice %12 {offsets = [0, 0], sizes = [8, 32], strides = [1, 1]} : vector<8x128xf32> to vector<8x32xf32>
    %16 = vector.extract_strided_slice %13 {offsets = [0, 0], sizes = [8, 32], strides = [1, 1]} : vector<8x128xf32> to vector<8x32xf32>
    %17 = vector.extract_strided_slice %14 {offsets = [0, 0], sizes = [8, 32], strides = [1, 1]} : vector<8x128xf32> to vector<8x32xf32>
    %cst_11 = arith.constant dense<0.000000e+00> : vector<8x8xf32>
    %18 = tpu.matmul %15, %16, %cst_11 {dimension_numbers = #tpu.dot_dimension_numbers<[1], [1], [0], [0], [0, 0, 1, 0], [], []>} : vector<8x32xf32>, vector<8x32xf32>, vector<8x8xf32> -> vector<8x8xf32>
    %cst_12 = arith.constant 0.176776692 : f32
    %19 = vector.broadcast %cst_12 : f32 to vector<8x8xf32>
    %20 = arith.mulf %18, %19 : vector<8x8xf32>
    %cst_13 = arith.constant dense<0xFF800000> : vector<8xf32>
    %21 = vector.multi_reduction <maximumf>, %20, %cst_13 [1] : vector<8x8xf32> to vector<8xf32>
    %22 = vector.shape_cast %21 : vector<8xf32> to vector<8x1xf32>
    %23 = vector.broadcast %22 : vector<8x1xf32> to vector<8x8xf32>
    %24 = arith.subf %20, %23 : vector<8x8xf32>
    %25 = math.exp %24 : vector<8x8xf32>
    %cst_14 = arith.constant dense<0.000000e+00> : vector<8xf32>
    %26 = vector.multi_reduction <add>, %25, %cst_14 [1] : vector<8x8xf32> to vector<8xf32>
    %27 = vector.shape_cast %26 : vector<8xf32> to vector<8x1xf32>
    %28 = tpu.reciprocal %27 : vector<8x1xf32> -> vector<8x1xf32>
    %29 = vector.broadcast %28 : vector<8x1xf32> to vector<8x8xf32>
    %30 = arith.mulf %25, %29 : vector<8x8xf32>
    %cst_15 = arith.constant dense<0.000000e+00> : vector<8x32xf32>
    %31 = tpu.matmul %30, %17, %cst_15 {dimension_numbers = #tpu.dot_dimension_numbers<[1], [0], [0], [1], [0, 0, 1, 1], [], []>} : vector<8x8xf32>, vector<8x32xf32>, vector<8x32xf32> -> vector<8x32xf32>
    %32 = vector.extract_strided_slice %10 {offsets = [0, 0], sizes = [32, 128], strides = [1, 1]} : vector<128x128xf32> to vector<32x128xf32>
    %cst_16 = arith.constant dense<0.000000e+00> : vector<8x128xf32>
    %33 = tpu.matmul %31, %32, %cst_16 {dimension_numbers = #tpu.dot_dimension_numbers<[1], [0], [0], [1], [0, 0, 1, 1], [], []>} : vector<8x32xf32>, vector<32x128xf32>, vector<8x128xf32> -> vector<8x128xf32>
    %34 = vector.extract_strided_slice %12 {offsets = [0, 32], sizes = [8, 32], strides = [1, 1]} : vector<8x128xf32> to vector<8x32xf32>
    %35 = vector.extract_strided_slice %13 {offsets = [0, 32], sizes = [8, 32], strides = [1, 1]} : vector<8x128xf32> to vector<8x32xf32>
    %36 = vector.extract_strided_slice %14 {offsets = [0, 32], sizes = [8, 32], strides = [1, 1]} : vector<8x128xf32> to vector<8x32xf32>
    %cst_17 = arith.constant dense<0.000000e+00> : vector<8x8xf32>
    %37 = tpu.matmul %34, %35, %cst_17 {dimension_numbers = #tpu.dot_dimension_numbers<[1], [1], [0], [0], [0, 0, 1, 0], [], []>} : vector<8x32xf32>, vector<8x32xf32>, vector<8x8xf32> -> vector<8x8xf32>
    %cst_18 = arith.constant 0.176776692 : f32
    %38 = vector.broadcast %cst_18 : f32 to vector<8x8xf32>
    %39 = arith.mulf %37, %38 : vector<8x8xf32>
    %cst_19 = arith.constant dense<0xFF800000> : vector<8xf32>
    %40 = vector.multi_reduction <maximumf>, %39, %cst_19 [1] : vector<8x8xf32> to vector<8xf32>
    %41 = vector.shape_cast %40 : vector<8xf32> to vector<8x1xf32>
    %42 = vector.broadcast %41 : vector<8x1xf32> to vector<8x8xf32>
    %43 = arith.subf %39, %42 : vector<8x8xf32>
    %44 = math.exp %43 : vector<8x8xf32>
    %cst_20 = arith.constant dense<0.000000e+00> : vector<8xf32>
    %45 = vector.multi_reduction <add>, %44, %cst_20 [1] : vector<8x8xf32> to vector<8xf32>
    %46 = vector.shape_cast %45 : vector<8xf32> to vector<8x1xf32>
    %47 = tpu.reciprocal %46 : vector<8x1xf32> -> vector<8x1xf32>
    %48 = vector.broadcast %47 : vector<8x1xf32> to vector<8x8xf32>
    %49 = arith.mulf %44, %48 : vector<8x8xf32>
    %cst_21 = arith.constant dense<0.000000e+00> : vector<8x32xf32>
    %50 = tpu.matmul %49, %36, %cst_21 {dimension_numbers = #tpu.dot_dimension_numbers<[1], [0], [0], [1], [0, 0, 1, 1], [], []>} : vector<8x8xf32>, vector<8x32xf32>, vector<8x32xf32> -> vector<8x32xf32>
    %51 = vector.extract_strided_slice %10 {offsets = [32, 0], sizes = [32, 128], strides = [1, 1]} : vector<128x128xf32> to vector<32x128xf32>
    %cst_22 = arith.constant dense<0.000000e+00> : vector<8x128xf32>
    %52 = tpu.matmul %50, %51, %cst_22 {dimension_numbers = #tpu.dot_dimension_numbers<[1], [0], [0], [1], [0, 0, 1, 1], [], []>} : vector<8x32xf32>, vector<32x128xf32>, vector<8x128xf32> -> vector<8x128xf32>
    %53 = arith.addf %33, %52 : vector<8x128xf32>
    %54 = vector.extract_strided_slice %12 {offsets = [0, 64], sizes = [8, 32], strides = [1, 1]} : vector<8x128xf32> to vector<8x32xf32>
    %55 = vector.extract_strided_slice %13 {offsets = [0, 64], sizes = [8, 32], strides = [1, 1]} : vector<8x128xf32> to vector<8x32xf32>
    %56 = vector.extract_strided_slice %14 {offsets = [0, 64], sizes = [8, 32], strides = [1, 1]} : vector<8x128xf32> to vector<8x32xf32>
    %cst_23 = arith.constant dense<0.000000e+00> : vector<8x8xf32>
    %57 = tpu.matmul %54, %55, %cst_23 {dimension_numbers = #tpu.dot_dimension_numbers<[1], [1], [0], [0], [0, 0, 1, 0], [], []>} : vector<8x32xf32>, vector<8x32xf32>, vector<8x8xf32> -> vector<8x8xf32>
    %cst_24 = arith.constant 0.176776692 : f32
    %58 = vector.broadcast %cst_24 : f32 to vector<8x8xf32>
    %59 = arith.mulf %57, %58 : vector<8x8xf32>
    %cst_25 = arith.constant dense<0xFF800000> : vector<8xf32>
    %60 = vector.multi_reduction <maximumf>, %59, %cst_25 [1] : vector<8x8xf32> to vector<8xf32>
    %61 = vector.shape_cast %60 : vector<8xf32> to vector<8x1xf32>
    %62 = vector.broadcast %61 : vector<8x1xf32> to vector<8x8xf32>
    %63 = arith.subf %59, %62 : vector<8x8xf32>
    %64 = math.exp %63 : vector<8x8xf32>
    %cst_26 = arith.constant dense<0.000000e+00> : vector<8xf32>
    %65 = vector.multi_reduction <add>, %64, %cst_26 [1] : vector<8x8xf32> to vector<8xf32>
    %66 = vector.shape_cast %65 : vector<8xf32> to vector<8x1xf32>
    %67 = tpu.reciprocal %66 : vector<8x1xf32> -> vector<8x1xf32>
    %68 = vector.broadcast %67 : vector<8x1xf32> to vector<8x8xf32>
    %69 = arith.mulf %64, %68 : vector<8x8xf32>
    %cst_27 = arith.constant dense<0.000000e+00> : vector<8x32xf32>
    %70 = tpu.matmul %69, %56, %cst_27 {dimension_numbers = #tpu.dot_dimension_numbers<[1], [0], [0], [1], [0, 0, 1, 1], [], []>} : vector<8x8xf32>, vector<8x32xf32>, vector<8x32xf32> -> vector<8x32xf32>
    %71 = vector.extract_strided_slice %10 {offsets = [64, 0], sizes = [32, 128], strides = [1, 1]} : vector<128x128xf32> to vector<32x128xf32>
    %cst_28 = arith.constant dense<0.000000e+00> : vector<8x128xf32>
    %72 = tpu.matmul %70, %71, %cst_28 {dimension_numbers = #tpu.dot_dimension_numbers<[1], [0], [0], [1], [0, 0, 1, 1], [], []>} : vector<8x32xf32>, vector<32x128xf32>, vector<8x128xf32> -> vector<8x128xf32>
    %73 = arith.addf %53, %72 : vector<8x128xf32>
    %74 = vector.extract_strided_slice %12 {offsets = [0, 96], sizes = [8, 32], strides = [1, 1]} : vector<8x128xf32> to vector<8x32xf32>
    %75 = vector.extract_strided_slice %13 {offsets = [0, 96], sizes = [8, 32], strides = [1, 1]} : vector<8x128xf32> to vector<8x32xf32>
    %76 = vector.extract_strided_slice %14 {offsets = [0, 96], sizes = [8, 32], strides = [1, 1]} : vector<8x128xf32> to vector<8x32xf32>
    %cst_29 = arith.constant dense<0.000000e+00> : vector<8x8xf32>
    %77 = tpu.matmul %74, %75, %cst_29 {dimension_numbers = #tpu.dot_dimension_numbers<[1], [1], [0], [0], [0, 0, 1, 0], [], []>} : vector<8x32xf32>, vector<8x32xf32>, vector<8x8xf32> -> vector<8x8xf32>
    %cst_30 = arith.constant 0.176776692 : f32
    %78 = vector.broadcast %cst_30 : f32 to vector<8x8xf32>
    %79 = arith.mulf %77, %78 : vector<8x8xf32>
    %cst_31 = arith.constant dense<0xFF800000> : vector<8xf32>
    %80 = vector.multi_reduction <maximumf>, %79, %cst_31 [1] : vector<8x8xf32> to vector<8xf32>
    %81 = vector.shape_cast %80 : vector<8xf32> to vector<8x1xf32>
    %82 = vector.broadcast %81 : vector<8x1xf32> to vector<8x8xf32>
    %83 = arith.subf %79, %82 : vector<8x8xf32>
    %84 = math.exp %83 : vector<8x8xf32>
    %cst_32 = arith.constant dense<0.000000e+00> : vector<8xf32>
    %85 = vector.multi_reduction <add>, %84, %cst_32 [1] : vector<8x8xf32> to vector<8xf32>
    %86 = vector.shape_cast %85 : vector<8xf32> to vector<8x1xf32>
    %87 = tpu.reciprocal %86 : vector<8x1xf32> -> vector<8x1xf32>
    %88 = vector.broadcast %87 : vector<8x1xf32> to vector<8x8xf32>
    %89 = arith.mulf %84, %88 : vector<8x8xf32>
    %cst_33 = arith.constant dense<0.000000e+00> : vector<8x32xf32>
    %90 = tpu.matmul %89, %76, %cst_33 {dimension_numbers = #tpu.dot_dimension_numbers<[1], [0], [0], [1], [0, 0, 1, 1], [], []>} : vector<8x8xf32>, vector<8x32xf32>, vector<8x32xf32> -> vector<8x32xf32>
    %91 = vector.extract_strided_slice %10 {offsets = [96, 0], sizes = [32, 128], strides = [1, 1]} : vector<128x128xf32> to vector<32x128xf32>
    %cst_34 = arith.constant dense<0.000000e+00> : vector<8x128xf32>
    %92 = tpu.matmul %90, %91, %cst_34 {dimension_numbers = #tpu.dot_dimension_numbers<[1], [0], [0], [1], [0, 0, 1, 1], [], []>} : vector<8x32xf32>, vector<32x128xf32>, vector<8x128xf32> -> vector<8x128xf32>
    %93 = arith.addf %73, %92 : vector<8x128xf32>
    %94 = vector.extract_strided_slice %7 {offsets = [8, 0], sizes = [8, 128], strides = [1, 1]} : vector<16x128xf32> to vector<8x128xf32>
    %95 = vector.extract_strided_slice %8 {offsets = [8, 0], sizes = [8, 128], strides = [1, 1]} : vector<16x128xf32> to vector<8x128xf32>
    %96 = vector.extract_strided_slice %9 {offsets = [8, 0], sizes = [8, 128], strides = [1, 1]} : vector<16x128xf32> to vector<8x128xf32>
    %97 = vector.extract_strided_slice %94 {offsets = [0, 0], sizes = [8, 32], strides = [1, 1]} : vector<8x128xf32> to vector<8x32xf32>
    %98 = vector.extract_strided_slice %95 {offsets = [0, 0], sizes = [8, 32], strides = [1, 1]} : vector<8x128xf32> to vector<8x32xf32>
    %99 = vector.extract_strided_slice %96 {offsets = [0, 0], sizes = [8, 32], strides = [1, 1]} : vector<8x128xf32> to vector<8x32xf32>
    %cst_35 = arith.constant dense<0.000000e+00> : vector<8x8xf32>
    %100 = tpu.matmul %97, %98, %cst_35 {dimension_numbers = #tpu.dot_dimension_numbers<[1], [1], [0], [0], [0, 0, 1, 0], [], []>} : vector<8x32xf32>, vector<8x32xf32>, vector<8x8xf32> -> vector<8x8xf32>
    %cst_36 = arith.constant 0.176776692 : f32
    %101 = vector.broadcast %cst_36 : f32 to vector<8x8xf32>
    %102 = arith.mulf %100, %101 : vector<8x8xf32>
    %cst_37 = arith.constant dense<0xFF800000> : vector<8xf32>
    %103 = vector.multi_reduction <maximumf>, %102, %cst_37 [1] : vector<8x8xf32> to vector<8xf32>
    %104 = vector.shape_cast %103 : vector<8xf32> to vector<8x1xf32>
    %105 = vector.broadcast %104 : vector<8x1xf32> to vector<8x8xf32>
    %106 = arith.subf %102, %105 : vector<8x8xf32>
    %107 = math.exp %106 : vector<8x8xf32>
    %cst_38 = arith.constant dense<0.000000e+00> : vector<8xf32>
    %108 = vector.multi_reduction <add>, %107, %cst_38 [1] : vector<8x8xf32> to vector<8xf32>
    %109 = vector.shape_cast %108 : vector<8xf32> to vector<8x1xf32>
    %110 = tpu.reciprocal %109 : vector<8x1xf32> -> vector<8x1xf32>
    %111 = vector.broadcast %110 : vector<8x1xf32> to vector<8x8xf32>
    %112 = arith.mulf %107, %111 : vector<8x8xf32>
    %cst_39 = arith.constant dense<0.000000e+00> : vector<8x32xf32>
    %113 = tpu.matmul %112, %99, %cst_39 {dimension_numbers = #tpu.dot_dimension_numbers<[1], [0], [0], [1], [0, 0, 1, 1], [], []>} : vector<8x8xf32>, vector<8x32xf32>, vector<8x32xf32> -> vector<8x32xf32>
    %114 = vector.extract_strided_slice %10 {offsets = [0, 0], sizes = [32, 128], strides = [1, 1]} : vector<128x128xf32> to vector<32x128xf32>
    %cst_40 = arith.constant dense<0.000000e+00> : vector<8x128xf32>
    %115 = tpu.matmul %113, %114, %cst_40 {dimension_numbers = #tpu.dot_dimension_numbers<[1], [0], [0], [1], [0, 0, 1, 1], [], []>} : vector<8x32xf32>, vector<32x128xf32>, vector<8x128xf32> -> vector<8x128xf32>
    %116 = vector.extract_strided_slice %94 {offsets = [0, 32], sizes = [8, 32], strides = [1, 1]} : vector<8x128xf32> to vector<8x32xf32>
    %117 = vector.extract_strided_slice %95 {offsets = [0, 32], sizes = [8, 32], strides = [1, 1]} : vector<8x128xf32> to vector<8x32xf32>
    %118 = vector.extract_strided_slice %96 {offsets = [0, 32], sizes = [8, 32], strides = [1, 1]} : vector<8x128xf32> to vector<8x32xf32>
    %cst_41 = arith.constant dense<0.000000e+00> : vector<8x8xf32>
    %119 = tpu.matmul %116, %117, %cst_41 {dimension_numbers = #tpu.dot_dimension_numbers<[1], [1], [0], [0], [0, 0, 1, 0], [], []>} : vector<8x32xf32>, vector<8x32xf32>, vector<8x8xf32> -> vector<8x8xf32>
    %cst_42 = arith.constant 0.176776692 : f32
    %120 = vector.broadcast %cst_42 : f32 to vector<8x8xf32>
    %121 = arith.mulf %119, %120 : vector<8x8xf32>
    %cst_43 = arith.constant dense<0xFF800000> : vector<8xf32>
    %122 = vector.multi_reduction <maximumf>, %121, %cst_43 [1] : vector<8x8xf32> to vector<8xf32>
    %123 = vector.shape_cast %122 : vector<8xf32> to vector<8x1xf32>
    %124 = vector.broadcast %123 : vector<8x1xf32> to vector<8x8xf32>
    %125 = arith.subf %121, %124 : vector<8x8xf32>
    %126 = math.exp %125 : vector<8x8xf32>
    %cst_44 = arith.constant dense<0.000000e+00> : vector<8xf32>
    %127 = vector.multi_reduction <add>, %126, %cst_44 [1] : vector<8x8xf32> to vector<8xf32>
    %128 = vector.shape_cast %127 : vector<8xf32> to vector<8x1xf32>
    %129 = tpu.reciprocal %128 : vector<8x1xf32> -> vector<8x1xf32>
    %130 = vector.broadcast %129 : vector<8x1xf32> to vector<8x8xf32>
    %131 = arith.mulf %126, %130 : vector<8x8xf32>
    %cst_45 = arith.constant dense<0.000000e+00> : vector<8x32xf32>
    %132 = tpu.matmul %131, %118, %cst_45 {dimension_numbers = #tpu.dot_dimension_numbers<[1], [0], [0], [1], [0, 0, 1, 1], [], []>} : vector<8x8xf32>, vector<8x32xf32>, vector<8x32xf32> -> vector<8x32xf32>
    %133 = vector.extract_strided_slice %10 {offsets = [32, 0], sizes = [32, 128], strides = [1, 1]} : vector<128x128xf32> to vector<32x128xf32>
    %cst_46 = arith.constant dense<0.000000e+00> : vector<8x128xf32>
    %134 = tpu.matmul %132, %133, %cst_46 {dimension_numbers = #tpu.dot_dimension_numbers<[1], [0], [0], [1], [0, 0, 1, 1], [], []>} : vector<8x32xf32>, vector<32x128xf32>, vector<8x128xf32> -> vector<8x128xf32>
    %135 = arith.addf %115, %134 : vector<8x128xf32>
    %136 = vector.extract_strided_slice %94 {offsets = [0, 64], sizes = [8, 32], strides = [1, 1]} : vector<8x128xf32> to vector<8x32xf32>
    %137 = vector.extract_strided_slice %95 {offsets = [0, 64], sizes = [8, 32], strides = [1, 1]} : vector<8x128xf32> to vector<8x32xf32>
    %138 = vector.extract_strided_slice %96 {offsets = [0, 64], sizes = [8, 32], strides = [1, 1]} : vector<8x128xf32> to vector<8x32xf32>
    %cst_47 = arith.constant dense<0.000000e+00> : vector<8x8xf32>
    %139 = tpu.matmul %136, %137, %cst_47 {dimension_numbers = #tpu.dot_dimension_numbers<[1], [1], [0], [0], [0, 0, 1, 0], [], []>} : vector<8x32xf32>, vector<8x32xf32>, vector<8x8xf32> -> vector<8x8xf32>
    %cst_48 = arith.constant 0.176776692 : f32
    %140 = vector.broadcast %cst_48 : f32 to vector<8x8xf32>
    %141 = arith.mulf %139, %140 : vector<8x8xf32>
    %cst_49 = arith.constant dense<0xFF800000> : vector<8xf32>
    %142 = vector.multi_reduction <maximumf>, %141, %cst_49 [1] : vector<8x8xf32> to vector<8xf32>
    %143 = vector.shape_cast %142 : vector<8xf32> to vector<8x1xf32>
    %144 = vector.broadcast %143 : vector<8x1xf32> to vector<8x8xf32>
    %145 = arith.subf %141, %144 : vector<8x8xf32>
    %146 = math.exp %145 : vector<8x8xf32>
    %cst_50 = arith.constant dense<0.000000e+00> : vector<8xf32>
    %147 = vector.multi_reduction <add>, %146, %cst_50 [1] : vector<8x8xf32> to vector<8xf32>
    %148 = vector.shape_cast %147 : vector<8xf32> to vector<8x1xf32>
    %149 = tpu.reciprocal %148 : vector<8x1xf32> -> vector<8x1xf32>
    %150 = vector.broadcast %149 : vector<8x1xf32> to vector<8x8xf32>
    %151 = arith.mulf %146, %150 : vector<8x8xf32>
    %cst_51 = arith.constant dense<0.000000e+00> : vector<8x32xf32>
    %152 = tpu.matmul %151, %138, %cst_51 {dimension_numbers = #tpu.dot_dimension_numbers<[1], [0], [0], [1], [0, 0, 1, 1], [], []>} : vector<8x8xf32>, vector<8x32xf32>, vector<8x32xf32> -> vector<8x32xf32>
    %153 = vector.extract_strided_slice %10 {offsets = [64, 0], sizes = [32, 128], strides = [1, 1]} : vector<128x128xf32> to vector<32x128xf32>
    %cst_52 = arith.constant dense<0.000000e+00> : vector<8x128xf32>
    %154 = tpu.matmul %152, %153, %cst_52 {dimension_numbers = #tpu.dot_dimension_numbers<[1], [0], [0], [1], [0, 0, 1, 1], [], []>} : vector<8x32xf32>, vector<32x128xf32>, vector<8x128xf32> -> vector<8x128xf32>
    %155 = arith.addf %135, %154 : vector<8x128xf32>
    %156 = vector.extract_strided_slice %94 {offsets = [0, 96], sizes = [8, 32], strides = [1, 1]} : vector<8x128xf32> to vector<8x32xf32>
    %157 = vector.extract_strided_slice %95 {offsets = [0, 96], sizes = [8, 32], strides = [1, 1]} : vector<8x128xf32> to vector<8x32xf32>
    %158 = vector.extract_strided_slice %96 {offsets = [0, 96], sizes = [8, 32], strides = [1, 1]} : vector<8x128xf32> to vector<8x32xf32>
    %cst_53 = arith.constant dense<0.000000e+00> : vector<8x8xf32>
    %159 = tpu.matmul %156, %157, %cst_53 {dimension_numbers = #tpu.dot_dimension_numbers<[1], [1], [0], [0], [0, 0, 1, 0], [], []>} : vector<8x32xf32>, vector<8x32xf32>, vector<8x8xf32> -> vector<8x8xf32>
    %cst_54 = arith.constant 0.176776692 : f32
    %160 = vector.broadcast %cst_54 : f32 to vector<8x8xf32>
    %161 = arith.mulf %159, %160 : vector<8x8xf32>
    %cst_55 = arith.constant dense<0xFF800000> : vector<8xf32>
    %162 = vector.multi_reduction <maximumf>, %161, %cst_55 [1] : vector<8x8xf32> to vector<8xf32>
    %163 = vector.shape_cast %162 : vector<8xf32> to vector<8x1xf32>
    %164 = vector.broadcast %163 : vector<8x1xf32> to vector<8x8xf32>
    %165 = arith.subf %161, %164 : vector<8x8xf32>
    %166 = math.exp %165 : vector<8x8xf32>
    %cst_56 = arith.constant dense<0.000000e+00> : vector<8xf32>
    %167 = vector.multi_reduction <add>, %166, %cst_56 [1] : vector<8x8xf32> to vector<8xf32>
    %168 = vector.shape_cast %167 : vector<8xf32> to vector<8x1xf32>
    %169 = tpu.reciprocal %168 : vector<8x1xf32> -> vector<8x1xf32>
    %170 = vector.broadcast %169 : vector<8x1xf32> to vector<8x8xf32>
    %171 = arith.mulf %166, %170 : vector<8x8xf32>
    %cst_57 = arith.constant dense<0.000000e+00> : vector<8x32xf32>
    %172 = tpu.matmul %171, %158, %cst_57 {dimension_numbers = #tpu.dot_dimension_numbers<[1], [0], [0], [1], [0, 0, 1, 1], [], []>} : vector<8x8xf32>, vector<8x32xf32>, vector<8x32xf32> -> vector<8x32xf32>
    %173 = vector.extract_strided_slice %10 {offsets = [96, 0], sizes = [32, 128], strides = [1, 1]} : vector<128x128xf32> to vector<32x128xf32>
    %cst_58 = arith.constant dense<0.000000e+00> : vector<8x128xf32>
    %174 = tpu.matmul %172, %173, %cst_58 {dimension_numbers = #tpu.dot_dimension_numbers<[1], [0], [0], [1], [0, 0, 1, 1], [], []>} : vector<8x32xf32>, vector<32x128xf32>, vector<8x128xf32> -> vector<8x128xf32>
    %175 = arith.addf %155, %174 : vector<8x128xf32>
    %176 = tpu.concatenate %93, %175 in 0 : vector<8x128xf32>, vector<8x128xf32> -> vector<16x128xf32>
    %177 = vector.broadcast %11 : vector<1x128xf32> to vector<16x128xf32>
    %178 = arith.addf %176, %177 : vector<16x128xf32>
    %179 = arith.addf %0, %178 : vector<16x128xf32>
    %c0_59 = arith.constant 0 : index
    %c0_60 = arith.constant 0 : index
    %180 = vector.load %arg6[%c0_59, %c0_60] : memref<1x128xf32, #tpu.memory_space<vmem>>, vector<1x128xf32>
    %c0_61 = arith.constant 0 : index
    %c0_62 = arith.constant 0 : index
    %181 = vector.load %arg7[%c0_61, %c0_62] : memref<1x128xf32, #tpu.memory_space<vmem>>, vector<1x128xf32>
    %cst_63 = arith.constant dense<0.000000e+00> : vector<16xf32>
    %182 = vector.multi_reduction <add>, %179, %cst_63 [1] : vector<16x128xf32> to vector<16xf32>
    %183 = vector.shape_cast %182 : vector<16xf32> to vector<16x1xf32>
    %cst_64 = arith.constant 1.280000e+02 : f32
    %184 = vector.broadcast %cst_64 : f32 to vector<16x1xf32>
    %185 = arith.divf %183, %184 : vector<16x1xf32>
    %186 = vector.broadcast %185 : vector<16x1xf32> to vector<16x128xf32>
    %187 = arith.subf %179, %186 : vector<16x128xf32>
    %188 = arith.mulf %187, %187 : vector<16x128xf32>
    %cst_65 = arith.constant dense<0.000000e+00> : vector<16xf32>
    %189 = vector.multi_reduction <add>, %188, %cst_65 [1] : vector<16x128xf32> to vector<16xf32>
    %190 = vector.shape_cast %189 : vector<16xf32> to vector<16x1xf32>
    %cst_66 = arith.constant 1.280000e+02 : f32
    %191 = vector.broadcast %cst_66 : f32 to vector<16x1xf32>
    %192 = arith.divf %190, %191 : vector<16x1xf32>
    %cst_67 = arith.constant 9.99999974E-6 : f32
    %193 = vector.broadcast %cst_67 : f32 to vector<16x1xf32>
    %194 = arith.addf %192, %193 : vector<16x1xf32>
    %195 = math.rsqrt %194 : vector<16x1xf32>
    %196 = vector.broadcast %195 : vector<16x1xf32> to vector<16x128xf32>
    %197 = arith.mulf %187, %196 : vector<16x128xf32>
    %198 = vector.broadcast %180 : vector<1x128xf32> to vector<16x128xf32>
    %199 = arith.mulf %197, %198 : vector<16x128xf32>
    %200 = vector.broadcast %181 : vector<1x128xf32> to vector<16x128xf32>
    %201 = arith.addf %199, %200 : vector<16x128xf32>
    %c0_68 = arith.constant 0 : index
    %c0_69 = arith.constant 0 : index
    %202 = vector.load %arg8[%c0_68, %c0_69] : memref<128x128xf32, #tpu.memory_space<vmem>>, vector<128x128xf32>
    %cst_70 = arith.constant dense<0.000000e+00> : vector<16x128xf32>
    %203 = tpu.matmul %201, %202, %cst_70 {dimension_numbers = #tpu.dot_dimension_numbers<[1], [0], [0], [1], [0, 0, 1, 1], [], []>} : vector<16x128xf32>, vector<128x128xf32>, vector<16x128xf32> -> vector<16x128xf32>
    %c0_71 = arith.constant 0 : index
    %c0_72 = arith.constant 0 : index
    %204 = vector.load %arg9[%c0_71, %c0_72] : memref<1x128xf32, #tpu.memory_space<vmem>>, vector<1x128xf32>
    %205 = vector.broadcast %204 : vector<1x128xf32> to vector<16x128xf32>
    %206 = arith.addf %203, %205 : vector<16x128xf32>
    %c0_73 = arith.constant 0 : index
    %c0_74 = arith.constant 0 : index
    %207 = vector.load %arg10[%c0_73, %c0_74] : memref<128x256xf32, #tpu.memory_space<vmem>>, vector<128x256xf32>
    %cst_75 = arith.constant dense<0.000000e+00> : vector<16x256xf32>
    %208 = tpu.matmul %1, %207, %cst_75 {dimension_numbers = #tpu.dot_dimension_numbers<[1], [0], [0], [1], [0, 0, 1, 1], [], []>} : vector<16x128xf32>, vector<128x256xf32>, vector<16x256xf32> -> vector<16x256xf32>
    %c0_76 = arith.constant 0 : index
    %c0_77 = arith.constant 0 : index
    %209 = vector.load %arg11[%c0_76, %c0_77] : memref<1x256xf32, #tpu.memory_space<vmem>>, vector<1x256xf32>
    %210 = vector.broadcast %209 : vector<1x256xf32> to vector<16x256xf32>
    %211 = arith.addf %208, %210 : vector<16x256xf32>
    %212 = vector.extract_strided_slice %211 {offsets = [0, 0], sizes = [16, 128], strides = [1, 1]} : vector<16x256xf32> to vector<16x128xf32>
    %213 = vector.extract_strided_slice %211 {offsets = [0, 128], sizes = [16, 128], strides = [1, 1]} : vector<16x256xf32> to vector<16x128xf32>
    %c0_78 = arith.constant 0 : index
    %c0_79 = arith.constant 0 : index
    %214 = vector.load %arg12[%c0_78, %c0_79] : memref<128x128xf32, #tpu.memory_space<vmem>>, vector<128x128xf32>
    %c0_80 = arith.constant 0 : index
    %c0_81 = arith.constant 0 : index
    %215 = vector.load %arg13[%c0_80, %c0_81] : memref<1x128xf32, #tpu.memory_space<vmem>>, vector<1x128xf32>
    %216 = vector.extract_strided_slice %206 {offsets = [0, 0], sizes = [8, 128], strides = [1, 1]} : vector<16x128xf32> to vector<8x128xf32>
    %217 = vector.extract_strided_slice %212 {offsets = [0, 0], sizes = [8, 128], strides = [1, 1]} : vector<16x128xf32> to vector<8x128xf32>
    %218 = vector.extract_strided_slice %213 {offsets = [0, 0], sizes = [8, 128], strides = [1, 1]} : vector<16x128xf32> to vector<8x128xf32>
    %219 = vector.extract_strided_slice %216 {offsets = [0, 0], sizes = [8, 32], strides = [1, 1]} : vector<8x128xf32> to vector<8x32xf32>
    %220 = vector.extract_strided_slice %217 {offsets = [0, 0], sizes = [8, 32], strides = [1, 1]} : vector<8x128xf32> to vector<8x32xf32>
    %221 = vector.extract_strided_slice %218 {offsets = [0, 0], sizes = [8, 32], strides = [1, 1]} : vector<8x128xf32> to vector<8x32xf32>
    %cst_82 = arith.constant dense<0.000000e+00> : vector<8x8xf32>
    %222 = tpu.matmul %219, %220, %cst_82 {dimension_numbers = #tpu.dot_dimension_numbers<[1], [1], [0], [0], [0, 0, 1, 0], [], []>} : vector<8x32xf32>, vector<8x32xf32>, vector<8x8xf32> -> vector<8x8xf32>
    %cst_83 = arith.constant 0.176776692 : f32
    %223 = vector.broadcast %cst_83 : f32 to vector<8x8xf32>
    %224 = arith.mulf %222, %223 : vector<8x8xf32>
    %cst_84 = arith.constant dense<0xFF800000> : vector<8xf32>
    %225 = vector.multi_reduction <maximumf>, %224, %cst_84 [1] : vector<8x8xf32> to vector<8xf32>
    %226 = vector.shape_cast %225 : vector<8xf32> to vector<8x1xf32>
    %227 = vector.broadcast %226 : vector<8x1xf32> to vector<8x8xf32>
    %228 = arith.subf %224, %227 : vector<8x8xf32>
    %229 = math.exp %228 : vector<8x8xf32>
    %cst_85 = arith.constant dense<0.000000e+00> : vector<8xf32>
    %230 = vector.multi_reduction <add>, %229, %cst_85 [1] : vector<8x8xf32> to vector<8xf32>
    %231 = vector.shape_cast %230 : vector<8xf32> to vector<8x1xf32>
    %232 = tpu.reciprocal %231 : vector<8x1xf32> -> vector<8x1xf32>
    %233 = vector.broadcast %232 : vector<8x1xf32> to vector<8x8xf32>
    %234 = arith.mulf %229, %233 : vector<8x8xf32>
    %cst_86 = arith.constant dense<0.000000e+00> : vector<8x32xf32>
    %235 = tpu.matmul %234, %221, %cst_86 {dimension_numbers = #tpu.dot_dimension_numbers<[1], [0], [0], [1], [0, 0, 1, 1], [], []>} : vector<8x8xf32>, vector<8x32xf32>, vector<8x32xf32> -> vector<8x32xf32>
    %236 = vector.extract_strided_slice %214 {offsets = [0, 0], sizes = [32, 128], strides = [1, 1]} : vector<128x128xf32> to vector<32x128xf32>
    %cst_87 = arith.constant dense<0.000000e+00> : vector<8x128xf32>
    %237 = tpu.matmul %235, %236, %cst_87 {dimension_numbers = #tpu.dot_dimension_numbers<[1], [0], [0], [1], [0, 0, 1, 1], [], []>} : vector<8x32xf32>, vector<32x128xf32>, vector<8x128xf32> -> vector<8x128xf32>
    %238 = vector.extract_strided_slice %216 {offsets = [0, 32], sizes = [8, 32], strides = [1, 1]} : vector<8x128xf32> to vector<8x32xf32>
    %239 = vector.extract_strided_slice %217 {offsets = [0, 32], sizes = [8, 32], strides = [1, 1]} : vector<8x128xf32> to vector<8x32xf32>
    %240 = vector.extract_strided_slice %218 {offsets = [0, 32], sizes = [8, 32], strides = [1, 1]} : vector<8x128xf32> to vector<8x32xf32>
    %cst_88 = arith.constant dense<0.000000e+00> : vector<8x8xf32>
    %241 = tpu.matmul %238, %239, %cst_88 {dimension_numbers = #tpu.dot_dimension_numbers<[1], [1], [0], [0], [0, 0, 1, 0], [], []>} : vector<8x32xf32>, vector<8x32xf32>, vector<8x8xf32> -> vector<8x8xf32>
    %cst_89 = arith.constant 0.176776692 : f32
    %242 = vector.broadcast %cst_89 : f32 to vector<8x8xf32>
    %243 = arith.mulf %241, %242 : vector<8x8xf32>
    %cst_90 = arith.constant dense<0xFF800000> : vector<8xf32>
    %244 = vector.multi_reduction <maximumf>, %243, %cst_90 [1] : vector<8x8xf32> to vector<8xf32>
    %245 = vector.shape_cast %244 : vector<8xf32> to vector<8x1xf32>
    %246 = vector.broadcast %245 : vector<8x1xf32> to vector<8x8xf32>
    %247 = arith.subf %243, %246 : vector<8x8xf32>
    %248 = math.exp %247 : vector<8x8xf32>
    %cst_91 = arith.constant dense<0.000000e+00> : vector<8xf32>
    %249 = vector.multi_reduction <add>, %248, %cst_91 [1] : vector<8x8xf32> to vector<8xf32>
    %250 = vector.shape_cast %249 : vector<8xf32> to vector<8x1xf32>
    %251 = tpu.reciprocal %250 : vector<8x1xf32> -> vector<8x1xf32>
    %252 = vector.broadcast %251 : vector<8x1xf32> to vector<8x8xf32>
    %253 = arith.mulf %248, %252 : vector<8x8xf32>
    %cst_92 = arith.constant dense<0.000000e+00> : vector<8x32xf32>
    %254 = tpu.matmul %253, %240, %cst_92 {dimension_numbers = #tpu.dot_dimension_numbers<[1], [0], [0], [1], [0, 0, 1, 1], [], []>} : vector<8x8xf32>, vector<8x32xf32>, vector<8x32xf32> -> vector<8x32xf32>
    %255 = vector.extract_strided_slice %214 {offsets = [32, 0], sizes = [32, 128], strides = [1, 1]} : vector<128x128xf32> to vector<32x128xf32>
    %cst_93 = arith.constant dense<0.000000e+00> : vector<8x128xf32>
    %256 = tpu.matmul %254, %255, %cst_93 {dimension_numbers = #tpu.dot_dimension_numbers<[1], [0], [0], [1], [0, 0, 1, 1], [], []>} : vector<8x32xf32>, vector<32x128xf32>, vector<8x128xf32> -> vector<8x128xf32>
    %257 = arith.addf %237, %256 : vector<8x128xf32>
    %258 = vector.extract_strided_slice %216 {offsets = [0, 64], sizes = [8, 32], strides = [1, 1]} : vector<8x128xf32> to vector<8x32xf32>
    %259 = vector.extract_strided_slice %217 {offsets = [0, 64], sizes = [8, 32], strides = [1, 1]} : vector<8x128xf32> to vector<8x32xf32>
    %260 = vector.extract_strided_slice %218 {offsets = [0, 64], sizes = [8, 32], strides = [1, 1]} : vector<8x128xf32> to vector<8x32xf32>
    %cst_94 = arith.constant dense<0.000000e+00> : vector<8x8xf32>
    %261 = tpu.matmul %258, %259, %cst_94 {dimension_numbers = #tpu.dot_dimension_numbers<[1], [1], [0], [0], [0, 0, 1, 0], [], []>} : vector<8x32xf32>, vector<8x32xf32>, vector<8x8xf32> -> vector<8x8xf32>
    %cst_95 = arith.constant 0.176776692 : f32
    %262 = vector.broadcast %cst_95 : f32 to vector<8x8xf32>
    %263 = arith.mulf %261, %262 : vector<8x8xf32>
    %cst_96 = arith.constant dense<0xFF800000> : vector<8xf32>
    %264 = vector.multi_reduction <maximumf>, %263, %cst_96 [1] : vector<8x8xf32> to vector<8xf32>
    %265 = vector.shape_cast %264 : vector<8xf32> to vector<8x1xf32>
    %266 = vector.broadcast %265 : vector<8x1xf32> to vector<8x8xf32>
    %267 = arith.subf %263, %266 : vector<8x8xf32>
    %268 = math.exp %267 : vector<8x8xf32>
    %cst_97 = arith.constant dense<0.000000e+00> : vector<8xf32>
    %269 = vector.multi_reduction <add>, %268, %cst_97 [1] : vector<8x8xf32> to vector<8xf32>
    %270 = vector.shape_cast %269 : vector<8xf32> to vector<8x1xf32>
    %271 = tpu.reciprocal %270 : vector<8x1xf32> -> vector<8x1xf32>
    %272 = vector.broadcast %271 : vector<8x1xf32> to vector<8x8xf32>
    %273 = arith.mulf %268, %272 : vector<8x8xf32>
    %cst_98 = arith.constant dense<0.000000e+00> : vector<8x32xf32>
    %274 = tpu.matmul %273, %260, %cst_98 {dimension_numbers = #tpu.dot_dimension_numbers<[1], [0], [0], [1], [0, 0, 1, 1], [], []>} : vector<8x8xf32>, vector<8x32xf32>, vector<8x32xf32> -> vector<8x32xf32>
    %275 = vector.extract_strided_slice %214 {offsets = [64, 0], sizes = [32, 128], strides = [1, 1]} : vector<128x128xf32> to vector<32x128xf32>
    %cst_99 = arith.constant dense<0.000000e+00> : vector<8x128xf32>
    %276 = tpu.matmul %274, %275, %cst_99 {dimension_numbers = #tpu.dot_dimension_numbers<[1], [0], [0], [1], [0, 0, 1, 1], [], []>} : vector<8x32xf32>, vector<32x128xf32>, vector<8x128xf32> -> vector<8x128xf32>
    %277 = arith.addf %257, %276 : vector<8x128xf32>
    %278 = vector.extract_strided_slice %216 {offsets = [0, 96], sizes = [8, 32], strides = [1, 1]} : vector<8x128xf32> to vector<8x32xf32>
    %279 = vector.extract_strided_slice %217 {offsets = [0, 96], sizes = [8, 32], strides = [1, 1]} : vector<8x128xf32> to vector<8x32xf32>
    %280 = vector.extract_strided_slice %218 {offsets = [0, 96], sizes = [8, 32], strides = [1, 1]} : vector<8x128xf32> to vector<8x32xf32>
    %cst_100 = arith.constant dense<0.000000e+00> : vector<8x8xf32>
    %281 = tpu.matmul %278, %279, %cst_100 {dimension_numbers = #tpu.dot_dimension_numbers<[1], [1], [0], [0], [0, 0, 1, 0], [], []>} : vector<8x32xf32>, vector<8x32xf32>, vector<8x8xf32> -> vector<8x8xf32>
    %cst_101 = arith.constant 0.176776692 : f32
    %282 = vector.broadcast %cst_101 : f32 to vector<8x8xf32>
    %283 = arith.mulf %281, %282 : vector<8x8xf32>
    %cst_102 = arith.constant dense<0xFF800000> : vector<8xf32>
    %284 = vector.multi_reduction <maximumf>, %283, %cst_102 [1] : vector<8x8xf32> to vector<8xf32>
    %285 = vector.shape_cast %284 : vector<8xf32> to vector<8x1xf32>
    %286 = vector.broadcast %285 : vector<8x1xf32> to vector<8x8xf32>
    %287 = arith.subf %283, %286 : vector<8x8xf32>
    %288 = math.exp %287 : vector<8x8xf32>
    %cst_103 = arith.constant dense<0.000000e+00> : vector<8xf32>
    %289 = vector.multi_reduction <add>, %288, %cst_103 [1] : vector<8x8xf32> to vector<8xf32>
    %290 = vector.shape_cast %289 : vector<8xf32> to vector<8x1xf32>
    %291 = tpu.reciprocal %290 : vector<8x1xf32> -> vector<8x1xf32>
    %292 = vector.broadcast %291 : vector<8x1xf32> to vector<8x8xf32>
    %293 = arith.mulf %288, %292 : vector<8x8xf32>
    %cst_104 = arith.constant dense<0.000000e+00> : vector<8x32xf32>
    %294 = tpu.matmul %293, %280, %cst_104 {dimension_numbers = #tpu.dot_dimension_numbers<[1], [0], [0], [1], [0, 0, 1, 1], [], []>} : vector<8x8xf32>, vector<8x32xf32>, vector<8x32xf32> -> vector<8x32xf32>
    %295 = vector.extract_strided_slice %214 {offsets = [96, 0], sizes = [32, 128], strides = [1, 1]} : vector<128x128xf32> to vector<32x128xf32>
    %cst_105 = arith.constant dense<0.000000e+00> : vector<8x128xf32>
    %296 = tpu.matmul %294, %295, %cst_105 {dimension_numbers = #tpu.dot_dimension_numbers<[1], [0], [0], [1], [0, 0, 1, 1], [], []>} : vector<8x32xf32>, vector<32x128xf32>, vector<8x128xf32> -> vector<8x128xf32>
    %297 = arith.addf %277, %296 : vector<8x128xf32>
    %298 = vector.extract_strided_slice %206 {offsets = [8, 0], sizes = [8, 128], strides = [1, 1]} : vector<16x128xf32> to vector<8x128xf32>
    %299 = vector.extract_strided_slice %212 {offsets = [8, 0], sizes = [8, 128], strides = [1, 1]} : vector<16x128xf32> to vector<8x128xf32>
    %300 = vector.extract_strided_slice %213 {offsets = [8, 0], sizes = [8, 128], strides = [1, 1]} : vector<16x128xf32> to vector<8x128xf32>
    %301 = vector.extract_strided_slice %298 {offsets = [0, 0], sizes = [8, 32], strides = [1, 1]} : vector<8x128xf32> to vector<8x32xf32>
    %302 = vector.extract_strided_slice %299 {offsets = [0, 0], sizes = [8, 32], strides = [1, 1]} : vector<8x128xf32> to vector<8x32xf32>
    %303 = vector.extract_strided_slice %300 {offsets = [0, 0], sizes = [8, 32], strides = [1, 1]} : vector<8x128xf32> to vector<8x32xf32>
    %cst_106 = arith.constant dense<0.000000e+00> : vector<8x8xf32>
    %304 = tpu.matmul %301, %302, %cst_106 {dimension_numbers = #tpu.dot_dimension_numbers<[1], [1], [0], [0], [0, 0, 1, 0], [], []>} : vector<8x32xf32>, vector<8x32xf32>, vector<8x8xf32> -> vector<8x8xf32>
    %cst_107 = arith.constant 0.176776692 : f32
    %305 = vector.broadcast %cst_107 : f32 to vector<8x8xf32>
    %306 = arith.mulf %304, %305 : vector<8x8xf32>
    %cst_108 = arith.constant dense<0xFF800000> : vector<8xf32>
    %307 = vector.multi_reduction <maximumf>, %306, %cst_108 [1] : vector<8x8xf32> to vector<8xf32>
    %308 = vector.shape_cast %307 : vector<8xf32> to vector<8x1xf32>
    %309 = vector.broadcast %308 : vector<8x1xf32> to vector<8x8xf32>
    %310 = arith.subf %306, %309 : vector<8x8xf32>
    %311 = math.exp %310 : vector<8x8xf32>
    %cst_109 = arith.constant dense<0.000000e+00> : vector<8xf32>
    %312 = vector.multi_reduction <add>, %311, %cst_109 [1] : vector<8x8xf32> to vector<8xf32>
    %313 = vector.shape_cast %312 : vector<8xf32> to vector<8x1xf32>
    %314 = tpu.reciprocal %313 : vector<8x1xf32> -> vector<8x1xf32>
    %315 = vector.broadcast %314 : vector<8x1xf32> to vector<8x8xf32>
    %316 = arith.mulf %311, %315 : vector<8x8xf32>
    %cst_110 = arith.constant dense<0.000000e+00> : vector<8x32xf32>
    %317 = tpu.matmul %316, %303, %cst_110 {dimension_numbers = #tpu.dot_dimension_numbers<[1], [0], [0], [1], [0, 0, 1, 1], [], []>} : vector<8x8xf32>, vector<8x32xf32>, vector<8x32xf32> -> vector<8x32xf32>
    %318 = vector.extract_strided_slice %214 {offsets = [0, 0], sizes = [32, 128], strides = [1, 1]} : vector<128x128xf32> to vector<32x128xf32>
    %cst_111 = arith.constant dense<0.000000e+00> : vector<8x128xf32>
    %319 = tpu.matmul %317, %318, %cst_111 {dimension_numbers = #tpu.dot_dimension_numbers<[1], [0], [0], [1], [0, 0, 1, 1], [], []>} : vector<8x32xf32>, vector<32x128xf32>, vector<8x128xf32> -> vector<8x128xf32>
    %320 = vector.extract_strided_slice %298 {offsets = [0, 32], sizes = [8, 32], strides = [1, 1]} : vector<8x128xf32> to vector<8x32xf32>
    %321 = vector.extract_strided_slice %299 {offsets = [0, 32], sizes = [8, 32], strides = [1, 1]} : vector<8x128xf32> to vector<8x32xf32>
    %322 = vector.extract_strided_slice %300 {offsets = [0, 32], sizes = [8, 32], strides = [1, 1]} : vector<8x128xf32> to vector<8x32xf32>
    %cst_112 = arith.constant dense<0.000000e+00> : vector<8x8xf32>
    %323 = tpu.matmul %320, %321, %cst_112 {dimension_numbers = #tpu.dot_dimension_numbers<[1], [1], [0], [0], [0, 0, 1, 0], [], []>} : vector<8x32xf32>, vector<8x32xf32>, vector<8x8xf32> -> vector<8x8xf32>
    %cst_113 = arith.constant 0.176776692 : f32
    %324 = vector.broadcast %cst_113 : f32 to vector<8x8xf32>
    %325 = arith.mulf %323, %324 : vector<8x8xf32>
    %cst_114 = arith.constant dense<0xFF800000> : vector<8xf32>
    %326 = vector.multi_reduction <maximumf>, %325, %cst_114 [1] : vector<8x8xf32> to vector<8xf32>
    %327 = vector.shape_cast %326 : vector<8xf32> to vector<8x1xf32>
    %328 = vector.broadcast %327 : vector<8x1xf32> to vector<8x8xf32>
    %329 = arith.subf %325, %328 : vector<8x8xf32>
    %330 = math.exp %329 : vector<8x8xf32>
    %cst_115 = arith.constant dense<0.000000e+00> : vector<8xf32>
    %331 = vector.multi_reduction <add>, %330, %cst_115 [1] : vector<8x8xf32> to vector<8xf32>
    %332 = vector.shape_cast %331 : vector<8xf32> to vector<8x1xf32>
    %333 = tpu.reciprocal %332 : vector<8x1xf32> -> vector<8x1xf32>
    %334 = vector.broadcast %333 : vector<8x1xf32> to vector<8x8xf32>
    %335 = arith.mulf %330, %334 : vector<8x8xf32>
    %cst_116 = arith.constant dense<0.000000e+00> : vector<8x32xf32>
    %336 = tpu.matmul %335, %322, %cst_116 {dimension_numbers = #tpu.dot_dimension_numbers<[1], [0], [0], [1], [0, 0, 1, 1], [], []>} : vector<8x8xf32>, vector<8x32xf32>, vector<8x32xf32> -> vector<8x32xf32>
    %337 = vector.extract_strided_slice %214 {offsets = [32, 0], sizes = [32, 128], strides = [1, 1]} : vector<128x128xf32> to vector<32x128xf32>
    %cst_117 = arith.constant dense<0.000000e+00> : vector<8x128xf32>
    %338 = tpu.matmul %336, %337, %cst_117 {dimension_numbers = #tpu.dot_dimension_numbers<[1], [0], [0], [1], [0, 0, 1, 1], [], []>} : vector<8x32xf32>, vector<32x128xf32>, vector<8x128xf32> -> vector<8x128xf32>
    %339 = arith.addf %319, %338 : vector<8x128xf32>
    %340 = vector.extract_strided_slice %298 {offsets = [0, 64], sizes = [8, 32], strides = [1, 1]} : vector<8x128xf32> to vector<8x32xf32>
    %341 = vector.extract_strided_slice %299 {offsets = [0, 64], sizes = [8, 32], strides = [1, 1]} : vector<8x128xf32> to vector<8x32xf32>
    %342 = vector.extract_strided_slice %300 {offsets = [0, 64], sizes = [8, 32], strides = [1, 1]} : vector<8x128xf32> to vector<8x32xf32>
    %cst_118 = arith.constant dense<0.000000e+00> : vector<8x8xf32>
    %343 = tpu.matmul %340, %341, %cst_118 {dimension_numbers = #tpu.dot_dimension_numbers<[1], [1], [0], [0], [0, 0, 1, 0], [], []>} : vector<8x32xf32>, vector<8x32xf32>, vector<8x8xf32> -> vector<8x8xf32>
    %cst_119 = arith.constant 0.176776692 : f32
    %344 = vector.broadcast %cst_119 : f32 to vector<8x8xf32>
    %345 = arith.mulf %343, %344 : vector<8x8xf32>
    %cst_120 = arith.constant dense<0xFF800000> : vector<8xf32>
    %346 = vector.multi_reduction <maximumf>, %345, %cst_120 [1] : vector<8x8xf32> to vector<8xf32>
    %347 = vector.shape_cast %346 : vector<8xf32> to vector<8x1xf32>
    %348 = vector.broadcast %347 : vector<8x1xf32> to vector<8x8xf32>
    %349 = arith.subf %345, %348 : vector<8x8xf32>
    %350 = math.exp %349 : vector<8x8xf32>
    %cst_121 = arith.constant dense<0.000000e+00> : vector<8xf32>
    %351 = vector.multi_reduction <add>, %350, %cst_121 [1] : vector<8x8xf32> to vector<8xf32>
    %352 = vector.shape_cast %351 : vector<8xf32> to vector<8x1xf32>
    %353 = tpu.reciprocal %352 : vector<8x1xf32> -> vector<8x1xf32>
    %354 = vector.broadcast %353 : vector<8x1xf32> to vector<8x8xf32>
    %355 = arith.mulf %350, %354 : vector<8x8xf32>
    %cst_122 = arith.constant dense<0.000000e+00> : vector<8x32xf32>
    %356 = tpu.matmul %355, %342, %cst_122 {dimension_numbers = #tpu.dot_dimension_numbers<[1], [0], [0], [1], [0, 0, 1, 1], [], []>} : vector<8x8xf32>, vector<8x32xf32>, vector<8x32xf32> -> vector<8x32xf32>
    %357 = vector.extract_strided_slice %214 {offsets = [64, 0], sizes = [32, 128], strides = [1, 1]} : vector<128x128xf32> to vector<32x128xf32>
    %cst_123 = arith.constant dense<0.000000e+00> : vector<8x128xf32>
    %358 = tpu.matmul %356, %357, %cst_123 {dimension_numbers = #tpu.dot_dimension_numbers<[1], [0], [0], [1], [0, 0, 1, 1], [], []>} : vector<8x32xf32>, vector<32x128xf32>, vector<8x128xf32> -> vector<8x128xf32>
    %359 = arith.addf %339, %358 : vector<8x128xf32>
    %360 = vector.extract_strided_slice %298 {offsets = [0, 96], sizes = [8, 32], strides = [1, 1]} : vector<8x128xf32> to vector<8x32xf32>
    %361 = vector.extract_strided_slice %299 {offsets = [0, 96], sizes = [8, 32], strides = [1, 1]} : vector<8x128xf32> to vector<8x32xf32>
    %362 = vector.extract_strided_slice %300 {offsets = [0, 96], sizes = [8, 32], strides = [1, 1]} : vector<8x128xf32> to vector<8x32xf32>
    %cst_124 = arith.constant dense<0.000000e+00> : vector<8x8xf32>
    %363 = tpu.matmul %360, %361, %cst_124 {dimension_numbers = #tpu.dot_dimension_numbers<[1], [1], [0], [0], [0, 0, 1, 0], [], []>} : vector<8x32xf32>, vector<8x32xf32>, vector<8x8xf32> -> vector<8x8xf32>
    %cst_125 = arith.constant 0.176776692 : f32
    %364 = vector.broadcast %cst_125 : f32 to vector<8x8xf32>
    %365 = arith.mulf %363, %364 : vector<8x8xf32>
    %cst_126 = arith.constant dense<0xFF800000> : vector<8xf32>
    %366 = vector.multi_reduction <maximumf>, %365, %cst_126 [1] : vector<8x8xf32> to vector<8xf32>
    %367 = vector.shape_cast %366 : vector<8xf32> to vector<8x1xf32>
    %368 = vector.broadcast %367 : vector<8x1xf32> to vector<8x8xf32>
    %369 = arith.subf %365, %368 : vector<8x8xf32>
    %370 = math.exp %369 : vector<8x8xf32>
    %cst_127 = arith.constant dense<0.000000e+00> : vector<8xf32>
    %371 = vector.multi_reduction <add>, %370, %cst_127 [1] : vector<8x8xf32> to vector<8xf32>
    %372 = vector.shape_cast %371 : vector<8xf32> to vector<8x1xf32>
    %373 = tpu.reciprocal %372 : vector<8x1xf32> -> vector<8x1xf32>
    %374 = vector.broadcast %373 : vector<8x1xf32> to vector<8x8xf32>
    %375 = arith.mulf %370, %374 : vector<8x8xf32>
    %cst_128 = arith.constant dense<0.000000e+00> : vector<8x32xf32>
    %376 = tpu.matmul %375, %362, %cst_128 {dimension_numbers = #tpu.dot_dimension_numbers<[1], [0], [0], [1], [0, 0, 1, 1], [], []>} : vector<8x8xf32>, vector<8x32xf32>, vector<8x32xf32> -> vector<8x32xf32>
    %377 = vector.extract_strided_slice %214 {offsets = [96, 0], sizes = [32, 128], strides = [1, 1]} : vector<128x128xf32> to vector<32x128xf32>
    %cst_129 = arith.constant dense<0.000000e+00> : vector<8x128xf32>
    %378 = tpu.matmul %376, %377, %cst_129 {dimension_numbers = #tpu.dot_dimension_numbers<[1], [0], [0], [1], [0, 0, 1, 1], [], []>} : vector<8x32xf32>, vector<32x128xf32>, vector<8x128xf32> -> vector<8x128xf32>
    %379 = arith.addf %359, %378 : vector<8x128xf32>
    %380 = tpu.concatenate %297, %379 in 0 : vector<8x128xf32>, vector<8x128xf32> -> vector<16x128xf32>
    %381 = vector.broadcast %215 : vector<1x128xf32> to vector<16x128xf32>
    %382 = arith.addf %380, %381 : vector<16x128xf32>
    %383 = arith.addf %201, %382 : vector<16x128xf32>
    %c0_130 = arith.constant 0 : index
    %c0_131 = arith.constant 0 : index
    %384 = vector.load %arg14[%c0_130, %c0_131] : memref<1x128xf32, #tpu.memory_space<vmem>>, vector<1x128xf32>
    %c0_132 = arith.constant 0 : index
    %c0_133 = arith.constant 0 : index
    %385 = vector.load %arg15[%c0_132, %c0_133] : memref<1x128xf32, #tpu.memory_space<vmem>>, vector<1x128xf32>
    %cst_134 = arith.constant dense<0.000000e+00> : vector<16xf32>
    %386 = vector.multi_reduction <add>, %383, %cst_134 [1] : vector<16x128xf32> to vector<16xf32>
    %387 = vector.shape_cast %386 : vector<16xf32> to vector<16x1xf32>
    %cst_135 = arith.constant 1.280000e+02 : f32
    %388 = vector.broadcast %cst_135 : f32 to vector<16x1xf32>
    %389 = arith.divf %387, %388 : vector<16x1xf32>
    %390 = vector.broadcast %389 : vector<16x1xf32> to vector<16x128xf32>
    %391 = arith.subf %383, %390 : vector<16x128xf32>
    %392 = arith.mulf %391, %391 : vector<16x128xf32>
    %cst_136 = arith.constant dense<0.000000e+00> : vector<16xf32>
    %393 = vector.multi_reduction <add>, %392, %cst_136 [1] : vector<16x128xf32> to vector<16xf32>
    %394 = vector.shape_cast %393 : vector<16xf32> to vector<16x1xf32>
    %cst_137 = arith.constant 1.280000e+02 : f32
    %395 = vector.broadcast %cst_137 : f32 to vector<16x1xf32>
    %396 = arith.divf %394, %395 : vector<16x1xf32>
    %cst_138 = arith.constant 9.99999974E-6 : f32
    %397 = vector.broadcast %cst_138 : f32 to vector<16x1xf32>
    %398 = arith.addf %396, %397 : vector<16x1xf32>
    %399 = math.rsqrt %398 : vector<16x1xf32>
    %400 = vector.broadcast %399 : vector<16x1xf32> to vector<16x128xf32>
    %401 = arith.mulf %391, %400 : vector<16x128xf32>
    %402 = vector.broadcast %384 : vector<1x128xf32> to vector<16x128xf32>
    %403 = arith.mulf %401, %402 : vector<16x128xf32>
    %404 = vector.broadcast %385 : vector<1x128xf32> to vector<16x128xf32>
    %405 = arith.addf %403, %404 : vector<16x128xf32>
    %c0_139 = arith.constant 0 : index
    %c0_140 = arith.constant 0 : index
    %406 = vector.load %arg16[%c0_139, %c0_140] : memref<128x256xf32, #tpu.memory_space<vmem>>, vector<128x256xf32>
    %cst_141 = arith.constant dense<0.000000e+00> : vector<16x256xf32>
    %407 = tpu.matmul %405, %406, %cst_141 {dimension_numbers = #tpu.dot_dimension_numbers<[1], [0], [0], [1], [0, 0, 1, 1], [], []>} : vector<16x128xf32>, vector<128x256xf32>, vector<16x256xf32> -> vector<16x256xf32>
    %c0_142 = arith.constant 0 : index
    %c0_143 = arith.constant 0 : index
    %408 = vector.load %arg17[%c0_142, %c0_143] : memref<1x256xf32, #tpu.memory_space<vmem>>, vector<1x256xf32>
    %409 = vector.broadcast %408 : vector<1x256xf32> to vector<16x256xf32>
    %410 = arith.addf %407, %409 : vector<16x256xf32>
    %cst_144 = arith.constant 0.000000e+00 : f32
    %411 = vector.broadcast %cst_144 : f32 to vector<16x256xf32>
    %412 = arith.maximumf %410, %411 : vector<16x256xf32>
    %c0_145 = arith.constant 0 : index
    %c0_146 = arith.constant 0 : index
    %413 = vector.load %arg18[%c0_145, %c0_146] : memref<256x128xf32, #tpu.memory_space<vmem>>, vector<256x128xf32>
    %cst_147 = arith.constant dense<0.000000e+00> : vector<16x128xf32>
    %414 = tpu.matmul %412, %413, %cst_147 {dimension_numbers = #tpu.dot_dimension_numbers<[1], [0], [0], [1], [0, 0, 1, 1], [], []>} : vector<16x256xf32>, vector<256x128xf32>, vector<16x128xf32> -> vector<16x128xf32>
    %c0_148 = arith.constant 0 : index
    %c0_149 = arith.constant 0 : index
    %415 = vector.load %arg19[%c0_148, %c0_149] : memref<1x128xf32, #tpu.memory_space<vmem>>, vector<1x128xf32>
    %416 = vector.broadcast %415 : vector<1x128xf32> to vector<16x128xf32>
    %417 = arith.addf %414, %416 : vector<16x128xf32>
    %418 = arith.addf %405, %417 : vector<16x128xf32>
    %c0_150 = arith.constant 0 : index
    %c0_151 = arith.constant 0 : index
    %419 = vector.load %arg20[%c0_150, %c0_151] : memref<1x128xf32, #tpu.memory_space<vmem>>, vector<1x128xf32>
    %c0_152 = arith.constant 0 : index
    %c0_153 = arith.constant 0 : index
    %420 = vector.load %arg21[%c0_152, %c0_153] : memref<1x128xf32, #tpu.memory_space<vmem>>, vector<1x128xf32>
    %cst_154 = arith.constant dense<0.000000e+00> : vector<16xf32>
    %421 = vector.multi_reduction <add>, %418, %cst_154 [1] : vector<16x128xf32> to vector<16xf32>
    %422 = vector.shape_cast %421 : vector<16xf32> to vector<16x1xf32>
    %cst_155 = arith.constant 1.280000e+02 : f32
    %423 = vector.broadcast %cst_155 : f32 to vector<16x1xf32>
    %424 = arith.divf %422, %423 : vector<16x1xf32>
    %425 = vector.broadcast %424 : vector<16x1xf32> to vector<16x128xf32>
    %426 = arith.subf %418, %425 : vector<16x128xf32>
    %427 = arith.mulf %426, %426 : vector<16x128xf32>
    %cst_156 = arith.constant dense<0.000000e+00> : vector<16xf32>
    %428 = vector.multi_reduction <add>, %427, %cst_156 [1] : vector<16x128xf32> to vector<16xf32>
    %429 = vector.shape_cast %428 : vector<16xf32> to vector<16x1xf32>
    %cst_157 = arith.constant 1.280000e+02 : f32
    %430 = vector.broadcast %cst_157 : f32 to vector<16x1xf32>
    %431 = arith.divf %429, %430 : vector<16x1xf32>
    %cst_158 = arith.constant 9.99999974E-6 : f32
    %432 = vector.broadcast %cst_158 : f32 to vector<16x1xf32>
    %433 = arith.addf %431, %432 : vector<16x1xf32>
    %434 = math.rsqrt %433 : vector<16x1xf32>
    %435 = vector.broadcast %434 : vector<16x1xf32> to vector<16x128xf32>
    %436 = arith.mulf %426, %435 : vector<16x128xf32>
    %437 = vector.broadcast %419 : vector<1x128xf32> to vector<16x128xf32>
    %438 = arith.mulf %436, %437 : vector<16x128xf32>
    %439 = vector.broadcast %420 : vector<1x128xf32> to vector<16x128xf32>
    %440 = arith.addf %438, %439 : vector<16x128xf32>
    %c0_159 = arith.constant 0 : index
    %c0_160 = arith.constant 0 : index
    %441 = vector.load %arg22[%c0_159, %c0_160] : memref<16x128xf32, #tpu.memory_space<vmem>>, vector<16x128xf32>
    tpu.vector_store %arg22[%c0_159, %c0_160], %440 {strides = array<i32>} : memref<16x128xf32, #tpu.memory_space<vmem>>, vector<16x128xf32>,
    return
  }
}

module attributes {stable_mosaic.version = 11 : i64} {
  func.func @_out_linear_kernel(%arg0: memref<16x128xf32, #tpu.memory_space<vmem>>, %arg1: memref<128x136xf32, #tpu.memory_space<vmem>>, %arg2: memref<1x136xf32, #tpu.memory_space<vmem>>, %arg3: memref<16x136xf32, #tpu.memory_space<vmem>>) attributes {dimension_semantics = [], scalar_prefetch = 0 : i64, scratch_operands = 0 : i64, tpu.core_type = #tpu.core_type<tc>} {
    %c0 = arith.constant 0 : index
    %c0_0 = arith.constant 0 : index
    %0 = vector.load %arg0[%c0, %c0_0] : memref<16x128xf32, #tpu.memory_space<vmem>>, vector<16x128xf32>
    %c0_1 = arith.constant 0 : index
    %c0_2 = arith.constant 0 : index
    %1 = vector.load %arg1[%c0_1, %c0_2] : memref<128x136xf32, #tpu.memory_space<vmem>>, vector<128x136xf32>
    %cst = arith.constant dense<0.000000e+00> : vector<16x136xf32>
    %2 = tpu.matmul %0, %1, %cst {dimension_numbers = #tpu.dot_dimension_numbers<[1], [0], [0], [1], [0, 0, 1, 1], [], []>} : vector<16x128xf32>, vector<128x136xf32>, vector<16x136xf32> -> vector<16x136xf32>
    %c0_3 = arith.constant 0 : index
    %c0_4 = arith.constant 0 : index
    %3 = vector.load %arg2[%c0_3, %c0_4] : memref<1x136xf32, #tpu.memory_space<vmem>>, vector<1x136xf32>
    %4 = vector.broadcast %3 : vector<1x136xf32> to vector<16x136xf32>
    %5 = arith.addf %2, %4 : vector<16x136xf32>
    %c0_5 = arith.constant 0 : index
    %c0_6 = arith.constant 0 : index
    %6 = vector.load %arg3[%c0_5, %c0_6] : memref<16x136xf32, #tpu.memory_space<vmem>>, vector<16x136xf32>
    tpu.vector_store %arg3[%c0_5, %c0_6], %5 {strides = array<i32>} : memref<16x136xf32, #tpu.memory_space<vmem>>, vector<16x136xf32>,
    return
  }
}

</mosaic_0001>

<bundles_post_ra>
// kernel: talking_head_forward.7
= control target key start
LH: loop header
LB: loop body
LE: loop exit
PB: predicated region body
PF: predicated region fallthrough
CT: control target
= control target key end

     0   :  { %9 = vsyncpa [#allocation3], 0  ;;  %s391_s0 = inlined_call_operand.hbm [shape: f32[16,80], index: 0, kind: input, shape index: {}]   ;;  %s392_s1 = inlined_call_operand.hbm [shape: f32[80,128], index: 1, kind: input, shape index: {}]   ;;  %s393_s2 = inlined_call_operand.hbm [shape: f32[1,128], index: 2, kind: input, shape index: {}]   ;;  %s394_s3 = inlined_call_operand.vmem [shape: f32[16,128], index: 3, kind: input, shape index: {}]   ;;  %s395_s4 = inlined_call_operand.vmem [shape: f32[16,128], index: 4, kind: output, shape index: {}]  }
   0x1   :  { %10 = vsyncpa [#allocation5], 0  ;;  %s304_s15 = smov [#allocation4]   ;;  %s305_s17 = smov [#allocation2]  }
   0x2   :  { %s28_s16 = sshll.u32 %s304_s15, 4  ;;  %s16_s18 = sshll.u32 %s305_s17, 4  ;;  %s29_s16 = int_to_ptr.vmem [resolvable:$true] %s28_s16  ;;  %s334_s18 = int_to_ptr.vmem [resolvable:$true] %s16_s18 }
   0x3   :  { %s234_s21 = scalar_lea.hbm %s392_s1, 1280 }
   0x4   :  { %p235_p0 = scmp.ne.s32.totalorder %s392_s1, %s234_s21  ;;  %p238_p1 = scmp.lt.u32.totalorder %s234_s21, %s392_s1 }
   0x6   :  { %p240_p2 = pnand %p238_p1, %p235_p0 }
   0x8   :  { %243 = shalt.err (!%p240_p2)
}
   0x9   :  { %s244_s26 = scalar_lea.vmem %s29_s16, 1280  ;;  %p249_p4 = scmp.lt.s32.totalorder %s29_s16, %s29_s16 }
   0xa   :  { %p245_p3 = scmp.ne.s32.totalorder %s29_s16, %s244_s26  ;;  %p250_p5 = scmp.lt.s32.totalorder %s244_s26, %s244_s26 }
   0xc   :  { %p251_p6 = por %p250_p5, %p249_p4 }
   0xe   :  { %p252_p7 = pnand %p251_p6, %p245_p3 }
  0x10   :  { %255 = shalt.err (!%p252_p7)
}
  0x11   :  { %s306_s27 = smov 128   ;;  %s307_s28 = smov 8  }
  0x12   :  { %34 = dma.hbm_to_vmem [thread:$0]  %s392_s1, 1280, %s29_s16, [#allocation5], %s306_s27, %s306_s27, %s307_s28  }
  0x13   :  { %s256_s7 = scalar_lea.hbm %s391_s0, 256 }
  0x14   :  { %p257_p8 = scmp.ne.s32.totalorder %s391_s0, %s256_s7  ;;  %p260_p9 = scmp.lt.u32.totalorder %s256_s7, %s391_s0 }
  0x16   :  { %p262_p10 = pnand %p260_p9, %p257_p8 }
  0x18   :  { %265 = shalt.err (!%p262_p10)
}
  0x19   :  { %s266_s12 = scalar_lea.vmem %s334_s18, 256  ;;  %p271_p12 = scmp.lt.s32.totalorder %s334_s18, %s334_s18 }
  0x1a   :  { %p267_p11 = scmp.ne.s32.totalorder %s334_s18, %s266_s12  ;;  %p272_p13 = scmp.lt.s32.totalorder %s266_s12, %s266_s12 }
  0x1c   :  { %p273_p0 = por %p272_p13, %p271_p12 }
  0x1e   :  { %p274_p1 = pnand %p273_p0, %p267_p11 }
  0x20   :  { %277 = shalt.err (!%p274_p1)
}
  0x21   :  { %22 = dma.hbm_to_vmem [thread:$0]  %s391_s0, 256, %s334_s18, [#allocation3], %s306_s27, %s306_s27, %s307_s28  }
  0x22   :  { %s308_s14 = smov [#allocation6]   ;;  %s278_s19 = scalar_lea.hbm %s393_s2, 16 }
  0x23   :  { %s41_s15 = sshll.u32 %s308_s14, 4  ;;  %p279_p2 = scmp.ne.s32.totalorder %s393_s2, %s278_s19  ;;  %s42_s15 = int_to_ptr.vmem [resolvable:$true] %s41_s15 }
  0x24   :  { %p282_p3 = scmp.lt.u32.totalorder %s278_s19, %s393_s2 }
  0x26   :  { %p284_p4 = pnand %p282_p3, %p279_p2 }
  0x28   :  { %287 = shalt.err (!%p284_p4)
}
  0x29   :  { %s288_s24 = scalar_lea.vmem %s42_s15, 16  ;;  %s292_s0 = scalar_lea.vmem %s42_s15, 32 }
  0x2a   :  { %p289_p5 = scmp.ne.s32.totalorder %s42_s15, %s288_s24  ;;  %p293_p6 = scmp.lt.s32.totalorder %s42_s15, %s42_s15 }
  0x2b   :  { %p294_p7 = scmp.lt.s32.totalorder %s292_s0, %s288_s24 }
  0x2d   :  { %p295_p8 = por %p294_p7, %p293_p6 }
  0x2f   :  { %p296_p9 = pnand %p295_p8, %p289_p5 }
  0x31   :  { %299 = shalt.err (!%p296_p9)
}
  0x32   :  { %44 = dma.hbm_to_vmem [thread:$0]  %s393_s2, 16, %s42_s15, [#allocation5]  }
  0x33   :  { %300 = dma.done.wait [#allocation3], 256  }
  0x34   :  { %301 = vsyncadd [#allocation3], 4294967040 }
  0x35   :  { %302 = dma.done.wait [#allocation5], 1296  }
  0x36   :  { %303 = vsyncadd [#allocation5], 4294966000  ;;  %v58_v0 = vld [vmem:[#allocation4] sm:$0xff]  ;;  %v59_v1 = vld [vmem:[#allocation4 + $0x8] sm:$0xff]  ;;  %vm75_vm0 = vcmask 654336  }
  0x37   :  { %v60_v2 = vld [vmem:[#allocation4 + $0x10] sm:$0xff]  ;;  %v209_v3 = vpack.c.bf16 %v59_v1, %v58_v0  ;;  %v61_v4 = vld [vmem:[#allocation4 + $0x18] sm:$0xff]  ;;  %v62_v6 = vld [vmem:[#allocation4 + $0x20] sm:$0xff] }
  0x38   :  { %v213_v5 = vpack.c.bf16 %v61_v4, %v60_v2  ;;  %v63_v7 = vld [vmem:[#allocation4 + $0x28] sm:$0xff]  ;;  %v56_v8 = vld [vmem:[#allocation2] sm:$0xff]  ;;  %v65_v11 = vld [vmem:[#allocation4 + $0x38] sm:$0xff] }
  0x39   :  { %210 = vmatprep.subr.bf16.mxu0 %v209_v3  ;;  %206 = vmatprep.mubr.msk.f32.mxu0 %vm75_vm0, %v56_v8  ;;  %v217_v9 = vpack.c.bf16 %v63_v7, %v62_v6  ;;  %v64_v10 = vld [vmem:[#allocation4 + $0x30] sm:$0xff]  ;;  %v66_v13 = vld [vmem:[#allocation4 + $0x40] sm:$0xff]  ;;  %v67_v14 = vld [vmem:[#allocation4 + $0x48] sm:$0xff] }
  0x3a   :  { %212 = vmatpush3.bf16.msra.mxu0 %v209_v3  ;;  %v221_v12 = vpack.c.bf16 %v65_v11, %v64_v10  ;;  %v225_v15 = vpack.c.bf16 %v67_v14, %v66_v13  ;;  %v57_v16 = vld [vmem:[#allocation2 + $0x8] sm:$0xff]  ;;  %v171_v17 = vld [vmem:[#allocation6] ss:$0 sm:$0xff] }
  0x3b   :  { %214 = vmatprep.subr.bf16.mxu0 %v213_v5  ;;  %v160_v21 = vld [vmem:[%s394_s3 + $0x8] sm:$0xff]  ;;  %v159_v24 = vld [vmem:[%s394_s3] sm:$0xff] }
  0x3e   :  { %216 = vmatpush3.bf16.msra.mxu0 %v213_v5 }
  0x3f   :  { %218 = vmatprep.subr.bf16.mxu0 %v217_v9 }
  0x42   :  { %220 = vmatpush3.bf16.msra.mxu0 %v217_v9 }
  0x43   :  { %222 = vmatprep.subr.bf16.mxu0 %v221_v12 }
  0x46   :  { %224 = vmatpush3.bf16.msra.mxu0 %v221_v12 }
  0x47   :  { %226 = vmatprep.subr.bf16.mxu0 %v225_v15 }
  0x4a   :  { %228 = vmatpush3.bf16.msra.mxu0 %v225_v15 }
  0x4d   :  { %207 = vmatmul.mubr.msk.f32.vlgmr.msra.gmra.mrb[0].mxu0 %vm75_vm0, %v57_v16 }
 0x120   :  { %v208_v18 = vpop.f32.mrb[0].mxu0 }
 0x121   :  { %v154_v19 = vadd.f32 %v208_v18, %v171_v17  ;;  %v148_v20 = vpop.f32.mrb[1].mxu0 }
 0x122   :  { %v149_v22 = vadd.f32 %v171_v17, %v148_v20 }
 0x123   :  { %v158_v23 = vmul.f32 11.313708, %v154_v19 }
 0x124   :  { %v157_v25 = vmul.f32 11.313708, %v149_v22 }
 0x125   :  { %v162_v26 = vadd.f32 %v160_v21, %v158_v23 }
 0x126   :  { %v161_v27 = vadd.f32 %v159_v24, %v157_v25 }
 0x127   :  { %164 = vst [vmem:[%s395_s4 + $0x8] sm:$0xff] %v162_v26 }
 0x128   :  { %163 = vst [vmem:[%s395_s4] sm:$0xff] %v161_v27 }
 0x129   :  { %169 = vsyncpa [#allocation3], 1 }
 0x12a   :  { %170 = vsyncpa [#allocation5], 1 }

// kernel: talking_head_forward.10
= control target key start
LH: loop header
LB: loop body
LE: loop exit
PB: predicated region body
PF: predicated region fallthrough
CT: control target
= control target key end

     0   :  { %9 = vsyncpa [#allocation3], 0  ;;  %s386_s0 = inlined_call_operand.hbm [shape: f32[16,136], index: 0, kind: input, shape index: {}]   ;;  %s387_s1 = inlined_call_operand.hbm [shape: f32[136,128], index: 1, kind: input, shape index: {}]   ;;  %s388_s2 = inlined_call_operand.hbm [shape: f32[1,128], index: 2, kind: input, shape index: {}]   ;;  %s389_s3 = inlined_call_operand.vmem [shape: f32[16,128], index: 3, kind: input, shape index: {}]   ;;  %s390_s4 = inlined_call_operand.vmem [shape: f32[16,128], index: 4, kind: output, shape index: {}]  }
   0x1   :  { %10 = vsyncpa [#allocation5], 0  ;;  %s304_s15 = smov [#allocation4]   ;;  %s234_s19 = scalar_lea.hbm %s387_s1, 2176 }
   0x2   :  { %s28_s16 = sshll.u32 %s304_s15, 4  ;;  %p235_p0 = scmp.ne.s32.totalorder %s387_s1, %s234_s19  ;;  %s29_s16 = int_to_ptr.vmem [resolvable:$true] %s28_s16 }
   0x3   :  { %p238_p1 = scmp.lt.u32.totalorder %s234_s19, %s387_s1 }
   0x5   :  { %p240_p2 = pnand %p238_p1, %p235_p0 }
   0x7   :  { %243 = shalt.err (!%p240_p2)
}
   0x8   :  { %s244_s24 = scalar_lea.vmem %s29_s16, 2176  ;;  %p249_p4 = scmp.lt.s32.totalorder %s29_s16, %s29_s16 }
   0x9   :  { %p245_p3 = scmp.ne.s32.totalorder %s29_s16, %s244_s24  ;;  %p250_p5 = scmp.lt.s32.totalorder %s244_s24, %s244_s24 }
   0xb   :  { %p251_p6 = por %p250_p5, %p249_p4 }
   0xd   :  { %p252_p7 = pnand %p251_p6, %p245_p3 }
   0xf   :  { %255 = shalt.err (!%p252_p7)
}
  0x10   :  { %s305_s25 = smov 128   ;;  %s306_s26 = smov 8  }
  0x11   :  { %34 = dma.hbm_to_vmem [thread:$0]  %s387_s1, 2176, %s29_s16, [#allocation5], %s305_s25, %s305_s25, %s306_s26  }
  0x12   :  { %s307_s29 = smov [#allocation2]   ;;  %s256_s7 = scalar_lea.hbm %s386_s0, 512 }
  0x13   :  { %s16_s30 = sshll.u32 %s307_s29, 4  ;;  %p257_p8 = scmp.ne.s32.totalorder %s386_s0, %s256_s7  ;;  %s17_s30 = int_to_ptr.vmem [resolvable:$true] %s16_s30 }
  0x14   :  { %p260_p9 = scmp.lt.u32.totalorder %s256_s7, %s386_s0 }
  0x16   :  { %p262_p10 = pnand %p260_p9, %p257_p8 }
  0x18   :  { %265 = shalt.err (!%p262_p10)
}
  0x19   :  { %s266_s12 = scalar_lea.vmem %s17_s30, 512  ;;  %p271_p12 = scmp.lt.s32.totalorder %s17_s30, %s17_s30 }
  0x1a   :  { %p267_p11 = scmp.ne.s32.totalorder %s17_s30, %s266_s12  ;;  %p272_p13 = scmp.lt.s32.totalorder %s266_s12, %s266_s12 }
  0x1c   :  { %p273_p0 = por %p272_p13, %p271_p12 }
  0x1e   :  { %p274_p1 = pnand %p273_p0, %p267_p11 }
  0x20   :  { %277 = shalt.err (!%p274_p1)
}
  0x21   :  { %s308_s1 = smov 256   ;;  %s309_s13 = smov 16  }
  0x22   :  { %22 = dma.hbm_to_vmem [thread:$0]  %s386_s0, 512, %s17_s30, [#allocation3], %s308_s1, %s308_s1, %s309_s13  }
  0x23   :  { %s310_s16 = smov [#allocation6]   ;;  %s278_s20 = scalar_lea.hbm %s388_s2, 16 }
  0x24   :  { %s41_s17 = sshll.u32 %s310_s16, 4  ;;  %p279_p2 = scmp.ne.s32.totalorder %s388_s2, %s278_s20  ;;  %s42_s17 = int_to_ptr.vmem [resolvable:$true] %s41_s17 }
  0x25   :  { %p282_p3 = scmp.lt.u32.totalorder %s278_s20, %s388_s2 }
  0x27   :  { %p284_p4 = pnand %p282_p3, %p279_p2 }
  0x29   :  { %287 = shalt.err (!%p284_p4)
}
  0x2a   :  { %s288_s25 = scalar_lea.vmem %s42_s17, 16  ;;  %s292_s0 = scalar_lea.vmem %s42_s17, 32 }
  0x2b   :  { %p289_p5 = scmp.ne.s32.totalorder %s42_s17, %s288_s25  ;;  %p293_p6 = scmp.lt.s32.totalorder %s42_s17, %s42_s17 }
  0x2c   :  { %p294_p7 = scmp.lt.s32.totalorder %s292_s0, %s288_s25 }
  0x2e   :  { %p295_p8 = por %p294_p7, %p293_p6 }
  0x30   :  { %p296_p9 = pnand %p295_p8, %p289_p5 }
  0x32   :  { %299 = shalt.err (!%p296_p9)
}
  0x33   :  { %44 = dma.hbm_to_vmem [thread:$0]  %s388_s2, 16, %s42_s17, [#allocation5]  }
  0x34   :  { %300 = dma.done.wait [#allocation3], 512  }
  0x35   :  { %301 = vsyncadd [#allocation3], 4294966784 }
  0x36   :  { %302 = dma.done.wait [#allocation5], 2192  }
  0x37   :  { %303 = vsyncadd [#allocation5], 4294965104  ;;  %v311_v0 = vmov 0.0|0.0   ;;  %v60_v1 = vld [vmem:[#allocation4] sm:$0xff]  ;;  %v61_v2 = vld [vmem:[#allocation4 + $0x8] sm:$0xff]  ;;  %vm84_vm0 = vcmask 64512  }
  0x38   :  { %183 = vmatprep.subr.bf16.mxu0 %v311_v0  ;;  %207 = vmatprep.subr.bf16.mxu1 %v311_v0  ;;  %v62_v3 = vld [vmem:[#allocation4 + $0x10] sm:$0xff]  ;;  %v184_v4 = vpack.c.bf16 %v61_v2, %v60_v1  ;;  %v63_v5 = vld [vmem:[#allocation4 + $0x18] sm:$0xff]  ;;  %v64_v7 = vld [vmem:[#allocation4 + $0x20] sm:$0xff]  ;;  %v312_v27 = vmov 0.0  }
  0x39   :  { %v187_v6 = vpack.c.bf16 %v63_v5, %v62_v3  ;;  %v65_v8 = vld [vmem:[#allocation4 + $0x28] sm:$0xff]  ;;  %v59_v10 = vld [vmem:[#allocation2 + $0x18] sm:$0xff]  ;;  %v66_v12 = vld [vmem:[#allocation4 + $0x30] sm:$0xff] }
  0x3a   :  { %185 = vmatpush1.bf16.msra.mxu0 %v184_v4  ;;  %216 = vmatpush1.bf16.msra.mxu1 %v184_v4  ;;  %v57_v9 = vld [vmem:[#allocation2 + $0x8] sm:$0xff]  ;;  %v190_v11 = vpack.c.bf16 %v65_v8, %v64_v7  ;;  %v67_v13 = vld [vmem:[#allocation4 + $0x38] sm:$0xff]  ;;  %v68_v15 = vld [vmem:[#allocation4 + $0x40] sm:$0xff] }
  0x3b   :  { %186 = vmatprep.subr.bf16.mxu0 %v311_v0  ;;  %208 = vmatprep.subr.bf16.mxu1 %v311_v0  ;;  %v193_v14 = vpack.c.bf16 %v67_v13, %v66_v12  ;;  %v69_v16 = vld [vmem:[#allocation4 + $0x48] sm:$0xff]  ;;  %v70_v18 = vld [vmem:[#allocation4 + $0x50] sm:$0xff]  ;;  %v71_v19 = vld [vmem:[#allocation4 + $0x58] sm:$0xff] }
  0x3c   :  { %181 = vmatprep.mubr.msk.f32.mxu0 %vm84_vm0, %v57_v9  ;;  %182 = vmatprep.mubr.msk.f32.mxu1 %vm84_vm0, %v59_v10  ;;  %v196_v17 = vpack.c.bf16 %v69_v16, %v68_v15  ;;  %v199_v20 = vpack.c.bf16 %v71_v19, %v70_v18  ;;  %v72_v21 = vld [vmem:[#allocation4 + $0x60] sm:$0xff]  ;;  %v73_v22 = vld [vmem:[#allocation4 + $0x68] sm:$0xff]  ;;  %v74_v24 = vld [vmem:[#allocation4 + $0x70] sm:$0xff] }
  0x3d   :  { %v202_v23 = vpack.c.bf16 %v73_v22, %v72_v21  ;;  %v75_v25 = vld [vmem:[#allocation4 + $0x78] sm:$0xff]  ;;  %v76_v28 = vld [vmem:[#allocation4 + $0x80] sm:$0xff]  ;;  %v58_v30 = vld [vmem:[#allocation2 + $0x10] sm:$0xff] }
  0x3e   :  { %188 = vmatpush1.bf16.msra.mxu0 %v187_v6  ;;  %217 = vmatpush1.bf16.msra.mxu1 %v187_v6  ;;  %v205_v26 = vpack.c.bf16 %v75_v25, %v74_v24  ;;  %v56_v29 = vld [vmem:[#allocation2] sm:$0xff]  ;;  %v180_v31 = vld [vmem:[#allocation6] ss:$0 sm:$0xff] }
  0x3f   :  { %189 = vmatprep.subr.bf16.mxu0 %v311_v0  ;;  %209 = vmatprep.subr.bf16.mxu1 %v311_v0  ;;  %v168_v38 = vld [vmem:[%s389_s3] sm:$0xff]  ;;  %v169_v39 = vld [vmem:[%s389_s3 + $0x8] sm:$0xff] }
  0x42   :  { %191 = vmatpush1.bf16.msra.mxu0 %v190_v11  ;;  %218 = vmatpush1.bf16.msra.mxu1 %v190_v11 }
  0x43   :  { %192 = vmatprep.subr.bf16.mxu0 %v311_v0  ;;  %210 = vmatprep.subr.bf16.mxu1 %v311_v0 }
  0x46   :  { %194 = vmatpush1.bf16.msra.mxu0 %v193_v14  ;;  %219 = vmatpush1.bf16.msra.mxu1 %v193_v14 }
  0x47   :  { %195 = vmatprep.subr.bf16.mxu0 %v311_v0  ;;  %211 = vmatprep.subr.bf16.mxu1 %v311_v0 }
  0x4a   :  { %197 = vmatpush1.bf16.msra.mxu0 %v196_v17  ;;  %220 = vmatpush1.bf16.msra.mxu1 %v196_v17 }
  0x4b   :  { %198 = vmatprep.subr.bf16.mxu0 %v311_v0  ;;  %212 = vmatprep.subr.bf16.mxu1 %v311_v0 }
  0x4e   :  { %200 = vmatpush1.bf16.msra.mxu0 %v199_v20  ;;  %221 = vmatpush1.bf16.msra.mxu1 %v199_v20 }
  0x4f   :  { %201 = vmatprep.subr.bf16.mxu0 %v311_v0  ;;  %213 = vmatprep.subr.bf16.mxu1 %v311_v0 }
  0x52   :  { %203 = vmatpush1.bf16.msra.mxu0 %v202_v23  ;;  %222 = vmatpush1.bf16.msra.mxu1 %v202_v23 }
  0x53   :  { %204 = vmatprep.subr.bf16.mxu0 %v311_v0  ;;  %214 = vmatprep.subr.bf16.mxu1 %v311_v0 }
  0x56   :  { %206 = vmatpush1.bf16.msra.mxu0 %v205_v26  ;;  %223 = vmatpush1.bf16.msra.mxu1 %v205_v26 }
  0x57   :  { %123 = vmatprep.subr.mxu0 %v312_v27  ;;  %215 = vmatprep.subr.mxu1 %v312_v27 }
  0x5a   :  { %124 = vmatpush1.msra.mxu0 %v76_v28  ;;  %224 = vmatpush1.msra.mxu1 %v76_v28 }
  0x5b   :  { %156 = vmatmul.mubr.f32.vlgmr.msra.gmra.mrb[0].mxu0 %v56_v29  ;;  %161 = vmatmul.mubr.f32.vlgmr.msra.gmra.mrb[0].mxu1 %v58_v30 }
 0x12e   :  { %v157_v32 = vpop.f32.mrb[0].mxu0  ;;  %v162_v33 = vpop.f32.mrb[0].mxu1 }
 0x12f   :  { %v158_v34 = vadd.f32 %v180_v31, %v157_v32  ;;  %v163_v35 = vadd.f32 %v180_v31, %v162_v33  ;;  %v159_v36 = vpop.f32.mrb[1].mxu0  ;;  %v164_v37 = vpop.f32.mrb[1].mxu1 }
 0x131   :  { %v166_v40 = vmul.f32 11.313708, %v158_v34  ;;  %v167_v41 = vmul.f32 11.313708, %v163_v35 }
 0x133   :  { %v170_v42 = vadd.f32 %v168_v38, %v166_v40  ;;  %v171_v43 = vadd.f32 %v169_v39, %v167_v41 }
 0x135   :  { %172 = vst [vmem:[%s390_s4] sm:$0xff] %v170_v42  ;;  %173 = vst [vmem:[%s390_s4 + $0x8] sm:$0xff] %v171_v43 }
 0x136   :  { %178 = vsyncpa [#allocation3], 1 }
 0x137   :  { %179 = vsyncpa [#allocation5], 1 }

// kernel: talking_head_forward.13
= control target key start
LH: loop header
LB: loop body
LE: loop exit
PB: predicated region body
PF: predicated region fallthrough
CT: control target
= control target key end

     0   :  { %v235_v7 = vmov 0.0   ;;  %s376_s0 = inlined_call_operand.vmem [shape: f32[16,128], index: 0, kind: input, shape index: {}]   ;;  %s377_s1 = inlined_call_operand.vmem [shape: f32[128,136], index: 1, kind: input, shape index: {}]   ;;  %s378_s2 = inlined_call_operand.vmem [shape: f32[1,136], index: 2, kind: input, shape index: {}]   ;;  %s379_s3 = inlined_call_operand.hbm [shape: f32[16,136], index: 3, kind: output, shape index: {}]  }
   0x1   :  { %v18_v0 = vld [vmem:[%s377_s1 + $0x8] sm:$0xff]  ;;  %v20_v1 = vld [vmem:[%s377_s1 + $0x18] sm:$0xff]  ;;  %v17_v2 = vld [vmem:[%s377_s1] sm:$0xff]  ;;  %125 = vmatprep.mubr.f32.mxu0 %v235_v7  ;;  %131 = vmatprep.mubr.f32.mxu1 %v235_v7 }
   0x2   :  { %v159_v3 = vpack.c.bf16 %v20_v1, %v18_v0  ;;  %v19_v4 = vld [vmem:[%s377_s1 + $0x10] sm:$0xff]  ;;  %v22_v5 = vld [vmem:[%s377_s1 + $0x28] sm:$0xff]  ;;  %v24_v6 = vld [vmem:[%s377_s1 + $0x38] sm:$0xff] }
   0x3   :  { %v161_v8 = vpack.c.bf16 %v19_v4, %v17_v2  ;;  %v163_v9 = vpack.c.bf16 %v24_v6, %v22_v5  ;;  %v21_v10 = vld [vmem:[%s377_s1 + $0x20] sm:$0xff]  ;;  %v23_v11 = vld [vmem:[%s377_s1 + $0x30] sm:$0xff]  ;;  %v26_v12 = vld [vmem:[%s377_s1 + $0x48] sm:$0xff] }
   0x4   :  { %160 = vmatprep.subr.bf16.mxu0 %v159_v3  ;;  %191 = vmatprep.subr.bf16.mxu1 %v159_v3  ;;  %v28_v13 = vld [vmem:[%s377_s1 + $0x58] sm:$0xff]  ;;  %v165_v14 = vpack.c.bf16 %v23_v11, %v21_v10  ;;  %v25_v16 = vld [vmem:[%s377_s1 + $0x40] sm:$0xff]  ;;  %v27_v17 = vld [vmem:[%s377_s1 + $0x50] sm:$0xff] }
   0x5   :  { %162 = vmatpush1.bf16.msra.mxu0 %v161_v8  ;;  %199 = vmatpush1.bf16.msra.mxu1 %v161_v8  ;;  %v167_v15 = vpack.c.bf16 %v28_v13, %v26_v12  ;;  %v30_v18 = vld [vmem:[%s377_s1 + $0x68] sm:$0xff]  ;;  %v32_v19 = vld [vmem:[%s377_s1 + $0x78] sm:$0xff]  ;;  %v169_v20 = vpack.c.bf16 %v27_v17, %v25_v16  ;;  %v29_v22 = vld [vmem:[%s377_s1 + $0x60] sm:$0xff] }
   0x6   :  { %164 = vmatprep.subr.bf16.mxu0 %v163_v9  ;;  %192 = vmatprep.subr.bf16.mxu1 %v163_v9  ;;  %v171_v21 = vpack.c.bf16 %v32_v19, %v30_v18  ;;  %v31_v23 = vld [vmem:[%s377_s1 + $0x70] sm:$0xff]  ;;  %v34_v24 = vld [vmem:[%s377_s1 + $0x88] sm:$0xff]  ;;  %v36_v25 = vld [vmem:[%s377_s1 + $0x98] sm:$0xff] }
   0x9   :  { %166 = vmatpush1.bf16.msra.mxu0 %v165_v14  ;;  %200 = vmatpush1.bf16.msra.mxu1 %v165_v14 }
   0xa   :  { %168 = vmatprep.subr.bf16.mxu0 %v167_v15  ;;  %193 = vmatprep.subr.bf16.mxu1 %v167_v15 }
   0xb   :  { %8 = vsyncpa [#allocation3], 0  ;;  %v173_v26 = vpack.c.bf16 %v31_v23, %v29_v22  ;;  %v175_v27 = vpack.c.bf16 %v36_v25, %v34_v24  ;;  %v33_v28 = vld [vmem:[%s377_s1 + $0x80] sm:$0xff]  ;;  %v35_v29 = vld [vmem:[%s377_s1 + $0x90] sm:$0xff]  ;;  %v51_v51 = vlaneseq  ;;  %s236_s27 = smov [#allocation2]   ;;  %vm139_vm0 = vcmask 64512  }
   0xc   :  { %v38_v30 = vld [vmem:[%s377_s1 + $0xa8] sm:$0xff]  ;;  %v40_v31 = vld [vmem:[%s377_s1 + $0xb8] sm:$0xff]  ;;  %v177_v32 = vpack.c.bf16 %v35_v29, %v33_v28  ;;  %v37_v34 = vld [vmem:[%s377_s1 + $0xa0] sm:$0xff]  ;;  %s148_s28 = sshll.u32 %s236_s27, 4  ;;  %s149_s28 = int_to_ptr.vmem [resolvable:$true] %s148_s28 }
   0xd   :  { %170 = vmatpush1.bf16.msra.mxu0 %v169_v20  ;;  %201 = vmatpush1.bf16.msra.mxu1 %v169_v20  ;;  %v179_v33 = vpack.c.bf16 %v40_v31, %v38_v30  ;;  %v39_v35 = vld [vmem:[%s377_s1 + $0xb0] sm:$0xff]  ;;  %v42_v36 = vld [vmem:[%s377_s1 + $0xc8] sm:$0xff]  ;;  %v44_v37 = vld [vmem:[%s377_s1 + $0xd8] sm:$0xff]  ;;  %v52_v52 = vshrl.u32 %v51_v51, 7  ;;  %p216_p1 = scmp.lt.s32.totalorder %s149_s28, %s149_s28 }
   0xe   :  { %172 = vmatprep.subr.bf16.mxu0 %v171_v21  ;;  %194 = vmatprep.subr.bf16.mxu1 %v171_v21  ;;  %v181_v38 = vpack.c.bf16 %v39_v35, %v37_v34  ;;  %v183_v39 = vpack.c.bf16 %v44_v37, %v42_v36  ;;  %v41_v40 = vld [vmem:[%s377_s1 + $0xc0] sm:$0xff]  ;;  %v43_v41 = vld [vmem:[%s377_s1 + $0xd0] sm:$0xff]  ;;  %v46_v42 = vld [vmem:[%s377_s1 + $0xe8] sm:$0xff] }
   0xf   :  { %v48_v43 = vld [vmem:[%s377_s1 + $0xf8] sm:$0xff]  ;;  %v185_v44 = vpack.c.bf16 %v43_v41, %v41_v40  ;;  %v45_v46 = vld [vmem:[%s377_s1 + $0xe0] sm:$0xff]  ;;  %v47_v47 = vld [vmem:[%s377_s1 + $0xf0] sm:$0xff]  ;;  %v53_v53 = vsub.s32 0, %v52_v52  ;;  %v57_v55 = vsub.s32 1, %v52_v52 }
  0x10   :  { %v187_v45 = vpack.c.bf16 %v48_v43, %v46_v42  ;;  %v189_v48 = vpack.c.bf16 %v47_v47, %v45_v46  ;;  %v15_v49 = vld [vmem:[%s376_s0] sm:$0xff]  ;;  %v16_v50 = vld [vmem:[%s376_s0 + $0x8] sm:$0xff]  ;;  %s211_s0 = scalar_lea.vmem %s149_s28, 512 }
  0x11   :  { %174 = vmatpush1.bf16.msra.mxu0 %v173_v26  ;;  %202 = vmatpush1.bf16.msra.mxu1 %v173_v26  ;;  %v49_v54 = vld [vmem:[%s378_s2] sm:$0x3]  ;;  %p212_p0 = scmp.ne.s32.totalorder %s149_s28, %s211_s0  ;;  %p217_p2 = scmp.lt.s32.totalorder %s211_s0, %s211_s0 }
  0x12   :  { %176 = vmatprep.subr.bf16.mxu0 %v175_v27  ;;  %195 = vmatprep.subr.bf16.mxu1 %v175_v27  ;;  %v54_v56 = vrot.slane %v49_v54, %v53_v53  ;;  %v58_v57 = vrot.slane %v49_v54, %v57_v55 }
  0x13   :  { %p218_p3 = por %p217_p2, %p216_p1 }
  0x15   :  { %178 = vmatpush1.bf16.msra.mxu0 %v177_v32  ;;  %203 = vmatpush1.bf16.msra.mxu1 %v177_v32  ;;  %p219_p4 = pnand %p218_p3, %p212_p0 }
  0x16   :  { %180 = vmatprep.subr.bf16.mxu0 %v179_v33  ;;  %196 = vmatprep.subr.bf16.mxu1 %v179_v33 }
  0x19   :  { %182 = vmatpush1.bf16.msra.mxu0 %v181_v38  ;;  %204 = vmatpush1.bf16.msra.mxu1 %v181_v38 }
  0x1a   :  { %184 = vmatprep.subr.bf16.mxu0 %v183_v39  ;;  %197 = vmatprep.subr.bf16.mxu1 %v183_v39 }
  0x1d   :  { %186 = vmatpush1.bf16.msra.mxu0 %v185_v44  ;;  %205 = vmatpush1.bf16.msra.mxu1 %v185_v44 }
  0x1e   :  { %188 = vmatprep.subr.bf16.mxu0 %v187_v45  ;;  %198 = vmatprep.subr.bf16.mxu1 %v187_v45 }
  0x21   :  { %190 = vmatpush1.bf16.msra.mxu0 %v189_v48  ;;  %206 = vmatpush1.bf16.msra.mxu1 %v189_v48 }
  0x24   :  { %126 = vmatmul.mubr.f32.vlgmr.msra.gmra.mrb[0].mxu0 %v15_v49  ;;  %132 = vmatmul.mubr.f32.vlgmr.msra.gmra.mrb[0].mxu1 %v16_v50 }
  0xf7   :  { %v127_v58 = vpop.f32.mrb[0].mxu0  ;;  %v133_v59 = vpop.f32.mrb[0].mxu1 }
  0xf8   :  { %v128_v60 = vadd.f32 %v127_v58, %v54_v56  ;;  %v134_v61 = vadd.f32 %v133_v59, %v54_v56  ;;  %v129_v62 = vpop.f32.mrb[1].mxu0  ;;  %v135_v63 = vpop.f32.mrb[1].mxu1 }
  0xf9   :  { %v130_v0 = vadd.f32 %v129_v62, %v58_v57  ;;  %v136_v1 = vadd.f32 %v135_v63, %v58_v57 }
  0xfa   :  { %138 = vst [vmem:[#allocation2] sm:$0xff] %v128_v60  ;;  %141 = vst [vmem:[#allocation2 + $0x10] sm:$0xff] %v134_v61 }
  0xfb   :  { %140 = vst.msk [vmem:[#allocation2 + $0x8] sm:$0xff] %vm139_vm0, %v130_v0  ;;  %142 = vst.msk [vmem:[#allocation2 + $0x18] sm:$0xff] %vm139_vm0, %v136_v1 }
  0xfc   :  { %222 = shalt.err (!%p219_p4)
}
  0xfd   :  { %s223_s30 = scalar_lea.hbm %s379_s3, 512 }
  0xfe   :  { %p224_p5 = scmp.ne.s32.totalorder %s379_s3, %s223_s30  ;;  %p227_p6 = scmp.lt.u32.totalorder %s223_s30, %s379_s3 }
 0x100   :  { %p229_p7 = pnand %p227_p6, %p224_p5 }
 0x102   :  { %232 = shalt.err (!%p229_p7)
}
 0x103   :  { %s237_s8 = smov 256   ;;  %s238_s9 = smov 16  }
 0x104   :  { %154 = dma.vmem_to_hbm [thread:$0]  %s149_s28, 512, %s379_s3, [#allocation3], %s237_s8, %s237_s8, %s238_s9  }
 0x105   :  { %233 = dma.done.wait [#allocation3], 512  }
 0x106   :  { %234 = vsyncadd [#allocation3], 4294966784 }
 0x107   :  { %158 = vsyncpa [#allocation3], 1 }

// kernel: talking_head_forward.8
= control target key start
LH: loop header
LB: loop body
LE: loop exit
PB: predicated region body
PF: predicated region fallthrough
CT: control target
= control target key end

     0   :  { %18 = vsyncpa [#allocation3], 0  ;;  %s4113_s0 = inlined_call_operand.vmem [shape: f32[16,128], index: 0, kind: input, shape index: {}]   ;;  %s4114_s1 = inlined_call_operand.hbm [shape: f32[128,384], index: 1, kind: input, shape index: {}]   ;;  %s4115_s2 = inlined_call_operand.hbm [shape: f32[1,384], index: 2, kind: input, shape index: {}]   ;;  %s4116_s3 = inlined_call_operand.hbm [shape: f32[128,128], index: 3, kind: input, shape index: {}]   ;;  %s4117_s4 = inlined_call_operand.hbm [shape: f32[1,128], index: 4, kind: input, shape index: {}]   ;;  %s4118_s5 = inlined_call_operand.hbm [shape: f32[1,128], index: 5, kind: input, shape index: {}]   ;;  %s4119_s6 = inlined_call_operand.hbm [shape: f32[1,128], index: 6, kind: input, shape index: {}]   ;;  %s4120_s7 = inlined_call_operand.hbm [shape: f32[128,256], index: 7, kind: input, shape index: {}]   ;;  %s4121_s8 = inlined_call_operand.hbm [shape: f32[1,256], index: 8, kind: input, shape index: {}]   ;;  %s4122_s9 = inlined_call_operand.hbm [shape: f32[256,128], index: 9, kind: input, shape index: {}]   ;;  %s4123_s10 = inlined_call_operand.hbm [shape: f32[1,128], index: 10, kind: input, shape index: {}]   ;;  %s4124_s11 = inlined_call_operand.hbm [shape: f32[1,128], index: 11, kind: input, shape index: {}]   ;;  %s4125_s12 = inlined_call_operand.hbm [shape: f32[1,128], index: 12, kind: input, shape index: {}]   ;;  %s4126_s13 = inlined_call_operand.vmem [shape: f32[16,128], index: 13, kind: output, shape index: {}]  }
   0x1   :  { %19 = vsyncpa [#allocation5], 0 }
   0x2   :  { %20 = vsyncpa [#allocation8], 0 }
   0x3   :  { %21 = vsyncpa [#allocation11], 0 }
   0x4   :  { %22 = vsyncpa [#allocation14], 0 }
   0x5   :  { %23 = vsyncpa [#allocation17], 0 }
   0x6   :  { %24 = vsyncpa [#allocation20], 0  ;;  %s3570_s25 = smov [#allocation4]   ;;  %s3571_s27 = smov [#allocation7]  }
   0x7   :  { %s45_s26 = sshll.u32 %s3570_s25, 4  ;;  %s67_s28 = sshll.u32 %s3571_s27, 4  ;;  %s46_s26 = int_to_ptr.vmem [resolvable:$true] %s45_s26  ;;  %s68_s28 = int_to_ptr.vmem [resolvable:$true] %s67_s28 }
   0x8   :  { %s3292_s14 = scalar_lea.hbm %s4115_s2, 48 }
   0x9   :  { %p3293_p0 = scmp.ne.s32.totalorder %s4115_s2, %s3292_s14  ;;  %p3296_p1 = scmp.lt.u32.totalorder %s3292_s14, %s4115_s2 }
   0xb   :  { %p3298_p2 = pnand %p3296_p1, %p3293_p0 }
   0xd   :  { %3301 = shalt.err (!%p3298_p2)
}
   0xe   :  { %s3302_s19 = scalar_lea.vmem %s46_s26, 48  ;;  %s3306_s20 = scalar_lea.vmem %s46_s26, 64 }
   0xf   :  { %p3303_p3 = scmp.ne.s32.totalorder %s46_s26, %s3302_s19  ;;  %p3307_p4 = scmp.lt.s32.totalorder %s46_s26, %s46_s26 }
  0x10   :  { %p3308_p5 = scmp.lt.s32.totalorder %s3306_s20, %s3302_s19 }
  0x12   :  { %p3309_p6 = por %p3308_p5, %p3307_p4 }
  0x14   :  { %p3310_p7 = pnand %p3309_p6, %p3303_p3 }
  0x16   :  { %3313 = shalt.err (!%p3310_p7)
}
  0x17   :  { %48 = dma.hbm_to_vmem [thread:$0]  %s4115_s2, 48, %s46_s26, [#allocation5]  }
  0x18   :  { %s3314_s25 = scalar_lea.hbm %s4117_s4, 16 }
  0x19   :  { %p3315_p8 = scmp.ne.s32.totalorder %s4117_s4, %s3314_s25  ;;  %p3318_p9 = scmp.lt.u32.totalorder %s3314_s25, %s4117_s4 }
  0x1b   :  { %p3320_p10 = pnand %p3318_p9, %p3315_p8 }
  0x1d   :  { %3323 = shalt.err (!%p3320_p10)
}
  0x1e   :  { %s3324_s15 = scalar_lea.vmem %s68_s28, 16  ;;  %s3328_s16 = scalar_lea.vmem %s68_s28, 32 }
  0x1f   :  { %p3325_p11 = scmp.ne.s32.totalorder %s68_s28, %s3324_s15  ;;  %p3329_p12 = scmp.lt.s32.totalorder %s68_s28, %s68_s28 }
  0x20   :  { %p3330_p13 = scmp.lt.s32.totalorder %s3328_s16, %s3324_s15 }
  0x22   :  { %p3331_p0 = por %p3330_p13, %p3329_p12 }
  0x24   :  { %p3332_p1 = pnand %p3331_p0, %p3325_p11 }
  0x26   :  { %3335 = shalt.err (!%p3332_p1)
}
  0x27   :  { %70 = dma.hbm_to_vmem [thread:$0]  %s4117_s4, 16, %s68_s28, [#allocation8]  }
  0x28   :  { %s3572_s17 = smov [#allocation10]   ;;  %s3573_s19 = smov [#allocation13]  }
  0x29   :  { %s87_s18 = sshll.u32 %s3572_s17, 4  ;;  %s109_s20 = sshll.u32 %s3573_s19, 4  ;;  %s88_s18 = int_to_ptr.vmem [resolvable:$true] %s87_s18  ;;  %s110_s20 = int_to_ptr.vmem [resolvable:$true] %s109_s20 }
  0x2a   :  { %s3336_s23 = scalar_lea.hbm %s4119_s6, 16 }
  0x2b   :  { %p3337_p2 = scmp.ne.s32.totalorder %s4119_s6, %s3336_s23  ;;  %p3340_p3 = scmp.lt.u32.totalorder %s3336_s23, %s4119_s6 }
  0x2d   :  { %p3342_p4 = pnand %p3340_p3, %p3337_p2 }
  0x2f   :  { %3345 = shalt.err (!%p3342_p4)
}
  0x30   :  { %s3346_s4 = scalar_lea.vmem %s88_s18, 16  ;;  %s3350_s28 = scalar_lea.vmem %s88_s18, 32 }
  0x31   :  { %p3347_p5 = scmp.ne.s32.totalorder %s88_s18, %s3346_s4  ;;  %p3351_p6 = scmp.lt.s32.totalorder %s88_s18, %s88_s18 }
  0x32   :  { %p3352_p7 = scmp.lt.s32.totalorder %s3350_s28, %s3346_s4 }
  0x34   :  { %p3353_p8 = por %p3352_p7, %p3351_p6 }
  0x36   :  { %p3354_p9 = pnand %p3353_p8, %p3347_p5 }
  0x38   :  { %3357 = shalt.err (!%p3354_p9)
}
  0x39   :  { %90 = dma.hbm_to_vmem [thread:$0]  %s4119_s6, 16, %s88_s18, [#allocation11]  }
  0x3a   :  { %s3358_s2 = scalar_lea.hbm %s4121_s8, 32 }
  0x3b   :  { %p3359_p10 = scmp.ne.s32.totalorder %s4121_s8, %s3358_s2  ;;  %p3362_p11 = scmp.lt.u32.totalorder %s3358_s2, %s4121_s8 }
  0x3d   :  { %p3364_p12 = pnand %p3362_p11, %p3359_p10 }
  0x3f   :  { %3367 = shalt.err (!%p3364_p12)
}
  0x40   :  { %s3368_s22 = scalar_lea.vmem %s110_s20, 32  ;;  %p3373_p0 = scmp.lt.s32.totalorder %s110_s20, %s110_s20 }
  0x41   :  { %p3369_p13 = scmp.ne.s32.totalorder %s110_s20, %s3368_s22  ;;  %p3374_p1 = scmp.lt.s32.totalorder %s3368_s22, %s3368_s22 }
  0x43   :  { %p3375_p2 = por %p3374_p1, %p3373_p0 }
  0x45   :  { %p3376_p3 = pnand %p3375_p2, %p3369_p13 }
  0x47   :  { %3379 = shalt.err (!%p3376_p3)
}
  0x48   :  { %112 = dma.hbm_to_vmem [thread:$0]  %s4121_s8, 32, %s110_s20, [#allocation14]  }
  0x49   :  { %s3574_s23 = smov [#allocation16]   ;;  %s3575_s25 = smov [#allocation2]  }
  0x4a   :  { %s131_s24 = sshll.u32 %s3574_s23, 4  ;;  %s32_s27 = sshll.u32 %s3575_s25, 4  ;;  %s132_s24 = int_to_ptr.vmem [resolvable:$true] %s131_s24  ;;  %s3712_s27 = int_to_ptr.vmem [resolvable:$true] %s32_s27 }
  0x4b   :  { %s3380_s28 = scalar_lea.hbm %s4123_s10, 16 }
  0x4c   :  { %p3381_p4 = scmp.ne.s32.totalorder %s4123_s10, %s3380_s28  ;;  %p3384_p5 = scmp.lt.u32.totalorder %s3380_s28, %s4123_s10 }
  0x4e   :  { %p3386_p6 = pnand %p3384_p5, %p3381_p4 }
  0x50   :  { %3389 = shalt.err (!%p3386_p6)
}
  0x51   :  { %s3390_s8 = scalar_lea.vmem %s132_s24, 16  ;;  %s3394_s20 = scalar_lea.vmem %s132_s24, 32 }
  0x52   :  { %p3391_p7 = scmp.ne.s32.totalorder %s132_s24, %s3390_s8  ;;  %p3395_p8 = scmp.lt.s32.totalorder %s132_s24, %s132_s24 }
  0x53   :  { %p3396_p9 = scmp.lt.s32.totalorder %s3394_s20, %s3390_s8 }
  0x55   :  { %p3397_p10 = por %p3396_p9, %p3395_p8 }
  0x57   :  { %p3398_p11 = pnand %p3397_p10, %p3391_p7 }
  0x59   :  { %3401 = shalt.err (!%p3398_p11)
}
  0x5a   :  { %134 = dma.hbm_to_vmem [thread:$0]  %s4123_s10, 16, %s132_s24, [#allocation17]  }
  0x5b   :  { %s3402_s21 = scalar_lea.hbm %s4114_s1, 6144 }
  0x5c   :  { %p3403_p12 = scmp.ne.s32.totalorder %s4114_s1, %s3402_s21  ;;  %p3406_p13 = scmp.lt.u32.totalorder %s3402_s21, %s4114_s1 }
  0x5e   :  { %p3408_p0 = pnand %p3406_p13, %p3403_p12 }
  0x60   :  { %3411 = shalt.err (!%p3408_p0)
}
  0x61   :  { %s3412_s25 = scalar_lea.vmem %s3712_s27, 6144  ;;  %p3417_p2 = scmp.lt.s32.totalorder %s3712_s27, %s3712_s27 }
  0x62   :  { %p3413_p1 = scmp.ne.s32.totalorder %s3712_s27, %s3412_s25  ;;  %p3418_p3 = scmp.lt.s32.totalorder %s3412_s25, %s3412_s25 }
  0x64   :  { %p3419_p4 = por %p3418_p3, %p3417_p2 }
  0x66   :  { %p3420_p5 = pnand %p3419_p4, %p3413_p1 }
  0x68   :  { %3423 = shalt.err (!%p3420_p5)
}
  0x69   :  { %s3576_s10 = smov 384   ;;  %s3577_s24 = smov 24  }
  0x6a   :  { %38 = dma.hbm_to_vmem [thread:$0]  %s4114_s1, 6144, %s3712_s27, [#allocation3], %s3576_s10, %s3576_s10, %s3577_s24  }
  0x6b   :  { %s3578_s28 = smov [#allocation6]   ;;  %s3424_s16 = scalar_lea.hbm %s4116_s3, 2048 }
  0x6c   :  { %s54_s30 = sshll.u32 %s3578_s28, 4  ;;  %p3425_p6 = scmp.ne.s32.totalorder %s4116_s3, %s3424_s16  ;;  %s55_s30 = int_to_ptr.vmem [resolvable:$true] %s54_s30 }
  0x6d   :  { %p3428_p7 = scmp.lt.u32.totalorder %s3424_s16, %s4116_s3 }
  0x6f   :  { %p3430_p8 = pnand %p3428_p7, %p3425_p6 }
  0x71   :  { %3433 = shalt.err (!%p3430_p8)
}
  0x72   :  { %s3434_s17 = scalar_lea.vmem %s55_s30, 2048  ;;  %p3439_p10 = scmp.lt.s32.totalorder %s55_s30, %s55_s30 }
  0x73   :  { %p3435_p9 = scmp.ne.s32.totalorder %s55_s30, %s3434_s17  ;;  %p3440_p11 = scmp.lt.s32.totalorder %s3434_s17, %s3434_s17 }
  0x75   :  { %p3441_p12 = por %p3440_p11, %p3439_p10 }
  0x77   :  { %p3442_p13 = pnand %p3441_p12, %p3435_p9 }
  0x79   :  { %3445 = shalt.err (!%p3442_p13)
}
  0x7a   :  { %s3579_s1 = smov 128   ;;  %s3580_s27 = smov 8  }
  0x7b   :  { %60 = dma.hbm_to_vmem [thread:$0]  %s4116_s3, 2048, %s55_s30, [#allocation5], %s3579_s1, %s3579_s1, %s3580_s27  }
  0x7c   :  { %s3581_s22 = smov [#allocation9]   ;;  %s3582_s18 = smov [#allocation12]  }
  0x7d   :  { %s77_s6 = sshll.u32 %s3581_s22, 4  ;;  %s96_s23 = sshll.u32 %s3582_s18, 4  ;;  %s78_s6 = int_to_ptr.vmem [resolvable:$true] %s77_s6  ;;  %s97_s23 = int_to_ptr.vmem [resolvable:$true] %s96_s23 }
  0x7e   :  { %s3446_s24 = scalar_lea.hbm %s4118_s5, 16 }
  0x7f   :  { %p3447_p0 = scmp.ne.s32.totalorder %s4118_s5, %s3446_s24  ;;  %p3450_p1 = scmp.lt.u32.totalorder %s3446_s24, %s4118_s5 }
  0x81   :  { %p3452_p2 = pnand %p3450_p1, %p3447_p0 }
  0x83   :  { %3455 = shalt.err (!%p3452_p2)
}
  0x84   :  { %s3456_s3 = scalar_lea.vmem %s78_s6, 16  ;;  %s3460_s30 = scalar_lea.vmem %s78_s6, 32 }
  0x85   :  { %p3457_p3 = scmp.ne.s32.totalorder %s78_s6, %s3456_s3  ;;  %p3461_p4 = scmp.lt.s32.totalorder %s78_s6, %s78_s6 }
  0x86   :  { %p3462_p5 = scmp.lt.s32.totalorder %s3460_s30, %s3456_s3 }
  0x88   :  { %p3463_p6 = por %p3462_p5, %p3461_p4 }
  0x8a   :  { %p3464_p7 = pnand %p3463_p6, %p3457_p3 }
  0x8c   :  { %3467 = shalt.err (!%p3464_p7)
}
  0x8d   :  { %80 = dma.hbm_to_vmem [thread:$0]  %s4118_s5, 16, %s78_s6, [#allocation8]  }
  0x8e   :  { %s3468_s2 = scalar_lea.hbm %s4120_s7, 4096 }
  0x8f   :  { %p3469_p8 = scmp.ne.s32.totalorder %s4120_s7, %s3468_s2  ;;  %p3472_p9 = scmp.lt.u32.totalorder %s3468_s2, %s4120_s7 }
  0x91   :  { %p3474_p10 = pnand %p3472_p9, %p3469_p8 }
  0x93   :  { %3477 = shalt.err (!%p3474_p10)
}
  0x94   :  { %s3478_s22 = scalar_lea.vmem %s97_s23, 4096  ;;  %p3483_p12 = scmp.lt.s32.totalorder %s97_s23, %s97_s23 }
  0x95   :  { %p3479_p11 = scmp.ne.s32.totalorder %s97_s23, %s3478_s22  ;;  %p3484_p13 = scmp.lt.s32.totalorder %s3478_s22, %s3478_s22 }
  0x97   :  { %p3485_p0 = por %p3484_p13, %p3483_p12 }
  0x99   :  { %p3486_p1 = pnand %p3485_p0, %p3479_p11 }
  0x9b   :  { %3489 = shalt.err (!%p3486_p1)
}
  0x9c   :  { %s3583_s5 = smov 256   ;;  %s3584_s6 = smov 16  }
  0x9d   :  { %102 = dma.hbm_to_vmem [thread:$0]  %s4120_s7, 4096, %s97_s23, [#allocation11], %s3583_s5, %s3583_s5, %s3584_s6  }
  0x9e   :  { %s3585_s10 = smov [#allocation15]   ;;  %s3586_s29 = smov [#allocation18]  }
  0x9f   :  { %s118_s24 = sshll.u32 %s3585_s10, 4  ;;  %s141_s4 = sshll.u32 %s3586_s29, 4  ;;  %s119_s24 = int_to_ptr.vmem [resolvable:$true] %s118_s24  ;;  %s142_s4 = int_to_ptr.vmem [resolvable:$true] %s141_s4 }
  0xa0   :  { %s3490_s3 = scalar_lea.hbm %s4122_s9, 4096 }
  0xa1   :  { %p3491_p2 = scmp.ne.s32.totalorder %s4122_s9, %s3490_s3  ;;  %p3494_p3 = scmp.lt.u32.totalorder %s3490_s3, %s4122_s9 }
  0xa3   :  { %p3496_p4 = pnand %p3494_p3, %p3491_p2 }
  0xa5   :  { %3499 = shalt.err (!%p3496_p4)
}
  0xa6   :  { %s3500_s7 = scalar_lea.vmem %s119_s24, 4096  ;;  %p3505_p6 = scmp.lt.s32.totalorder %s119_s24, %s119_s24 }
  0xa7   :  { %p3501_p5 = scmp.ne.s32.totalorder %s119_s24, %s3500_s7  ;;  %p3506_p7 = scmp.lt.s32.totalorder %s3500_s7, %s3500_s7 }
  0xa9   :  { %p3507_p8 = por %p3506_p7, %p3505_p6 }
  0xab   :  { %p3508_p9 = pnand %p3507_p8, %p3501_p5 }
  0xad   :  { %3511 = shalt.err (!%p3508_p9)
}
  0xae   :  { %124 = dma.hbm_to_vmem [thread:$0]  %s4122_s9, 4096, %s119_s24, [#allocation14], %s3579_s1, %s3579_s1, %s3580_s27  }
  0xaf   :  { %s3512_s17 = scalar_lea.hbm %s4124_s11, 16 }
  0xb0   :  { %p3513_p10 = scmp.ne.s32.totalorder %s4124_s11, %s3512_s17  ;;  %p3516_p11 = scmp.lt.u32.totalorder %s3512_s17, %s4124_s11 }
  0xb2   :  { %p3518_p12 = pnand %p3516_p11, %p3513_p10 }
  0xb4   :  { %3521 = shalt.err (!%p3518_p12)
}
  0xb5   :  { %s3522_s6 = scalar_lea.vmem %s142_s4, 16  ;;  %s3526_s18 = scalar_lea.vmem %s142_s4, 32 }
  0xb6   :  { %p3523_p13 = scmp.ne.s32.totalorder %s142_s4, %s3522_s6  ;;  %p3527_p0 = scmp.lt.s32.totalorder %s142_s4, %s142_s4 }
  0xb7   :  { %p3528_p1 = scmp.lt.s32.totalorder %s3526_s18, %s3522_s6 }
  0xb9   :  { %p3529_p2 = por %p3528_p1, %p3527_p0 }
  0xbb   :  { %p3530_p3 = pnand %p3529_p2, %p3523_p13 }
  0xbd   :  { %3533 = shalt.err (!%p3530_p3)
}
  0xbe   :  { %144 = dma.hbm_to_vmem [thread:$0]  %s4124_s11, 16, %s142_s4, [#allocation17]  }
  0xbf   :  { %s3587_s27 = smov [#allocation19]   ;;  %s3534_s29 = scalar_lea.hbm %s4125_s12, 16 }
  0xc0   :  { %s151_s25 = sshll.u32 %s3587_s27, 4  ;;  %p3535_p4 = scmp.ne.s32.totalorder %s4125_s12, %s3534_s29  ;;  %s152_s25 = int_to_ptr.vmem [resolvable:$true] %s151_s25 }
  0xc1   :  { %p3538_p5 = scmp.lt.u32.totalorder %s3534_s29, %s4125_s12 }
  0xc3   :  { %p3540_p6 = pnand %p3538_p5, %p3535_p4 }
  0xc5   :  { %3543 = shalt.err (!%p3540_p6)
}
  0xc6   :  { %s3544_s15 = scalar_lea.vmem %s152_s25, 16  ;;  %s3548_s11 = scalar_lea.vmem %s152_s25, 32 }
  0xc7   :  { %p3545_p7 = scmp.ne.s32.totalorder %s152_s25, %s3544_s15  ;;  %p3549_p8 = scmp.lt.s32.totalorder %s152_s25, %s152_s25 }
  0xc8   :  { %p3550_p9 = scmp.lt.s32.totalorder %s3548_s11, %s3544_s15 }
  0xca   :  { %p3551_p10 = por %p3550_p9, %p3549_p8 }
  0xcc   :  { %p3552_p11 = pnand %p3551_p10, %p3545_p7 }
  0xce   :  { %3555 = shalt.err (!%p3552_p11)
}
  0xcf   :  { %154 = dma.hbm_to_vmem [thread:$0]  %s4125_s12, 16, %s152_s25, [#allocation20]  }
  0xd0   :  { %3556 = dma.done.wait [#allocation3], 6144  }
  0xd1   :  { %3557 = vsyncadd [#allocation3], 4294961152 }
  0xd2   :  { %3558 = dma.done.wait [#allocation5], 2096  }
  0xd3   :  { %3559 = vsyncadd [#allocation5], 4294965200 }
  0xd4   :  { %3560 = dma.done.wait [#allocation8], 32  }
  0xd5   :  { %3561 = vsyncadd [#allocation8], 4294967264 }
  0xd6   :  { %3562 = dma.done.wait [#allocation11], 4112  }
  0xd7   :  { %3563 = vsyncadd [#allocation11], 4294963184 }
  0xd8   :  { %3564 = dma.done.wait [#allocation14], 4128  }
  0xd9   :  { %3565 = vsyncadd [#allocation14], 4294963168 }
  0xda   :  { %3566 = dma.done.wait [#allocation17], 32  }
  0xdb   :  { %3567 = vsyncadd [#allocation17], 4294967264 }
  0xdc   :  { %3568 = dma.done.wait [#allocation20], 16  }
  0xdd   :  { %3569 = vsyncadd [#allocation20], 4294967280  ;;  %v3588_v0 = vmov 0.0   ;;  %v194_v1 = vld [vmem:[#allocation2 + $0x8] sm:$0xff]  ;;  %v197_v2 = vld [vmem:[#allocation2 + $0x20] sm:$0xff]  ;;  %vm3589_vm0 = vmmov 0  }
  0xde   :  { %322 = vmatprep.mubr.f32.mxu0 %v3588_v0  ;;  %v193_v3 = vld [vmem:[#allocation2] sm:$0xff]  ;;  %v3051_v4 = vpack.c.bf16 %v197_v2, %v194_v1  ;;  %v196_v5 = vld [vmem:[#allocation2 + $0x18] sm:$0xff]  ;;  %v203_v7 = vld [vmem:[#allocation2 + $0x50] sm:$0xff]  ;;  %vm427_vm1 = vcmask 261120   ;;  %s3590_s20 = smov 96   ;;  %vm505_vm2 = vcmask 64512  }
  0xdf   :  { %v200_v6 = vld [vmem:[#allocation2 + $0x38] sm:$0xff]  ;;  %v3053_v8 = vpack.c.bf16 %v196_v5, %v193_v3  ;;  %v199_v10 = vld [vmem:[#allocation2 + $0x30] sm:$0xff]  ;;  %v202_v11 = vld [vmem:[#allocation2 + $0x48] sm:$0xff]  ;;  %s3591_s2 = smov 64   ;;  %s3592_s26 = smov 32  }
  0xe0   :  { %v3055_v9 = vpack.c.bf16 %v203_v7, %v200_v6  ;;  %v206_v12 = vld [vmem:[#allocation2 + $0x68] sm:$0xff]  ;;  %3052 = vmatprep.subr.bf16.mxu0 %v3051_v4  ;;  %v209_v13 = vld [vmem:[#allocation2 + $0x80] sm:$0xff]  ;;  %v3057_v14 = vpack.c.bf16 %v202_v11, %v199_v10  ;;  %v208_v17 = vld [vmem:[#allocation2 + $0x78] sm:$0xff] }
  0xe1   :  { %3054 = vmatpush1.bf16.msra.mxu0 %v3053_v8  ;;  %v3059_v15 = vpack.c.bf16 %v209_v13, %v206_v12  ;;  %v205_v16 = vld [vmem:[#allocation2 + $0x60] sm:$0xff]  ;;  %v212_v18 = vld [vmem:[#allocation2 + $0x98] sm:$0xff]  ;;  %v215_v19 = vld [vmem:[#allocation2 + $0xb0] sm:$0xff]  ;;  %v243_v12 = vlaneseq }
  0xe2   :  { %3056 = vmatprep.subr.bf16.mxu0 %v3055_v9  ;;  %v3061_v20 = vpack.c.bf16 %v208_v17, %v205_v16  ;;  %v3063_v21 = vpack.c.bf16 %v215_v19, %v212_v18  ;;  %v211_v22 = vld [vmem:[#allocation2 + $0x90] sm:$0xff]  ;;  %v214_v23 = vld [vmem:[#allocation2 + $0xa8] sm:$0xff]  ;;  %v221_v25 = vld [vmem:[#allocation2 + $0xe0] sm:$0xff] }
  0xe3   :  { %v218_v24 = vld [vmem:[#allocation2 + $0xc8] sm:$0xff]  ;;  %v3825_v26 = vld [vmem:[%s4113_s0] sm:$0xff]  ;;  %v195_v27 = vld [vmem:[#allocation2 + $0x10] sm:$0xff]  ;;  %v3065_v30 = vpack.c.bf16 %v214_v23, %v211_v22  ;;  %v3839_v13 = vshrl.u32 %v243_v12, 7 }
  0xe4   :  { %v198_v28 = vld [vmem:[#allocation2 + $0x28] sm:$0xff]  ;;  %v201_v29 = vld [vmem:[#allocation2 + $0x40] sm:$0xff]  ;;  %2880 = vmatprep.mubr.f32.mxu1 %v3825_v26  ;;  %v204_v33 = vld [vmem:[#allocation2 + $0x58] sm:$0xff]  ;;  %v3067_v34 = vpack.c.bf16 %v221_v25, %v218_v24 }
  0xe5   :  { %3058 = vmatpush1.bf16.msra.mxu0 %v3057_v14  ;;  %v217_v31 = vld [vmem:[#allocation2 + $0xc0] sm:$0xff]  ;;  %v3083_v32 = vpack.c.bf16 %v198_v28, %v195_v27  ;;  %v220_v35 = vld [vmem:[#allocation2 + $0xd8] sm:$0xff]  ;;  %v3087_v36 = vpack.c.bf16 %v204_v33, %v201_v29  ;;  %v207_v37 = vld [vmem:[#allocation2 + $0x70] sm:$0xff]  ;;  %v249_v14 = vsub.s32 1, %v3839_v13  ;;  %v245_v16 = vsub.s32 0, %v3839_v13 }
  0xe6   :  { %3060 = vmatprep.subr.bf16.mxu0 %v3059_v15  ;;  %v210_v38 = vld [vmem:[#allocation2 + $0x88] sm:$0xff]  ;;  %v224_v39 = vld [vmem:[#allocation2 + $0xf8] sm:$0xff]  ;;  %v227_v40 = vld [vmem:[#allocation2 + $0x110] sm:$0xff]  ;;  %v3069_v41 = vpack.c.bf16 %v220_v35, %v217_v31  ;;  %v253_v23 = vsub.s32 2, %v3839_v13 }
  0xe7   :  { %3084 = vmatprep.subr.bf16.mxu1 %v3083_v32  ;;  %v223_v42 = vld [vmem:[#allocation2 + $0xf0] sm:$0xff]  ;;  %v3091_v43 = vpack.c.bf16 %v210_v38, %v207_v37  ;;  %v3071_v44 = vpack.c.bf16 %v227_v40, %v224_v39  ;;  %v226_v45 = vld [vmem:[#allocation2 + $0x108] sm:$0xff]  ;;  %v213_v46 = vld [vmem:[#allocation2 + $0xa0] sm:$0xff] }
  0xe8   :  { %3086 = vmatpush3.bf16.msra.mxu1 %v3083_v32  ;;  %v216_v47 = vld [vmem:[#allocation2 + $0xb8] sm:$0xff]  ;;  %v230_v48 = vld [vmem:[#allocation2 + $0x128] sm:$0xff]  ;;  %v233_v49 = vld [vmem:[#allocation2 + $0x140] sm:$0xff]  ;;  %v3073_v50 = vpack.c.bf16 %v226_v45, %v223_v42 }
  0xe9   :  { %3062 = vmatpush1.bf16.msra.mxu0 %v3061_v20  ;;  %3088 = vmatprep.subr.bf16.mxu1 %v3087_v36  ;;  %v229_v51 = vld [vmem:[#allocation2 + $0x120] sm:$0xff]  ;;  %v3095_v52 = vpack.c.bf16 %v216_v47, %v213_v46  ;;  %v3075_v53 = vpack.c.bf16 %v233_v49, %v230_v48  ;;  %v232_v54 = vld [vmem:[#allocation2 + $0x138] sm:$0xff]  ;;  %v219_v55 = vld [vmem:[#allocation2 + $0xd0] sm:$0xff] }
  0xea   :  { %3064 = vmatprep.subr.bf16.mxu0 %v3063_v21  ;;  %v222_v56 = vld [vmem:[#allocation2 + $0xe8] sm:$0xff]  ;;  %v236_v57 = vld [vmem:[#allocation2 + $0x158] sm:$0xff]  ;;  %v239_v58 = vld [vmem:[#allocation2 + $0x170] sm:$0xff]  ;;  %v3077_v59 = vpack.c.bf16 %v232_v54, %v229_v51  ;;  %v3593_v51 = vmov 0.0|0.0  }
  0xeb   :  { %v235_v60 = vld [vmem:[#allocation2 + $0x150] sm:$0xff]  ;;  %v3099_v61 = vpack.c.bf16 %v222_v56, %v219_v55  ;;  %v3079_v62 = vpack.c.bf16 %v239_v58, %v236_v57  ;;  %v238_v63 = vld [vmem:[#allocation2 + $0x168] sm:$0xff]  ;;  %v225_v1 = vld [vmem:[#allocation2 + $0x100] sm:$0xff] }
  0xec   :  { %3090 = vmatpush3.bf16.msra.mxu1 %v3087_v36  ;;  %v228_v2 = vld [vmem:[#allocation2 + $0x118] sm:$0xff]  ;;  %v3081_v3 = vpack.c.bf16 %v238_v63, %v235_v60  ;;  %v231_v5 = vld [vmem:[#allocation2 + $0x130] sm:$0xff]  ;;  %v234_v6 = vld [vmem:[#allocation2 + $0x148] sm:$0xff] }
  0xed   :  { %3066 = vmatpush1.bf16.msra.mxu0 %v3065_v30  ;;  %3092 = vmatprep.subr.bf16.mxu1 %v3091_v43  ;;  %v3103_v4 = vpack.c.bf16 %v228_v2, %v225_v1  ;;  %v3107_v7 = vpack.c.bf16 %v234_v6, %v231_v5  ;;  %v237_v8 = vld [vmem:[#allocation2 + $0x160] sm:$0xff]  ;;  %v240_v9 = vld [vmem:[#allocation2 + $0x178] sm:$0xff]  ;;  %v192_v11 = vld [vmem:[%s4113_s0 + $0x8] sm:$0xff] }
  0xee   :  { %3068 = vmatprep.subr.bf16.mxu0 %v3067_v34  ;;  %v3111_v10 = vpack.c.bf16 %v240_v9, %v237_v8  ;;  %v241_v15 = vld [vmem:[#allocation4] sm:$0x7]  ;;  %v414_v56 = vld [vmem:[#allocation6 + $0x20] sm:$0xff]  ;;  %v415_v57 = vld [vmem:[#allocation6 + $0x28] sm:$0xff] }
  0xef   :  { %v3845_v17 = vrot.slane %v241_v15, %v249_v14  ;;  %v3849_v19 = vrot.slane %v241_v15, %v245_v16  ;;  %v254_v24 = vrot.slane %v241_v15, %v253_v23  ;;  %v416_v58 = vld [vmem:[#allocation6 + $0x30] sm:$0xff]  ;;  %v417_v60 = vld [vmem:[#allocation6 + $0x38] sm:$0xff]  ;;  %v410_v1 = vld [vmem:[#allocation6] sm:$0xff] }
  0xf0   :  { %3094 = vmatpush3.bf16.msra.mxu1 %v3091_v43  ;;  %v411_v2 = vld [vmem:[#allocation6 + $0x8] sm:$0xff]  ;;  %v412_v6 = vld [vmem:[#allocation6 + $0x10] sm:$0xff] }
  0xf1   :  { %3070 = vmatpush1.bf16.msra.mxu0 %v3069_v41  ;;  %3096 = vmatprep.subr.bf16.mxu1 %v3095_v52 }
  0xf2   :  { %3072 = vmatprep.subr.bf16.mxu0 %v3071_v44 }
  0xf4   :  { %3098 = vmatpush3.bf16.msra.mxu1 %v3095_v52 }
  0xf5   :  { %3074 = vmatpush1.bf16.msra.mxu0 %v3073_v50  ;;  %3100 = vmatprep.subr.bf16.mxu1 %v3099_v61 }
  0xf6   :  { %3076 = vmatprep.subr.bf16.mxu0 %v3075_v53 }
  0xf8   :  { %3102 = vmatpush3.bf16.msra.mxu1 %v3099_v61  ;;  %v3898_v61 = vpack.c.bf16 %v417_v60, %v416_v58 }
  0xf9   :  { %3078 = vmatpush1.bf16.msra.mxu0 %v3077_v59  ;;  %3104 = vmatprep.subr.bf16.mxu1 %v3103_v4  ;;  %v3895_v59 = vpack.c.bf16 %v415_v57, %v414_v56 }
  0xfa   :  { %3080 = vmatprep.subr.bf16.mxu0 %v3079_v62 }
  0xfc   :  { %3106 = vmatpush3.bf16.msra.mxu1 %v3103_v4  ;;  %v3904_v4 = vpack.c.bf16 %v411_v2, %v410_v1 }
  0xfd   :  { %3082 = vmatpush1.bf16.msra.mxu0 %v3081_v3  ;;  %3108 = vmatprep.subr.bf16.mxu1 %v3107_v7 }
  0xfe   :  { %2888 = vmatprep.subr.mxu0 %v3588_v0 }
 0x100   :  { %323 = vmatmul.mubr.f32.vlgmr.msra.gmra.mrb[0].mxu0 %v3825_v26  ;;  %3110 = vmatpush3.bf16.msra.mxu1 %v3107_v7  ;;  %v413_v7 = vld [vmem:[#allocation6 + $0x18] sm:$0xff] }
 0x101   :  { %328 = vmatprep.mubr.f32.mxu0 %v3588_v0  ;;  %3112 = vmatprep.subr.bf16.mxu1 %v3111_v10  ;;  %v3908_v8 = vpack.c.bf16 %v413_v7, %v412_v6  ;;  %v423_v6 = vld [vmem:[#allocation6 + $0x68] sm:$0xff]  ;;  %v424_v7 = vld [vmem:[#allocation6 + $0x70] sm:$0xff] }
 0x104   :  { %3114 = vmatpush3.bf16.msra.mxu1 %v3111_v10  ;;  %329 = vmatmul.mubr.f32.gmra.mrb[2].mxu0 %v192_v11 }
 0x105   :  { %2883 = vmatprep.subr.mxu1 %v3588_v0  ;;  %2890 = vmatprep.mubr.msk.f32.mxu0 %vm3589_vm0, %v3588_v0 }
 0x107   :  { %2881 = vmatmul.mubr.f32.vlgmr.msra.gmra.mrb[0].mxu1 %v192_v11 }
 0x108   :  { %2885 = vmatprep.mubr.msk.f32.mxu1 %vm3589_vm0, %v3588_v0 }
 0x1d3   :  { %v324_v18 = vpop.f32.mrb[0].mxu0 }
 0x1d4   :  { %v326_v20 = vpop.f32.mrb[1].mxu0  ;;  %v3855_v22 = vadd.f32 %v324_v18, %v3849_v19 }
 0x1d5   :  { %v327_v21 = vadd.f32 %v326_v20, %v3845_v17 }
 0x1d7   :  { %592 = vrot.lane.b32.xlu0 %v327_v21, %s3590_s20  ;;  %2884 = vmatpush3.xpose.msk.msra.mxu1 %vm427_vm1, %v327_v21  ;;  %v3888_v52 = vpop.f32.mrb[2].mxu0 }
 0x1d8   :  { %2893 = vmatprep.subr.mxu1 %v3588_v0  ;;  %v3890_v53 = vpop.f32.mrb[3].mxu0 }
 0x1d9   :  { %v3958_v2 = vadd.f32 %v3890_v53, %v3845_v17 }
 0x1da   :  { %2886 = vmatmul.mubr.msk.f32.vlgmr.msra.gmra.mrb[2].mxu1 %vm427_vm1, %v3855_v22  ;;  %v2882_v25 = vpop.f32.mrb[0].mxu1 }
 0x1db   :  { %590 = vrot.lane.b32.xlu0 %v3855_v22, %s3590_s20  ;;  %2895 = vmatprep.mubr.msk.f32.mxu1 %vm3589_vm0, %v3588_v0  ;;  %v3865_v27 = vadd.f32 %v2882_v25, %v254_v24  ;;  %v401_v28 = vpop.f32.mrb[1].mxu1 }
 0x1dc   :  { %v3867_v29 = vadd.f32 %v401_v28, %v254_v24 }
 0x1de   :  { %2889 = vmatpush3.msra.mxu0 %v3867_v29 }
 0x1df   :  { %2898 = vmatprep.subr.mxu0 %v3588_v0 }
 0x249   :  { %v593_v30 = vpop.permute.xlu0 %592 }
 0x24a   :  { %2894 = vmatpush3.xpose.msk.msra.mxu1 %vm427_vm1, %v593_v30 }
 0x24b   :  { %3115 = vmatprep.subr.bf16.mxu1 %v3593_v51 }
 0x24d   :  { %v591_v31 = vpop.permute.xlu0 %590 }
 0x24e   :  { %2896 = vmatmul.mubr.msk.f32.vlgmr.msra.gmra.mrb[4].mxu1 %vm427_vm1, %v591_v31 }
 0x24f   :  { %2911 = vmatprep.mubr.msk.f32.mxu1 %vm3589_vm0, %v3588_v0  ;;  %3117 = vmatpush3.bf16.msra.mxu1 %v3895_v59 }
 0x250   :  { %3118 = vmatprep.subr.bf16.mxu1 %v3593_v51 }
 0x253   :  { %3120 = vmatpush3.bf16.msra.mxu1 %v3898_v61 }
 0x254   :  { %2925 = vmatprep.subr.mxu1 %v3588_v0 }
 0x2ad   :  { %v500_v32 = vpop.f32.mrb[2].mxu1 }
 0x2ae   :  { %v504_v33 = vmul.f32 0.17677669, %v500_v32  ;;  %v2887_v34 = vpop.f32.mrb[3].mxu1 }
 0x2b0   :  { %v506_v35 = vsel %vm505_vm2, %v504_v33, -inf }
 0x2b1   :  { %507 = vmax.xlane.f32.xlu1 %v506_v35 }
 0x321   :  { %v664_v36 = vpop.f32.mrb[4].mxu1 }
 0x322   :  { %v668_v37 = vmul.f32 0.17677669, %v664_v36  ;;  %v2897_v38 = vpop.f32.mrb[5].mxu1 }
 0x324   :  { %v669_v39 = vsel %vm505_vm2, %v668_v37, -inf }
 0x325   :  { %670 = vmax.xlane.f32.xlu1 %v669_v39  ;;  %v418_v39 = vld [vmem:[#allocation6 + $0x40] sm:$0xff] }
 0x33e   :  { %v508_v40 = vpop.xlane.xlu1 %507 }
 0x33f   :  { %v509_v41 = vsub.f32 %v504_v33, %v508_v40  ;;  %v419_v40 = vld [vmem:[#allocation6 + $0x48] sm:$0xff] }
 0x341   :  { %v510_v42 = vmul.f32 1.442695, %v509_v41  ;;  %v420_v41 = vld [vmem:[#allocation6 + $0x50] sm:$0xff] }
 0x343   :  { %3251 = vpow2.f32 %v510_v42  ;;  %v3933_v42 = vpack.c.bf16 %v419_v40, %v418_v39 }
 0x34d   :  { %v3252_v43 = vpop.eup %3251 }
 0x34e   :  { %v512_v44 = vsel %vm505_vm2, %v3252_v43, 0.0 }
 0x34f   :  { %513 = vadd.xlane.f32.xlu0 %v512_v44 }
 0x365   :  { %993 = vrot.lane.b32.xlu0 %v3867_v29, %s3591_s2 }
 0x369   :  { %1145 = vrot.lane.b32.xlu0 %v327_v21, %s3592_s26 }
 0x3b2   :  { %v671_v45 = vpop.xlane.xlu1 %670 }
 0x3b3   :  { %v672_v46 = vsub.f32 %v668_v37, %v671_v45 }
 0x3b5   :  { %v673_v47 = vmul.f32 1.442695, %v672_v46 }
 0x3b7   :  { %3253 = vpow2.f32 %v673_v47 }
 0x3c1   :  { %v3254_v48 = vpop.eup %3253 }
 0x3c2   :  { %v675_v49 = vsel %vm505_vm2, %v3254_v48, 0.0 }
 0x3c3   :  { %676 = vadd.xlane.f32.xlu1 %v675_v49 }
 0x3d4   :  { %681 = vrot.lane.b32.xlu1 %v3867_v29, %s3590_s20 }
 0x3d8   :  { %905 = vrot.lane.b32.xlu1 %v327_v21, %s3591_s2 }
 0x3dc   :  { %v514_v50 = vpop.xlane.xlu0 %513  ;;  %903 = vrot.lane.b32.xlu1 %v3855_v22, %s3591_s2 }
 0x3dd   :  { %3255 = vrcp.f32 %v514_v50 }
 0x3e0   :  { %v994_v10 = vpop.permute.xlu0 %993 }
 0x3e4   :  { %v1146_v45 = vpop.permute.xlu0 %1145 }
 0x3e7   :  { %v3256_v54 = vpop.eup %3255 }
 0x3e8   :  { %v516_v55 = vmul.f32 %v3256_v54, %v3252_v43  ;;  %v421_v43 = vld [vmem:[#allocation6 + $0x58] sm:$0xff] }
 0x3e9   :  { %v3936_v44 = vpack.c.bf16 %v421_v43, %v420_v41 }
 0x3ea   :  { %2891 = vmatmul.mubr.msk.f32.vlgmr.msra.gmra.mrb[4].mxu0 %vm505_vm2, %v516_v55 }
 0x3eb   :  { %2900 = vmatprep.mubr.msk.f32.mxu0 %vm3589_vm0, %v3588_v0 }
 0x450   :  { %v677_v62 = vpop.xlane.xlu1 %676 }
 0x451   :  { %3257 = vrcp.f32 %v677_v62 }
 0x454   :  { %v682_v63 = vpop.permute.xlu1 %681 }
 0x455   :  { %2899 = vmatpush3.msra.mxu0 %v682_v63 }
 0x456   :  { %3121 = vmatprep.subr.bf16.mxu0 %v3593_v51 }
 0x458   :  { %v906_v12 = vpop.permute.xlu1 %905 }
 0x45b   :  { %v3258_v3 = vpop.eup %3257 }
 0x45c   :  { %v679_v5 = vmul.f32 %v3258_v3, %v3254_v48  ;;  %v904_v20 = vpop.permute.xlu1 %903  ;;  %v3964_v3 = vadd.f32 %v3888_v52, %v3849_v19 }
 0x45e   :  { %2901 = vmatmul.mubr.msk.f32.vlgmr.msra.gmra.mrb[6].mxu0 %vm505_vm2, %v679_v5  ;;  %v422_v5 = vld [vmem:[#allocation6 + $0x60] sm:$0xff] }
 0x45f   :  { %3123 = vmatpush3.bf16.msra.mxu0 %v3904_v4  ;;  %2922 = vmatprep.mubr.msk.f32.mxu0 %vm3589_vm0, %v3588_v0 }
 0x460   :  { %3124 = vmatprep.subr.bf16.mxu0 %v3593_v51 }
 0x463   :  { %3126 = vmatpush3.bf16.msra.mxu0 %v3908_v8 }
 0x464   :  { %2930 = vmatprep.subr.mxu0 %v3588_v0 }
 0x4bd   :  { %v586_v9 = vpop.f32.mrb[4].mxu0 }
 0x4be   :  { %v2892_v11 = vpop.f32.mrb[5].mxu0  ;;  %2923 = vmatmul.mubr.msk.f32.vlgmr.msra.gmra.mrb[8].mxu0 %vm427_vm1, %v586_v9  ;;  %v3968_v9 = vpack.c.bf16 %v423_v6, %v422_v5 }
 0x4bf   :  { %2931 = vmatpush3.msra.mxu0 %v994_v10  ;;  %2932 = vmatprep.mubr.msk.f32.mxu0 %vm3589_vm0, %v3588_v0 }
 0x4c0   :  { %2946 = vmatprep.subr.mxu0 %v3588_v0 }
 0x531   :  { %v753_v15 = vpop.f32.mrb[6].mxu0 }
 0x532   :  { %v2902_v18 = vpop.f32.mrb[7].mxu0  ;;  %2912 = vmatmul.mubr.msk.f32.vlgmr.msra.gmra.mrb[6].mxu1 %vm427_vm1, %v753_v15 }
 0x533   :  { %2926 = vmatpush3.xpose.msk.msra.mxu1 %vm427_vm1, %v906_v12  ;;  %2927 = vmatprep.mubr.msk.f32.mxu1 %vm3589_vm0, %v3588_v0 }
 0x534   :  { %3127 = vmatprep.subr.bf16.mxu1 %v3593_v51 }
 0x536   :  { %2928 = vmatmul.mubr.msk.f32.vlgmr.msra.gmra.mrb[8].mxu1 %vm427_vm1, %v904_v20 }
 0x537   :  { %2943 = vmatprep.mubr.msk.f32.mxu1 %vm3589_vm0, %v3588_v0  ;;  %3129 = vmatpush3.bf16.msra.mxu1 %v3933_v42 }
 0x538   :  { %3130 = vmatprep.subr.bf16.mxu1 %v3593_v51 }
 0x53b   :  { %3132 = vmatpush3.bf16.msra.mxu1 %v3936_v44 }
 0x53c   :  { %3133 = vmatprep.subr.bf16.mxu1 %v3593_v51 }
 0x591   :  { %v899_v21 = vpop.f32.mrb[8].mxu0 }
 0x592   :  { %v2924_v23 = vpop.f32.mrb[9].mxu0 }
 0x605   :  { %v826_v24 = vpop.f32.mrb[6].mxu1 }
 0x606   :  { %v3927_v25 = vadd.f32 %v899_v21, %v826_v24  ;;  %v2913_v28 = vpop.f32.mrb[7].mxu1 }
 0x609   :  { %v977_v30 = vpop.f32.mrb[8].mxu1 }
 0x60a   :  { %v981_v31 = vmul.f32 0.17677669, %v977_v30  ;;  %v2929_v32 = vpop.f32.mrb[9].mxu1 }
 0x60c   :  { %v982_v33 = vsel %vm505_vm2, %v981_v31, -inf }
 0x60d   :  { %983 = vmax.xlane.f32.xlu1 %v982_v33 }
 0x69a   :  { %v984_v34 = vpop.xlane.xlu1 %983 }
 0x69b   :  { %v985_v35 = vsub.f32 %v981_v31, %v984_v34 }
 0x69d   :  { %v986_v36 = vmul.f32 1.442695, %v985_v35 }
 0x69f   :  { %3259 = vpow2.f32 %v986_v36 }
 0x6a9   :  { %v3260_v37 = vpop.eup %3259 }
 0x6aa   :  { %v988_v38 = vsel %vm505_vm2, %v3260_v37, 0.0 }
 0x6ab   :  { %989 = vadd.xlane.f32.xlu0 %v988_v38 }
 0x6c1   :  { %1143 = vrot.lane.b32.xlu0 %v3855_v22, %s3592_s26 }
 0x738   :  { %v990_v46 = vpop.xlane.xlu0 %989 }
 0x739   :  { %3261 = vrcp.f32 %v990_v46 }
 0x73c   :  { %v1144_v48 = vpop.permute.xlu0 %1143 }
 0x743   :  { %v3262_v22 = vpop.eup %3261 }
 0x744   :  { %v992_v47 = vmul.f32 %v3262_v22, %v3260_v37 }
 0x746   :  { %2933 = vmatmul.mubr.msk.f32.vlgmr.msra.gmra.mrb[10].mxu0 %vm505_vm2, %v992_v47 }
 0x747   :  { %2947 = vmatpush3.xpose.msk.msra.mxu0 %vm427_vm1, %v1146_v45  ;;  %2948 = vmatprep.mubr.msk.f32.mxu0 %vm3589_vm0, %v3588_v0 }
 0x748   :  { %2951 = vmatprep.subr.mxu0 %v3588_v0 }
 0x74a   :  { %2949 = vmatmul.mubr.msk.f32.vlgmr.msra.gmra.mrb[12].mxu0 %vm427_vm1, %v1144_v48 }
 0x74b   :  { %2953 = vmatprep.mubr.msk.f32.mxu0 %vm3589_vm0, %v3588_v0 }
 0x819   :  { %v1065_v49 = vpop.f32.mrb[10].mxu0 }
 0x81a   :  { %v2934_v50 = vpop.f32.mrb[11].mxu0  ;;  %2944 = vmatmul.mubr.msk.f32.vlgmr.msra.gmra.mrb[10].mxu1 %vm427_vm1, %v1065_v49 }
 0x81b   :  { %2964 = vmatprep.mubr.msk.f32.mxu1 %vm3589_vm0, %v3588_v0  ;;  %3135 = vmatpush3.bf16.msra.mxu1 %v3968_v9 }
 0x81c   :  { %3136 = vmatprep.subr.bf16.mxu1 %v3593_v51 }
 0x81d   :  { %v1217_v54 = vpop.f32.mrb[12].mxu0 }
 0x81e   :  { %v1221_v55 = vmul.f32 0.17677669, %v1217_v54  ;;  %v2950_v56 = vpop.f32.mrb[13].mxu0 }
 0x820   :  { %v1222_v57 = vsel %vm505_vm2, %v1221_v55, -inf }
 0x821   :  { %1223 = vmax.xlane.f32.xlu0 %v1222_v57 }
 0x8ae   :  { %v1224_v58 = vpop.xlane.xlu0 %1223 }
 0x8af   :  { %v1225_v60 = vsub.f32 %v1221_v55, %v1224_v58 }
 0x8b1   :  { %v1226_v62 = vmul.f32 1.442695, %v1225_v60 }
 0x8b3   :  { %3263 = vpow2.f32 %v1226_v62 }
 0x8bd   :  { %v3264_v63 = vpop.eup %3263 }
 0x8be   :  { %v1228_v1 = vsel %vm505_vm2, %v3264_v63, 0.0 }
 0x8bf   :  { %1229 = vadd.xlane.f32.xlu1 %v1228_v1 }
 0x8d0   :  { %1233 = vrot.lane.b32.xlu1 %v3867_v29, %s3592_s26  ;;  %v425_v29 = vld [vmem:[#allocation6 + $0x78] sm:$0xff] }
 0x8d1   :  { %v3971_v17 = vpack.c.bf16 %v425_v29, %v424_v7 }
 0x8d3   :  { %3138 = vmatpush3.bf16.msra.mxu1 %v3971_v17 }
 0x8d4   :  { %1546 = vrot.lane.b32.xlu1 %v3958_v2, %s3590_s20  ;;  %2977 = vmatprep.subr.mxu1 %v3588_v0 }
 0x8d8   :  { %1544 = vrot.lane.b32.xlu1 %v3964_v3, %s3590_s20 }
 0x8ed   :  { %v1138_v19 = vpop.f32.mrb[10].mxu1 }
 0x8ee   :  { %v1142_v52 = vadd.f32 %v1138_v19, %v3927_v25  ;;  %v2945_v53 = vpop.f32.mrb[11].mxu1 }
 0x94c   :  { %v1230_v10 = vpop.xlane.xlu1 %1229 }
 0x94d   :  { %3265 = vrcp.f32 %v1230_v10 }
 0x950   :  { %v1234_v11 = vpop.permute.xlu1 %1233 }
 0x951   :  { %2952 = vmatpush3.msra.mxu0 %v1234_v11 }
 0x952   :  { %2967 = vmatprep.subr.mxu0 %v3588_v0 }
 0x954   :  { %v1547_v18 = vpop.permute.xlu1 %1546 }
 0x957   :  { %v3266_v12 = vpop.eup %3265 }
 0x958   :  { %v1232_v15 = vmul.f32 %v3266_v12, %v3264_v63  ;;  %v1545_v23 = vpop.permute.xlu1 %1544 }
 0x95a   :  { %2954 = vmatmul.mubr.msk.f32.vlgmr.msra.gmra.mrb[14].mxu0 %vm505_vm2, %v1232_v15 }
 0x95b   :  { %2968 = vmatpush3.xpose.msk.msra.mxu0 %vm427_vm1, %v3958_v2  ;;  %2969 = vmatprep.mubr.msk.f32.mxu0 %vm3589_vm0, %v3588_v0 }
 0x95c   :  { %2972 = vmatprep.subr.mxu0 %v3588_v0 }
 0x95e   :  { %2970 = vmatmul.mubr.msk.f32.vlgmr.msra.gmra.mrb[16].mxu0 %vm427_vm1, %v3964_v3 }
 0x95f   :  { %2973 = vmatpush3.msra.mxu0 %v3865_v27  ;;  %2974 = vmatprep.mubr.msk.f32.mxu0 %vm3589_vm0, %v3588_v0 }
 0x960   :  { %2982 = vmatprep.subr.mxu0 %v3588_v0 }
 0xa2d   :  { %v1305_v20 = vpop.f32.mrb[14].mxu0 }
 0xa2e   :  { %v2955_v21 = vpop.f32.mrb[15].mxu0  ;;  %2965 = vmatmul.mubr.msk.f32.vlgmr.msra.gmra.mrb[12].mxu1 %vm427_vm1, %v1305_v20 }
 0xa2f   :  { %2978 = vmatpush3.xpose.msk.msra.mxu1 %vm427_vm1, %v1547_v18  ;;  %2979 = vmatprep.mubr.msk.f32.mxu1 %vm3589_vm0, %v3588_v0 }
 0xa30   :  { %3139 = vmatprep.subr.bf16.mxu1 %v3593_v51 }
 0xa31   :  { %v1455_v24 = vpop.f32.mrb[16].mxu0 }
 0xa32   :  { %v1459_v25 = vmul.f32 0.17677669, %v1455_v24  ;;  %v2971_v28 = vpop.f32.mrb[17].mxu0  ;;  %2980 = vmatmul.mubr.msk.f32.vlgmr.msra.gmra.mrb[14].mxu1 %vm427_vm1, %v1545_v23 }
 0xa33   :  { %3141 = vmatpush3.bf16.msra.mxu1 %v3895_v59  ;;  %2995 = vmatprep.mubr.msk.f32.mxu1 %vm3589_vm0, %v3588_v0 }
 0xa34   :  { %v1460_v30 = vsel %vm505_vm2, %v1459_v25, -inf  ;;  %3142 = vmatprep.subr.bf16.mxu1 %v3593_v51 }
 0xa35   :  { %1461 = vmax.xlane.f32.xlu1 %v1460_v30 }
 0xa37   :  { %3144 = vmatpush3.bf16.msra.mxu1 %v3898_v61 }
 0xa38   :  { %3009 = vmatprep.subr.mxu1 %v3588_v0 }
 0xa46   :  { %1857 = vrot.lane.b32.xlu1 %v3964_v3, %s3591_s2 }
 0xac2   :  { %v1462_v31 = vpop.xlane.xlu1 %1461 }
 0xac3   :  { %v1463_v32 = vsub.f32 %v1459_v25, %v1462_v31 }
 0xac5   :  { %v1464_v33 = vmul.f32 1.442695, %v1463_v32 }
 0xac7   :  { %3267 = vpow2.f32 %v1464_v33 }
 0xad1   :  { %v3268_v40 = vpop.eup %3267 }
 0xad2   :  { %v1466_v61 = vsel %vm505_vm2, %v3268_v40, 0.0 }
 0xb01   :  { %v1378_v59 = vpop.f32.mrb[12].mxu1 }
 0xb02   :  { %v4005_v34 = vadd.f32 %v1378_v59, %v1142_v52  ;;  %v2966_v35 = vpop.f32.mrb[13].mxu1 }
 0xb03   :  { %v4068_v35 = vld [vmem:[#allocation7] ss:$0 sm:$0xff] }
 0xb05   :  { %v1618_v36 = vpop.f32.mrb[14].mxu1 }
 0xb06   :  { %v1622_v37 = vmul.f32 0.17677669, %v1618_v36  ;;  %v2981_v38 = vpop.f32.mrb[15].mxu1  ;;  %v2343_v36 = vadd.f32 %v4068_v35, %v4005_v34 }
 0xb07   :  { %v2389_v38 = vld [vmem:[#allocation12 + $0x8] sm:$0xff] }
 0xb08   :  { %v1623_v39 = vsel %vm505_vm2, %v1622_v37, -inf }
 0xb09   :  { %1624 = vmax.xlane.f32.xlu0 %v1623_v39 }
 0xb0d   :  { %1467 = vadd.xlane.f32.xlu0 %v1466_v61 }
 0xb96   :  { %v1625_v41 = vpop.xlane.xlu0 %1624 }
 0xb97   :  { %v1626_v43 = vsub.f32 %v1622_v37, %v1625_v41  ;;  %v2345_v37 = vadd.f32 %v2343_v36, %v3825_v26  ;;  %v2418_v36 = vld [vmem:[#allocation12 + $0xf0] sm:$0xff] }
 0xb99   :  { %v1627_v45 = vmul.f32 1.442695, %v1626_v43 }
 0xb9a   :  { %v1468_v46 = vpop.xlane.xlu0 %1467 }
 0xb9b   :  { %3269 = vpow2.f32 %v1627_v45 }
 0xb9c   :  { %3271 = vrcp.f32 %v1468_v46 }
 0xba5   :  { %v3270_v22 = vpop.eup %3269 }
 0xba6   :  { %v3272_v47 = vpop.eup %3271  ;;  %v1629_v48 = vsel %vm505_vm2, %v3270_v22, 0.0 }
 0xba7   :  { %v1470_v49 = vmul.f32 %v3272_v47, %v3268_v40  ;;  %1630 = vadd.xlane.f32.xlu0 %v1629_v48  ;;  %v2390_v47 = vld [vmem:[#allocation12 + $0x10] sm:$0xff]  ;;  %v2393_v48 = vld [vmem:[#allocation12 + $0x28] sm:$0xff] }
 0xba9   :  { %2975 = vmatmul.mubr.msk.f32.vlgmr.msra.gmra.mrb[18].mxu0 %vm505_vm2, %v1470_v49  ;;  %v2395_v49 = vld [vmem:[#allocation12 + $0x38] sm:$0xff] }
 0xbaa   :  { %2984 = vmatprep.mubr.msk.f32.mxu0 %vm3589_vm0, %v3588_v0 }
 0xbbd   :  { %1635 = vrot.lane.b32.xlu0 %v3865_v27, %s3590_s20 }
 0xbc1   :  { %1859 = vrot.lane.b32.xlu0 %v3958_v2, %s3591_s2 }
 0xc34   :  { %v1631_v50 = vpop.xlane.xlu0 %1630 }
 0xc35   :  { %3273 = vrcp.f32 %v1631_v50 }
 0xc38   :  { %v1636_v54 = vpop.permute.xlu0 %1635 }
 0xc39   :  { %2983 = vmatpush3.msra.mxu0 %v1636_v54 }
 0xc3a   :  { %3145 = vmatprep.subr.bf16.mxu0 %v3593_v51 }
 0xc3c   :  { %v1860_v62 = vpop.permute.xlu0 %1859 }
 0xc3f   :  { %v3274_v55 = vpop.eup %3273 }
 0xc40   :  { %v1633_v56 = vmul.f32 %v3274_v55, %v3270_v22  ;;  %v2388_v22 = vld [vmem:[#allocation12] sm:$0xff] }
 0xc41   :  { %v3165_v54 = vpack.c.bf16 %v2390_v47, %v2388_v22  ;;  %v4086_v22 = vld [vmem:[#allocation10] ss:$0 sm:$0xff] }
 0xc42   :  { %2985 = vmatmul.mubr.msk.f32.vlgmr.msra.gmra.mrb[20].mxu0 %vm505_vm2, %v1633_v56  ;;  %v3167_v56 = vpack.c.bf16 %v2395_v49, %v2393_v48  ;;  %v2513_v48 = vld [vmem:[#allocation15] sm:$0xff]  ;;  %v2514_v49 = vld [vmem:[#allocation15 + $0x8] sm:$0xff] }
 0xc43   :  { %3147 = vmatpush3.bf16.msra.mxu0 %v3904_v4  ;;  %3006 = vmatprep.mubr.msk.f32.mxu0 %vm3589_vm0, %v3588_v0  ;;  %v1858_v4 = vpop.permute.xlu1 %1857 }
 0xc44   :  { %3148 = vmatprep.subr.bf16.mxu0 %v3593_v51 }
 0xc47   :  { %3150 = vmatpush3.bf16.msra.mxu0 %v3908_v8 }
 0xc48   :  { %3014 = vmatprep.subr.mxu0 %v3588_v0 }
 0xc7c   :  { %v1540_v57 = vpop.f32.mrb[18].mxu0 }
 0xc7d   :  { %v2976_v58 = vpop.f32.mrb[19].mxu0  ;;  %3007 = vmatmul.mubr.msk.f32.vlgmr.msra.gmra.mrb[22].mxu0 %vm427_vm1, %v1540_v57  ;;  %v2392_v57 = vld [vmem:[#allocation12 + $0x20] sm:$0xff] }
 0xc7e   :  { %3016 = vmatprep.mubr.msk.f32.mxu0 %vm3589_vm0, %v3588_v0  ;;  %v2394_v58 = vld [vmem:[#allocation12 + $0x30] sm:$0xff] }
 0xd15   :  { %v1707_v60 = vpop.f32.mrb[20].mxu0 }
 0xd16   :  { %v2986_v63 = vpop.f32.mrb[21].mxu0  ;;  %2996 = vmatmul.mubr.msk.f32.vlgmr.msra.gmra.mrb[16].mxu1 %vm427_vm1, %v1707_v60  ;;  %v2397_v60 = vld [vmem:[#allocation12 + $0x48] sm:$0xff] }
 0xd17   :  { %3010 = vmatpush3.xpose.msk.msra.mxu1 %vm427_vm1, %v1860_v62  ;;  %3011 = vmatprep.mubr.msk.f32.mxu1 %vm3589_vm0, %v3588_v0  ;;  %v2399_v62 = vld [vmem:[#allocation12 + $0x58] sm:$0xff]  ;;  %v3169_v63 = vpack.c.bf16 %v2394_v58, %v2392_v57 }
 0xd18   :  { %3151 = vmatprep.subr.bf16.mxu1 %v3593_v51  ;;  %v2515_v57 = vld [vmem:[#allocation15 + $0x10] sm:$0xff]  ;;  %v2516_v58 = vld [vmem:[#allocation15 + $0x18] sm:$0xff] }
 0xd1a   :  { %3012 = vmatmul.mubr.msk.f32.vlgmr.msra.gmra.mrb[18].mxu1 %vm427_vm1, %v1858_v4  ;;  %v3171_v4 = vpack.c.bf16 %v2399_v62, %v2397_v60  ;;  %v2533_v60 = vld [vmem:[#allocation15 + $0xa0] sm:$0xff]  ;;  %v2534_v62 = vld [vmem:[#allocation15 + $0xa8] sm:$0xff] }
 0xd1b   :  { %3153 = vmatpush3.bf16.msra.mxu1 %v3933_v42  ;;  %3027 = vmatprep.mubr.msk.f32.mxu1 %vm3589_vm0, %v3588_v0 }
 0xd1c   :  { %3154 = vmatprep.subr.bf16.mxu1 %v3593_v51 }
 0xd1f   :  { %3156 = vmatpush3.bf16.msra.mxu1 %v3936_v44 }
 0xd20   :  { %3157 = vmatprep.subr.bf16.mxu1 %v3593_v51 }
 0xd50   :  { %v1853_v8 = vpop.f32.mrb[22].mxu0 }
 0xd51   :  { %v3008_v1 = vpop.f32.mrb[23].mxu0 }
 0xd52   :  { %v2398_v1 = vld [vmem:[#allocation12 + $0x50] sm:$0xff] }
 0xde9   :  { %v1780_v5 = vpop.f32.mrb[16].mxu1 }
 0xdea   :  { %v4040_v6 = vadd.f32 %v1853_v8, %v1780_v5  ;;  %v2997_v7 = vpop.f32.mrb[17].mxu1  ;;  %v2396_v8 = vld [vmem:[#allocation12 + $0x40] sm:$0xff] }
 0xdeb   :  { %v3173_v5 = vpack.c.bf16 %v2398_v1, %v2396_v8  ;;  %v2403_v7 = vld [vmem:[#allocation12 + $0x78] sm:$0xff]  ;;  %v3203_v8 = vpack.c.bf16 %v2534_v62, %v2533_v60  ;;  %v2517_v1 = vld [vmem:[#allocation15 + $0x20] sm:$0xff] }
 0xded   :  { %v1931_v29 = vpop.f32.mrb[18].mxu1 }
 0xdee   :  { %v1935_v19 = vmul.f32 0.17677669, %v1931_v29  ;;  %v3013_v52 = vpop.f32.mrb[19].mxu1 }
 0xdef   :  { %v2402_v52 = vld [vmem:[#allocation12 + $0x70] sm:$0xff] }
 0xdf0   :  { %v1936_v42 = vsel %vm505_vm2, %v1935_v19, -inf }
 0xdf1   :  { %1937 = vmax.xlane.f32.xlu0 %v1936_v42 }
 0xe07   :  { %1947 = vrot.lane.b32.xlu0 %v3865_v27, %s3591_s2 }
 0xe0b   :  { %2097 = vrot.lane.b32.xlu0 %v3964_v3, %s3592_s26 }
 0xe7e   :  { %v1938_v44 = vpop.xlane.xlu0 %1937 }
 0xe7f   :  { %v1939_v53 = vsub.f32 %v1935_v19, %v1938_v44  ;;  %v2400_v19 = vld [vmem:[#allocation12 + $0x60] sm:$0xff]  ;;  %v2405_v44 = vld [vmem:[#allocation12 + $0x88] sm:$0xff] }
 0xe80   :  { %v3177_v42 = vpack.c.bf16 %v2402_v52, %v2400_v19  ;;  %v2519_v19 = vld [vmem:[#allocation15 + $0x30] sm:$0xff]  ;;  %v2520_v52 = vld [vmem:[#allocation15 + $0x38] sm:$0xff] }
 0xe81   :  { %v1940_v10 = vmul.f32 1.442695, %v1939_v53  ;;  %v2407_v53 = vld [vmem:[#allocation12 + $0x98] sm:$0xff] }
 0xe82   :  { %v1948_v11 = vpop.permute.xlu0 %1947 }
 0xe83   :  { %3275 = vpow2.f32 %v1940_v10  ;;  %3015 = vmatpush3.msra.mxu0 %v1948_v11  ;;  %v3179_v10 = vpack.c.bf16 %v2407_v53, %v2405_v44  ;;  %v2404_v11 = vld [vmem:[#allocation12 + $0x80] sm:$0xff]  ;;  %v2538_v44 = vld [vmem:[#allocation15 + $0xc8] sm:$0xff]  ;;  %v3209_v53 = vpack.c.bf16 %v2520_v52, %v2519_v19 }
 0xe84   :  { %3030 = vmatprep.subr.mxu0 %v3588_v0 }
 0xe86   :  { %v2098_v23 = vpop.permute.xlu0 %2097 }
 0xe8d   :  { %v3276_v12 = vpop.eup %3275 }
 0xe8e   :  { %v1942_v15 = vsel %vm505_vm2, %v3276_v12, 0.0 }
 0xe8f   :  { %1943 = vadd.xlane.f32.xlu1 %v1942_v15  ;;  %v2409_v15 = vld [vmem:[#allocation12 + $0xa8] sm:$0xff] }
 0xea0   :  { %2099 = vrot.lane.b32.xlu1 %v3958_v2, %s3592_s26 }
 0xf1c   :  { %v1944_v18 = vpop.xlane.xlu1 %1943 }
 0xf1d   :  { %3277 = vrcp.f32 %v1944_v18 }
 0xf20   :  { %v2100_v3 = vpop.permute.xlu1 %2099 }
 0xf27   :  { %v3278_v20 = vpop.eup %3277 }
 0xf28   :  { %v1946_v21 = vmul.f32 %v3278_v20, %v3276_v12  ;;  %v2406_v12 = vld [vmem:[#allocation12 + $0x90] sm:$0xff]  ;;  %v2411_v20 = vld [vmem:[#allocation12 + $0xb8] sm:$0xff] }
 0xf29   :  { %v3181_v18 = vpack.c.bf16 %v2406_v12, %v2404_v11  ;;  %v2521_v11 = vld [vmem:[#allocation15 + $0x40] sm:$0xff]  ;;  %v2522_v12 = vld [vmem:[#allocation15 + $0x48] sm:$0xff] }
 0xf2a   :  { %3017 = vmatmul.mubr.msk.f32.vlgmr.msra.gmra.mrb[24].mxu0 %vm505_vm2, %v1946_v21  ;;  %v2408_v21 = vld [vmem:[#allocation12 + $0xa0] sm:$0xff] }
 0xf2b   :  { %3031 = vmatpush3.xpose.msk.msra.mxu0 %vm427_vm1, %v2100_v3  ;;  %3032 = vmatprep.mubr.msk.f32.mxu0 %vm3589_vm0, %v3588_v0  ;;  %v2410_v3 = vld [vmem:[#allocation12 + $0xb0] sm:$0xff] }
 0xf2c   :  { %3035 = vmatprep.subr.mxu0 %v3588_v0 }
 0xf2e   :  { %3033 = vmatmul.mubr.msk.f32.vlgmr.msra.gmra.mrb[26].mxu0 %vm427_vm1, %v2098_v23  ;;  %v3183_v23 = vpack.c.bf16 %v2411_v20, %v2409_v15  ;;  %v2539_v15 = vld [vmem:[#allocation15 + $0xd0] sm:$0xff]  ;;  %v3213_v20 = vpack.c.bf16 %v2522_v12, %v2521_v11 }
 0xf2f   :  { %3037 = vmatprep.mubr.msk.f32.mxu0 %vm3589_vm0, %v3588_v0 }
 0xffd   :  { %v2019_v2 = vpop.f32.mrb[24].mxu0 }
 0xffe   :  { %v3018_v24 = vpop.f32.mrb[25].mxu0  ;;  %3028 = vmatmul.mubr.msk.f32.vlgmr.msra.gmra.mrb[20].mxu1 %vm427_vm1, %v2019_v2  ;;  %v2413_v2 = vld [vmem:[#allocation12 + $0xc8] sm:$0xff] }
 0xfff   :  { %3159 = vmatpush3.bf16.msra.mxu1 %v3968_v9  ;;  %3048 = vmatprep.mubr.msk.f32.mxu1 %vm3589_vm0, %v3588_v0  ;;  %v2415_v24 = vld [vmem:[#allocation12 + $0xd8] sm:$0xff] }
0x1000   :  { %3160 = vmatprep.subr.bf16.mxu1 %v3593_v51 }
0x1001   :  { %v2171_v25 = vpop.f32.mrb[26].mxu0 }
0x1002   :  { %v2175_v28 = vmul.f32 0.17677669, %v2171_v25  ;;  %v3034_v30 = vpop.f32.mrb[27].mxu0  ;;  %v3185_v25 = vpack.c.bf16 %v2410_v3, %v2408_v21  ;;  %v2523_v3 = vld [vmem:[#allocation15 + $0x50] sm:$0xff] }
0x1003   :  { %3162 = vmatpush3.bf16.msra.mxu1 %v3971_v17  ;;  %v2412_v30 = vld [vmem:[#allocation12 + $0xc0] sm:$0xff] }
0x1004   :  { %v2176_v31 = vsel %vm505_vm2, %v2175_v28, -inf }
0x1005   :  { %2177 = vmax.xlane.f32.xlu0 %v2176_v31  ;;  %v2414_v31 = vld [vmem:[#allocation12 + $0xd0] sm:$0xff] }
0x101b   :  { %2187 = vrot.lane.b32.xlu0 %v3865_v27, %s3592_s26  ;;  %v2391_v27 = vld [vmem:[#allocation12 + $0x18] sm:$0xff] }
0x101c   :  { %v3163_v39 = vpack.c.bf16 %v2391_v27, %v2389_v38  ;;  %v2530_v38 = vld [vmem:[#allocation15 + $0x88] sm:$0xff] }
0x1092   :  { %v2178_v32 = vpop.xlane.xlu0 %2177 }
0x1093   :  { %v2179_v33 = vsub.f32 %v2175_v28, %v2178_v32  ;;  %v3187_v28 = vpack.c.bf16 %v2415_v24, %v2413_v2  ;;  %v2417_v32 = vld [vmem:[#allocation12 + $0xe8] sm:$0xff] }
0x1094   :  { %v2541_v2 = vld [vmem:[#allocation15 + $0xe0] sm:$0xff]  ;;  %v2542_v24 = vld [vmem:[#allocation15 + $0xe8] sm:$0xff] }
0x1095   :  { %v2180_v59 = vmul.f32 1.442695, %v2179_v33  ;;  %v2419_v33 = vld [vmem:[#allocation12 + $0xf8] sm:$0xff] }
0x1096   :  { %v2188_v9 = vpop.permute.xlu0 %2187 }
0x1097   :  { %3279 = vpow2.f32 %v2180_v59  ;;  %3036 = vmatpush3.msra.mxu0 %v2188_v9  ;;  %v3189_v59 = vpack.c.bf16 %v2414_v31, %v2412_v30  ;;  %v3191_v9 = vpack.c.bf16 %v2419_v33, %v2417_v32  ;;  %v2525_v30 = vld [vmem:[#allocation15 + $0x60] sm:$0xff]  ;;  %v2526_v31 = vld [vmem:[#allocation15 + $0x68] sm:$0xff]  ;;  %v2543_v33 = vld [vmem:[#allocation15 + $0xf0] sm:$0xff] }
0x1098   :  { %3164 = vmatprep.subr.bf16.mxu0 %v3163_v39  ;;  %v3221_v32 = vpack.c.bf16 %v2526_v31, %v2525_v30  ;;  %v2718_v30 = vld [vmem:[#allocation18] ss:$0 sm:$0xff] }
0x10a1   :  { %v3280_v51 = vpop.eup %3279 }
0x10a2   :  { %v2182_v17 = vsel %vm505_vm2, %v3280_v51, 0.0 }
0x10a3   :  { %2183 = vadd.xlane.f32.xlu1 %v2182_v17 }
0x10a7   :  { %2349 = vadd.xlane.f32.xlu1 %v2345_v37 }
0x10d1   :  { %v2092_v40 = vpop.f32.mrb[20].mxu1 }
0x10d2   :  { %v4075_v61 = vadd.f32 %v2092_v40, %v4040_v6  ;;  %v3029_v41 = vpop.f32.mrb[21].mxu1  ;;  %v2401_v6 = vld [vmem:[#allocation12 + $0x68] sm:$0xff] }
0x10d3   :  { %v3175_v29 = vpack.c.bf16 %v2403_v7, %v2401_v6  ;;  %v2536_v6 = vld [vmem:[#allocation15 + $0xb8] sm:$0xff] }
0x1130   :  { %v2184_v43 = vpop.xlane.xlu1 %2183 }
0x1131   :  { %3281 = vrcp.f32 %v2184_v43 }
0x1134   :  { %v2350_v45 = vpop.xlane.xlu1 %2349 }
0x1135   :  { %v2354_v46 = vmul.f32 0.0078125, %v2350_v45  ;;  %v4083_v45 = vld [vmem:[#allocation9] ss:$0 sm:$0xff] }
0x1137   :  { %v4077_v34 = vsub.f32 %v2345_v37, %v2354_v46  ;;  %v2529_v37 = vld [vmem:[#allocation15 + $0x80] sm:$0xff] }
0x1138   :  { %v3195_v27 = vpack.c.bf16 %v2530_v38, %v2529_v37  ;;  %v2420_v37 = vld [vmem:[#allocation13] sm:$0x3] }
0x1139   :  { %v2358_v26 = vmul.f32 %v4077_v34, %v4077_v34  ;;  %v2425_v38 = vrot.slane %v2420_v37, %v245_v16  ;;  %v3291_v16 = vld [vmem:[%s4113_s0 + $0x8] sm:$0xff] }
0x113a   :  { %3196 = vmatprep.subr.bf16.mxu1 %v3195_v27  ;;  %v2429_v27 = vrot.slane %v2420_v37, %v249_v14 }
0x113b   :  { %v3282_v50 = vpop.eup %3281  ;;  %2360 = vadd.xlane.f32.xlu0 %v2358_v26 }
0x113c   :  { %v2186_v55 = vmul.f32 %v3282_v50, %v3280_v51  ;;  %v2416_v51 = vld [vmem:[#allocation12 + $0xe0] sm:$0xff]  ;;  %v2531_v50 = vld [vmem:[#allocation15 + $0x90] sm:$0xff] }
0x113d   :  { %v3193_v17 = vpack.c.bf16 %v2418_v36, %v2416_v51  ;;  %v2527_v51 = vld [vmem:[#allocation15 + $0x70] sm:$0xff]  ;;  %v2528_v36 = vld [vmem:[#allocation15 + $0x78] sm:$0xff] }
0x113e   :  { %3038 = vmatmul.mubr.msk.f32.vlgmr.msra.gmra.mrb[28].mxu0 %vm505_vm2, %v2186_v55  ;;  %v3197_v55 = vpack.c.bf16 %v2514_v49, %v2513_v48 }
0x113f   :  { %3166 = vmatpush1.bf16.msra.mxu0 %v3165_v54  ;;  %2496 = vmatprep.mubr.f32.mxu0 %v3588_v0  ;;  %v2532_v54 = vld [vmem:[#allocation15 + $0x98] sm:$0xff] }
0x1140   :  { %3168 = vmatprep.subr.bf16.mxu0 %v3167_v56  ;;  %v3199_v56 = vpack.c.bf16 %v2532_v54, %v2531_v50 }
0x1143   :  { %3170 = vmatpush1.bf16.msra.mxu0 %v3169_v63 }
0x1144   :  { %3172 = vmatprep.subr.bf16.mxu0 %v3171_v4  ;;  %v3201_v4 = vpack.c.bf16 %v2516_v58, %v2515_v57 }
0x1147   :  { %3174 = vmatpush1.bf16.msra.mxu0 %v3173_v5  ;;  %v2535_v5 = vld [vmem:[#allocation15 + $0xb0] sm:$0xff] }
0x1148   :  { %3176 = vmatprep.subr.bf16.mxu0 %v3175_v29  ;;  %v3207_v29 = vpack.c.bf16 %v2536_v6, %v2535_v5 }
0x114b   :  { %3178 = vmatpush1.bf16.msra.mxu0 %v3177_v42  ;;  %v2537_v42 = vld [vmem:[#allocation15 + $0xc0] sm:$0xff] }
0x114c   :  { %3180 = vmatprep.subr.bf16.mxu0 %v3179_v10  ;;  %v3211_v10 = vpack.c.bf16 %v2538_v44, %v2537_v42 }
0x114f   :  { %3182 = vmatpush1.bf16.msra.mxu0 %v3181_v18  ;;  %v2540_v18 = vld [vmem:[#allocation15 + $0xd8] sm:$0xff] }
0x1150   :  { %3184 = vmatprep.subr.bf16.mxu0 %v3183_v23  ;;  %v3215_v21 = vpack.c.bf16 %v2540_v18, %v2539_v15  ;;  %v2524_v23 = vld [vmem:[#allocation15 + $0x58] sm:$0xff] }
0x1153   :  { %3186 = vmatpush1.bf16.msra.mxu0 %v3185_v25  ;;  %v3217_v25 = vpack.c.bf16 %v2524_v23, %v2523_v3 }
0x1154   :  { %3188 = vmatprep.subr.bf16.mxu0 %v3187_v28  ;;  %v3219_v28 = vpack.c.bf16 %v2542_v24, %v2541_v2 }
0x1157   :  { %3190 = vmatpush1.bf16.msra.mxu0 %v3189_v59  ;;  %v2544_v59 = vld [vmem:[#allocation15 + $0xf8] sm:$0xff] }
0x1158   :  { %3192 = vmatprep.subr.bf16.mxu0 %v3191_v9  ;;  %v3223_v9 = vpack.c.bf16 %v2544_v59, %v2543_v33 }
0x115b   :  { %3194 = vmatpush1.bf16.msra.mxu0 %v3193_v17  ;;  %v3225_v17 = vpack.c.bf16 %v2528_v36, %v2527_v51 }
0x11c8   :  { %v2361_v39 = vpop.xlane.xlu0 %2360 }
0x11c9   :  { %v2364_v40 = vmul.f32 0.0078125, %v2361_v39 }
0x11cb   :  { %v2366_v41 = vadd.f32 1e-05, %v2364_v40 }
0x11cd   :  { %3283 = vrsqrt.f32 %v2366_v41 }
0x11d7   :  { %v3284_v43 = vpop.eup %3283 }
0x11d8   :  { %v2370_v46 = vmul.f32 %v3284_v43, %v4077_v34 }
0x11da   :  { %v2378_v47 = vmul.f32 %v4083_v45, %v2370_v46 }
0x11dc   :  { %v4090_v26 = vadd.f32 %v4086_v22, %v2378_v47 }
0x11de   :  { %2497 = vmatmul.mubr.f32.vlgmr.msra.gmra.mrb[30].mxu0 %v4090_v26 }
0x11df   :  { %2502 = vmatprep.mubr.f32.mxu0 %v3588_v0  ;;  %v2518_v0 = vld [vmem:[#allocation15 + $0x28] sm:$0xff] }
0x11e0   :  { %v3205_v7 = vpack.c.bf16 %v2518_v0, %v2517_v1 }
0x1211   :  { %v2259_v34 = vpop.f32.mrb[28].mxu0 }
0x1212   :  { %v3039_v63 = vpop.f32.mrb[29].mxu0  ;;  %3049 = vmatmul.mubr.msk.f32.vlgmr.msra.gmra.mrb[22].mxu1 %vm427_vm1, %v2259_v34  ;;  %v2717_v34 = vld [vmem:[#allocation16] ss:$0 sm:$0xff] }
0x1213   :  { %3198 = vmatpush3.bf16.msra.mxu1 %v3197_v55 }
0x1214   :  { %3200 = vmatprep.subr.bf16.mxu1 %v3199_v56 }
0x1217   :  { %3202 = vmatpush3.bf16.msra.mxu1 %v3201_v4 }
0x1218   :  { %3204 = vmatprep.subr.bf16.mxu1 %v3203_v8 }
0x121b   :  { %3206 = vmatpush3.bf16.msra.mxu1 %v3205_v7 }
0x121c   :  { %3208 = vmatprep.subr.bf16.mxu1 %v3207_v29 }
0x121f   :  { %3210 = vmatpush3.bf16.msra.mxu1 %v3209_v53 }
0x1220   :  { %3212 = vmatprep.subr.bf16.mxu1 %v3211_v10 }
0x1223   :  { %3214 = vmatpush3.bf16.msra.mxu1 %v3213_v20 }
0x1224   :  { %3216 = vmatprep.subr.bf16.mxu1 %v3215_v21 }
0x1227   :  { %3218 = vmatpush3.bf16.msra.mxu1 %v3217_v25 }
0x1228   :  { %3220 = vmatprep.subr.bf16.mxu1 %v3219_v28 }
0x122b   :  { %3222 = vmatpush3.bf16.msra.mxu1 %v3221_v32  ;;  %v2719_v32 = vld [vmem:[#allocation19] ss:$0 sm:$0xff] }
0x122c   :  { %3224 = vmatprep.subr.bf16.mxu1 %v3223_v9 }
0x122f   :  { %3226 = vmatpush3.bf16.msra.mxu1 %v3225_v17 }
0x12b1   :  { %v2498_v39 = vpop.f32.mrb[30].mxu0 }
0x12b2   :  { %v2499_v40 = vadd.f32 %v2498_v39, %v2425_v38  ;;  %v2500_v41 = vpop.f32.mrb[31].mxu0 }
0x12b3   :  { %v2501_v43 = vadd.f32 %v2500_v41, %v2429_v27 }
0x12b4   :  { %v2509_v47 = vmax.f32 %v2499_v40, 0.0 }
0x12b5   :  { %v2510_v46 = vmax.f32 %v2501_v43, 0.0 }
0x12b7   :  { %2616 = vmatprep.mubr.f32.mxu1 %v2510_v46 }
0x12b8   :  { %2617 = vmatmul.mubr.f32.vlgmr.msra.gmra.mrb[24].mxu1 %v2509_v47 }
0x12e5   :  { %v2332_v48 = vpop.f32.mrb[22].mxu1 }
0x12e6   :  { %v2336_v49 = vadd.f32 %v2332_v48, %v4075_v61  ;;  %v3050_v50 = vpop.f32.mrb[23].mxu1 }
0x12e8   :  { %v2344_v54 = vadd.f32 %v4068_v35, %v2336_v49 }
0x12ea   :  { %v2346_v13 = vadd.f32 %v3291_v16, %v2344_v54 }
0x12ec   :  { %2351 = vadd.xlane.f32.xlu1 %v2346_v13 }
0x1379   :  { %v2352_v14 = vpop.xlane.xlu1 %2351 }
0x137a   :  { %v2355_v55 = vmul.f32 0.0078125, %v2352_v14 }
0x137c   :  { %v2357_v56 = vsub.f32 %v2346_v13, %v2355_v55 }
0x137e   :  { %v2359_v57 = vmul.f32 %v2357_v56, %v2357_v56 }
0x1380   :  { %2362 = vadd.xlane.f32.xlu1 %v2359_v57 }
0x138b   :  { %v2842_v58 = vpop.f32.mrb[24].mxu1 }
0x138c   :  { %v2843_v60 = vpop.f32.mrb[25].mxu1 }
0x138d   :  { %v2844_v62 = vadd.f32 %v2843_v60, %v2842_v58 }
0x138f   :  { %v2619_v63 = vadd.f32 %v2844_v62, %v2717_v34 }
0x1391   :  { %v2627_v61 = vadd.f32 %v2619_v63, %v4090_v26 }
0x1393   :  { %2631 = vadd.xlane.f32.xlu1 %v2627_v61 }
0x140d   :  { %v2363_v35 = vpop.xlane.xlu1 %2362 }
0x140e   :  { %v2365_v4 = vmul.f32 0.0078125, %v2363_v35 }
0x1410   :  { %v2367_v8 = vadd.f32 1e-05, %v2365_v4 }
0x1412   :  { %3285 = vrsqrt.f32 %v2367_v8 }
0x141c   :  { %v3286_v1 = vpop.eup %3285 }
0x141d   :  { %v2371_v0 = vmul.f32 %v3286_v1, %v2357_v56 }
0x141f   :  { %v2379_v5 = vmul.f32 %v4083_v45, %v2371_v0 }
0x1420   :  { %v2632_v26 = vpop.xlane.xlu1 %2631 }
0x1421   :  { %v2387_v6 = vadd.f32 %v4086_v22, %v2379_v5  ;;  %v2635_v11 = vmul.f32 0.0078125, %v2632_v26 }
0x1423   :  { %2503 = vmatmul.mubr.f32.gmra.mrb[32].mxu0 %v2387_v6  ;;  %v2637_v18 = vsub.f32 %v2627_v61, %v2635_v11 }
0x1425   :  { %v2639_v45 = vmul.f32 %v2637_v18, %v2637_v18 }
0x14f6   :  { %v2504_v7 = vpop.f32.mrb[32].mxu0 }
0x14f7   :  { %v2505_v29 = vadd.f32 %v2504_v7, %v2425_v38  ;;  %v2506_v19 = vpop.f32.mrb[33].mxu0 }
0x14f8   :  { %v2507_v52 = vadd.f32 %v2506_v19, %v2429_v27 }
0x14f9   :  { %v2511_v44 = vmax.f32 %v2505_v29, 0.0 }
0x14fa   :  { %v2512_v42 = vmax.f32 %v2507_v52, 0.0 }
0x14fc   :  { %2621 = vmatprep.mubr.f32.mxu1 %v2512_v42 }
0x14fd   :  { %2622 = vmatmul.mubr.f32.gmra.mrb[26].mxu1 %v2511_v44 }
0x15d0   :  { %v2845_v53 = vpop.f32.mrb[26].mxu1 }
0x15d1   :  { %v2846_v10 = vpop.f32.mrb[27].mxu1 }
0x15d2   :  { %v2847_v12 = vadd.f32 %v2846_v10, %v2845_v53 }
0x15d4   :  { %v2624_v15 = vadd.f32 %v2847_v12, %v2717_v34 }
0x15d6   :  { %v2628_v20 = vadd.f32 %v2624_v15, %v2387_v6 }
0x15d8   :  { %2633 = vadd.xlane.f32.xlu1 %v2628_v20 }
0x15dc   :  { %2641 = vadd.xlane.f32.xlu1 %v2639_v45 }
0x1665   :  { %v2634_v22 = vpop.xlane.xlu1 %2633 }
0x1666   :  { %v2636_v21 = vmul.f32 0.0078125, %v2634_v22 }
0x1668   :  { %v2638_v3 = vsub.f32 %v2628_v20, %v2636_v21 }
0x1669   :  { %v2642_v23 = vpop.xlane.xlu1 %2641 }
0x166a   :  { %v2645_v2 = vmul.f32 0.0078125, %v2642_v23  ;;  %v2640_v24 = vmul.f32 %v2638_v3, %v2638_v3 }
0x166c   :  { %v2647_v25 = vadd.f32 1e-05, %v2645_v2  ;;  %2643 = vadd.xlane.f32.xlu1 %v2640_v24 }
0x166e   :  { %3287 = vrsqrt.f32 %v2647_v25 }
0x1678   :  { %v3288_v28 = vpop.eup %3287 }
0x1679   :  { %v2651_v31 = vmul.f32 %v3288_v28, %v2637_v18 }
0x167b   :  { %v2659_v33 = vmul.f32 %v2718_v30, %v2651_v31 }
0x167d   :  { %v2667_v59 = vadd.f32 %v2719_v32, %v2659_v33 }
0x167f   :  { %2669 = vst [vmem:[%s4126_s13] sm:$0xff] %v2667_v59 }
0x16f9   :  { %v2644_v9 = vpop.xlane.xlu1 %2643 }
0x16fa   :  { %v2646_v51 = vmul.f32 0.0078125, %v2644_v9 }
0x16fc   :  { %v2648_v36 = vadd.f32 1e-05, %v2646_v51 }
0x16fe   :  { %3289 = vrsqrt.f32 %v2648_v36 }
0x1708   :  { %v3290_v17 = vpop.eup %3289 }
0x1709   :  { %v2652_v37 = vmul.f32 %v3290_v17, %v2638_v3 }
0x170b   :  { %v2660_v38 = vmul.f32 %v2718_v30, %v2652_v37 }
0x170d   :  { %v2668_v27 = vadd.f32 %v2719_v32, %v2660_v38 }
0x170f   :  { %2670 = vst [vmem:[%s4126_s13 + $0x8] sm:$0xff] %v2668_v27 }
0x1710   :  { %2675 = vsyncpa [#allocation3], 1 }
0x1711   :  { %2676 = vsyncpa [#allocation5], 1 }
0x1712   :  { %2677 = vsyncpa [#allocation8], 1 }
0x1713   :  { %2678 = vsyncpa [#allocation11], 1 }
0x1714   :  { %2679 = vsyncpa [#allocation14], 1 }
0x1715   :  { %2680 = vsyncpa [#allocation17], 1 }
0x1716   :  { %2681 = vsyncpa [#allocation20], 1 }

// kernel: talking_head_forward.11
= control target key start
LH: loop header
LB: loop body
LE: loop exit
PB: predicated region body
PF: predicated region fallthrough
CT: control target
= control target key end

     0   :  { %s7533_s0 = inlined_call_operand.vmem [shape: f32[16,128], index: 0, kind: input, shape index: {}]   ;;  %s7534_s1 = inlined_call_operand.vmem [shape: f32[16,128], index: 1, kind: input, shape index: {}]   ;;  %s7535_s2 = inlined_call_operand.hbm [shape: f32[128,384], index: 2, kind: input, shape index: {}]   ;;  %s7536_s3 = inlined_call_operand.hbm [shape: f32[1,384], index: 3, kind: input, shape index: {}]   ;;  %s7537_s4 = inlined_call_operand.hbm [shape: f32[128,128], index: 4, kind: input, shape index: {}]   ;;  %s7538_s5 = inlined_call_operand.hbm [shape: f32[1,128], index: 5, kind: input, shape index: {}]   ;;  %s7539_s6 = inlined_call_operand.hbm [shape: f32[1,128], index: 6, kind: input, shape index: {}]   ;;  %s7540_s7 = inlined_call_operand.hbm [shape: f32[1,128], index: 7, kind: input, shape index: {}]   ;;  %s7541_s8 = inlined_call_operand.hbm [shape: f32[128,128], index: 8, kind: input, shape index: {}]   ;;  %s7542_s9 = inlined_call_operand.hbm [shape: f32[1,128], index: 9, kind: input, shape index: {}]   ;;  %s7543_s10 = inlined_call_operand.hbm [shape: f32[128,256], index: 10, kind: input, shape index: {}]   ;;  %s7544_s11 = inlined_call_operand.hbm [shape: f32[1,256], index: 11, kind: input, shape index: {}]   ;;  %s7545_s12 = inlined_call_operand.hbm [shape: f32[128,128], index: 12, kind: input, shape index: {}]   ;;  %s7546_s13 = inlined_call_operand.hbm [shape: f32[1,128], index: 13, kind: input, shape index: {}]   ;;  %s7547_s14 = inlined_call_operand.hbm [shape: f32[1,128], index: 14, kind: input, shape index: {}]   ;;  %s7548_s15 = inlined_call_operand.hbm [shape: f32[1,128], index: 15, kind: input, shape index: {}]   ;;  %s7549_s16 = inlined_call_operand.hbm [shape: f32[128,256], index: 16, kind: input, shape index: {}]   ;;  %s7550_s17 = inlined_call_operand.hbm [shape: f32[1,256], index: 17, kind: input, shape index: {}]   ;;  %s7551_s18 = inlined_call_operand.hbm [shape: f32[256,128], index: 18, kind: input, shape index: {}]   ;;  %s7552_s19 = inlined_call_operand.hbm [shape: f32[1,128], index: 19, kind: input, shape index: {}]   ;;  %s7553_s20 = inlined_call_operand.hbm [shape: f32[1,128], index: 20, kind: input, shape index: {}]   ;;  %s7554_s21 = inlined_call_operand.hbm [shape: f32[1,128], index: 21, kind: input, shape index: {}]   ;;  %s7555_s22 = inlined_call_operand.vmem [shape: f32[16,128], index: 22, kind: output, shape index: {}]  }
   0x1   :  { %7563 = sst [smem:[#allocation44_spill]] %s7533_s0 }
   0x2   :  { %7564 = sst [smem:[#allocation45_spill]] %s7534_s1 }
   0x3   :  { %7565 = sst [smem:[#allocation46_spill]] %s7535_s2 }
   0x4   :  { %7566 = sst [smem:[#allocation47_spill]] %s7536_s3 }
   0x5   :  { %7567 = sst [smem:[#allocation48_spill]] %s7537_s4 }
   0x6   :  { %7568 = sst [smem:[#allocation49_spill]] %s7538_s5 }
   0x7   :  { %7569 = sst [smem:[#allocation50_spill]] %s7539_s6 }
   0x8   :  { %27 = vsyncpa [#allocation3], 0 }
   0x9   :  { %28 = vsyncpa [#allocation5], 0 }
   0xa   :  { %29 = vsyncpa [#allocation8], 0 }
   0xb   :  { %30 = vsyncpa [#allocation11], 0 }
   0xc   :  { %31 = vsyncpa [#allocation14], 0 }
   0xd   :  { %32 = vsyncpa [#allocation17], 0 }
   0xe   :  { %33 = vsyncpa [#allocation20], 0 }
   0xf   :  { %34 = vsyncpa [#allocation23], 0 }
  0x10   :  { %35 = vsyncpa [#allocation26], 0 }
  0x11   :  { %36 = vsyncpa [#allocation29], 0 }
  0x12   :  { %37 = vsyncpa [#allocation32], 0  ;;  %s6563_s3 = smov [#allocation4]   ;;  %s6564_s29 = smov [#allocation7]  }
  0x13   :  { %s60_s28 = sshll.u32 %s6563_s3, 4  ;;  %s82_s30 = sshll.u32 %s6564_s29, 4  ;;  %s61_s28 = int_to_ptr.vmem [resolvable:$true] %s60_s28  ;;  %s83_s30 = int_to_ptr.vmem [resolvable:$true] %s82_s30 }
  0x14   :  { %s7570_s23 = sld [smem:[#allocation47_spill]] }
  0x1a   :  { %s6101_s1 = scalar_lea.hbm %s7570_s23, 48 }
  0x1b   :  { %p6102_p0 = scmp.ne.s32.totalorder %s7570_s23, %s6101_s1  ;;  %p6105_p1 = scmp.lt.u32.totalorder %s6101_s1, %s7570_s23 }
  0x1d   :  { %p6107_p2 = pnand %p6105_p1, %p6102_p0 }
  0x1f   :  { %6110 = shalt.err (!%p6107_p2)
}
  0x20   :  { %s6111_s26 = scalar_lea.vmem %s61_s28, 48  ;;  %s6115_s2 = scalar_lea.vmem %s61_s28, 64 }
  0x21   :  { %p6112_p3 = scmp.ne.s32.totalorder %s61_s28, %s6111_s26  ;;  %p6116_p4 = scmp.lt.s32.totalorder %s61_s28, %s61_s28 }
  0x22   :  { %p6117_p5 = scmp.lt.s32.totalorder %s6115_s2, %s6111_s26 }
  0x24   :  { %p6118_p6 = por %p6117_p5, %p6116_p4 }
  0x26   :  { %p6119_p7 = pnand %p6118_p6, %p6112_p3 }
  0x28   :  { %6122 = shalt.err (!%p6119_p7)
}
  0x29   :  { %63 = dma.hbm_to_vmem [thread:$0]  %s7570_s23, 48, %s61_s28, [#allocation5]  }
  0x2a   :  { %s7571_s0 = sld [smem:[#allocation49_spill]] }
  0x30   :  { %s6123_s5 = scalar_lea.hbm %s7571_s0, 16 }
  0x31   :  { %p6124_p8 = scmp.ne.s32.totalorder %s7571_s0, %s6123_s5  ;;  %p6127_p9 = scmp.lt.u32.totalorder %s6123_s5, %s7571_s0 }
  0x33   :  { %p6129_p10 = pnand %p6127_p9, %p6124_p8 }
  0x35   :  { %6132 = shalt.err (!%p6129_p10)
}
  0x36   :  { %s6133_s26 = scalar_lea.vmem %s83_s30, 16  ;;  %s6137_s2 = scalar_lea.vmem %s83_s30, 32 }
  0x37   :  { %p6134_p11 = scmp.ne.s32.totalorder %s83_s30, %s6133_s26  ;;  %p6138_p12 = scmp.lt.s32.totalorder %s83_s30, %s83_s30 }
  0x38   :  { %p6139_p13 = scmp.lt.s32.totalorder %s6137_s2, %s6133_s26 }
  0x3a   :  { %p6140_p0 = por %p6139_p13, %p6138_p12 }
  0x3c   :  { %p6141_p1 = pnand %p6140_p0, %p6134_p11 }
  0x3e   :  { %6144 = shalt.err (!%p6141_p1)
}
  0x3f   :  { %85 = dma.hbm_to_vmem [thread:$0]  %s7571_s0, 16, %s83_s30, [#allocation8]  }
  0x40   :  { %s6565_s27 = smov [#allocation10]   ;;  %s6566_s29 = smov [#allocation13]  }
  0x41   :  { %s102_s3 = sshll.u32 %s6565_s27, 4  ;;  %s124_s4 = sshll.u32 %s6566_s29, 4  ;;  %s103_s3 = int_to_ptr.vmem [resolvable:$true] %s102_s3  ;;  %s125_s4 = int_to_ptr.vmem [resolvable:$true] %s124_s4 }
  0x42   :  { %s6145_s1 = scalar_lea.hbm %s7540_s7, 16 }
  0x43   :  { %p6146_p2 = scmp.ne.s32.totalorder %s7540_s7, %s6145_s1  ;;  %p6149_p3 = scmp.lt.u32.totalorder %s6145_s1, %s7540_s7 }
  0x45   :  { %p6151_p4 = pnand %p6149_p3, %p6146_p2 }
  0x47   :  { %6154 = shalt.err (!%p6151_p4)
}
  0x48   :  { %s6155_s30 = scalar_lea.vmem %s103_s3, 16  ;;  %s6159_s0 = scalar_lea.vmem %s103_s3, 32 }
  0x49   :  { %p6156_p5 = scmp.ne.s32.totalorder %s103_s3, %s6155_s30  ;;  %p6160_p6 = scmp.lt.s32.totalorder %s103_s3, %s103_s3 }
  0x4a   :  { %p6161_p7 = scmp.lt.s32.totalorder %s6159_s0, %s6155_s30 }
  0x4c   :  { %p6162_p8 = por %p6161_p7, %p6160_p6 }
  0x4e   :  { %p6163_p9 = pnand %p6162_p8, %p6156_p5 }
  0x50   :  { %6166 = shalt.err (!%p6163_p9)
}
  0x51   :  { %105 = dma.hbm_to_vmem [thread:$0]  %s7540_s7, 16, %s103_s3, [#allocation11]  }
  0x52   :  { %s6167_s5 = scalar_lea.hbm %s7542_s9, 16 }
  0x53   :  { %p6168_p10 = scmp.ne.s32.totalorder %s7542_s9, %s6167_s5  ;;  %p6171_p11 = scmp.lt.u32.totalorder %s6167_s5, %s7542_s9 }
  0x55   :  { %p6173_p12 = pnand %p6171_p11, %p6168_p10 }
  0x57   :  { %6176 = shalt.err (!%p6173_p12)
}
  0x58   :  { %s6177_s26 = scalar_lea.vmem %s125_s4, 16  ;;  %s6181_s2 = scalar_lea.vmem %s125_s4, 32 }
  0x59   :  { %p6178_p13 = scmp.ne.s32.totalorder %s125_s4, %s6177_s26  ;;  %p6182_p0 = scmp.lt.s32.totalorder %s125_s4, %s125_s4 }
  0x5a   :  { %p6183_p1 = scmp.lt.s32.totalorder %s6181_s2, %s6177_s26 }
  0x5c   :  { %p6184_p2 = por %p6183_p1, %p6182_p0 }
  0x5e   :  { %p6185_p3 = pnand %p6184_p2, %p6178_p13 }
  0x60   :  { %6188 = shalt.err (!%p6185_p3)
}
  0x61   :  { %127 = dma.hbm_to_vmem [thread:$0]  %s7542_s9, 16, %s125_s4, [#allocation14]  }
  0x62   :  { %s6567_s30 = smov [#allocation16]   ;;  %s6568_s28 = smov [#allocation19]  }
  0x63   :  { %s146_s0 = sshll.u32 %s6567_s30, 4  ;;  %s168_s23 = sshll.u32 %s6568_s28, 4  ;;  %s147_s0 = int_to_ptr.vmem [resolvable:$true] %s146_s0  ;;  %s169_s23 = int_to_ptr.vmem [resolvable:$true] %s168_s23 }
  0x64   :  { %s6189_s5 = scalar_lea.hbm %s7544_s11, 32 }
  0x65   :  { %p6190_p4 = scmp.ne.s32.totalorder %s7544_s11, %s6189_s5  ;;  %p6193_p5 = scmp.lt.u32.totalorder %s6189_s5, %s7544_s11 }
  0x67   :  { %p6195_p6 = pnand %p6193_p5, %p6190_p4 }
  0x69   :  { %6198 = shalt.err (!%p6195_p6)
}
  0x6a   :  { %s6199_s9 = scalar_lea.vmem %s147_s0, 32  ;;  %p6204_p8 = scmp.lt.s32.totalorder %s147_s0, %s147_s0 }
  0x6b   :  { %p6200_p7 = scmp.ne.s32.totalorder %s147_s0, %s6199_s9  ;;  %p6205_p9 = scmp.lt.s32.totalorder %s6199_s9, %s6199_s9 }
  0x6d   :  { %p6206_p10 = por %p6205_p9, %p6204_p8 }
  0x6f   :  { %p6207_p11 = pnand %p6206_p10, %p6200_p7 }
  0x71   :  { %6210 = shalt.err (!%p6207_p11)
}
  0x72   :  { %149 = dma.hbm_to_vmem [thread:$0]  %s7544_s11, 32, %s147_s0, [#allocation17]  }
  0x73   :  { %s6211_s3 = scalar_lea.hbm %s7546_s13, 16 }
  0x74   :  { %p6212_p12 = scmp.ne.s32.totalorder %s7546_s13, %s6211_s3  ;;  %p6215_p13 = scmp.lt.u32.totalorder %s6211_s3, %s7546_s13 }
  0x76   :  { %p6217_p0 = pnand %p6215_p13, %p6212_p12 }
  0x78   :  { %6220 = shalt.err (!%p6217_p0)
}
  0x79   :  { %s6221_s5 = scalar_lea.vmem %s169_s23, 16  ;;  %s6225_s24 = scalar_lea.vmem %s169_s23, 32 }
  0x7a   :  { %p6222_p1 = scmp.ne.s32.totalorder %s169_s23, %s6221_s5  ;;  %p6226_p2 = scmp.lt.s32.totalorder %s169_s23, %s169_s23 }
  0x7b   :  { %p6227_p3 = scmp.lt.s32.totalorder %s6225_s24, %s6221_s5 }
  0x7d   :  { %p6228_p4 = por %p6227_p3, %p6226_p2 }
  0x7f   :  { %p6229_p5 = pnand %p6228_p4, %p6222_p1 }
  0x81   :  { %6232 = shalt.err (!%p6229_p5)
}
  0x82   :  { %171 = dma.hbm_to_vmem [thread:$0]  %s7546_s13, 16, %s169_s23, [#allocation20]  }
  0x83   :  { %s6569_s1 = smov [#allocation22]   ;;  %s6570_s25 = smov [#allocation25]  }
  0x84   :  { %s188_s6 = sshll.u32 %s6569_s1, 4  ;;  %s210_s9 = sshll.u32 %s6570_s25, 4  ;;  %s189_s6 = int_to_ptr.vmem [resolvable:$true] %s188_s6  ;;  %s211_s9 = int_to_ptr.vmem [resolvable:$true] %s210_s9 }
  0x85   :  { %s6233_s2 = scalar_lea.hbm %s7548_s15, 16 }
  0x86   :  { %p6234_p6 = scmp.ne.s32.totalorder %s7548_s15, %s6233_s2  ;;  %p6237_p7 = scmp.lt.u32.totalorder %s6233_s2, %s7548_s15 }
  0x88   :  { %p6239_p8 = pnand %p6237_p7, %p6234_p6 }
  0x8a   :  { %6242 = shalt.err (!%p6239_p8)
}
  0x8b   :  { %s6243_s13 = scalar_lea.vmem %s189_s6, 16  ;;  %s6247_s23 = scalar_lea.vmem %s189_s6, 32 }
  0x8c   :  { %p6244_p9 = scmp.ne.s32.totalorder %s189_s6, %s6243_s13  ;;  %p6248_p10 = scmp.lt.s32.totalorder %s189_s6, %s189_s6 }
  0x8d   :  { %p6249_p11 = scmp.lt.s32.totalorder %s6247_s23, %s6243_s13 }
  0x8f   :  { %p6250_p12 = por %p6249_p11, %p6248_p10 }
  0x91   :  { %p6251_p13 = pnand %p6250_p12, %p6244_p9 }
  0x93   :  { %6254 = shalt.err (!%p6251_p13)
}
  0x94   :  { %191 = dma.hbm_to_vmem [thread:$0]  %s7548_s15, 16, %s189_s6, [#allocation23]  }
  0x95   :  { %s6255_s11 = scalar_lea.hbm %s7550_s17, 32 }
  0x96   :  { %p6256_p0 = scmp.ne.s32.totalorder %s7550_s17, %s6255_s11  ;;  %p6259_p1 = scmp.lt.u32.totalorder %s6255_s11, %s7550_s17 }
  0x98   :  { %p6261_p2 = pnand %p6259_p1, %p6256_p0 }
  0x9a   :  { %6264 = shalt.err (!%p6261_p2)
}
  0x9b   :  { %s6265_s26 = scalar_lea.vmem %s211_s9, 32  ;;  %p6270_p4 = scmp.lt.s32.totalorder %s211_s9, %s211_s9 }
  0x9c   :  { %p6266_p3 = scmp.ne.s32.totalorder %s211_s9, %s6265_s26  ;;  %p6271_p5 = scmp.lt.s32.totalorder %s6265_s26, %s6265_s26 }
  0x9e   :  { %p6272_p6 = por %p6271_p5, %p6270_p4 }
  0xa0   :  { %p6273_p7 = pnand %p6272_p6, %p6266_p3 }
  0xa2   :  { %6276 = shalt.err (!%p6273_p7)
}
  0xa3   :  { %213 = dma.hbm_to_vmem [thread:$0]  %s7550_s17, 32, %s211_s9, [#allocation26]  }
  0xa4   :  { %s6571_s2 = smov [#allocation28]   ;;  %s6572_s3 = smov [#allocation2]  }
  0xa5   :  { %s232_s7 = sshll.u32 %s6571_s2, 4  ;;  %s47_s30 = sshll.u32 %s6572_s3, 4  ;;  %s233_s7 = int_to_ptr.vmem [resolvable:$true] %s232_s7  ;;  %s6806_s30 = int_to_ptr.vmem [resolvable:$true] %s47_s30 }
  0xa6   :  { %s6277_s23 = scalar_lea.hbm %s7552_s19, 16 }
  0xa7   :  { %p6278_p8 = scmp.ne.s32.totalorder %s7552_s19, %s6277_s23  ;;  %p6281_p9 = scmp.lt.u32.totalorder %s6277_s23, %s7552_s19 }
  0xa9   :  { %p6283_p10 = pnand %p6281_p9, %p6278_p8 }
  0xab   :  { %6286 = shalt.err (!%p6283_p10)
}
  0xac   :  { %s6287_s17 = scalar_lea.vmem %s233_s7, 16  ;;  %s6291_s9 = scalar_lea.vmem %s233_s7, 32 }
  0xad   :  { %p6288_p11 = scmp.ne.s32.totalorder %s233_s7, %s6287_s17  ;;  %p6292_p12 = scmp.lt.s32.totalorder %s233_s7, %s233_s7 }
  0xae   :  { %p6293_p13 = scmp.lt.s32.totalorder %s6291_s9, %s6287_s17 }
  0xb0   :  { %p6294_p0 = por %p6293_p13, %p6292_p12 }
  0xb2   :  { %p6295_p1 = pnand %p6294_p0, %p6288_p11 }
  0xb4   :  { %6298 = shalt.err (!%p6295_p1)
}
  0xb5   :  { %235 = dma.hbm_to_vmem [thread:$0]  %s7552_s19, 16, %s233_s7, [#allocation29]  }
  0xb6   :  { %s7572_s4 = sld [smem:[#allocation46_spill]] }
  0xbc   :  { %s6299_s26 = scalar_lea.hbm %s7572_s4, 6144 }
  0xbd   :  { %p6300_p2 = scmp.ne.s32.totalorder %s7572_s4, %s6299_s26  ;;  %p6303_p3 = scmp.lt.u32.totalorder %s6299_s26, %s7572_s4 }
  0xbf   :  { %p6305_p4 = pnand %p6303_p3, %p6300_p2 }
  0xc1   :  { %6308 = shalt.err (!%p6305_p4)
}
  0xc2   :  { %s6309_s28 = scalar_lea.vmem %s6806_s30, 6144  ;;  %p6314_p6 = scmp.lt.s32.totalorder %s6806_s30, %s6806_s30 }
  0xc3   :  { %p6310_p5 = scmp.ne.s32.totalorder %s6806_s30, %s6309_s28  ;;  %p6315_p7 = scmp.lt.s32.totalorder %s6309_s28, %s6309_s28 }
  0xc5   :  { %p6316_p8 = por %p6315_p7, %p6314_p6 }
  0xc7   :  { %p6317_p9 = pnand %p6316_p8, %p6310_p5 }
  0xc9   :  { %6320 = shalt.err (!%p6317_p9)
}
  0xca   :  { %s6573_s19 = smov 384   ;;  %s6574_s7 = smov 24  }
  0xcb   :  { %53 = dma.hbm_to_vmem [thread:$0]  %s7572_s4, 6144, %s6806_s30, [#allocation3], %s6573_s19, %s6573_s19, %s6574_s7  }
  0xcc   :  { %s6575_s27 = smov [#allocation6]   ;;  %s7573_s17 = sld [smem:[#allocation48_spill]] }
  0xcd   :  { %s69_s29 = sshll.u32 %s6575_s27, 4  ;;  %s70_s29 = int_to_ptr.vmem [resolvable:$true] %s69_s29 }
  0xd2   :  { %s6321_s9 = scalar_lea.hbm %s7573_s17, 2048 }
  0xd3   :  { %p6322_p10 = scmp.ne.s32.totalorder %s7573_s17, %s6321_s9  ;;  %p6325_p11 = scmp.lt.u32.totalorder %s6321_s9, %s7573_s17 }
  0xd5   :  { %p6327_p12 = pnand %p6325_p11, %p6322_p10 }
  0xd7   :  { %6330 = shalt.err (!%p6327_p12)
}
  0xd8   :  { %s6331_s26 = scalar_lea.vmem %s70_s29, 2048  ;;  %p6336_p0 = scmp.lt.s32.totalorder %s70_s29, %s70_s29 }
  0xd9   :  { %p6332_p13 = scmp.ne.s32.totalorder %s70_s29, %s6331_s26  ;;  %p6337_p1 = scmp.lt.s32.totalorder %s6331_s26, %s6331_s26 }
  0xdb   :  { %p6338_p2 = por %p6337_p1, %p6336_p0 }
  0xdd   :  { %p6339_p3 = pnand %p6338_p2, %p6332_p13 }
  0xdf   :  { %6342 = shalt.err (!%p6339_p3)
}
  0xe0   :  { %s6576_s30 = smov 128   ;;  %s6577_s4 = smov 8  }
  0xe1   :  { %75 = dma.hbm_to_vmem [thread:$0]  %s7573_s17, 2048, %s70_s29, [#allocation5], %s6576_s30, %s6576_s30, %s6577_s4  }
  0xe2   :  { %s6578_s2 = smov [#allocation9]   ;;  %s6579_s28 = smov [#allocation12]  }
  0xe3   :  { %s92_s3 = sshll.u32 %s6578_s2, 4  ;;  %s111_s19 = sshll.u32 %s6579_s28, 4  ;;  %s93_s3 = int_to_ptr.vmem [resolvable:$true] %s92_s3  ;;  %s112_s19 = int_to_ptr.vmem [resolvable:$true] %s111_s19 }
  0xe4   :  { %s7574_s23 = sld [smem:[#allocation50_spill]] }
  0xea   :  { %s6343_s27 = scalar_lea.hbm %s7574_s23, 16 }
  0xeb   :  { %p6344_p4 = scmp.ne.s32.totalorder %s7574_s23, %s6343_s27  ;;  %p6347_p5 = scmp.lt.u32.totalorder %s6343_s27, %s7574_s23 }
  0xed   :  { %p6349_p6 = pnand %p6347_p5, %p6344_p4 }
  0xef   :  { %6352 = shalt.err (!%p6349_p6)
}
  0xf0   :  { %s6353_s29 = scalar_lea.vmem %s93_s3, 16  ;;  %s6357_s17 = scalar_lea.vmem %s93_s3, 32 }
  0xf1   :  { %p6354_p7 = scmp.ne.s32.totalorder %s93_s3, %s6353_s29  ;;  %p6358_p8 = scmp.lt.s32.totalorder %s93_s3, %s93_s3 }
  0xf2   :  { %p6359_p9 = scmp.lt.s32.totalorder %s6357_s17, %s6353_s29 }
  0xf4   :  { %p6360_p10 = por %p6359_p9, %p6358_p8 }
  0xf6   :  { %p6361_p11 = pnand %p6360_p10, %p6354_p7 }
  0xf8   :  { %6364 = shalt.err (!%p6361_p11)
}
  0xf9   :  { %95 = dma.hbm_to_vmem [thread:$0]  %s7574_s23, 16, %s93_s3, [#allocation8]  }
  0xfa   :  { %s6365_s15 = scalar_lea.hbm %s7541_s8, 2048 }
  0xfb   :  { %p6366_p12 = scmp.ne.s32.totalorder %s7541_s8, %s6365_s15  ;;  %p6369_p13 = scmp.lt.u32.totalorder %s6365_s15, %s7541_s8 }
  0xfd   :  { %p6371_p0 = pnand %p6369_p13, %p6366_p12 }
  0xff   :  { %6374 = shalt.err (!%p6371_p0)
}
 0x100   :  { %s6375_s13 = scalar_lea.vmem %s112_s19, 2048  ;;  %p6380_p2 = scmp.lt.s32.totalorder %s112_s19, %s112_s19 }
 0x101   :  { %p6376_p1 = scmp.ne.s32.totalorder %s112_s19, %s6375_s13  ;;  %p6381_p3 = scmp.lt.s32.totalorder %s6375_s13, %s6375_s13 }
 0x103   :  { %p6382_p4 = por %p6381_p3, %p6380_p2 }
 0x105   :  { %p6383_p5 = pnand %p6382_p4, %p6376_p1 }
 0x107   :  { %6386 = shalt.err (!%p6383_p5)
}
 0x108   :  { %117 = dma.hbm_to_vmem [thread:$0]  %s7541_s8, 2048, %s112_s19, [#allocation11], %s6576_s30, %s6576_s30, %s6577_s4  }
 0x109   :  { %s6580_s27 = smov [#allocation15]   ;;  %s6387_s11 = scalar_lea.hbm %s7543_s10, 4096 }
 0x10a   :  { %s133_s5 = sshll.u32 %s6580_s27, 4  ;;  %p6388_p6 = scmp.ne.s32.totalorder %s7543_s10, %s6387_s11  ;;  %s134_s5 = int_to_ptr.vmem [resolvable:$true] %s133_s5 }
 0x10b   :  { %p6391_p7 = scmp.lt.u32.totalorder %s6387_s11, %s7543_s10 }
 0x10d   :  { %p6393_p8 = pnand %p6391_p7, %p6388_p6 }
 0x10f   :  { %6396 = shalt.err (!%p6393_p8)
}
 0x110   :  { %s6397_s25 = scalar_lea.vmem %s134_s5, 4096  ;;  %p6402_p10 = scmp.lt.s32.totalorder %s134_s5, %s134_s5 }
 0x111   :  { %p6398_p9 = scmp.ne.s32.totalorder %s134_s5, %s6397_s25  ;;  %p6403_p11 = scmp.lt.s32.totalorder %s6397_s25, %s6397_s25 }
 0x113   :  { %p6404_p12 = por %p6403_p11, %p6402_p10 }
 0x115   :  { %p6405_p13 = pnand %p6404_p12, %p6398_p9 }
 0x117   :  { %6408 = shalt.err (!%p6405_p13)
}
 0x118   :  { %s6581_s8 = smov 256   ;;  %s6582_s19 = smov 16  }
 0x119   :  { %139 = dma.hbm_to_vmem [thread:$0]  %s7543_s10, 4096, %s134_s5, [#allocation14], %s6581_s8, %s6581_s8, %s6582_s19  }
 0x11a   :  { %s6583_s6 = smov [#allocation18]   ;;  %s6584_s28 = smov [#allocation21]  }
 0x11b   :  { %s155_s2 = sshll.u32 %s6583_s6, 4  ;;  %s178_s7 = sshll.u32 %s6584_s28, 4  ;;  %s156_s2 = int_to_ptr.vmem [resolvable:$true] %s155_s2  ;;  %s179_s7 = int_to_ptr.vmem [resolvable:$true] %s178_s7 }
 0x11c   :  { %s6409_s23 = scalar_lea.hbm %s7545_s12, 2048 }
 0x11d   :  { %p6410_p0 = scmp.ne.s32.totalorder %s7545_s12, %s6409_s23  ;;  %p6413_p1 = scmp.lt.u32.totalorder %s6409_s23, %s7545_s12 }
 0x11f   :  { %p6415_p2 = pnand %p6413_p1, %p6410_p0 }
 0x121   :  { %6418 = shalt.err (!%p6415_p2)
}
 0x122   :  { %s6419_s10 = scalar_lea.vmem %s156_s2, 2048  ;;  %p6424_p4 = scmp.lt.s32.totalorder %s156_s2, %s156_s2 }
 0x123   :  { %p6420_p3 = scmp.ne.s32.totalorder %s156_s2, %s6419_s10  ;;  %p6425_p5 = scmp.lt.s32.totalorder %s6419_s10, %s6419_s10 }
 0x125   :  { %p6426_p6 = por %p6425_p5, %p6424_p4 }
 0x127   :  { %p6427_p7 = pnand %p6426_p6, %p6420_p3 }
 0x129   :  { %6430 = shalt.err (!%p6427_p7)
}
 0x12a   :  { %161 = dma.hbm_to_vmem [thread:$0]  %s7545_s12, 2048, %s156_s2, [#allocation17], %s6576_s30, %s6576_s30, %s6577_s4  }
 0x12b   :  { %s6431_s1 = scalar_lea.hbm %s7547_s14, 16 }
 0x12c   :  { %p6432_p8 = scmp.ne.s32.totalorder %s7547_s14, %s6431_s1  ;;  %p6435_p9 = scmp.lt.u32.totalorder %s6431_s1, %s7547_s14 }
 0x12e   :  { %p6437_p10 = pnand %p6435_p9, %p6432_p8 }
 0x130   :  { %6440 = shalt.err (!%p6437_p10)
}
 0x131   :  { %s6441_s28 = scalar_lea.vmem %s179_s7, 16  ;;  %s6445_s13 = scalar_lea.vmem %s179_s7, 32 }
 0x132   :  { %p6442_p11 = scmp.ne.s32.totalorder %s179_s7, %s6441_s28  ;;  %p6446_p12 = scmp.lt.s32.totalorder %s179_s7, %s179_s7 }
 0x133   :  { %p6447_p13 = scmp.lt.s32.totalorder %s6445_s13, %s6441_s28 }
 0x135   :  { %p6448_p0 = por %p6447_p13, %p6446_p12 }
 0x137   :  { %p6449_p1 = pnand %p6448_p0, %p6442_p11 }
 0x139   :  { %6452 = shalt.err (!%p6449_p1)
}
 0x13a   :  { %181 = dma.hbm_to_vmem [thread:$0]  %s7547_s14, 16, %s179_s7, [#allocation20]  }
 0x13b   :  { %s6585_s3 = smov [#allocation24]   ;;  %s6586_s27 = smov [#allocation27]  }
 0x13c   :  { %s197_s23 = sshll.u32 %s6585_s3, 4  ;;  %s219_s24 = sshll.u32 %s6586_s27, 4  ;;  %s198_s23 = int_to_ptr.vmem [resolvable:$true] %s197_s23  ;;  %s6921_s24 = int_to_ptr.vmem [resolvable:$true] %s219_s24 }
 0x13d   :  { %s6453_s10 = scalar_lea.hbm %s7549_s16, 4096 }
 0x13e   :  { %p6454_p2 = scmp.ne.s32.totalorder %s7549_s16, %s6453_s10  ;;  %p6457_p3 = scmp.lt.u32.totalorder %s6453_s10, %s7549_s16 }
 0x140   :  { %p6459_p4 = pnand %p6457_p3, %p6454_p2 }
 0x142   :  { %6462 = shalt.err (!%p6459_p4)
}
 0x143   :  { %s6463_s14 = scalar_lea.vmem %s198_s23, 4096  ;;  %p6468_p6 = scmp.lt.s32.totalorder %s198_s23, %s198_s23 }
 0x144   :  { %p6464_p5 = scmp.ne.s32.totalorder %s198_s23, %s6463_s14  ;;  %p6469_p7 = scmp.lt.s32.totalorder %s6463_s14, %s6463_s14 }
 0x146   :  { %p6470_p8 = por %p6469_p7, %p6468_p6 }
 0x148   :  { %p6471_p9 = pnand %p6470_p8, %p6464_p5 }
 0x14a   :  { %6474 = shalt.err (!%p6471_p9)
}
 0x14b   :  { %203 = dma.hbm_to_vmem [thread:$0]  %s7549_s16, 4096, %s198_s23, [#allocation23], %s6581_s8, %s6581_s8, %s6582_s19  }
 0x14c   :  { %s6475_s15 = scalar_lea.hbm %s7551_s18, 4096 }
 0x14d   :  { %p6476_p10 = scmp.ne.s32.totalorder %s7551_s18, %s6475_s15  ;;  %p6479_p11 = scmp.lt.u32.totalorder %s6475_s15, %s7551_s18 }
 0x14f   :  { %p6481_p12 = pnand %p6479_p11, %p6476_p10 }
 0x151   :  { %6484 = shalt.err (!%p6481_p12)
}
 0x152   :  { %s6485_s2 = scalar_lea.vmem %s6921_s24, 4096  ;;  %p6490_p0 = scmp.lt.s32.totalorder %s6921_s24, %s6921_s24 }
 0x153   :  { %p6486_p13 = scmp.ne.s32.totalorder %s6921_s24, %s6485_s2  ;;  %p6491_p1 = scmp.lt.s32.totalorder %s6485_s2, %s6485_s2 }
 0x155   :  { %p6492_p2 = por %p6491_p1, %p6490_p0 }
 0x157   :  { %p6493_p3 = pnand %p6492_p2, %p6486_p13 }
 0x159   :  { %6496 = shalt.err (!%p6493_p3)
}
 0x15a   :  { %225 = dma.hbm_to_vmem [thread:$0]  %s7551_s18, 4096, %s6921_s24, [#allocation26], %s6576_s30, %s6576_s30, %s6577_s4  }
 0x15b   :  { %s6587_s19 = smov [#allocation30]   ;;  %s6588_s23 = smov [#allocation31]  }
 0x15c   :  { %s242_s3 = sshll.u32 %s6587_s19, 4  ;;  %s252_s27 = sshll.u32 %s6588_s23, 4  ;;  %s243_s3 = int_to_ptr.vmem [resolvable:$true] %s242_s3  ;;  %s253_s27 = int_to_ptr.vmem [resolvable:$true] %s252_s27 }
 0x15d   :  { %s6497_s10 = scalar_lea.hbm %s7553_s20, 16 }
 0x15e   :  { %p6498_p4 = scmp.ne.s32.totalorder %s7553_s20, %s6497_s10  ;;  %p6501_p5 = scmp.lt.u32.totalorder %s6497_s10, %s7553_s20 }
 0x160   :  { %p6503_p6 = pnand %p6501_p5, %p6498_p4 }
 0x162   :  { %6506 = shalt.err (!%p6503_p6)
}
 0x163   :  { %s6507_s18 = scalar_lea.vmem %s243_s3, 16  ;;  %s6511_s30 = scalar_lea.vmem %s243_s3, 32 }
 0x164   :  { %p6508_p7 = scmp.ne.s32.totalorder %s243_s3, %s6507_s18  ;;  %p6512_p8 = scmp.lt.s32.totalorder %s243_s3, %s243_s3 }
 0x165   :  { %p6513_p9 = scmp.lt.s32.totalorder %s6511_s30, %s6507_s18 }
 0x167   :  { %p6514_p10 = por %p6513_p9, %p6512_p8 }
 0x169   :  { %p6515_p11 = pnand %p6514_p10, %p6508_p7 }
 0x16b   :  { %6518 = shalt.err (!%p6515_p11)
}
 0x16c   :  { %245 = dma.hbm_to_vmem [thread:$0]  %s7553_s20, 16, %s243_s3, [#allocation29]  }
 0x16d   :  { %s6519_s1 = scalar_lea.hbm %s7554_s21, 16 }
 0x16e   :  { %p6520_p12 = scmp.ne.s32.totalorder %s7554_s21, %s6519_s1  ;;  %p6523_p13 = scmp.lt.u32.totalorder %s6519_s1, %s7554_s21 }
 0x170   :  { %p6525_p0 = pnand %p6523_p13, %p6520_p12 }
 0x172   :  { %6528 = shalt.err (!%p6525_p0)
}
 0x173   :  { %s6529_s28 = scalar_lea.vmem %s253_s27, 16  ;;  %s6533_s13 = scalar_lea.vmem %s253_s27, 32 }
 0x174   :  { %p6530_p1 = scmp.ne.s32.totalorder %s253_s27, %s6529_s28  ;;  %p6534_p2 = scmp.lt.s32.totalorder %s253_s27, %s253_s27 }
 0x175   :  { %p6535_p3 = scmp.lt.s32.totalorder %s6533_s13, %s6529_s28 }
 0x177   :  { %p6536_p4 = por %p6535_p3, %p6534_p2 }
 0x179   :  { %p6537_p5 = pnand %p6536_p4, %p6530_p1 }
 0x17b   :  { %6540 = shalt.err (!%p6537_p5)
}
 0x17c   :  { %255 = dma.hbm_to_vmem [thread:$0]  %s7554_s21, 16, %s253_s27, [#allocation32]  }
 0x17d   :  { %6541 = dma.done.wait [#allocation3], 6144  }
 0x17e   :  { %6542 = vsyncadd [#allocation3], 4294961152 }
 0x17f   :  { %6543 = dma.done.wait [#allocation5], 2096  }
 0x180   :  { %6544 = vsyncadd [#allocation5], 4294965200 }
 0x181   :  { %6545 = dma.done.wait [#allocation8], 32  }
 0x182   :  { %6546 = vsyncadd [#allocation8], 4294967264 }
 0x183   :  { %6547 = dma.done.wait [#allocation11], 2064  }
 0x184   :  { %6548 = vsyncadd [#allocation11], 4294965232 }
 0x185   :  { %6549 = dma.done.wait [#allocation14], 4112  }
 0x186   :  { %6550 = vsyncadd [#allocation14], 4294963184 }
 0x187   :  { %6551 = dma.done.wait [#allocation17], 2080  }
 0x188   :  { %6552 = vsyncadd [#allocation17], 4294965216 }
 0x189   :  { %6553 = dma.done.wait [#allocation20], 32  }
 0x18a   :  { %6554 = vsyncadd [#allocation20], 4294967264 }
 0x18b   :  { %6555 = dma.done.wait [#allocation23], 4112  }
 0x18c   :  { %6556 = vsyncadd [#allocation23], 4294963184 }
 0x18d   :  { %6557 = dma.done.wait [#allocation26], 4128  }
 0x18e   :  { %6558 = vsyncadd [#allocation26], 4294963168 }
 0x18f   :  { %6559 = dma.done.wait [#allocation29], 32  }
 0x190   :  { %6560 = vsyncadd [#allocation29], 4294967264 }
 0x191   :  { %6561 = dma.done.wait [#allocation32], 16  }
 0x192   :  { %6562 = vsyncadd [#allocation32], 4294967280  ;;  %v6589_v0 = vmov 0.0   ;;  %v321_v1 = vld [vmem:[#allocation2 + $0x8] sm:$0xff]  ;;  %v324_v2 = vld [vmem:[#allocation2 + $0x20] sm:$0xff]  ;;  %s7575_s16 = sld [smem:[#allocation44_spill]] }
 0x193   :  { %449 = vmatprep.mubr.f32.mxu0 %v6589_v0  ;;  %v320_v3 = vld [vmem:[#allocation2] sm:$0xff]  ;;  %v5705_v4 = vpack.c.bf16 %v324_v2, %v321_v1  ;;  %v323_v5 = vld [vmem:[#allocation2 + $0x18] sm:$0xff]  ;;  %v330_v7 = vld [vmem:[#allocation2 + $0x50] sm:$0xff]  ;;  %vm6590_vm0 = vmmov 0   ;;  %vm554_vm1 = vcmask 261120   ;;  %s6591_s3 = smov 96  }
 0x194   :  { %v327_v6 = vld [vmem:[#allocation2 + $0x38] sm:$0xff]  ;;  %v5707_v8 = vpack.c.bf16 %v323_v5, %v320_v3  ;;  %v326_v10 = vld [vmem:[#allocation2 + $0x30] sm:$0xff]  ;;  %v329_v11 = vld [vmem:[#allocation2 + $0x48] sm:$0xff]  ;;  %vm632_vm2 = vcmask 64512   ;;  %s6592_s23 = smov 64   ;;  %s6593_s27 = smov 32  }
 0x195   :  { %v5709_v9 = vpack.c.bf16 %v330_v7, %v327_v6  ;;  %v333_v12 = vld [vmem:[#allocation2 + $0x68] sm:$0xff]  ;;  %5706 = vmatprep.subr.bf16.mxu0 %v5705_v4  ;;  %v336_v13 = vld [vmem:[#allocation2 + $0x80] sm:$0xff]  ;;  %v5711_v14 = vpack.c.bf16 %v329_v11, %v326_v10  ;;  %v335_v17 = vld [vmem:[#allocation2 + $0x78] sm:$0xff]  ;;  %s7576_s10 = sld [smem:[#allocation45_spill]] }
 0x196   :  { %5708 = vmatpush1.bf16.msra.mxu0 %v5707_v8  ;;  %v5713_v15 = vpack.c.bf16 %v336_v13, %v333_v12  ;;  %v332_v16 = vld [vmem:[#allocation2 + $0x60] sm:$0xff]  ;;  %v339_v18 = vld [vmem:[#allocation2 + $0x98] sm:$0xff]  ;;  %v342_v19 = vld [vmem:[#allocation2 + $0xb0] sm:$0xff]  ;;  %v370_v12 = vlaneseq }
 0x197   :  { %5710 = vmatprep.subr.bf16.mxu0 %v5709_v9  ;;  %v5715_v20 = vpack.c.bf16 %v335_v17, %v332_v16  ;;  %v5717_v21 = vpack.c.bf16 %v342_v19, %v339_v18  ;;  %v338_v22 = vld [vmem:[#allocation2 + $0x90] sm:$0xff]  ;;  %v341_v23 = vld [vmem:[#allocation2 + $0xa8] sm:$0xff]  ;;  %v348_v25 = vld [vmem:[#allocation2 + $0xe0] sm:$0xff] }
 0x198   :  { %v345_v24 = vld [vmem:[#allocation2 + $0xc8] sm:$0xff]  ;;  %v6986_v26 = vld [vmem:[%s7575_s16] sm:$0xff]  ;;  %v322_v27 = vld [vmem:[#allocation2 + $0x10] sm:$0xff]  ;;  %v5719_v30 = vpack.c.bf16 %v341_v23, %v338_v22  ;;  %v371_v13 = vshrl.u32 %v370_v12, 7 }
 0x199   :  { %v325_v28 = vld [vmem:[#allocation2 + $0x28] sm:$0xff]  ;;  %v328_v29 = vld [vmem:[#allocation2 + $0x40] sm:$0xff]  ;;  %5331 = vmatprep.mubr.f32.mxu1 %v6986_v26  ;;  %v331_v33 = vld [vmem:[#allocation2 + $0x58] sm:$0xff]  ;;  %v5721_v34 = vpack.c.bf16 %v348_v25, %v345_v24 }
 0x19a   :  { %5712 = vmatpush1.bf16.msra.mxu0 %v5711_v14  ;;  %v344_v31 = vld [vmem:[#allocation2 + $0xc0] sm:$0xff]  ;;  %v5737_v32 = vpack.c.bf16 %v325_v28, %v322_v27  ;;  %v347_v35 = vld [vmem:[#allocation2 + $0xd8] sm:$0xff]  ;;  %v5741_v36 = vpack.c.bf16 %v331_v33, %v328_v29  ;;  %v334_v37 = vld [vmem:[#allocation2 + $0x70] sm:$0xff]  ;;  %v7004_v14 = vsub.s32 1, %v371_v13  ;;  %v7006_v16 = vsub.s32 0, %v371_v13 }
 0x19b   :  { %5714 = vmatprep.subr.bf16.mxu0 %v5713_v15  ;;  %v337_v38 = vld [vmem:[#allocation2 + $0x88] sm:$0xff]  ;;  %v351_v39 = vld [vmem:[#allocation2 + $0xf8] sm:$0xff]  ;;  %v354_v40 = vld [vmem:[#allocation2 + $0x110] sm:$0xff]  ;;  %v5723_v41 = vpack.c.bf16 %v347_v35, %v344_v31  ;;  %v380_v23 = vsub.s32 2, %v371_v13 }
 0x19c   :  { %5738 = vmatprep.subr.bf16.mxu1 %v5737_v32  ;;  %v350_v42 = vld [vmem:[#allocation2 + $0xf0] sm:$0xff]  ;;  %v5745_v43 = vpack.c.bf16 %v337_v38, %v334_v37  ;;  %v5725_v44 = vpack.c.bf16 %v354_v40, %v351_v39  ;;  %v353_v45 = vld [vmem:[#allocation2 + $0x108] sm:$0xff]  ;;  %v340_v46 = vld [vmem:[#allocation2 + $0xa0] sm:$0xff] }
 0x19d   :  { %5740 = vmatpush3.bf16.msra.mxu1 %v5737_v32  ;;  %v343_v47 = vld [vmem:[#allocation2 + $0xb8] sm:$0xff]  ;;  %v357_v48 = vld [vmem:[#allocation2 + $0x128] sm:$0xff]  ;;  %v360_v49 = vld [vmem:[#allocation2 + $0x140] sm:$0xff]  ;;  %v5727_v50 = vpack.c.bf16 %v353_v45, %v350_v42 }
 0x19e   :  { %5716 = vmatpush1.bf16.msra.mxu0 %v5715_v20  ;;  %5742 = vmatprep.subr.bf16.mxu1 %v5741_v36  ;;  %v356_v51 = vld [vmem:[#allocation2 + $0x120] sm:$0xff]  ;;  %v5749_v52 = vpack.c.bf16 %v343_v47, %v340_v46  ;;  %v5729_v53 = vpack.c.bf16 %v360_v49, %v357_v48  ;;  %v359_v54 = vld [vmem:[#allocation2 + $0x138] sm:$0xff]  ;;  %v346_v55 = vld [vmem:[#allocation2 + $0xd0] sm:$0xff] }
 0x19f   :  { %5718 = vmatprep.subr.bf16.mxu0 %v5717_v21  ;;  %v349_v56 = vld [vmem:[#allocation2 + $0xe8] sm:$0xff]  ;;  %v363_v57 = vld [vmem:[#allocation2 + $0x158] sm:$0xff]  ;;  %v366_v58 = vld [vmem:[#allocation2 + $0x170] sm:$0xff]  ;;  %v5731_v59 = vpack.c.bf16 %v359_v54, %v356_v51 }
 0x1a0   :  { %v362_v60 = vld [vmem:[#allocation2 + $0x150] sm:$0xff]  ;;  %v5753_v61 = vpack.c.bf16 %v349_v56, %v346_v55  ;;  %v5733_v62 = vpack.c.bf16 %v366_v58, %v363_v57  ;;  %v365_v63 = vld [vmem:[#allocation2 + $0x168] sm:$0xff]  ;;  %v352_v1 = vld [vmem:[#allocation2 + $0x100] sm:$0xff]  ;;  %v6594_v56 = vmov 0.0|0.0  }
 0x1a1   :  { %5744 = vmatpush3.bf16.msra.mxu1 %v5741_v36  ;;  %v355_v2 = vld [vmem:[#allocation2 + $0x118] sm:$0xff]  ;;  %v5735_v3 = vpack.c.bf16 %v365_v63, %v362_v60  ;;  %v358_v5 = vld [vmem:[#allocation2 + $0x130] sm:$0xff]  ;;  %v361_v6 = vld [vmem:[#allocation2 + $0x148] sm:$0xff] }
 0x1a2   :  { %5720 = vmatpush1.bf16.msra.mxu0 %v5719_v30  ;;  %5746 = vmatprep.subr.bf16.mxu1 %v5745_v43  ;;  %v5757_v4 = vpack.c.bf16 %v355_v2, %v352_v1  ;;  %v5761_v7 = vpack.c.bf16 %v361_v6, %v358_v5  ;;  %v364_v8 = vld [vmem:[#allocation2 + $0x160] sm:$0xff]  ;;  %v367_v9 = vld [vmem:[#allocation2 + $0x178] sm:$0xff]  ;;  %v6996_v11 = vld [vmem:[%s7575_s16 + $0x8] sm:$0xff] }
 0x1a3   :  { %5722 = vmatprep.subr.bf16.mxu0 %v5721_v34  ;;  %v5765_v10 = vpack.c.bf16 %v367_v9, %v364_v8  ;;  %v368_v15 = vld [vmem:[#allocation4] sm:$0x7]  ;;  %v541_v57 = vld [vmem:[#allocation6 + $0x20] sm:$0xff]  ;;  %v542_v58 = vld [vmem:[#allocation6 + $0x28] sm:$0xff] }
 0x1a4   :  { %v7009_v17 = vrot.slane %v368_v15, %v7004_v14  ;;  %v7012_v19 = vrot.slane %v368_v15, %v7006_v16  ;;  %v381_v24 = vrot.slane %v368_v15, %v380_v23  ;;  %v539_v8 = vld [vmem:[#allocation6 + $0x10] sm:$0xff]  ;;  %v540_v9 = vld [vmem:[#allocation6 + $0x18] sm:$0xff] }
 0x1a5   :  { %5748 = vmatpush3.bf16.msra.mxu1 %v5745_v43 }
 0x1a6   :  { %5724 = vmatpush1.bf16.msra.mxu0 %v5723_v41  ;;  %5750 = vmatprep.subr.bf16.mxu1 %v5749_v52 }
 0x1a7   :  { %5726 = vmatprep.subr.bf16.mxu0 %v5725_v44 }
 0x1a9   :  { %5752 = vmatpush3.bf16.msra.mxu1 %v5749_v52 }
 0x1aa   :  { %5728 = vmatpush1.bf16.msra.mxu0 %v5727_v50  ;;  %5754 = vmatprep.subr.bf16.mxu1 %v5753_v61 }
 0x1ab   :  { %5730 = vmatprep.subr.bf16.mxu0 %v5729_v53 }
 0x1ad   :  { %5756 = vmatpush3.bf16.msra.mxu1 %v5753_v61  ;;  %v7056_v61 = vpack.c.bf16 %v542_v58, %v541_v57 }
 0x1ae   :  { %5732 = vmatpush1.bf16.msra.mxu0 %v5731_v59  ;;  %5758 = vmatprep.subr.bf16.mxu1 %v5757_v4  ;;  %v543_v59 = vld [vmem:[#allocation6 + $0x30] sm:$0xff] }
 0x1af   :  { %5734 = vmatprep.subr.bf16.mxu0 %v5733_v62  ;;  %v544_v62 = vld [vmem:[#allocation6 + $0x38] sm:$0xff] }
 0x1b0   :  { %v7061_v1 = vpack.c.bf16 %v544_v62, %v543_v59 }
 0x1b1   :  { %5760 = vmatpush3.bf16.msra.mxu1 %v5757_v4  ;;  %v538_v4 = vld [vmem:[#allocation6 + $0x8] sm:$0xff] }
 0x1b2   :  { %5736 = vmatpush1.bf16.msra.mxu0 %v5735_v3  ;;  %5762 = vmatprep.subr.bf16.mxu1 %v5761_v7  ;;  %v537_v3 = vld [vmem:[#allocation6] sm:$0xff] }
 0x1b3   :  { %5349 = vmatprep.subr.mxu0 %v6589_v0  ;;  %v7066_v6 = vpack.c.bf16 %v538_v4, %v537_v3  ;;  %v550_v3 = vld [vmem:[#allocation6 + $0x68] sm:$0xff]  ;;  %v551_v4 = vld [vmem:[#allocation6 + $0x70] sm:$0xff] }
 0x1b5   :  { %450 = vmatmul.mubr.f32.vlgmr.msra.gmra.mrb[0].mxu0 %v6986_v26  ;;  %5764 = vmatpush3.bf16.msra.mxu1 %v5761_v7 }
 0x1b6   :  { %455 = vmatprep.mubr.f32.mxu0 %v6589_v0  ;;  %5766 = vmatprep.subr.bf16.mxu1 %v5765_v10 }
 0x1b9   :  { %5768 = vmatpush3.bf16.msra.mxu1 %v5765_v10  ;;  %456 = vmatmul.mubr.f32.gmra.mrb[2].mxu0 %v6996_v11  ;;  %v7070_v10 = vpack.c.bf16 %v540_v9, %v539_v8 }
 0x1ba   :  { %5334 = vmatprep.subr.mxu1 %v6589_v0  ;;  %5351 = vmatprep.mubr.msk.f32.mxu0 %vm6590_vm0, %v6589_v0 }
 0x1bc   :  { %5332 = vmatmul.mubr.f32.vlgmr.msra.gmra.mrb[0].mxu1 %v6996_v11 }
 0x1bd   :  { %5336 = vmatprep.mubr.msk.f32.mxu1 %vm6590_vm0, %v6589_v0 }
 0x288   :  { %v451_v18 = vpop.f32.mrb[0].mxu0 }
 0x289   :  { %v453_v20 = vpop.f32.mrb[1].mxu0  ;;  %v7018_v22 = vadd.f32 %v451_v18, %v7012_v19 }
 0x28a   :  { %v454_v21 = vadd.f32 %v453_v20, %v7009_v17 }
 0x28c   :  { %719 = vrot.lane.b32.xlu1 %v454_v21, %s6591_s3  ;;  %5335 = vmatpush3.xpose.msk.msra.mxu1 %vm554_vm1, %v454_v21  ;;  %v7054_v60 = vpop.f32.mrb[2].mxu0 }
 0x28d   :  { %5339 = vmatprep.subr.mxu1 %v6589_v0  ;;  %v7058_v63 = vpop.f32.mrb[3].mxu0  ;;  %v7125_v57 = vadd.f32 %v7054_v60, %v7012_v19  ;;  %v552_v60 = vld [vmem:[#allocation6 + $0x78] sm:$0xff] }
 0x28f   :  { %5337 = vmatmul.mubr.msk.f32.vlgmr.msra.gmra.mrb[2].mxu1 %vm554_vm1, %v7018_v22  ;;  %v5333_v25 = vpop.f32.mrb[0].mxu1 }
 0x290   :  { %717 = vrot.lane.b32.xlu1 %v7018_v22, %s6591_s3  ;;  %5341 = vmatprep.mubr.msk.f32.mxu1 %vm6590_vm0, %v6589_v0  ;;  %v7027_v27 = vadd.f32 %v5333_v25, %v381_v24  ;;  %v528_v28 = vpop.f32.mrb[1].mxu1 }
 0x291   :  { %v7029_v29 = vadd.f32 %v528_v28, %v381_v24 }
 0x293   :  { %5340 = vmatpush3.msra.mxu1 %v7029_v29 }
 0x294   :  { %5344 = vmatprep.subr.mxu1 %v6589_v0 }
 0x2fe   :  { %v720_v41 = vpop.permute.xlu1 %719 }
 0x302   :  { %v718_v43 = vpop.permute.xlu1 %717 }
 0x362   :  { %v627_v30 = vpop.f32.mrb[2].mxu1 }
 0x363   :  { %v631_v31 = vmul.f32 0.17677669, %v627_v30  ;;  %v5338_v32 = vpop.f32.mrb[3].mxu1 }
 0x365   :  { %v633_v33 = vsel %vm632_vm2, %v631_v31, -inf }
 0x366   :  { %634 = vmax.xlane.f32.xlu0 %v633_v33 }
 0x3f3   :  { %v635_v34 = vpop.xlane.xlu0 %634 }
 0x3f4   :  { %v636_v35 = vsub.f32 %v631_v31, %v635_v34 }
 0x3f6   :  { %v637_v36 = vmul.f32 1.442695, %v636_v35 }
 0x3f8   :  { %6025 = vpow2.f32 %v637_v36 }
 0x402   :  { %v6026_v37 = vpop.eup %6025 }
 0x403   :  { %v639_v38 = vsel %vm632_vm2, %v6026_v37, 0.0 }
 0x404   :  { %640 = vadd.xlane.f32.xlu0 %v639_v38 }
 0x491   :  { %v641_v39 = vpop.xlane.xlu0 %640 }
 0x492   :  { %6027 = vrcp.f32 %v641_v39  ;;  %v545_v39 = vld [vmem:[#allocation6 + $0x40] sm:$0xff] }
 0x49c   :  { %v6028_v40 = vpop.eup %6027 }
 0x49d   :  { %v643_v42 = vmul.f32 %v6028_v40, %v6026_v37  ;;  %v546_v40 = vld [vmem:[#allocation6 + $0x48] sm:$0xff] }
 0x49f   :  { %5342 = vmatmul.mubr.msk.f32.vlgmr.msra.gmra.mrb[4].mxu1 %vm632_vm2, %v643_v42  ;;  %v7095_v42 = vpack.c.bf16 %v546_v40, %v545_v39 }
 0x4a0   :  { %5345 = vmatpush3.xpose.msk.msra.mxu1 %vm554_vm1, %v720_v41  ;;  %5346 = vmatprep.mubr.msk.f32.mxu1 %vm6590_vm0, %v6589_v0  ;;  %v547_v41 = vld [vmem:[#allocation6 + $0x50] sm:$0xff] }
 0x4a1   :  { %5769 = vmatprep.subr.bf16.mxu1 %v6594_v56 }
 0x4a3   :  { %5347 = vmatmul.mubr.msk.f32.vlgmr.msra.gmra.mrb[6].mxu1 %vm554_vm1, %v718_v43  ;;  %v548_v43 = vld [vmem:[#allocation6 + $0x58] sm:$0xff] }
 0x4a4   :  { %5362 = vmatprep.mubr.msk.f32.mxu1 %vm6590_vm0, %v6589_v0  ;;  %5771 = vmatpush3.bf16.msra.mxu1 %v7056_v61 }
 0x4a5   :  { %5772 = vmatprep.subr.bf16.mxu1 %v6594_v56 }
 0x4a8   :  { %5774 = vmatpush3.bf16.msra.mxu1 %v7061_v1 }
 0x4a9   :  { %5376 = vmatprep.subr.mxu1 %v6589_v0 }
 0x572   :  { %v713_v44 = vpop.f32.mrb[4].mxu1 }
 0x573   :  { %v5343_v45 = vpop.f32.mrb[5].mxu1 }
 0x576   :  { %v791_v46 = vpop.f32.mrb[6].mxu1 }
 0x577   :  { %v795_v47 = vmul.f32 0.17677669, %v791_v46  ;;  %v5348_v48 = vpop.f32.mrb[7].mxu1 }
 0x579   :  { %v796_v49 = vsel %vm632_vm2, %v795_v47, -inf }
 0x57a   :  { %797 = vmax.xlane.f32.xlu0 %v796_v49 }
 0x590   :  { %808 = vrot.lane.b32.xlu0 %v7029_v29, %s6591_s3 }
 0x594   :  { %1032 = vrot.lane.b32.xlu0 %v454_v21, %s6592_s23 }
 0x598   :  { %1030 = vrot.lane.b32.xlu0 %v7018_v22, %s6592_s23 }
 0x607   :  { %v798_v50 = vpop.xlane.xlu0 %797 }
 0x608   :  { %v799_v51 = vsub.f32 %v795_v47, %v798_v50 }
 0x60a   :  { %v800_v52 = vmul.f32 1.442695, %v799_v51 }
 0x60b   :  { %v809_v53 = vpop.permute.xlu0 %808 }
 0x60c   :  { %6029 = vpow2.f32 %v800_v52  ;;  %5350 = vmatpush3.msra.mxu0 %v809_v53 }
 0x60d   :  { %5775 = vmatprep.subr.bf16.mxu0 %v6594_v56 }
 0x60f   :  { %v1033_v13 = vpop.permute.xlu0 %1032 }
 0x613   :  { %v1031_v20 = vpop.permute.xlu0 %1030 }
 0x616   :  { %v6030_v54 = vpop.eup %6029 }
 0x617   :  { %v802_v55 = vsel %vm632_vm2, %v6030_v54, 0.0 }
 0x618   :  { %803 = vadd.xlane.f32.xlu1 %v802_v55  ;;  %v7119_v55 = vadd.f32 %v7058_v63, %v7009_v17  ;;  %v549_v63 = vld [vmem:[#allocation6 + $0x60] sm:$0xff] }
 0x619   :  { %v7131_v19 = vpack.c.bf16 %v550_v3, %v549_v63 }
 0x629   :  { %1120 = vrot.lane.b32.xlu1 %v7029_v29, %s6592_s23 }
 0x62d   :  { %1272 = vrot.lane.b32.xlu1 %v454_v21, %s6593_s27 }
 0x6a5   :  { %v804_v2 = vpop.xlane.xlu1 %803 }
 0x6a6   :  { %6031 = vrcp.f32 %v804_v2 }
 0x6a9   :  { %v1121_v12 = vpop.permute.xlu1 %1120 }
 0x6ad   :  { %v1273_v45 = vpop.permute.xlu1 %1272 }
 0x6b0   :  { %v6032_v5 = vpop.eup %6031 }
 0x6b1   :  { %v806_v7 = vmul.f32 %v6032_v5, %v6030_v54  ;;  %v7134_v5 = vpack.c.bf16 %v552_v60, %v551_v4 }
 0x6b3   :  { %5352 = vmatmul.mubr.msk.f32.vlgmr.msra.gmra.mrb[4].mxu0 %vm632_vm2, %v806_v7 }
 0x6b4   :  { %5777 = vmatpush3.bf16.msra.mxu0 %v7066_v6  ;;  %5373 = vmatprep.mubr.msk.f32.mxu0 %vm6590_vm0, %v6589_v0 }
 0x6b5   :  { %5778 = vmatprep.subr.bf16.mxu0 %v6594_v56 }
 0x6b8   :  { %5780 = vmatpush3.bf16.msra.mxu0 %v7070_v10 }
 0x6b9   :  { %5381 = vmatprep.subr.mxu0 %v6589_v0 }
 0x6bb   :  { %5374 = vmatmul.mubr.msk.f32.vlgmr.msra.gmra.mrb[6].mxu0 %vm554_vm1, %v713_v44  ;;  %v7098_v44 = vpack.c.bf16 %v548_v43, %v547_v41 }
 0x6bc   :  { %5382 = vmatpush3.msra.mxu0 %v1121_v12  ;;  %5383 = vmatprep.mubr.msk.f32.mxu0 %vm6590_vm0, %v6589_v0 }
 0x6bd   :  { %5397 = vmatprep.subr.mxu0 %v6589_v0 }
 0x786   :  { %v880_v15 = vpop.f32.mrb[4].mxu0 }
 0x787   :  { %v5353_v18 = vpop.f32.mrb[5].mxu0  ;;  %5363 = vmatmul.mubr.msk.f32.vlgmr.msra.gmra.mrb[8].mxu1 %vm554_vm1, %v880_v15 }
 0x788   :  { %5377 = vmatpush3.xpose.msk.msra.mxu1 %vm554_vm1, %v1033_v13  ;;  %5378 = vmatprep.mubr.msk.f32.mxu1 %vm6590_vm0, %v6589_v0 }
 0x789   :  { %5781 = vmatprep.subr.bf16.mxu1 %v6594_v56 }
 0x78b   :  { %5379 = vmatmul.mubr.msk.f32.vlgmr.msra.gmra.mrb[10].mxu1 %vm554_vm1, %v1031_v20 }
 0x78c   :  { %5394 = vmatprep.mubr.msk.f32.mxu1 %vm6590_vm0, %v6589_v0  ;;  %5783 = vmatpush3.bf16.msra.mxu1 %v7095_v42 }
 0x78d   :  { %5784 = vmatprep.subr.bf16.mxu1 %v6594_v56 }
 0x78e   :  { %v1026_v21 = vpop.f32.mrb[6].mxu0 }
 0x78f   :  { %v5375_v23 = vpop.f32.mrb[7].mxu0 }
 0x790   :  { %5786 = vmatpush3.bf16.msra.mxu1 %v7098_v44 }
 0x791   :  { %5787 = vmatprep.subr.bf16.mxu1 %v6594_v56 }
 0x85a   :  { %v953_v24 = vpop.f32.mrb[8].mxu1 }
 0x85b   :  { %v7089_v25 = vadd.f32 %v1026_v21, %v953_v24  ;;  %v5364_v28 = vpop.f32.mrb[9].mxu1 }
 0x85e   :  { %v1104_v30 = vpop.f32.mrb[10].mxu1 }
 0x85f   :  { %v1108_v31 = vmul.f32 0.17677669, %v1104_v30  ;;  %v5380_v32 = vpop.f32.mrb[11].mxu1 }
 0x861   :  { %v1109_v33 = vsel %vm632_vm2, %v1108_v31, -inf }
 0x862   :  { %1110 = vmax.xlane.f32.xlu0 %v1109_v33 }
 0x8ef   :  { %v1111_v34 = vpop.xlane.xlu0 %1110 }
 0x8f0   :  { %v1112_v35 = vsub.f32 %v1108_v31, %v1111_v34 }
 0x8f2   :  { %v1113_v36 = vmul.f32 1.442695, %v1112_v35 }
 0x8f4   :  { %6033 = vpow2.f32 %v1113_v36 }
 0x8fe   :  { %v6034_v37 = vpop.eup %6033 }
 0x8ff   :  { %v1115_v38 = vsel %vm632_vm2, %v6034_v37, 0.0 }
 0x900   :  { %1116 = vadd.xlane.f32.xlu1 %v1115_v38 }
 0x911   :  { %1270 = vrot.lane.b32.xlu1 %v7018_v22, %s6593_s27 }
 0x98d   :  { %v1117_v46 = vpop.xlane.xlu1 %1116 }
 0x98e   :  { %6035 = vrcp.f32 %v1117_v46 }
 0x991   :  { %v1271_v48 = vpop.permute.xlu1 %1270 }
 0x998   :  { %v6036_v22 = vpop.eup %6035 }
 0x999   :  { %v1119_v47 = vmul.f32 %v6036_v22, %v6034_v37 }
 0x99b   :  { %5384 = vmatmul.mubr.msk.f32.vlgmr.msra.gmra.mrb[8].mxu0 %vm632_vm2, %v1119_v47 }
 0x99c   :  { %5398 = vmatpush3.xpose.msk.msra.mxu0 %vm554_vm1, %v1273_v45  ;;  %5399 = vmatprep.mubr.msk.f32.mxu0 %vm6590_vm0, %v6589_v0 }
 0x99d   :  { %5402 = vmatprep.subr.mxu0 %v6589_v0 }
 0x99f   :  { %5400 = vmatmul.mubr.msk.f32.vlgmr.msra.gmra.mrb[10].mxu0 %vm554_vm1, %v1271_v48 }
 0x9a0   :  { %5404 = vmatprep.mubr.msk.f32.mxu0 %vm6590_vm0, %v6589_v0 }
 0xa6e   :  { %v1192_v49 = vpop.f32.mrb[8].mxu0 }
 0xa6f   :  { %v5385_v50 = vpop.f32.mrb[9].mxu0  ;;  %5395 = vmatmul.mubr.msk.f32.vlgmr.msra.gmra.mrb[12].mxu1 %vm554_vm1, %v1192_v49 }
 0xa70   :  { %5415 = vmatprep.mubr.msk.f32.mxu1 %vm6590_vm0, %v6589_v0  ;;  %5789 = vmatpush3.bf16.msra.mxu1 %v7131_v19 }
 0xa71   :  { %5790 = vmatprep.subr.bf16.mxu1 %v6594_v56 }
 0xa72   :  { %v1344_v51 = vpop.f32.mrb[10].mxu0 }
 0xa73   :  { %v1348_v52 = vmul.f32 0.17677669, %v1344_v51  ;;  %v5401_v53 = vpop.f32.mrb[11].mxu0 }
 0xa74   :  { %5792 = vmatpush3.bf16.msra.mxu1 %v7134_v5 }
 0xa75   :  { %v1349_v54 = vsel %vm632_vm2, %v1348_v52, -inf  ;;  %5428 = vmatprep.subr.mxu1 %v6589_v0 }
 0xa76   :  { %1350 = vmax.xlane.f32.xlu0 %v1349_v54 }
 0xa8c   :  { %1360 = vrot.lane.b32.xlu0 %v7029_v29, %s6593_s27 }
 0xa90   :  { %1673 = vrot.lane.b32.xlu0 %v7119_v55, %s6591_s3 }
 0xa94   :  { %1671 = vrot.lane.b32.xlu0 %v7125_v57, %s6591_s3 }
 0xb03   :  { %v1351_v58 = vpop.xlane.xlu0 %1350 }
 0xb04   :  { %v1352_v59 = vsub.f32 %v1348_v52, %v1351_v58 }
 0xb06   :  { %v1353_v62 = vmul.f32 1.442695, %v1352_v59 }
 0xb07   :  { %v1361_v2 = vpop.permute.xlu0 %1360 }
 0xb08   :  { %6037 = vpow2.f32 %v1353_v62  ;;  %5403 = vmatpush3.msra.mxu0 %v1361_v2 }
 0xb09   :  { %5418 = vmatprep.subr.mxu0 %v6589_v0 }
 0xb0b   :  { %v1674_v18 = vpop.permute.xlu0 %1673 }
 0xb0f   :  { %v1672_v23 = vpop.permute.xlu0 %1671 }
 0xb12   :  { %v6038_v17 = vpop.eup %6037 }
 0xb13   :  { %v1355_v29 = vsel %vm632_vm2, %v6038_v17, 0.0 }
 0xb14   :  { %1356 = vadd.xlane.f32.xlu1 %v1355_v29 }
 0xb42   :  { %v1265_v7 = vpop.f32.mrb[12].mxu1 }
 0xb43   :  { %v1269_v8 = vadd.f32 %v1265_v7, %v7089_v25  ;;  %v5396_v9 = vpop.f32.mrb[13].mxu1 }
 0xba1   :  { %v1357_v12 = vpop.xlane.xlu1 %1356 }
 0xba2   :  { %6039 = vrcp.f32 %v1357_v12 }
 0xbac   :  { %v6040_v13 = vpop.eup %6039 }
 0xbad   :  { %v1359_v15 = vmul.f32 %v6040_v13, %v6038_v17 }
 0xbaf   :  { %5405 = vmatmul.mubr.msk.f32.vlgmr.msra.gmra.mrb[12].mxu0 %vm632_vm2, %v1359_v15 }
 0xbb0   :  { %5419 = vmatpush3.xpose.msk.msra.mxu0 %vm554_vm1, %v7119_v55  ;;  %5420 = vmatprep.mubr.msk.f32.mxu0 %vm6590_vm0, %v6589_v0 }
 0xbb1   :  { %5423 = vmatprep.subr.mxu0 %v6589_v0 }
 0xbb3   :  { %5421 = vmatmul.mubr.msk.f32.vlgmr.msra.gmra.mrb[14].mxu0 %vm554_vm1, %v7125_v57 }
 0xbb4   :  { %5424 = vmatpush3.msra.mxu0 %v7027_v27  ;;  %5425 = vmatprep.mubr.msk.f32.mxu0 %vm6590_vm0, %v6589_v0 }
 0xbb5   :  { %5433 = vmatprep.subr.mxu0 %v6589_v0 }
 0xc82   :  { %v1432_v20 = vpop.f32.mrb[12].mxu0 }
 0xc83   :  { %v5406_v21 = vpop.f32.mrb[13].mxu0  ;;  %5416 = vmatmul.mubr.msk.f32.vlgmr.msra.gmra.mrb[14].mxu1 %vm554_vm1, %v1432_v20 }
 0xc84   :  { %5429 = vmatpush3.xpose.msk.msra.mxu1 %vm554_vm1, %v1674_v18  ;;  %5430 = vmatprep.mubr.msk.f32.mxu1 %vm6590_vm0, %v6589_v0 }
 0xc85   :  { %5793 = vmatprep.subr.bf16.mxu1 %v6594_v56 }
 0xc86   :  { %v1582_v24 = vpop.f32.mrb[14].mxu0 }
 0xc87   :  { %v1586_v25 = vmul.f32 0.17677669, %v1582_v24  ;;  %v5422_v28 = vpop.f32.mrb[15].mxu0  ;;  %5431 = vmatmul.mubr.msk.f32.vlgmr.msra.gmra.mrb[16].mxu1 %vm554_vm1, %v1672_v23 }
 0xc88   :  { %5795 = vmatpush3.bf16.msra.mxu1 %v7056_v61  ;;  %5446 = vmatprep.mubr.msk.f32.mxu1 %vm6590_vm0, %v6589_v0 }
 0xc89   :  { %v1587_v30 = vsel %vm632_vm2, %v1586_v25, -inf  ;;  %5796 = vmatprep.subr.bf16.mxu1 %v6594_v56 }
 0xc8a   :  { %1588 = vmax.xlane.f32.xlu0 %v1587_v30 }
 0xc8c   :  { %5798 = vmatpush3.bf16.msra.mxu1 %v7061_v1 }
 0xc8d   :  { %5460 = vmatprep.subr.mxu1 %v6589_v0 }
 0xca0   :  { %1986 = vrot.lane.b32.xlu0 %v7119_v55, %s6592_s23 }
 0xd17   :  { %v1589_v31 = vpop.xlane.xlu0 %1588 }
 0xd18   :  { %v1590_v32 = vsub.f32 %v1586_v25, %v1589_v31 }
 0xd1a   :  { %v1591_v33 = vmul.f32 1.442695, %v1590_v32 }
 0xd1b   :  { %v1987_v62 = vpop.permute.xlu0 %1986 }
 0xd1c   :  { %6041 = vpow2.f32 %v1591_v33 }
 0xd26   :  { %v6042_v40 = vpop.eup %6041 }
 0xd27   :  { %v1593_v1 = vsel %vm632_vm2, %v6042_v40, 0.0 }
 0xd56   :  { %v1505_v61 = vpop.f32.mrb[14].mxu1 }
 0xd57   :  { %v7167_v34 = vadd.f32 %v1505_v61, %v1269_v8  ;;  %v5417_v35 = vpop.f32.mrb[15].mxu1 }
 0xd58   :  { %v5039_v35 = vld [vmem:[#allocation7] ss:$0 sm:$0xff] }
 0xd5a   :  { %v1745_v36 = vpop.f32.mrb[16].mxu1 }
 0xd5b   :  { %v1749_v37 = vmul.f32 0.17677669, %v1745_v36  ;;  %v5432_v38 = vpop.f32.mrb[17].mxu1 }
 0xd5d   :  { %v1750_v39 = vsel %vm632_vm2, %v1749_v37, -inf }
 0xd5e   :  { %1751 = vmax.xlane.f32.xlu1 %v1750_v39 }
 0xd62   :  { %1594 = vadd.xlane.f32.xlu1 %v1593_v1 }
 0xdeb   :  { %v1752_v41 = vpop.xlane.xlu1 %1751 }
 0xdec   :  { %v1753_v43 = vsub.f32 %v1749_v37, %v1752_v41  ;;  %v2470_v37 = vadd.f32 %v5039_v35, %v7167_v34 }
 0xdee   :  { %v1754_v45 = vmul.f32 1.442695, %v1753_v43 }
 0xdef   :  { %v1595_v46 = vpop.xlane.xlu1 %1594 }
 0xdf0   :  { %6043 = vpow2.f32 %v1754_v45 }
 0xdf1   :  { %6045 = vrcp.f32 %v1595_v46 }
 0xdfa   :  { %v6044_v22 = vpop.eup %6043 }
 0xdfb   :  { %v6046_v47 = vpop.eup %6045  ;;  %v1756_v48 = vsel %vm632_vm2, %v6044_v22, 0.0 }
 0xdfc   :  { %v1597_v49 = vmul.f32 %v6046_v47, %v6042_v40  ;;  %1757 = vadd.xlane.f32.xlu1 %v1756_v48 }
 0xdfe   :  { %5426 = vmatmul.mubr.msk.f32.vlgmr.msra.gmra.mrb[16].mxu0 %vm632_vm2, %v1597_v49 }
 0xdff   :  { %5435 = vmatprep.mubr.msk.f32.mxu0 %vm6590_vm0, %v6589_v0 }
 0xe0d   :  { %1762 = vrot.lane.b32.xlu1 %v7027_v27, %s6591_s3 }
 0xe11   :  { %1984 = vrot.lane.b32.xlu1 %v7125_v57, %s6592_s23 }
 0xe89   :  { %v1758_v50 = vpop.xlane.xlu1 %1757 }
 0xe8a   :  { %6047 = vrcp.f32 %v1758_v50 }
 0xe8d   :  { %v1763_v51 = vpop.permute.xlu1 %1762 }
 0xe8e   :  { %5434 = vmatpush3.msra.mxu0 %v1763_v51 }
 0xe8f   :  { %5799 = vmatprep.subr.bf16.mxu0 %v6594_v56 }
 0xe94   :  { %v6048_v52 = vpop.eup %6047 }
 0xe95   :  { %v1760_v53 = vmul.f32 %v6048_v52, %v6044_v22 }
 0xe97   :  { %5436 = vmatmul.mubr.msk.f32.vlgmr.msra.gmra.mrb[18].mxu0 %vm632_vm2, %v1760_v53  ;;  %v2614_v53 = vld [vmem:[#allocation15 + $0x8] sm:$0xff] }
 0xe98   :  { %5801 = vmatpush3.bf16.msra.mxu0 %v7066_v6  ;;  %5457 = vmatprep.mubr.msk.f32.mxu0 %vm6590_vm0, %v6589_v0  ;;  %v1985_v6 = vpop.permute.xlu1 %1984 }
 0xe99   :  { %5802 = vmatprep.subr.bf16.mxu0 %v6594_v56 }
 0xe9c   :  { %5804 = vmatpush3.bf16.msra.mxu0 %v7070_v10 }
 0xe9d   :  { %5465 = vmatprep.subr.mxu0 %v6589_v0 }
 0xed1   :  { %v1667_v54 = vpop.f32.mrb[16].mxu0 }
 0xed2   :  { %v5427_v58 = vpop.f32.mrb[17].mxu0  ;;  %5458 = vmatmul.mubr.msk.f32.vlgmr.msra.gmra.mrb[20].mxu0 %vm554_vm1, %v1667_v54  ;;  %v2616_v54 = vld [vmem:[#allocation15 + $0x18] sm:$0xff] }
 0xed3   :  { %5467 = vmatprep.mubr.msk.f32.mxu0 %vm6590_vm0, %v6589_v0  ;;  %v2613_v58 = vld [vmem:[#allocation15] sm:$0xff] }
 0xf6a   :  { %v1834_v59 = vpop.f32.mrb[18].mxu0 }
 0xf6b   :  { %v5437_v2 = vpop.f32.mrb[19].mxu0  ;;  %5447 = vmatmul.mubr.msk.f32.vlgmr.msra.gmra.mrb[18].mxu1 %vm554_vm1, %v1834_v59  ;;  %v5849_v59 = vpack.c.bf16 %v2616_v54, %v2614_v53  ;;  %v2633_v53 = vld [vmem:[#allocation15 + $0xa0] sm:$0xff] }
 0xf6c   :  { %5461 = vmatpush3.xpose.msk.msra.mxu1 %vm554_vm1, %v1987_v62  ;;  %5462 = vmatprep.mubr.msk.f32.mxu1 %vm6590_vm0, %v6589_v0  ;;  %v2615_v62 = vld [vmem:[#allocation15 + $0x10] sm:$0xff]  ;;  %v2515_v2 = vld [vmem:[#allocation12] sm:$0xff] }
 0xf6d   :  { %5805 = vmatprep.subr.bf16.mxu1 %v6594_v56 }
 0xf6f   :  { %5463 = vmatmul.mubr.msk.f32.vlgmr.msra.gmra.mrb[20].mxu1 %vm554_vm1, %v1985_v6  ;;  %v2516_v6 = vld [vmem:[#allocation12 + $0x8] sm:$0xff] }
 0xf70   :  { %5807 = vmatpush3.bf16.msra.mxu1 %v7095_v42  ;;  %5478 = vmatprep.mubr.msk.f32.mxu1 %vm6590_vm0, %v6589_v0 }
 0xf71   :  { %5808 = vmatprep.subr.bf16.mxu1 %v6594_v56 }
 0xf74   :  { %5810 = vmatpush3.bf16.msra.mxu1 %v7098_v44 }
 0xf75   :  { %5811 = vmatprep.subr.bf16.mxu1 %v6594_v56 }
 0xfa5   :  { %v1980_v10 = vpop.f32.mrb[20].mxu0 }
 0xfa6   :  { %v5459_v17 = vpop.f32.mrb[21].mxu0 }
 0xfa7   :  { %v5817_v17 = vpack.c.bf16 %v2516_v6, %v2515_v2 }
0x103e   :  { %v1907_v29 = vpop.f32.mrb[18].mxu1 }
0x103f   :  { %v1981_v63 = vadd.f32 %v1980_v10, %v1907_v29  ;;  %v5448_v3 = vpop.f32.mrb[19].mxu1  ;;  %v5851_v10 = vpack.c.bf16 %v2615_v62, %v2613_v58  ;;  %v2618_v29 = vld [vmem:[#allocation15 + $0x28] sm:$0xff]  ;;  %v2635_v58 = vld [vmem:[#allocation15 + $0xb0] sm:$0xff] }
0x1040   :  { %v2617_v3 = vld [vmem:[#allocation15 + $0x20] sm:$0xff]  ;;  %v2526_v62 = vld [vmem:[#allocation12 + $0x58] sm:$0xff]  ;;  %v5871_v2 = vpack.c.bf16 %v2635_v58, %v2633_v53 }
0x1042   :  { %v2058_v4 = vpop.f32.mrb[20].mxu1 }
0x1043   :  { %v2062_v60 = vmul.f32 0.17677669, %v2058_v4  ;;  %v5464_v7 = vpop.f32.mrb[21].mxu1 }
0x1044   :  { %v2518_v7 = vld [vmem:[#allocation12 + $0x18] sm:$0xff] }
0x1045   :  { %v2063_v8 = vsel %vm632_vm2, %v2062_v60, -inf }
0x1046   :  { %2064 = vmax.xlane.f32.xlu1 %v2063_v8 }
0x1057   :  { %2074 = vrot.lane.b32.xlu1 %v7027_v27, %s6592_s23 }
0x105b   :  { %2224 = vrot.lane.b32.xlu1 %v7125_v57, %s6593_s27 }
0x10d3   :  { %v2065_v42 = vpop.xlane.xlu1 %2064 }
0x10d4   :  { %v2066_v44 = vsub.f32 %v2062_v60, %v2065_v42  ;;  %v2517_v60 = vld [vmem:[#allocation12 + $0x10] sm:$0xff] }
0x10d5   :  { %v5821_v42 = vpack.c.bf16 %v2518_v7, %v2517_v60 }
0x10d6   :  { %v2067_v9 = vmul.f32 1.442695, %v2066_v44  ;;  %v2622_v44 = vld [vmem:[#allocation15 + $0x48] sm:$0xff] }
0x10d7   :  { %v2075_v12 = vpop.permute.xlu1 %2074 }
0x10d8   :  { %6049 = vpow2.f32 %v2067_v9  ;;  %5466 = vmatpush3.msra.mxu0 %v2075_v12  ;;  %v2624_v9 = vld [vmem:[#allocation15 + $0x58] sm:$0xff]  ;;  %v2621_v12 = vld [vmem:[#allocation15 + $0x40] sm:$0xff] }
0x10d9   :  { %5481 = vmatprep.subr.mxu0 %v6589_v0 }
0x10db   :  { %v2225_v23 = vpop.permute.xlu1 %2224 }
0x10e2   :  { %v6050_v13 = vpop.eup %6049 }
0x10e3   :  { %v2069_v15 = vsel %vm632_vm2, %v6050_v13, 0.0 }
0x10e4   :  { %2070 = vadd.xlane.f32.xlu0 %v2069_v15  ;;  %v2623_v15 = vld [vmem:[#allocation15 + $0x50] sm:$0xff] }
0x10fa   :  { %2226 = vrot.lane.b32.xlu0 %v7119_v55, %s6593_s27 }
0x1171   :  { %v2071_v18 = vpop.xlane.xlu0 %2070 }
0x1172   :  { %6051 = vrcp.f32 %v2071_v18  ;;  %v2519_v18 = vld [vmem:[#allocation12 + $0x20] sm:$0xff] }
0x1175   :  { %v2227_v57 = vpop.permute.xlu0 %2226 }
0x117c   :  { %v6052_v20 = vpop.eup %6051 }
0x117d   :  { %v2073_v21 = vmul.f32 %v6052_v20, %v6050_v13  ;;  %v5857_v13 = vpack.c.bf16 %v2624_v9, %v2622_v44  ;;  %v2520_v20 = vld [vmem:[#allocation12 + $0x28] sm:$0xff] }
0x117e   :  { %v2641_v44 = vld [vmem:[#allocation15 + $0xe0] sm:$0xff] }
0x117f   :  { %5468 = vmatmul.mubr.msk.f32.vlgmr.msra.gmra.mrb[22].mxu0 %vm632_vm2, %v2073_v21  ;;  %v5825_v21 = vpack.c.bf16 %v2520_v20, %v2519_v18 }
0x1180   :  { %5482 = vmatpush3.xpose.msk.msra.mxu0 %vm554_vm1, %v2227_v57  ;;  %5483 = vmatprep.mubr.msk.f32.mxu0 %vm6590_vm0, %v6589_v0  ;;  %v2626_v57 = vld [vmem:[#allocation15 + $0x68] sm:$0xff] }
0x1181   :  { %5486 = vmatprep.subr.mxu0 %v6589_v0 }
0x1183   :  { %5484 = vmatmul.mubr.msk.f32.vlgmr.msra.gmra.mrb[24].mxu0 %vm554_vm1, %v2225_v23  ;;  %v2628_v23 = vld [vmem:[#allocation15 + $0x78] sm:$0xff] }
0x1184   :  { %5488 = vmatprep.mubr.msk.f32.mxu0 %vm6590_vm0, %v6589_v0 }
0x1252   :  { %v2146_v55 = vpop.f32.mrb[22].mxu0 }
0x1253   :  { %v5469_v24 = vpop.f32.mrb[23].mxu0  ;;  %5479 = vmatmul.mubr.msk.f32.vlgmr.msra.gmra.mrb[22].mxu1 %vm554_vm1, %v2146_v55  ;;  %v5859_v55 = vpack.c.bf16 %v2623_v15, %v2621_v12  ;;  %v2643_v12 = vld [vmem:[#allocation15 + $0xf0] sm:$0xff] }
0x1254   :  { %5813 = vmatpush3.bf16.msra.mxu1 %v7131_v19  ;;  %5499 = vmatprep.mubr.msk.f32.mxu1 %vm6590_vm0, %v6589_v0  ;;  %v5861_v24 = vpack.c.bf16 %v2628_v23, %v2626_v57  ;;  %v2530_v15 = vld [vmem:[#allocation12 + $0x78] sm:$0xff]  ;;  %v5879_v18 = vpack.c.bf16 %v2643_v12, %v2641_v44  ;;  %v2734_v12 = vld [vmem:[#allocation18] sm:$0xff] }
0x1255   :  { %5814 = vmatprep.subr.bf16.mxu1 %v6594_v56 }
0x1256   :  { %v2298_v25 = vpop.f32.mrb[24].mxu0 }
0x1257   :  { %v2302_v28 = vmul.f32 0.17677669, %v2298_v25  ;;  %v5485_v30 = vpop.f32.mrb[25].mxu0  ;;  %v2625_v25 = vld [vmem:[#allocation15 + $0x60] sm:$0xff] }
0x1258   :  { %5816 = vmatpush3.bf16.msra.mxu1 %v7134_v5  ;;  %v2472_v5 = vadd.f32 %v2470_v37, %v6986_v26 }
0x1259   :  { %v2303_v31 = vsel %vm632_vm2, %v2302_v28, -inf  ;;  %5850 = vmatprep.subr.bf16.mxu1 %v5849_v59  ;;  %v2525_v59 = vld [vmem:[#allocation12 + $0x50] sm:$0xff] }
0x125a   :  { %2304 = vmax.xlane.f32.xlu1 %v2303_v31  ;;  %v5837_v6 = vpack.c.bf16 %v2526_v62, %v2525_v59 }
0x126b   :  { %2314 = vrot.lane.b32.xlu1 %v7027_v27, %s6593_s27 }
0x12e7   :  { %v2305_v32 = vpop.xlane.xlu1 %2304 }
0x12e8   :  { %v2306_v33 = vsub.f32 %v2302_v28, %v2305_v32  ;;  %v2627_v28 = vld [vmem:[#allocation15 + $0x70] sm:$0xff] }
0x12e9   :  { %v5863_v30 = vpack.c.bf16 %v2627_v28, %v2625_v25 }
0x12ea   :  { %v2307_v61 = vmul.f32 1.442695, %v2306_v33 }
0x12eb   :  { %v2315_v19 = vpop.permute.xlu1 %2314 }
0x12ec   :  { %6053 = vpow2.f32 %v2307_v61  ;;  %5487 = vmatpush3.msra.mxu0 %v2315_v19 }
0x12ed   :  { %5818 = vmatprep.subr.bf16.mxu0 %v5817_v17 }
0x12f6   :  { %v6054_v36 = vpop.eup %6053 }
0x12f7   :  { %v2309_v38 = vsel %vm632_vm2, %v6054_v36, 0.0 }
0x12f8   :  { %2310 = vadd.xlane.f32.xlu0 %v2309_v38  ;;  %v7243_v38 = vld [vmem:[#allocation9] ss:$0 sm:$0xff] }
0x12fc   :  { %2476 = vadd.xlane.f32.xlu0 %v2472_v5 }
0x1326   :  { %v2219_v39 = vpop.f32.mrb[22].mxu1 }
0x1327   :  { %v2223_v40 = vadd.f32 %v2219_v39, %v1981_v63  ;;  %v5480_v1 = vpop.f32.mrb[23].mxu1  ;;  %v2620_v63 = vld [vmem:[#allocation15 + $0x38] sm:$0xff]  ;;  %v2521_v39 = vld [vmem:[#allocation12 + $0x30] sm:$0xff] }
0x1328   :  { %v5853_v4 = vpack.c.bf16 %v2620_v63, %v2618_v29  ;;  %v7246_v1 = vld [vmem:[#allocation10] ss:$0 sm:$0xff]  ;;  %v2637_v29 = vld [vmem:[#allocation15 + $0xc0] sm:$0xff] }
0x1385   :  { %v2311_v27 = vpop.xlane.xlu0 %2310 }
0x1386   :  { %6055 = vrcp.f32 %v2311_v27 }
0x1389   :  { %v2477_v34 = vpop.xlane.xlu0 %2476 }
0x138a   :  { %v2481_v47 = vmul.f32 0.0078125, %v2477_v34  ;;  %v2629_v34 = vld [vmem:[#allocation15 + $0x80] sm:$0xff] }
0x138c   :  { %v7234_v50 = vsub.f32 %v2472_v5, %v2481_v47 }
0x138e   :  { %v2485_v52 = vmul.f32 %v7234_v50, %v7234_v50 }
0x1390   :  { %v6056_v41 = vpop.eup %6055 }
0x1391   :  { %v2313_v43 = vmul.f32 %v6056_v41, %v6054_v36  ;;  %v2630_v41 = vld [vmem:[#allocation15 + $0x88] sm:$0xff] }
0x1393   :  { %5489 = vmatmul.mubr.msk.f32.vlgmr.msra.gmra.mrb[26].mxu0 %vm632_vm2, %v2313_v43  ;;  %v2632_v43 = vld [vmem:[#allocation15 + $0x98] sm:$0xff] }
0x1394   :  { %5820 = vmatpush3.bf16.msra.mxu0 %v5817_v17  ;;  %v2640_v17 = vld [vmem:[#allocation15 + $0xd8] sm:$0xff] }
0x1395   :  { %5822 = vmatprep.subr.bf16.mxu0 %v5821_v42 }
0x1398   :  { %5824 = vmatpush3.bf16.msra.mxu0 %v5821_v42  ;;  %v2644_v42 = vld [vmem:[#allocation15 + $0xf8] sm:$0xff] }
0x1399   :  { %5826 = vmatprep.subr.bf16.mxu0 %v5825_v21 }
0x139c   :  { %5828 = vmatpush3.bf16.msra.mxu0 %v5825_v21  ;;  %v318_v21 = vld [vmem:[%s7576_s10] sm:$0xff] }
0x1466   :  { %v2386_v45 = vpop.f32.mrb[26].mxu0 }
0x1467   :  { %v5490_v46 = vpop.f32.mrb[27].mxu0  ;;  %5500 = vmatmul.mubr.msk.f32.vlgmr.msra.gmra.mrb[24].mxu1 %vm554_vm1, %v2386_v45 }
0x1468   :  { %2721 = vmatprep.mubr.f32.mxu1 %v6589_v0  ;;  %5852 = vmatpush1.bf16.msra.mxu1 %v5851_v10  ;;  %v5865_v46 = vpack.c.bf16 %v2632_v43, %v2630_v41  ;;  %v2638_v10 = vld [vmem:[#allocation15 + $0xc8] sm:$0xff] }
0x1469   :  { %5854 = vmatprep.subr.bf16.mxu1 %v5853_v4  ;;  %v5873_v63 = vpack.c.bf16 %v2640_v17, %v2638_v10  ;;  %v2527_v4 = vld [vmem:[#allocation12 + $0x60] sm:$0xff] }
0x153a   :  { %v2459_v22 = vpop.f32.mrb[24].mxu1 }
0x153b   :  { %v2463_v26 = vadd.f32 %v2459_v22, %v2223_v40  ;;  %v5501_v48 = vpop.f32.mrb[25].mxu1  ;;  %v2522_v40 = vld [vmem:[#allocation12 + $0x38] sm:$0xff] }
0x153c   :  { %v5829_v27 = vpack.c.bf16 %v2522_v40, %v2521_v39  ;;  %v2631_v22 = vld [vmem:[#allocation15 + $0x90] sm:$0xff]  ;;  %v2523_v48 = vld [vmem:[#allocation12 + $0x40] sm:$0xff] }
0x153d   :  { %v2471_v49 = vadd.f32 %v5039_v35, %v2463_v26  ;;  %v5867_v47 = vpack.c.bf16 %v2631_v22, %v2629_v34 }
0x153e   :  { %5830 = vmatprep.subr.bf16.mxu0 %v5829_v27 }
0x153f   :  { %v2473_v51 = vadd.f32 %v2471_v49, %v6996_v11  ;;  %v2619_v11 = vld [vmem:[#allocation15 + $0x30] sm:$0xff]  ;;  %5832 = vmatpush3.bf16.msra.mxu0 %v5829_v27  ;;  %v2524_v49 = vld [vmem:[#allocation12 + $0x48] sm:$0xff] }
0x1540   :  { %v5855_v8 = vpack.c.bf16 %v2619_v11, %v2617_v3  ;;  %v2639_v3 = vld [vmem:[#allocation15 + $0xd0] sm:$0xff]  ;;  %v2528_v11 = vld [vmem:[#allocation12 + $0x68] sm:$0xff] }
0x1541   :  { %2478 = vadd.xlane.f32.xlu0 %v2473_v51  ;;  %v5875_v60 = vpack.c.bf16 %v2639_v3, %v2637_v29  ;;  %v5841_v7 = vpack.c.bf16 %v2528_v11, %v2527_v4  ;;  %v319_v4 = vld [vmem:[%s7576_s10 + $0x8] sm:$0xff] }
0x1542   :  { %5856 = vmatpush1.bf16.msra.mxu1 %v5855_v8  ;;  %v2642_v8 = vld [vmem:[#allocation15 + $0xe8] sm:$0xff] }
0x1543   :  { %5858 = vmatprep.subr.bf16.mxu1 %v5857_v13  ;;  %v5877_v9 = vpack.c.bf16 %v2644_v42, %v2642_v8  ;;  %v2529_v13 = vld [vmem:[#allocation12 + $0x70] sm:$0xff]  ;;  %v2738_v11 = vld [vmem:[#allocation18 + $0x20] sm:$0xff]  ;;  %v2741_v42 = vld [vmem:[#allocation18 + $0x38] sm:$0xff] }
0x1544   :  { %v5845_v20 = vpack.c.bf16 %v2530_v15, %v2529_v13  ;;  %v2735_v13 = vld [vmem:[#allocation18 + $0x8] sm:$0xff] }
0x1545   :  { %2487 = vadd.xlane.f32.xlu0 %v2485_v52  ;;  %v2636_v52 = vld [vmem:[#allocation15 + $0xb8] sm:$0xff] }
0x1546   :  { %5860 = vmatpush1.bf16.msra.mxu1 %v5859_v55 }
0x1547   :  { %5862 = vmatprep.subr.bf16.mxu1 %v5861_v24 }
0x154a   :  { %5864 = vmatpush1.bf16.msra.mxu1 %v5863_v30 }
0x154b   :  { %5866 = vmatprep.subr.bf16.mxu1 %v5865_v46 }
0x154e   :  { %5868 = vmatpush1.bf16.msra.mxu1 %v5867_v47 }
0x15ce   :  { %v2479_v31 = vpop.xlane.xlu0 %2478 }
0x15cf   :  { %v2482_v32 = vmul.f32 0.0078125, %v2479_v31  ;;  %v2645_v31 = vld [vmem:[#allocation16] sm:$0x3] }
0x15d1   :  { %v7239_v33 = vsub.f32 %v2473_v51, %v2482_v32  ;;  %v2634_v51 = vld [vmem:[#allocation15 + $0xa8] sm:$0xff]  ;;  %v7268_v32 = vrot.slane %v2645_v31, %v7006_v16 }
0x15d2   :  { %v2488_v61 = vpop.xlane.xlu0 %2487  ;;  %v5869_v54 = vpack.c.bf16 %v2636_v52, %v2634_v51 }
0x15d3   :  { %v2491_v19 = vmul.f32 0.0078125, %v2488_v61  ;;  %v2486_v35 = vmul.f32 %v7239_v33, %v7239_v33 }
0x15d4   :  { %5870 = vmatprep.subr.bf16.mxu1 %v5869_v54 }
0x15d5   :  { %v2493_v36 = vadd.f32 1e-05, %v2491_v19  ;;  %2489 = vadd.xlane.f32.xlu1 %v2486_v35  ;;  %5872 = vmatpush1.bf16.msra.mxu1 %v5871_v2 }
0x15d6   :  { %5874 = vmatprep.subr.bf16.mxu1 %v5873_v63 }
0x15d7   :  { %6057 = vrsqrt.f32 %v2493_v36  ;;  %v7277_v36 = vrot.slane %v2645_v31, %v7004_v14 }
0x15d9   :  { %5876 = vmatpush1.bf16.msra.mxu1 %v5875_v60  ;;  %v2739_v60 = vld [vmem:[#allocation18 + $0x28] sm:$0xff] }
0x15da   :  { %5878 = vmatprep.subr.bf16.mxu1 %v5877_v9  ;;  %v7324_v8 = vpack.c.bf16 %v2739_v60, %v2738_v11 }
0x15dd   :  { %5880 = vmatpush1.bf16.msra.mxu1 %v5879_v18  ;;  %v7332_v18 = vpack.c.bf16 %v2735_v13, %v2734_v12  ;;  %v2747_v12 = vld [vmem:[#allocation18 + $0x68] sm:$0xff]  ;;  %v2748_v13 = vld [vmem:[#allocation18 + $0x70] sm:$0xff] }
0x15de   :  { %5552 = vmatprep.subr.mxu1 %v6589_v0 }
0x15e0   :  { %2722 = vmatmul.mubr.f32.vlgmr.msra.gmra.mrb[26].mxu1 %v318_v21  ;;  %v2736_v21 = vld [vmem:[#allocation18 + $0x10] sm:$0xff] }
0x15e1   :  { %v6058_v37 = vpop.eup %6057  ;;  %2727 = vmatprep.mubr.f32.mxu1 %v6589_v0 }
0x15e2   :  { %v2497_v5 = vmul.f32 %v6058_v37, %v7234_v50  ;;  %v5833_v50 = vpack.c.bf16 %v2524_v49, %v2523_v48 }
0x15e4   :  { %v2505_v45 = vmul.f32 %v7243_v38, %v2497_v5  ;;  %5834 = vmatprep.subr.bf16.mxu0 %v5833_v50  ;;  %2728 = vmatmul.mubr.f32.gmra.mrb[28].mxu1 %v319_v4 }
0x15e5   :  { %5836 = vmatpush3.bf16.msra.mxu0 %v5833_v50  ;;  %5554 = vmatprep.mubr.msk.f32.mxu1 %vm6590_vm0, %v6589_v0 }
0x15e6   :  { %v7250_v26 = vadd.f32 %v7246_v1, %v2505_v45  ;;  %5838 = vmatprep.subr.bf16.mxu0 %v5837_v6 }
0x15e8   :  { %5534 = vmatprep.mubr.f32.mxu0 %v7250_v26 }
0x15e9   :  { %5840 = vmatpush3.bf16.msra.mxu0 %v5837_v6 }
0x15ea   :  { %5842 = vmatprep.subr.bf16.mxu0 %v5841_v7 }
0x15ed   :  { %5844 = vmatpush3.bf16.msra.mxu0 %v5841_v7  ;;  %v2740_v7 = vld [vmem:[#allocation18 + $0x30] sm:$0xff] }
0x15ee   :  { %5846 = vmatprep.subr.bf16.mxu0 %v5845_v20  ;;  %v7327_v44 = vpack.c.bf16 %v2741_v42, %v2740_v7 }
0x15f1   :  { %5848 = vmatpush3.bf16.msra.mxu0 %v5845_v20 }
0x15f2   :  { %5537 = vmatprep.subr.mxu0 %v6589_v0 }
0x1662   :  { %v2490_v57 = vpop.xlane.xlu1 %2489 }
0x1663   :  { %v2492_v23 = vmul.f32 0.0078125, %v2490_v57  ;;  %v2737_v57 = vld [vmem:[#allocation18 + $0x18] sm:$0xff] }
0x1665   :  { %v2494_v55 = vadd.f32 1e-05, %v2492_v23  ;;  %v7336_v23 = vpack.c.bf16 %v2737_v57, %v2736_v21 }
0x1667   :  { %6059 = vrsqrt.f32 %v2494_v55 }
0x1671   :  { %v6060_v24 = vpop.eup %6059 }
0x1672   :  { %v2498_v25 = vmul.f32 %v6060_v24, %v7239_v33  ;;  %v5042_v33 = vld [vmem:[#allocation13] ss:$0 sm:$0xff] }
0x1674   :  { %v2506_v28 = vmul.f32 %v7243_v38, %v2498_v25 }
0x1676   :  { %v7262_v30 = vadd.f32 %v7246_v1, %v2506_v28 }
0x1678   :  { %5535 = vmatmul.mubr.f32.vlgmr.msra.gmra.mrb[28].mxu0 %v7262_v30 }
0x1679   :  { %5539 = vmatprep.mubr.msk.f32.mxu0 %vm6590_vm0, %v6589_v0 }
0x16b3   :  { %v2723_v61 = vpop.f32.mrb[26].mxu1 }
0x16b4   :  { %v7271_v19 = vadd.f32 %v2723_v61, %v7268_v32  ;;  %v2725_v35 = vpop.f32.mrb[27].mxu1 }
0x16b5   :  { %v7284_v40 = vadd.f32 %v2725_v35, %v7277_v36 }
0x16b6   :  { %5538 = vmatpush3.xpose.msk.msra.mxu0 %vm554_vm1, %v7271_v19 }
0x16b7   :  { %5542 = vmatprep.subr.mxu0 %v6589_v0  ;;  %v2729_v24 = vpop.f32.mrb[28].mxu1 }
0x16b8   :  { %v7347_v25 = vpop.f32.mrb[29].mxu1  ;;  %v7386_v4 = vadd.f32 %v2729_v24, %v7268_v32  ;;  %v2746_v32 = vld [vmem:[#allocation18 + $0x60] sm:$0xff] }
0x174b   :  { %v5536_v37 = vpop.f32.mrb[28].mxu0 }
0x174c   :  { %v7279_v38 = vadd.f32 %v5536_v37, %v5042_v33  ;;  %v2604_v5 = vpop.f32.mrb[29].mxu0 }
0x174d   :  { %v7281_v39 = vadd.f32 %v5042_v33, %v2604_v5 }
0x174f   :  { %5540 = vmatmul.mubr.msk.f32.vlgmr.msra.gmra.mrb[30].mxu0 %vm554_vm1, %v7281_v39 }
0x1750   :  { %5543 = vmatpush3.msra.mxu0 %v7284_v40  ;;  %5544 = vmatprep.mubr.msk.f32.mxu0 %vm6590_vm0, %v6589_v0 }
0x1751   :  { %5547 = vmatprep.subr.mxu0 %v6589_v0 }
0x1822   :  { %v2823_v1 = vpop.f32.mrb[30].mxu0 }
0x1823   :  { %v2827_v27 = vmul.f32 0.17677669, %v2823_v1  ;;  %v5541_v41 = vpop.f32.mrb[31].mxu0 }
0x1825   :  { %v2828_v43 = vsel %vm632_vm2, %v2827_v27, -inf }
0x1826   :  { %2829 = vmax.xlane.f32.xlu0 %v2828_v43 }
0x183c   :  { %2914 = vrot.lane.b32.xlu0 %v7271_v19, %s6591_s3 }
0x18b3   :  { %v2830_v45 = vpop.xlane.xlu0 %2829 }
0x18b4   :  { %v2831_v46 = vsub.f32 %v2827_v27, %v2830_v45 }
0x18b6   :  { %v2832_v34 = vmul.f32 1.442695, %v2831_v46 }
0x18b7   :  { %v2915_v48 = vpop.permute.xlu0 %2914 }
0x18b8   :  { %6061 = vpow2.f32 %v2832_v34 }
0x18c2   :  { %v6062_v22 = vpop.eup %6061 }
0x18c3   :  { %v2834_v47 = vsel %vm632_vm2, %v6062_v22, 0.0 }
0x18c4   :  { %2835 = vadd.xlane.f32.xlu0 %v2834_v47 }
0x18da   :  { %2912 = vrot.lane.b32.xlu0 %v7281_v39, %s6591_s3 }
0x1951   :  { %v2836_v49 = vpop.xlane.xlu0 %2835 }
0x1952   :  { %6063 = vrcp.f32 %v2836_v49  ;;  %v2742_v49 = vld [vmem:[#allocation18 + $0x40] sm:$0xff] }
0x1955   :  { %v2913_v52 = vpop.permute.xlu0 %2912 }
0x195c   :  { %v6064_v50 = vpop.eup %6063 }
0x195d   :  { %v2838_v51 = vmul.f32 %v6064_v50, %v6062_v22  ;;  %v2743_v50 = vld [vmem:[#allocation18 + $0x48] sm:$0xff] }
0x195f   :  { %5545 = vmatmul.mubr.msk.f32.vlgmr.msra.gmra.mrb[32].mxu0 %vm632_vm2, %v2838_v51  ;;  %v2744_v51 = vld [vmem:[#allocation18 + $0x50] sm:$0xff] }
0x1960   :  { %5548 = vmatpush3.xpose.msk.msra.mxu0 %vm554_vm1, %v2915_v48  ;;  %5549 = vmatprep.mubr.msk.f32.mxu0 %vm6590_vm0, %v6589_v0 }
0x1961   :  { %5881 = vmatprep.subr.bf16.mxu0 %v6594_v56 }
0x1963   :  { %5550 = vmatmul.mubr.msk.f32.vlgmr.msra.gmra.mrb[34].mxu0 %vm554_vm1, %v2913_v52  ;;  %v7363_v52 = vpack.c.bf16 %v2743_v50, %v2742_v49 }
0x1964   :  { %5565 = vmatprep.mubr.msk.f32.mxu0 %vm6590_vm0, %v6589_v0  ;;  %5883 = vmatpush3.bf16.msra.mxu0 %v7324_v8 }
0x1965   :  { %5884 = vmatprep.subr.bf16.mxu0 %v6594_v56 }
0x1968   :  { %5886 = vmatpush3.bf16.msra.mxu0 %v7327_v44 }
0x1969   :  { %5579 = vmatprep.subr.mxu0 %v6589_v0 }
0x1a32   :  { %v2908_v53 = vpop.f32.mrb[32].mxu0 }
0x1a33   :  { %v5546_v54 = vpop.f32.mrb[33].mxu0 }
0x1a36   :  { %v2986_v58 = vpop.f32.mrb[34].mxu0 }
0x1a37   :  { %v2990_v59 = vmul.f32 0.17677669, %v2986_v58  ;;  %v5551_v62 = vpop.f32.mrb[35].mxu0 }
0x1a39   :  { %v2991_v2 = vsel %vm632_vm2, %v2990_v59, -inf }
0x1a3a   :  { %2992 = vmax.xlane.f32.xlu1 %v2991_v2 }
0x1a4b   :  { %3003 = vrot.lane.b32.xlu1 %v7284_v40, %s6591_s3 }
0x1a4f   :  { %3227 = vrot.lane.b32.xlu1 %v7271_v19, %s6592_s23 }
0x1a53   :  { %3225 = vrot.lane.b32.xlu1 %v7281_v39, %s6592_s23 }
0x1ac7   :  { %v2993_v6 = vpop.xlane.xlu1 %2992 }
0x1ac8   :  { %v2994_v10 = vsub.f32 %v2990_v59, %v2993_v6 }
0x1aca   :  { %v2995_v17 = vmul.f32 1.442695, %v2994_v10 }
0x1acb   :  { %v3004_v29 = vpop.permute.xlu1 %3003 }
0x1acc   :  { %6065 = vpow2.f32 %v2995_v17  ;;  %5553 = vmatpush3.msra.mxu1 %v3004_v29 }
0x1acd   :  { %5887 = vmatprep.subr.bf16.mxu1 %v6594_v56 }
0x1acf   :  { %v3228_v28 = vpop.permute.xlu1 %3227 }
0x1ad6   :  { %v6066_v63 = vpop.eup %6065 }
0x1ad7   :  { %v2997_v3 = vsel %vm632_vm2, %v6066_v63, 0.0 }
0x1ad8   :  { %2998 = vadd.xlane.f32.xlu0 %v2997_v3 }
0x1aee   :  { %3315 = vrot.lane.b32.xlu0 %v7284_v40, %s6592_s23 }
0x1af2   :  { %3467 = vrot.lane.b32.xlu0 %v7271_v19, %s6593_s27  ;;  %v3226_v19 = vpop.permute.xlu1 %3225 }
0x1b65   :  { %v2999_v9 = vpop.xlane.xlu0 %2998 }
0x1b66   :  { %6067 = vrcp.f32 %v2999_v9 }
0x1b69   :  { %v3316_v55 = vpop.permute.xlu0 %3315 }
0x1b6d   :  { %v3468_v58 = vpop.permute.xlu0 %3467 }
0x1b70   :  { %v6068_v15 = vpop.eup %6067 }
0x1b71   :  { %v3001_v20 = vmul.f32 %v6068_v15, %v6066_v63  ;;  %v7394_v15 = vpack.c.bf16 %v2747_v12, %v2746_v32 }
0x1b73   :  { %5555 = vmatmul.mubr.msk.f32.vlgmr.msra.gmra.mrb[30].mxu1 %vm632_vm2, %v3001_v20  ;;  %v2749_v20 = vld [vmem:[#allocation18 + $0x78] sm:$0xff] }
0x1b74   :  { %5889 = vmatpush3.bf16.msra.mxu1 %v7332_v18  ;;  %5576 = vmatprep.mubr.msk.f32.mxu1 %vm6590_vm0, %v6589_v0  ;;  %v7397_v21 = vpack.c.bf16 %v2749_v20, %v2748_v13 }
0x1b75   :  { %5890 = vmatprep.subr.bf16.mxu1 %v6594_v56 }
0x1b78   :  { %5892 = vmatpush3.bf16.msra.mxu1 %v7336_v23 }
0x1b79   :  { %5584 = vmatprep.subr.mxu1 %v6589_v0 }
0x1b7b   :  { %5577 = vmatmul.mubr.msk.f32.vlgmr.msra.gmra.mrb[32].mxu1 %vm554_vm1, %v2908_v53  ;;  %v2745_v53 = vld [vmem:[#allocation18 + $0x58] sm:$0xff] }
0x1b7c   :  { %5585 = vmatpush3.msra.mxu1 %v3316_v55  ;;  %5586 = vmatprep.mubr.msk.f32.mxu1 %vm6590_vm0, %v6589_v0  ;;  %v7366_v54 = vpack.c.bf16 %v2745_v53, %v2744_v51 }
0x1b7d   :  { %5600 = vmatprep.subr.mxu1 %v6589_v0 }
0x1c46   :  { %v3075_v31 = vpop.f32.mrb[30].mxu1 }
0x1c47   :  { %v5556_v61 = vpop.f32.mrb[31].mxu1  ;;  %5566 = vmatmul.mubr.msk.f32.vlgmr.msra.gmra.mrb[36].mxu0 %vm554_vm1, %v3075_v31 }
0x1c48   :  { %5580 = vmatpush3.xpose.msk.msra.mxu0 %vm554_vm1, %v3228_v28  ;;  %5581 = vmatprep.mubr.msk.f32.mxu0 %vm6590_vm0, %v6589_v0 }
0x1c49   :  { %5893 = vmatprep.subr.bf16.mxu0 %v6594_v56 }
0x1c4b   :  { %5582 = vmatmul.mubr.msk.f32.vlgmr.msra.gmra.mrb[38].mxu0 %vm554_vm1, %v3226_v19  ;;  %v7411_v19 = vadd.f32 %v7347_v25, %v7277_v36 }
0x1c4c   :  { %5597 = vmatprep.mubr.msk.f32.mxu0 %vm6590_vm0, %v6589_v0  ;;  %5895 = vmatpush3.bf16.msra.mxu0 %v7363_v52 }
0x1c4d   :  { %5896 = vmatprep.subr.bf16.mxu0 %v6594_v56 }
0x1c4e   :  { %v3221_v35 = vpop.f32.mrb[32].mxu1 }
0x1c4f   :  { %v5578_v33 = vpop.f32.mrb[33].mxu1 }
0x1c50   :  { %5898 = vmatpush3.bf16.msra.mxu0 %v7366_v54 }
0x1c51   :  { %5899 = vmatprep.subr.bf16.mxu0 %v6594_v56 }
0x1d1a   :  { %v3148_v37 = vpop.f32.mrb[36].mxu0 }
0x1d1b   :  { %v7357_v5 = vadd.f32 %v3221_v35, %v3148_v37  ;;  %v5567_v1 = vpop.f32.mrb[37].mxu0 }
0x1d1e   :  { %v3299_v27 = vpop.f32.mrb[38].mxu0 }
0x1d1f   :  { %v3303_v41 = vmul.f32 0.17677669, %v3299_v27  ;;  %v5583_v43 = vpop.f32.mrb[39].mxu0 }
0x1d21   :  { %v3304_v45 = vsel %vm632_vm2, %v3303_v41, -inf }
0x1d22   :  { %3305 = vmax.xlane.f32.xlu1 %v3304_v45 }
0x1daf   :  { %v3306_v46 = vpop.xlane.xlu1 %3305 }
0x1db0   :  { %v3307_v34 = vsub.f32 %v3303_v41, %v3306_v46 }
0x1db2   :  { %v3308_v22 = vmul.f32 1.442695, %v3307_v34 }
0x1db4   :  { %6069 = vpow2.f32 %v3308_v22 }
0x1dbe   :  { %v6070_v47 = vpop.eup %6069 }
0x1dbf   :  { %v3310_v48 = vsel %vm632_vm2, %v6070_v47, 0.0 }
0x1dc0   :  { %3311 = vadd.xlane.f32.xlu0 %v3310_v48 }
0x1dd6   :  { %3465 = vrot.lane.b32.xlu0 %v7281_v39, %s6593_s27 }
0x1e4d   :  { %v3312_v59 = vpop.xlane.xlu0 %3311 }
0x1e4e   :  { %6071 = vrcp.f32 %v3312_v59 }
0x1e51   :  { %v3466_v2 = vpop.permute.xlu0 %3465 }
0x1e58   :  { %v6072_v39 = vpop.eup %6071 }
0x1e59   :  { %v3314_v62 = vmul.f32 %v6072_v39, %v6070_v47 }
0x1e5b   :  { %5587 = vmatmul.mubr.msk.f32.vlgmr.msra.gmra.mrb[34].mxu1 %vm632_vm2, %v3314_v62 }
0x1e5c   :  { %5601 = vmatpush3.xpose.msk.msra.mxu1 %vm554_vm1, %v3468_v58  ;;  %5602 = vmatprep.mubr.msk.f32.mxu1 %vm6590_vm0, %v6589_v0 }
0x1e5d   :  { %5605 = vmatprep.subr.mxu1 %v6589_v0 }
0x1e5f   :  { %5603 = vmatmul.mubr.msk.f32.vlgmr.msra.gmra.mrb[36].mxu1 %vm554_vm1, %v3466_v2 }
0x1e60   :  { %5607 = vmatprep.mubr.msk.f32.mxu1 %vm6590_vm0, %v6589_v0 }
0x1f2e   :  { %v3387_v6 = vpop.f32.mrb[34].mxu1 }
0x1f2f   :  { %v5588_v10 = vpop.f32.mrb[35].mxu1  ;;  %5598 = vmatmul.mubr.msk.f32.vlgmr.msra.gmra.mrb[40].mxu0 %vm554_vm1, %v3387_v6 }
0x1f30   :  { %5618 = vmatprep.mubr.msk.f32.mxu0 %vm6590_vm0, %v6589_v0  ;;  %5901 = vmatpush3.bf16.msra.mxu0 %v7394_v15 }
0x1f31   :  { %5902 = vmatprep.subr.bf16.mxu0 %v6594_v56 }
0x1f32   :  { %v3539_v17 = vpop.f32.mrb[36].mxu1 }
0x1f33   :  { %v3543_v29 = vmul.f32 0.17677669, %v3539_v17  ;;  %v5604_v63 = vpop.f32.mrb[37].mxu1 }
0x1f34   :  { %5904 = vmatpush3.bf16.msra.mxu0 %v7397_v21 }
0x1f35   :  { %v3544_v3 = vsel %vm632_vm2, %v3543_v29, -inf  ;;  %5631 = vmatprep.subr.mxu0 %v6589_v0 }
0x1f36   :  { %3545 = vmax.xlane.f32.xlu1 %v3544_v3 }
0x1f47   :  { %3555 = vrot.lane.b32.xlu1 %v7284_v40, %s6593_s27 }
0x1f4b   :  { %3868 = vrot.lane.b32.xlu1 %v7386_v4, %s6591_s3 }
0x1f4f   :  { %3866 = vrot.lane.b32.xlu1 %v7279_v38, %s6591_s3 }
0x1fc3   :  { %v3546_v11 = vpop.xlane.xlu1 %3545 }
0x1fc4   :  { %v3547_v60 = vsub.f32 %v3543_v29, %v3546_v11 }
0x1fc6   :  { %v3548_v7 = vmul.f32 1.442695, %v3547_v60 }
0x1fc7   :  { %v3556_v42 = vpop.permute.xlu1 %3555 }
0x1fc8   :  { %6073 = vpow2.f32 %v3548_v7  ;;  %5606 = vmatpush3.msra.mxu1 %v3556_v42 }
0x1fc9   :  { %5621 = vmatprep.subr.mxu1 %v6589_v0 }
0x1fcb   :  { %v3869_v35 = vpop.permute.xlu1 %3868 }
0x1fcf   :  { %v3867_v36 = vpop.permute.xlu1 %3866 }
0x1fd2   :  { %v6074_v9 = vpop.eup %6073 }
0x1fd3   :  { %v3550_v40 = vsel %vm632_vm2, %v6074_v9, 0.0 }
0x1fd4   :  { %3551 = vadd.xlane.f32.xlu0 %v3550_v40 }
0x2002   :  { %v3460_v57 = vpop.f32.mrb[40].mxu0 }
0x2003   :  { %v3464_v55 = vadd.f32 %v3460_v57, %v7357_v5  ;;  %v5599_v24 = vpop.f32.mrb[41].mxu0 }
0x2061   :  { %v3552_v28 = vpop.xlane.xlu0 %3551 }
0x2062   :  { %6075 = vrcp.f32 %v3552_v28 }
0x206c   :  { %v6076_v31 = vpop.eup %6075 }
0x206d   :  { %v3554_v61 = vmul.f32 %v6076_v31, %v6074_v9 }
0x206f   :  { %5608 = vmatmul.mubr.msk.f32.vlgmr.msra.gmra.mrb[38].mxu1 %vm632_vm2, %v3554_v61 }
0x2070   :  { %5622 = vmatpush3.xpose.msk.msra.mxu1 %vm554_vm1, %v7386_v4  ;;  %5623 = vmatprep.mubr.msk.f32.mxu1 %vm6590_vm0, %v6589_v0 }
0x2071   :  { %5626 = vmatprep.subr.mxu1 %v6589_v0 }
0x2073   :  { %5624 = vmatmul.mubr.msk.f32.vlgmr.msra.gmra.mrb[40].mxu1 %vm554_vm1, %v7279_v38 }
0x2074   :  { %5627 = vmatpush3.msra.mxu1 %v7411_v19  ;;  %5628 = vmatprep.mubr.msk.f32.mxu1 %vm6590_vm0, %v6589_v0 }
0x2075   :  { %5636 = vmatprep.subr.mxu1 %v6589_v0 }
0x2142   :  { %v3627_v33 = vpop.f32.mrb[38].mxu1 }
0x2143   :  { %v5609_v37 = vpop.f32.mrb[39].mxu1  ;;  %5619 = vmatmul.mubr.msk.f32.vlgmr.msra.gmra.mrb[42].mxu0 %vm554_vm1, %v3627_v33 }
0x2144   :  { %5632 = vmatpush3.xpose.msk.msra.mxu0 %vm554_vm1, %v3869_v35  ;;  %5633 = vmatprep.mubr.msk.f32.mxu0 %vm6590_vm0, %v6589_v0 }
0x2145   :  { %5905 = vmatprep.subr.bf16.mxu0 %v6594_v56 }
0x2146   :  { %v3777_v25 = vpop.f32.mrb[40].mxu1 }
0x2147   :  { %v3781_v5 = vmul.f32 0.17677669, %v3777_v25  ;;  %v5625_v1 = vpop.f32.mrb[41].mxu1  ;;  %5634 = vmatmul.mubr.msk.f32.vlgmr.msra.gmra.mrb[44].mxu0 %vm554_vm1, %v3867_v36 }
0x2148   :  { %5907 = vmatpush3.bf16.msra.mxu0 %v7324_v8  ;;  %5649 = vmatprep.mubr.msk.f32.mxu0 %vm6590_vm0, %v6589_v0 }
0x2149   :  { %v3782_v27 = vsel %vm632_vm2, %v3781_v5, -inf  ;;  %5908 = vmatprep.subr.bf16.mxu0 %v6594_v56 }
0x214a   :  { %3783 = vmax.xlane.f32.xlu1 %v3782_v27 }
0x214c   :  { %5910 = vmatpush3.bf16.msra.mxu0 %v7327_v44 }
0x214d   :  { %5663 = vmatprep.subr.mxu0 %v6589_v0 }
0x215b   :  { %4181 = vrot.lane.b32.xlu1 %v7386_v4, %s6592_s23 }
0x21d7   :  { %v3784_v41 = vpop.xlane.xlu1 %3783 }
0x21d8   :  { %v3785_v43 = vsub.f32 %v3781_v5, %v3784_v41 }
0x21da   :  { %v3786_v45 = vmul.f32 1.442695, %v3785_v43 }
0x21db   :  { %v4182_v7 = vpop.permute.xlu1 %4181 }
0x21dc   :  { %6077 = vpow2.f32 %v3786_v45 }
0x21e6   :  { %v6078_v50 = vpop.eup %6077 }
0x21e7   :  { %v3788_v44 = vsel %vm632_vm2, %v6078_v50, 0.0 }
0x2216   :  { %v3700_v8 = vpop.f32.mrb[42].mxu0 }
0x2217   :  { %v7434_v46 = vadd.f32 %v3700_v8, %v3464_v55  ;;  %v5620_v34 = vpop.f32.mrb[43].mxu0 }
0x2218   :  { %v5075_v34 = vld [vmem:[#allocation19] ss:$0 sm:$0xff] }
0x221a   :  { %v3940_v22 = vpop.f32.mrb[44].mxu0 }
0x221b   :  { %v3944_v47 = vmul.f32 0.17677669, %v3940_v22  ;;  %v5635_v48 = vpop.f32.mrb[45].mxu0 }
0x221d   :  { %v3945_v49 = vsel %vm632_vm2, %v3944_v47, -inf }
0x221e   :  { %3946 = vmax.xlane.f32.xlu0 %v3945_v49 }
0x2222   :  { %3789 = vadd.xlane.f32.xlu0 %v3788_v44 }
0x22ab   :  { %v3947_v51 = vpop.xlane.xlu0 %3946 }
0x22ac   :  { %v3948_v53 = vsub.f32 %v3944_v47, %v3947_v51 }
0x22ae   :  { %v3949_v58 = vmul.f32 1.442695, %v3948_v53 }
0x22af   :  { %v3790_v59 = vpop.xlane.xlu0 %3789 }
0x22b0   :  { %6079 = vpow2.f32 %v3949_v58 }
0x22b1   :  { %6081 = vrcp.f32 %v3790_v59  ;;  %v4712_v59 = vld [vmem:[#allocation24 + $0x18] sm:$0xff] }
0x22ba   :  { %v6080_v39 = vpop.eup %6079 }
0x22bb   :  { %v6082_v62 = vpop.eup %6081  ;;  %v3951_v2 = vsel %vm632_vm2, %v6080_v39, 0.0 }
0x22bc   :  { %v3792_v6 = vmul.f32 %v6082_v62, %v6078_v50  ;;  %3952 = vadd.xlane.f32.xlu0 %v3951_v2  ;;  %v4711_v62 = vld [vmem:[#allocation24 + $0x10] sm:$0xff]  ;;  %v4714_v2 = vld [vmem:[#allocation24 + $0x28] sm:$0xff] }
0x22be   :  { %5629 = vmatmul.mubr.msk.f32.vlgmr.msra.gmra.mrb[42].mxu1 %vm632_vm2, %v3792_v6  ;;  %v4716_v6 = vld [vmem:[#allocation24 + $0x38] sm:$0xff] }
0x22bf   :  { %5638 = vmatprep.mubr.msk.f32.mxu1 %vm6590_vm0, %v6589_v0 }
0x22d2   :  { %3957 = vrot.lane.b32.xlu0 %v7411_v19, %s6591_s3 }
0x22d6   :  { %4179 = vrot.lane.b32.xlu0 %v7279_v38, %s6592_s23 }
0x2349   :  { %v3953_v10 = vpop.xlane.xlu0 %3952 }
0x234a   :  { %6083 = vrcp.f32 %v3953_v10 }
0x234d   :  { %v3958_v17 = vpop.permute.xlu0 %3957 }
0x234e   :  { %5637 = vmatpush3.msra.mxu1 %v3958_v17  ;;  %v5933_v17 = vpack.c.bf16 %v4716_v6, %v4714_v2  ;;  %v7513_v6 = vld [vmem:[#allocation22] ss:$0 sm:$0xff] }
0x234f   :  { %5911 = vmatprep.subr.bf16.mxu1 %v6594_v56 }
0x2354   :  { %v6084_v29 = vpop.eup %6083 }
0x2355   :  { %v3955_v63 = vmul.f32 %v6084_v29, %v6080_v39  ;;  %v4709_v39 = vld [vmem:[#allocation24] sm:$0xff] }
0x2356   :  { %v5931_v10 = vpack.c.bf16 %v4711_v62, %v4709_v39  ;;  %v4713_v29 = vld [vmem:[#allocation24 + $0x20] sm:$0xff]  ;;  %v7510_v62 = vld [vmem:[#allocation21] ss:$0 sm:$0xff] }
0x2357   :  { %5639 = vmatmul.mubr.msk.f32.vlgmr.msra.gmra.mrb[44].mxu1 %vm632_vm2, %v3955_v63  ;;  %v4715_v63 = vld [vmem:[#allocation24 + $0x30] sm:$0xff] }
0x2358   :  { %5913 = vmatpush3.bf16.msra.mxu1 %v7332_v18  ;;  %5660 = vmatprep.mubr.msk.f32.mxu1 %vm6590_vm0, %v6589_v0  ;;  %v4180_v18 = vpop.permute.xlu0 %4179 }
0x2359   :  { %5914 = vmatprep.subr.bf16.mxu1 %v6594_v56 }
0x235c   :  { %5916 = vmatpush3.bf16.msra.mxu1 %v7336_v23 }
0x235d   :  { %5668 = vmatprep.subr.mxu1 %v6589_v0 }
0x2391   :  { %v3862_v3 = vpop.f32.mrb[42].mxu1 }
0x2392   :  { %v5630_v11 = vpop.f32.mrb[43].mxu1  ;;  %5661 = vmatmul.mubr.msk.f32.vlgmr.msra.gmra.mrb[46].mxu1 %vm554_vm1, %v3862_v3  ;;  %v5935_v3 = vpack.c.bf16 %v4715_v63, %v4713_v29  ;;  %v4850_v29 = vld [vmem:[#allocation27 + $0x80] sm:$0xff]  ;;  %v4851_v63 = vld [vmem:[#allocation27 + $0x88] sm:$0xff] }
0x2393   :  { %5670 = vmatprep.mubr.msk.f32.mxu1 %vm6590_vm0, %v6589_v0 }
0x242a   :  { %v4029_v60 = vpop.f32.mrb[44].mxu1 }
0x242b   :  { %v5640_v42 = vpop.f32.mrb[45].mxu1  ;;  %5650 = vmatmul.mubr.msk.f32.vlgmr.msra.gmra.mrb[46].mxu0 %vm554_vm1, %v4029_v60 }
0x242c   :  { %5664 = vmatpush3.xpose.msk.msra.mxu0 %vm554_vm1, %v4182_v7  ;;  %5665 = vmatprep.mubr.msk.f32.mxu0 %vm6590_vm0, %v6589_v0 }
0x242d   :  { %5917 = vmatprep.subr.bf16.mxu0 %v6594_v56 }
0x242f   :  { %5666 = vmatmul.mubr.msk.f32.vlgmr.msra.gmra.mrb[48].mxu0 %vm554_vm1, %v4180_v18 }
0x2430   :  { %5919 = vmatpush3.bf16.msra.mxu0 %v7363_v52  ;;  %5681 = vmatprep.mubr.msk.f32.mxu0 %vm6590_vm0, %v6589_v0 }
0x2431   :  { %5920 = vmatprep.subr.bf16.mxu0 %v6594_v56 }
0x2434   :  { %5922 = vmatpush3.bf16.msra.mxu0 %v7366_v54 }
0x2435   :  { %5923 = vmatprep.subr.bf16.mxu0 %v6594_v56 }
0x2465   :  { %v4175_v23 = vpop.f32.mrb[46].mxu1 }
0x2466   :  { %v5662_v9 = vpop.f32.mrb[47].mxu1 }
0x24fe   :  { %v4102_v40 = vpop.f32.mrb[46].mxu0 }
0x24ff   :  { %v4176_v32 = vadd.f32 %v4175_v23, %v4102_v40  ;;  %v5651_v12 = vpop.f32.mrb[47].mxu0 }
0x2500   :  { %v4718_v12 = vld [vmem:[#allocation24 + $0x48] sm:$0xff] }
0x2502   :  { %v4253_v13 = vpop.f32.mrb[48].mxu0 }
0x2503   :  { %v4257_v20 = vmul.f32 0.17677669, %v4253_v13  ;;  %v5667_v57 = vpop.f32.mrb[49].mxu0  ;;  %v4720_v13 = vld [vmem:[#allocation24 + $0x58] sm:$0xff] }
0x2504   :  { %v4717_v57 = vld [vmem:[#allocation24 + $0x40] sm:$0xff] }
0x2505   :  { %v4258_v55 = vsel %vm632_vm2, %v4257_v20, -inf }
0x2506   :  { %4259 = vmax.xlane.f32.xlu0 %v4258_v55  ;;  %v4719_v55 = vld [vmem:[#allocation24 + $0x50] sm:$0xff] }
0x251c   :  { %4269 = vrot.lane.b32.xlu0 %v7411_v19, %s6592_s23 }
0x2520   :  { %4419 = vrot.lane.b32.xlu0 %v7279_v38, %s6593_s27 }
0x2593   :  { %v4260_v52 = vpop.xlane.xlu0 %4259 }
0x2594   :  { %v4261_v54 = vsub.f32 %v4257_v20, %v4260_v52  ;;  %v5937_v20 = vpack.c.bf16 %v4720_v13, %v4718_v12  ;;  %v5939_v52 = vpack.c.bf16 %v4719_v55, %v4717_v57  ;;  %v4855_v12 = vld [vmem:[#allocation27 + $0xa8] sm:$0xff]  ;;  %v4838_v57 = vld [vmem:[#allocation27 + $0x20] sm:$0xff]  ;;  %v4856_v55 = vld [vmem:[#allocation27 + $0xb0] sm:$0xff] }
0x2596   :  { %v4262_v24 = vmul.f32 1.442695, %v4261_v54  ;;  %v4722_v54 = vld [vmem:[#allocation24 + $0x68] sm:$0xff] }
0x2597   :  { %v4270_v28 = vpop.permute.xlu0 %4269 }
0x2598   :  { %6085 = vpow2.f32 %v4262_v24  ;;  %5669 = vmatpush3.msra.mxu1 %v4270_v28  ;;  %v4724_v24 = vld [vmem:[#allocation24 + $0x78] sm:$0xff] }
0x2599   :  { %5684 = vmatprep.subr.mxu1 %v6589_v0  ;;  %v5941_v28 = vpack.c.bf16 %v4724_v24, %v4722_v54 }
0x259b   :  { %v4420_v36 = vpop.permute.xlu0 %4419 }
0x25a2   :  { %v6086_v31 = vpop.eup %6085 }
0x25a3   :  { %v4264_v61 = vsel %vm632_vm2, %v6086_v31, 0.0 }
0x25a4   :  { %4265 = vadd.xlane.f32.xlu1 %v4264_v61  ;;  %v4723_v61 = vld [vmem:[#allocation24 + $0x70] sm:$0xff] }
0x25b5   :  { %4421 = vrot.lane.b32.xlu1 %v7386_v4, %s6593_s27 }
0x2631   :  { %v4266_v35 = vpop.xlane.xlu1 %4265 }
0x2632   :  { %6087 = vrcp.f32 %v4266_v35 }
0x2635   :  { %v4422_v38 = vpop.permute.xlu1 %4421 }
0x263c   :  { %v6088_v33 = vpop.eup %6087 }
0x263d   :  { %v4268_v37 = vmul.f32 %v6088_v33, %v6086_v31  ;;  %v4721_v31 = vld [vmem:[#allocation24 + $0x60] sm:$0xff]  ;;  %v4728_v33 = vld [vmem:[#allocation24 + $0x98] sm:$0xff] }
0x263e   :  { %v5943_v35 = vpack.c.bf16 %v4723_v61, %v4721_v31  ;;  %v4841_v31 = vld [vmem:[#allocation27 + $0x38] sm:$0xff]  ;;  %v4858_v61 = vld [vmem:[#allocation27 + $0xc0] sm:$0xff] }
0x263f   :  { %5671 = vmatmul.mubr.msk.f32.vlgmr.msra.gmra.mrb[48].mxu1 %vm632_vm2, %v4268_v37 }
0x2640   :  { %5685 = vmatpush3.xpose.msk.msra.mxu1 %vm554_vm1, %v4422_v38  ;;  %5686 = vmatprep.mubr.msk.f32.mxu1 %vm6590_vm0, %v6589_v0  ;;  %v4725_v38 = vld [vmem:[#allocation24 + $0x80] sm:$0xff] }
0x2641   :  { %5689 = vmatprep.subr.mxu1 %v6589_v0 }
0x2643   :  { %5687 = vmatmul.mubr.msk.f32.vlgmr.msra.gmra.mrb[50].mxu1 %vm554_vm1, %v4420_v36  ;;  %v4727_v36 = vld [vmem:[#allocation24 + $0x90] sm:$0xff] }
0x2644   :  { %5691 = vmatprep.mubr.msk.f32.mxu1 %vm6590_vm0, %v6589_v0 }
0x2712   :  { %v4341_v4 = vpop.f32.mrb[48].mxu1 }
0x2713   :  { %v5672_v25 = vpop.f32.mrb[49].mxu1  ;;  %5682 = vmatmul.mubr.msk.f32.vlgmr.msra.gmra.mrb[50].mxu0 %vm554_vm1, %v4341_v4  ;;  %v4730_v4 = vld [vmem:[#allocation24 + $0xa8] sm:$0xff] }
0x2714   :  { %5925 = vmatpush3.bf16.msra.mxu0 %v7394_v15  ;;  %5702 = vmatprep.mubr.msk.f32.mxu0 %vm6590_vm0, %v6589_v0  ;;  %v5947_v25 = vpack.c.bf16 %v4727_v36, %v4725_v38  ;;  %v4843_v38 = vld [vmem:[#allocation27 + $0x48] sm:$0xff]  ;;  %v4860_v36 = vld [vmem:[#allocation27 + $0xd0] sm:$0xff] }
0x2715   :  { %5926 = vmatprep.subr.bf16.mxu0 %v6594_v56  ;;  %v4665_v56 = vadd.f32 %v5075_v34, %v7434_v46  ;;  %v4710_v46 = vld [vmem:[#allocation24 + $0x8] sm:$0xff] }
0x2716   :  { %v4493_v5 = vpop.f32.mrb[50].mxu1 }
0x2717   :  { %v4497_v1 = vmul.f32 0.17677669, %v4493_v5  ;;  %v5688_v27 = vpop.f32.mrb[51].mxu1  ;;  %v4732_v5 = vld [vmem:[#allocation24 + $0xb8] sm:$0xff] }
0x2718   :  { %5928 = vmatpush3.bf16.msra.mxu0 %v7397_v21  ;;  %v4667_v21 = vadd.f32 %v4665_v56, %v7250_v26  ;;  %v5929_v26 = vpack.c.bf16 %v4712_v59, %v4710_v46  ;;  %v4731_v27 = vld [vmem:[#allocation24 + $0xb0] sm:$0xff]  ;;  %v4738_v56 = vld [vmem:[#allocation24 + $0xe8] sm:$0xff] }
0x2719   :  { %v4498_v41 = vsel %vm632_vm2, %v4497_v1, -inf }
0x271a   :  { %4499 = vmax.xlane.f32.xlu0 %v4498_v41  ;;  %v5949_v41 = vpack.c.bf16 %v4732_v5, %v4730_v4  ;;  %v4861_v4 = vld [vmem:[#allocation27 + $0xd8] sm:$0xff] }
0x271b   :  { %v5981_v5 = vpack.c.bf16 %v4861_v4, %v4860_v36  ;;  %v5079_v36 = vld [vmem:[#allocation30] ss:$0 sm:$0xff] }
0x2730   :  { %4509 = vrot.lane.b32.xlu0 %v7411_v19, %s6593_s27 }
0x27a7   :  { %v4500_v43 = vpop.xlane.xlu0 %4499 }
0x27a8   :  { %v4501_v45 = vsub.f32 %v4497_v1, %v4500_v43  ;;  %v4729_v1 = vld [vmem:[#allocation24 + $0xa0] sm:$0xff]  ;;  %v4734_v43 = vld [vmem:[#allocation24 + $0xc8] sm:$0xff] }
0x27aa   :  { %v4502_v8 = vmul.f32 1.442695, %v4501_v45  ;;  %v4736_v45 = vld [vmem:[#allocation24 + $0xd8] sm:$0xff] }
0x27ab   :  { %v4510_v15 = vpop.permute.xlu0 %4509 }
0x27ac   :  { %6089 = vpow2.f32 %v4502_v8  ;;  %5690 = vmatpush3.msra.mxu1 %v4510_v15  ;;  %v5951_v8 = vpack.c.bf16 %v4731_v27, %v4729_v1  ;;  %v5953_v15 = vpack.c.bf16 %v4736_v45, %v4734_v43  ;;  %v4844_v1 = vld [vmem:[#allocation27 + $0x50] sm:$0xff]  ;;  %v4845_v27 = vld [vmem:[#allocation27 + $0x58] sm:$0xff]  ;;  %v4863_v43 = vld [vmem:[#allocation27 + $0xe8] sm:$0xff] }
0x27ad   :  { %5930 = vmatprep.subr.bf16.mxu1 %v5929_v26  ;;  %v5983_v45 = vpack.c.bf16 %v4845_v27, %v4844_v1 }
0x27b6   :  { %v6090_v22 = vpop.eup %6089 }
0x27b7   :  { %v4504_v47 = vsel %vm632_vm2, %v6090_v22, 0.0 }
0x27b8   :  { %4505 = vadd.xlane.f32.xlu1 %v4504_v47  ;;  %v4740_v47 = vld [vmem:[#allocation24 + $0xf8] sm:$0xff] }
0x27bc   :  { %4671 = vadd.xlane.f32.xlu1 %v4667_v21 }
0x27e6   :  { %v4414_v48 = vpop.f32.mrb[50].mxu0 }
0x27e7   :  { %v4418_v49 = vadd.f32 %v4414_v48, %v4176_v32  ;;  %v5683_v50 = vpop.f32.mrb[51].mxu0  ;;  %v5957_v48 = vpack.c.bf16 %v4740_v47, %v4738_v56  ;;  %v4864_v56 = vld [vmem:[#allocation27 + $0xf0] sm:$0xff]  ;;  %v4865_v47 = vld [vmem:[#allocation27 + $0xf8] sm:$0xff] }
0x27e8   :  { %v4739_v50 = vld [vmem:[#allocation24 + $0xf0] sm:$0xff] }
0x2845   :  { %v4506_v19 = vpop.xlane.xlu1 %4505 }
0x2846   :  { %6091 = vrcp.f32 %v4506_v19 }
0x2849   :  { %v4672_v11 = vpop.xlane.xlu1 %4671 }
0x284a   :  { %v4675_v7 = vmul.f32 0.0078125, %v4672_v11  ;;  %v5961_v11 = vpack.c.bf16 %v4851_v63, %v4850_v29 }
0x284c   :  { %v7501_v9 = vsub.f32 %v4667_v21, %v4675_v7  ;;  %v4852_v7 = vld [vmem:[#allocation27 + $0x90] sm:$0xff]  ;;  %5962 = vmatprep.subr.bf16.mxu0 %v5961_v11 }
0x284e   :  { %v4679_v32 = vmul.f32 %v7501_v9, %v7501_v9 }
0x2850   :  { %v6092_v44 = vpop.eup %6091 }
0x2851   :  { %v4508_v51 = vmul.f32 %v6092_v44, %v6090_v22  ;;  %v4735_v22 = vld [vmem:[#allocation24 + $0xd0] sm:$0xff] }
0x2853   :  { %5692 = vmatmul.mubr.msk.f32.vlgmr.msra.gmra.mrb[52].mxu1 %vm632_vm2, %v4508_v51 }
0x2854   :  { %4817 = vmatprep.mubr.f32.mxu1 %v6589_v0  ;;  %5932 = vmatpush1.bf16.msra.mxu1 %v5931_v10 }
0x2855   :  { %5934 = vmatprep.subr.bf16.mxu1 %v5933_v17 }
0x2858   :  { %5936 = vmatpush1.bf16.msra.mxu1 %v5935_v3  ;;  %v4834_v3 = vld [vmem:[#allocation27] sm:$0xff] }
0x2859   :  { %5938 = vmatprep.subr.bf16.mxu1 %v5937_v20 }
0x285c   :  { %5940 = vmatpush1.bf16.msra.mxu1 %v5939_v52  ;;  %v4857_v52 = vld [vmem:[#allocation27 + $0xb8] sm:$0xff] }
0x285d   :  { %5942 = vmatprep.subr.bf16.mxu1 %v5941_v28  ;;  %v5973_v24 = vpack.c.bf16 %v4857_v52, %v4856_v55  ;;  %v4840_v28 = vld [vmem:[#allocation27 + $0x30] sm:$0xff] }
0x2860   :  { %5944 = vmatpush1.bf16.msra.mxu1 %v5943_v35  ;;  %v4859_v35 = vld [vmem:[#allocation27 + $0xc8] sm:$0xff] }
0x2926   :  { %v4581_v53 = vpop.f32.mrb[52].mxu1 }
0x2927   :  { %v5693_v58 = vpop.f32.mrb[53].mxu1  ;;  %5703 = vmatmul.mubr.msk.f32.vlgmr.msra.gmra.mrb[52].mxu0 %vm554_vm1, %v4581_v53 }
0x29fa   :  { %v4654_v60 = vpop.f32.mrb[52].mxu0 }
0x29fb   :  { %v4658_v42 = vadd.f32 %v4654_v60, %v4418_v49  ;;  %v5704_v18 = vpop.f32.mrb[53].mxu0  ;;  %v4737_v49 = vld [vmem:[#allocation24 + $0xe0] sm:$0xff]  ;;  %v4835_v60 = vld [vmem:[#allocation27 + $0x8] sm:$0xff] }
0x29fc   :  { %v5959_v19 = vpack.c.bf16 %v4739_v50, %v4737_v49  ;;  %v5963_v18 = vpack.c.bf16 %v4835_v60, %v4834_v3  ;;  %v4849_v49 = vld [vmem:[#allocation27 + $0x78] sm:$0xff] }
0x29fd   :  { %v4666_v23 = vadd.f32 %v5075_v34, %v4658_v42  ;;  %v4733_v34 = vld [vmem:[#allocation24 + $0xc0] sm:$0xff] }
0x29fe   :  { %v5955_v21 = vpack.c.bf16 %v4735_v22, %v4733_v34  ;;  %v4853_v42 = vld [vmem:[#allocation27 + $0x98] sm:$0xff]  ;;  %5964 = vmatpush3.bf16.msra.mxu0 %v5963_v18  ;;  %v4847_v34 = vld [vmem:[#allocation27 + $0x68] sm:$0xff] }
0x29ff   :  { %v4668_v40 = vadd.f32 %v4666_v23, %v7262_v30  ;;  %v4726_v30 = vld [vmem:[#allocation24 + $0x88] sm:$0xff]  ;;  %v5965_v23 = vpack.c.bf16 %v4853_v42, %v4852_v7 }
0x2a00   :  { %v5945_v37 = vpack.c.bf16 %v4728_v33, %v4726_v30  ;;  %v5975_v30 = vpack.c.bf16 %v4841_v31, %v4840_v28  ;;  %v5977_v33 = vpack.c.bf16 %v4859_v35, %v4858_v61 }
0x2a01   :  { %4673 = vadd.xlane.f32.xlu1 %v4668_v40  ;;  %5966 = vmatprep.subr.bf16.mxu0 %v5965_v23 }
0x2a02   :  { %5946 = vmatprep.subr.bf16.mxu1 %v5945_v37  ;;  %v4842_v37 = vld [vmem:[#allocation27 + $0x40] sm:$0xff] }
0x2a03   :  { %5948 = vmatpush1.bf16.msra.mxu1 %v5947_v25  ;;  %v5979_v25 = vpack.c.bf16 %v4843_v38, %v4842_v37 }
0x2a04   :  { %5950 = vmatprep.subr.bf16.mxu1 %v5949_v41  ;;  %v4862_v41 = vld [vmem:[#allocation27 + $0xe0] sm:$0xff] }
0x2a05   :  { %4681 = vadd.xlane.f32.xlu1 %v4679_v32  ;;  %v4854_v32 = vld [vmem:[#allocation27 + $0xa0] sm:$0xff] }
0x2a06   :  { %v5969_v20 = vpack.c.bf16 %v4855_v12, %v4854_v32 }
0x2a07   :  { %5952 = vmatpush1.bf16.msra.mxu1 %v5951_v8  ;;  %v5985_v8 = vpack.c.bf16 %v4863_v43, %v4862_v41 }
0x2a08   :  { %5954 = vmatprep.subr.bf16.mxu1 %v5953_v15  ;;  %v4846_v15 = vld [vmem:[#allocation27 + $0x60] sm:$0xff] }
0x2a09   :  { %v5987_v22 = vpack.c.bf16 %v4847_v34, %v4846_v15 }
0x2a0b   :  { %5956 = vmatpush1.bf16.msra.mxu1 %v5955_v21  ;;  %v5989_v21 = vpack.c.bf16 %v4865_v47, %v4864_v56 }
0x2a0c   :  { %5958 = vmatprep.subr.bf16.mxu1 %v5957_v48  ;;  %v4848_v48 = vld [vmem:[#allocation27 + $0x70] sm:$0xff] }
0x2a0d   :  { %v5991_v50 = vpack.c.bf16 %v4849_v49, %v4848_v48 }
0x2a0f   :  { %5960 = vmatpush1.bf16.msra.mxu1 %v5959_v19 }
0x2a8e   :  { %v4674_v44 = vpop.xlane.xlu1 %4673 }
0x2a8f   :  { %v4676_v51 = vmul.f32 0.0078125, %v4674_v44 }
0x2a91   :  { %v7506_v53 = vsub.f32 %v4668_v40, %v4676_v51  ;;  %v4837_v40 = vld [vmem:[#allocation27 + $0x18] sm:$0xff] }
0x2a92   :  { %v4682_v58 = vpop.xlane.xlu1 %4681 }
0x2a93   :  { %v4685_v46 = vmul.f32 0.0078125, %v4682_v58  ;;  %v4680_v59 = vmul.f32 %v7506_v53, %v7506_v53 }
0x2a95   :  { %v4687_v39 = vadd.f32 1e-05, %v4685_v46  ;;  %4683 = vadd.xlane.f32.xlu0 %v4680_v59 }
0x2a97   :  { %6093 = vrsqrt.f32 %v4687_v39 }
0x2aa1   :  { %v6094_v26 = vpop.eup %6093 }
0x2aa2   :  { %v4691_v2 = vmul.f32 %v6094_v26, %v7501_v9  ;;  %v4836_v9 = vld [vmem:[#allocation27 + $0x10] sm:$0xff]  ;;  %v4741_v26 = vld [vmem:[#allocation25] sm:$0x3] }
0x2aa3   :  { %v5967_v13 = vpack.c.bf16 %v4837_v40, %v4836_v9 }
0x2aa4   :  { %v4699_v10 = vmul.f32 %v7510_v62, %v4691_v2  ;;  %v4746_v2 = vrot.slane %v4741_v26, %v7006_v16  ;;  %v5078_v16 = vld [vmem:[#allocation28] ss:$0 sm:$0xff] }
0x2aa5   :  { %5968 = vmatpush3.bf16.msra.mxu0 %v5967_v13 }
0x2aa6   :  { %v7517_v17 = vadd.f32 %v7513_v6, %v4699_v10  ;;  %5970 = vmatprep.subr.bf16.mxu0 %v5969_v20  ;;  %v4750_v10 = vrot.slane %v4741_v26, %v7004_v14 }
0x2aa8   :  { %4818 = vmatmul.mubr.f32.vlgmr.msra.gmra.mrb[54].mxu1 %v7517_v17 }
0x2aa9   :  { %4823 = vmatprep.mubr.f32.mxu1 %v6589_v0  ;;  %v4839_v0 = vld [vmem:[#allocation27 + $0x28] sm:$0xff] }
0x2aaa   :  { %v5971_v54 = vpack.c.bf16 %v4839_v0, %v4838_v57 }
0x2aac   :  { %5972 = vmatpush3.bf16.msra.mxu0 %v5971_v54 }
0x2aad   :  { %5974 = vmatprep.subr.bf16.mxu0 %v5973_v24 }
0x2ab0   :  { %5976 = vmatpush3.bf16.msra.mxu0 %v5975_v30 }
0x2ab1   :  { %5978 = vmatprep.subr.bf16.mxu0 %v5977_v33 }
0x2ab4   :  { %5980 = vmatpush3.bf16.msra.mxu0 %v5979_v25  ;;  %v5080_v25 = vld [vmem:[#allocation31] ss:$0 sm:$0xff] }
0x2ab5   :  { %5982 = vmatprep.subr.bf16.mxu0 %v5981_v5 }
0x2ab8   :  { %5984 = vmatpush3.bf16.msra.mxu0 %v5983_v45 }
0x2ab9   :  { %5986 = vmatprep.subr.bf16.mxu0 %v5985_v8 }
0x2abc   :  { %5988 = vmatpush3.bf16.msra.mxu0 %v5987_v22 }
0x2abd   :  { %5990 = vmatprep.subr.bf16.mxu0 %v5989_v21 }
0x2ac0   :  { %5992 = vmatpush3.bf16.msra.mxu0 %v5991_v50 }
0x2b22   :  { %v4684_v19 = vpop.xlane.xlu0 %4683 }
0x2b23   :  { %v4686_v44 = vmul.f32 0.0078125, %v4684_v19 }
0x2b25   :  { %v4688_v51 = vadd.f32 1e-05, %v4686_v44 }
0x2b27   :  { %6095 = vrsqrt.f32 %v4688_v51 }
0x2b31   :  { %v6096_v58 = vpop.eup %6095 }
0x2b32   :  { %v4692_v46 = vmul.f32 %v6096_v58, %v7506_v53 }
0x2b34   :  { %v4700_v59 = vmul.f32 %v7510_v62, %v4692_v46 }
0x2b36   :  { %v4708_v39 = vadd.f32 %v7513_v6, %v4700_v59 }
0x2b38   :  { %4824 = vmatmul.mubr.f32.gmra.mrb[56].mxu1 %v4708_v39 }
0x2b7b   :  { %v4819_v29 = vpop.f32.mrb[54].mxu1 }
0x2b7c   :  { %v4820_v63 = vadd.f32 %v4819_v29, %v4746_v2  ;;  %v4821_v3 = vpop.f32.mrb[55].mxu1 }
0x2b7d   :  { %v4822_v11 = vadd.f32 %v4821_v3, %v4750_v10 }
0x2b7e   :  { %v4830_v7 = vmax.f32 %v4820_v63, 0.0 }
0x2b7f   :  { %v4831_v60 = vmax.f32 %v4822_v11, 0.0 }
0x2b81   :  { %4937 = vmatprep.mubr.f32.mxu0 %v4831_v60 }
0x2b82   :  { %4938 = vmatmul.mubr.f32.vlgmr.msra.gmra.mrb[54].mxu0 %v4830_v7 }
0x2c0b   :  { %v4825_v42 = vpop.f32.mrb[56].mxu1 }
0x2c0c   :  { %v4826_v53 = vadd.f32 %v4825_v42, %v4746_v2  ;;  %v4827_v18 = vpop.f32.mrb[57].mxu1 }
0x2c0d   :  { %v4828_v62 = vadd.f32 %v4827_v18, %v4750_v10 }
0x2c0e   :  { %v4832_v6 = vmax.f32 %v4826_v53, 0.0 }
0x2c0f   :  { %v4833_v23 = vmax.f32 %v4828_v62, 0.0 }
0x2c11   :  { %4942 = vmatprep.mubr.f32.mxu0 %v4833_v23 }
0x2c12   :  { %4943 = vmatmul.mubr.f32.gmra.mrb[56].mxu0 %v4832_v6 }
0x2c55   :  { %v5293_v9 = vpop.f32.mrb[54].mxu0 }
0x2c56   :  { %v5294_v40 = vpop.f32.mrb[55].mxu0 }
0x2c57   :  { %v5295_v14 = vadd.f32 %v5294_v40, %v5293_v9 }
0x2c59   :  { %v4940_v32 = vadd.f32 %v5295_v14, %v5078_v16 }
0x2c5b   :  { %v4948_v12 = vadd.f32 %v4940_v32, %v7517_v17 }
0x2c5d   :  { %4952 = vadd.xlane.f32.xlu1 %v4948_v12 }
0x2ce5   :  { %v5296_v13 = vpop.f32.mrb[56].mxu0 }
0x2ce6   :  { %v5297_v20 = vpop.f32.mrb[57].mxu0 }
0x2ce7   :  { %v5298_v57 = vadd.f32 %v5297_v20, %v5296_v13 }
0x2ce9   :  { %v4945_v0 = vadd.f32 %v5298_v57, %v5078_v16 }
0x2cea   :  { %v4953_v55 = vpop.xlane.xlu1 %4952 }
0x2ceb   :  { %v4956_v52 = vmul.f32 0.0078125, %v4953_v55  ;;  %v4949_v54 = vadd.f32 %v4945_v0, %v4708_v39 }
0x2ced   :  { %v4958_v24 = vsub.f32 %v4948_v12, %v4956_v52  ;;  %4954 = vadd.xlane.f32.xlu1 %v4949_v54 }
0x2cef   :  { %v4960_v28 = vmul.f32 %v4958_v24, %v4958_v24 }
0x2cf1   :  { %4962 = vadd.xlane.f32.xlu1 %v4960_v28 }
0x2d7a   :  { %v4955_v31 = vpop.xlane.xlu1 %4954 }
0x2d7b   :  { %v4957_v61 = vmul.f32 0.0078125, %v4955_v31 }
0x2d7d   :  { %v4959_v35 = vsub.f32 %v4949_v54, %v4957_v61 }
0x2d7e   :  { %v4963_v30 = vpop.xlane.xlu1 %4962 }
0x2d7f   :  { %v4966_v33 = vmul.f32 0.0078125, %v4963_v30  ;;  %v4961_v37 = vmul.f32 %v4959_v35, %v4959_v35 }
0x2d81   :  { %v4968_v38 = vadd.f32 1e-05, %v4966_v33  ;;  %4964 = vadd.xlane.f32.xlu1 %v4961_v37 }
0x2d83   :  { %6097 = vrsqrt.f32 %v4968_v38 }
0x2d8d   :  { %v6098_v17 = vpop.eup %6097 }
0x2d8e   :  { %v4972_v4 = vmul.f32 %v6098_v17, %v4958_v24 }
0x2d90   :  { %v4980_v5 = vmul.f32 %v5079_v36, %v4972_v4 }
0x2d92   :  { %v4988_v1 = vadd.f32 %v5080_v25, %v4980_v5 }
0x2d94   :  { %4990 = vst [vmem:[%s7555_s22] sm:$0xff] %v4988_v1 }
0x2e0e   :  { %v4965_v27 = vpop.xlane.xlu1 %4964 }
0x2e0f   :  { %v4967_v41 = vmul.f32 0.0078125, %v4965_v27 }
0x2e11   :  { %v4969_v43 = vadd.f32 1e-05, %v4967_v41 }
0x2e13   :  { %6099 = vrsqrt.f32 %v4969_v43 }
0x2e1d   :  { %v6100_v45 = vpop.eup %6099 }
0x2e1e   :  { %v4973_v8 = vmul.f32 %v6100_v45, %v4959_v35 }
0x2e20   :  { %v4981_v15 = vmul.f32 %v5079_v36, %v4973_v8 }
0x2e22   :  { %v4989_v34 = vadd.f32 %v5080_v25, %v4981_v15 }
0x2e24   :  { %4991 = vst [vmem:[%s7555_s22 + $0x8] sm:$0xff] %v4989_v34 }
0x2e25   :  { %4996 = vsyncpa [#allocation3], 1 }
0x2e26   :  { %4997 = vsyncpa [#allocation5], 1 }
0x2e27   :  { %4998 = vsyncpa [#allocation8], 1 }
0x2e28   :  { %4999 = vsyncpa [#allocation11], 1 }
0x2e29   :  { %5000 = vsyncpa [#allocation14], 1 }
0x2e2a   :  { %5001 = vsyncpa [#allocation17], 1 }
0x2e2b   :  { %5002 = vsyncpa [#allocation20], 1 }
0x2e2c   :  { %5003 = vsyncpa [#allocation23], 1 }
0x2e2d   :  { %5004 = vsyncpa [#allocation26], 1 }
0x2e2e   :  { %5005 = vsyncpa [#allocation29], 1 }
0x2e2f   :  { %5006 = vsyncpa [#allocation32], 1 }

</bundles_post_ra>
